<compile_context>
chip_gen: v7x
topology: tpu7x:2x2x1
jax: 0.10.0
libtpu: 0.0.40
codegen_flags: <defaults>
</compile_context>

<pallas_src>
import jax
import jax.numpy as jnp
from jax.experimental import pallas as pl
from jax.experimental.pallas import tpu as pltpu


# ---------------------------------------------------------------------------
# Pallas kernel: o[:, tile] = x @ W[tile, :].T + b[tile]   (one N-tile per grid step)
# ---------------------------------------------------------------------------
def _linear_kernel(x_ref, w_ref, b_ref, o_ref):
    # x_ref: (B, K)   bf16, whole activation resident in VMEM (tiny: ~27 KiB)
    # w_ref: (TN, K)  bf16, one contiguous N-tile of the (N, K) weight
    # b_ref: (1, TN)  f32,  matching bias tile
    # o_ref: (B, TN)  f32
    acc = jax.lax.dot_general(
        x_ref[...], w_ref[...],
        dimension_numbers=(((1,), (1,)), ((), ())),   # contract K with K (native trans_b on MXU)
        preferred_element_type=jnp.float32)
    o_ref[...] = (acc + b_ref[...]).astype(o_ref.dtype)


# ---------------------------------------------------------------------------
# Tile selection: multiple of 128 that divides the 128-padded N, fits VMEM,
# and (if possible) gives an even grid so v7x's two TensorCores get equal work.
# ---------------------------------------------------------------------------
def _pick_tile(n_pad128, k, max_w_tile_bytes=40 * 1024 * 1024):
    n_blocks = n_pad128 // 128
    candidates = []
    for d in range(1, n_blocks + 1):
        if n_blocks % d == 0:
            tn = d * 128
            if 2 * tn * k * 2 <= max_w_tile_bytes:   # double-buffered bf16 W tile
                candidates.append(tn)
    even = [t for t in candidates if (n_pad128 // t) % 2 == 0]
    pool = even if even else candidates
    return max(pool)


# ---------------------------------------------------------------------------
# One-time parameter preparation + jitted forward (core=None -> identity).
# ---------------------------------------------------------------------------
def make_sensor_forward(weight_nk, bias):
    """weight_nk: (N, K) torch-layout weight (f32), bias: (N,) f32."""
    N, K = weight_nk.shape
    assert bias.shape == (N,)

    n_pad = pl.cdiv(N, 128) * 128
    tn = _pick_tile(n_pad, K)

    # Hoisted out of the forward path: cast to bf16 and pad ONCE at init.
    w16 = weight_nk.astype(jnp.bfloat16)
    b32 = bias.astype(jnp.float32)
    if n_pad != N:
        w16 = jnp.pad(w16, ((0, n_pad - N), (0, 0)))
        b32 = jnp.pad(b32, (0, n_pad - N))
    b2 = b32.reshape(1, n_pad)
    w16, b2 = jax.block_until_ready((w16, b2))   # materialize prepared params now

    grid = (n_pad // tn,)

    @jax.jit
    def forward(inputs):
        # TODO(synk): `core` is an externally injected module (None in this spec) -> identity.
        h = inputs.reshape(inputs.shape[0], -1)          # torch .view(B, -1) on contiguous NCHW
        h16 = h.astype(jnp.bfloat16)                     # tiny (B x K), negligible traffic
        B = h16.shape[0]

        cost = pl.CostEstimate(
            flops=2 * B * K * n_pad,
            bytes_accessed=n_pad * K * 2 + B * K * 2 + B * n_pad * 4,
            transcendentals=0)

        y = pl.pallas_call(
            _linear_kernel,
            out_shape=jax.ShapeDtypeStruct((B, n_pad), jnp.float32),
            grid_spec=pltpu.PrefetchScalarGridSpec(
                num_scalar_prefetch=0,
                grid=grid,
                in_specs=[
                    pl.BlockSpec((B, K), lambda j: (0, 0)),    # x: whole activation each step
                    pl.BlockSpec((tn, K), lambda j: (j, 0)),   # W: contiguous N-tile (tn rows of K)
                    pl.BlockSpec((1, tn), lambda j: (0, j)),   # b: matching tile
                ],
                out_specs=pl.BlockSpec((B, tn), lambda j: (0, j)),
            ),
            compiler_params=pltpu.CompilerParams(
                dimension_semantics=("parallel",),             # N tiles shard across TensorCores
                vmem_limit_bytes=48 * 1024 * 1024,             # < v7x 64 MiB physical, ample headroom
            ),
            cost_estimate=cost,
        )(h16, w16, b2)

        return y[:, :N] if n_pad != N else y

    return forward


if __name__ == "__main__":
    IN_FEATURES = 6912              # fixed by nn.Linear(6912, num_neurons)
    NUM_NEURONS = 1000              # small stand-in; tile picker handles the real 8372 too
    B, C, H, W = 2, 3, 48, 48       # 3*48*48 = 6912

    key = jax.random.PRNGKey(0)
    k_x, k_w, k_b = jax.random.split(key, 3)

    # Deterministic synthetic parameters, torch layout: weight (N, K), bias (N,).
    bound = 1.0 / (IN_FEATURES ** 0.5)
    weight = jax.random.uniform(k_w, (NUM_NEURONS, IN_FEATURES), jnp.float32,
                                minval=-bound, maxval=bound)
    bias = jax.random.uniform(k_b, (NUM_NEURONS,), jnp.float32,
                              minval=-bound, maxval=bound)
    inputs = jax.random.normal(k_x, (B, C, H, W), jnp.float32)   # NCHW

    forward = make_sensor_forward(weight, bias)   # one-time bf16 cast + pad + jit
    y = forward(inputs)
    y = jax.block_until_ready(y)
    assert y.shape == (B, NUM_NEURONS)

    # Reference matched to the kernel's bf16-weight / f32-accumulate numerics.
    h = inputs.reshape(B, -1)
    h16 = h.astype(jnp.bfloat16).astype(jnp.float32)
    w16 = weight.astype(jnp.bfloat16).astype(jnp.float32)
    y_ref = jnp.dot(h16, w16.T, precision=jax.lax.Precision.HIGHEST) + bias
    assert jnp.allclose(y, y_ref, atol=2e-3, rtol=2e-3)

    # Sanity vs. full-f32 math (only bf16 quantisation error expected).
    y_f32 = jnp.dot(h, weight.T, precision=jax.lax.Precision.HIGHEST) + bias
    assert jnp.allclose(y, y_f32, atol=3e-2, rtol=3e-2)

    print("KERNEL_OK")
</pallas_src>

<mosaic_0001>
module attributes {stable_mosaic.version = 11 : i64} {
  func.func @_linear_kernel(%arg0: i32, %arg1: memref<2x6912xbf16, #tpu.memory_space<vmem>>, %arg2: memref<512x6912xbf16, #tpu.memory_space<vmem>>, %arg3: memref<1x512xf32, #tpu.memory_space<vmem>>, %arg4: memref<2x512xf32, #tpu.memory_space<vmem>>) attributes {dimension_semantics = [#tpu.dimension_semantics<parallel>], iteration_bounds = array<i64: 2>, scalar_prefetch = 0 : i64, scratch_operands = 0 : i64, tpu.core_type = #tpu.core_type<tc>, window_params = [{pipeline_mode = #tpu.pipeline_mode<synchronous>, transform_indices = @transform_0, window_bounds = array<i64: 2, 6912>}, {transform_indices = @transform_1, window_bounds = array<i64: 512, 6912>}, {transform_indices = @transform_2, window_bounds = array<i64: 1, 512>}, {transform_indices = @transform_3, window_bounds = array<i64: 2, 512>}]} {
    %c0 = arith.constant 0 : index
    %c0_0 = arith.constant 0 : index
    %0 = vector.load %arg1[%c0, %c0_0] : memref<2x6912xbf16, #tpu.memory_space<vmem>>, vector<2x6912xbf16>
    %c0_1 = arith.constant 0 : index
    %c0_2 = arith.constant 0 : index
    %1 = vector.load %arg2[%c0_1, %c0_2] : memref<512x6912xbf16, #tpu.memory_space<vmem>>, vector<512x6912xbf16>
    %cst = arith.constant dense<0.000000e+00> : vector<2x512xf32>
    %2 = tpu.matmul %0, %1, %cst {dimension_numbers = #tpu.dot_dimension_numbers<[1], [1], [0], [0], [0, 0, 1, 0], [], []>} : vector<2x6912xbf16>, vector<512x6912xbf16>, vector<2x512xf32> -> vector<2x512xf32>
    %c0_3 = arith.constant 0 : index
    %c0_4 = arith.constant 0 : index
    %3 = vector.load %arg3[%c0_3, %c0_4] : memref<1x512xf32, #tpu.memory_space<vmem>>, vector<1x512xf32>
    %4 = vector.broadcast %3 : vector<1x512xf32> to vector<2x512xf32>
    %5 = arith.addf %2, %4 : vector<2x512xf32>
    %c0_5 = arith.constant 0 : index
    %c0_6 = arith.constant 0 : index
    %6 = vector.load %arg4[%c0_5, %c0_6] : memref<2x512xf32, #tpu.memory_space<vmem>>, vector<2x512xf32>
    tpu.vector_store %arg4[%c0_5, %c0_6], %5 {strides = array<i32>} : memref<2x512xf32, #tpu.memory_space<vmem>>, vector<2x512xf32>,
    return
  }
  func.func @transform_0(%arg0: i32) -> (i32, i32) {
    %c0_i32 = arith.constant 0 : i32
    %c0_i32_0 = arith.constant 0 : i32
    %c0_i32_1 = arith.constant 0 : i32
    return %c0_i32, %c0_i32_0 : i32, i32
  }
  func.func @transform_1(%arg0: i32) -> (i32, i32) {
    %c0_i32 = arith.constant 0 : i32
    %c0_i32_0 = arith.constant 0 : i32
    return %arg0, %c0_i32 : i32, i32
  }
  func.func @transform_2(%arg0: i32) -> (i32, i32) {
    %c0_i32 = arith.constant 0 : i32
    %c0_i32_0 = arith.constant 0 : i32
    return %c0_i32, %arg0 : i32, i32
  }
  func.func @transform_3(%arg0: i32) -> (i32, i32) {
    %c0_i32 = arith.constant 0 : i32
    %c0_i32_0 = arith.constant 0 : i32
    return %c0_i32, %arg0 : i32, i32
  }
}

</mosaic_0001>

<bundles_post_ra>
// kernel: forward.1
= control target key start
LH: loop header
LB: loop body
LE: loop exit
PB: predicated region body
PF: predicated region fallthrough
CT: control target
= control target key end

     0   :  { %8 = vsyncpa [#allocation3], 0  ;;  %s20164_s0 = inlined_call_operand.vmem [shape: bf16[2,6912], index: 0, kind: input, shape index: {}]   ;;  %s20165_s1 = inlined_call_operand.vmem [shape: bf16[1024,6912], index: 1, kind: input, shape index: {}]   ;;  %s20166_s2 = inlined_call_operand.vmem [shape: f32[1,1024], index: 2, kind: input, shape index: {}]   ;;  %s20167_s3 = inlined_call_operand.hbm [shape: f32[2,1024], index: 3, kind: output, shape index: {}]  }
   0x1   :  { %10 = vsyncpa [#allocation3 + $0x1], 0  ;;  %s17999_s12 = smov 0   ;;  %s18001_s13 = smov 0  }
   0x2   :  { %s18003_s14 = smov 0   ;;  %s18005_s15 = smov 0  }
   0x3 LB: > { %s18020_s16 = sadd.s32 4294967295, %s17974_s15   ;;  %s13313_s17 = sadd.s32 4294967294, %s17974_s15   ;;  %s17974_s15 = sphi %s18005_s15, %s20173_s15   ;;  %s17970_s14 = sphi %s18003_s14, %s20172_s14   ;;  %s17966_s13 = sphi %s18001_s13, %s20171_s13   ;;  %s17962_s12 = sphi %s17999_s12, %s20170_s12  }
   0x4   : > { %s18024_s18 = sadd.s32 1, %s17974_s15   ;;  %s96_s19 = sadd.s32 1, %s17970_s14 }
   0x5   : > { %s93_s20 = ssub.s32 %s17974_s15, %s18024_s18  ;;  %p106_p0 = scmp.ne.s32.totalorder %s17970_s14, %s17966_s13 }
   0x6   : > { %p94_p1 = scmp.eq.s32.totalorder %s93_s20, 0  ;;  %p107_p2 = scmp.eq.s32.totalorder %s18020_s16, 1 }
   0x7   : > { %p112_p3 = scmp.ne.s32.totalorder %s17966_s13, %s17962_s12  ;;  %p113_p4 = scmp.eq.s32.totalorder %s13313_s17, 1 }
   0x8   : > { %s18035_s21 = scalar_select %p94_p1, %s17970_s14, %s96_s19  }
   0x9   : > { %p18037_p5 = por %p107_p2, %p106_p0  ;;  %p18041_p6 = por %p113_p4, %p112_p3 }
   0xa   : > { %p13316_p7 = scmp.ge.s32.totalorder %s17974_s15, 1  ;;  %p152_p8 = scmp.lt.s32.totalorder %s17974_s15, 3 }
   0xc   : > { %p153_p9 = pnand %p13316_p7, %p152_p8 }
   0xd   : > { %s13318_s24 = sshll.u32 (!%p153_p9), %s18020_s16, 6  ;;  %v1931_v0 = vlaneseq (!%p153_p9)  ;;  %v17976_v1 = vmov (!%p153_p9), 1966171168   ;;  %v18053_v5 = vld.sshfl [vmem:[%s20164_s0] sm:$0xff pattern:$0x75316420] (!%p153_p9) }
   0xe   : > { %156 = sbr.rel (%p153_p9) target bundleno = 3718 (0xe86), region = 32  ;;  %p182_p10 = scmp.lt.s32.totalorder (!%p153_p9), %s13318_s24, 127  ;;  %v1960_v2 = vunpack.c.l.s4 (!%p153_p9), %v17976_v1  ;;  %v1973_v9 = vcombine.high (!%p153_p9), %v18053_v5, %v18053_v5 }
   0xf   : > { %v18048_v3 = vshrl.u32 (!%p153_p9), %v1931_v0, 7  ;;  %s13320_s29 = sshll.u32 (!%p153_p9), %s18020_s16, 2  ;;  %s15054_s8 = sshll.u32 (!%p153_p9), %s18020_s16, 7 }
  0x10   : > { %v1961_v4 = vunpack.c.0.s8 (!%p153_p9), %v1960_v2  ;;  %p189_p11 = scmp.lt.s32.totalorder (!%p153_p9), %s13320_s29, 7  ;;  %s20120_s19 = scalar_lea.hbm (!%p153_p9), %s20167_s3, %s15054_s8 }
  0x11   : > { %s17978_s16 = smov (!%p153_p9), [#allocation2]  }
  0x12   : > { %v18056_v6 = vsub.s32 (!%p153_p9), %v1961_v4, %v18048_v3  ;;  %s17916_s25 = sshll.u32 (!%p153_p9), %s17978_s16, 4  ;;  %s17917_s25 = int_to_ptr.vmem [resolvable:$false] %s17916_s25 }
  0x13   : > { %s17918_s26 = scalar_lea.vmem (!%p153_p9), %s17917_s25, 256 }
  0x14   : > { %v18071_v13 = vrot.slane (!%p153_p9), %v1973_v9, %v18056_v6 }
  0x15   : > { %s20175_s24 = smov (!%p182_p10, %s13318_s24), 127  ;;  %s20177_s29 = smov (!%p189_p11, %s13320_s29), 7 }
  0x16   : > { %s15267_s27 = smul.u32 216, %s20175_s24  ;;  %11025 = vmatprep.mubr.bf16.mxu0 %v18071_v13  ;;  %12132 = vmatprep.mubr.bf16.mxu1 %v18071_v13  ;;  %s191_s6 = scalar_lea.vmem %s20166_s2, %s20177_s29 }
  0x18   : > { %s18061_s30 = scalar_lea.vmem %s20165_s1, %s15267_s27 }
  0x19   : > { %v15309_v7 = vld [vmem:[%s18061_s30 + $0x4] ss:$216 sps:$4 sm:$0xff]   ;;  %v15313_v10 = vld [vmem:[%s18061_s30] ss:$216 sps:$4 sm:$0xff]   ;;  %v15315_v12 = vld [vmem:[%s18061_s30 + $0x1b4] ss:$216 sps:$4 sm:$0xff]  }
  0x1a   : > { %v15311_v8 = vld [vmem:[%s18061_s30 + $0x1b04] ss:$216 sps:$4 sm:$0xff]   ;;  %10993 = vmatprep.subr.bf16.mxu0 %v15309_v7  ;;  %v15314_v11 = vld [vmem:[%s18061_s30 + $0x1b00] ss:$216 sps:$4 sm:$0xff]   ;;  %v15317_v14 = vld [vmem:[%s18061_s30 + $0x1cb4] ss:$216 sps:$4 sm:$0xff]  }
  0x1b   : > { %12100 = vmatprep.subr.bf16.mxu1 %v15311_v8  ;;  %10994 = vmatpush1.bf16.xpose.msra.mxu0 %v15313_v10  ;;  %v15319_v15 = vld [vmem:[%s18061_s30 + $0x1b0] ss:$216 sps:$4 sm:$0xff]   ;;  %v15321_v17 = vld [vmem:[%s18061_s30 + $0x364] ss:$216 sps:$4 sm:$0xff]   ;;  %v15325_v19 = vld [vmem:[%s18061_s30 + $0x360] ss:$216 sps:$4 sm:$0xff]  }
  0x1c   : > { %12101 = vmatpush1.bf16.xpose.msra.mxu1 %v15314_v11  ;;  %10995 = vmatprep.subr.bf16.mxu0 %v15315_v12  ;;  %v15320_v16 = vld [vmem:[%s18061_s30 + $0x1cb0] ss:$216 sps:$4 sm:$0xff]   ;;  %v15323_v18 = vld [vmem:[%s18061_s30 + $0x1e64] ss:$216 sps:$4 sm:$0xff]   ;;  %v15326_v20 = vld [vmem:[%s18061_s30 + $0x1e60] ss:$216 sps:$4 sm:$0xff]  }
  0x1d   : > { %12102 = vmatprep.subr.bf16.mxu1 %v15317_v14  ;;  %v15327_v21 = vld [vmem:[%s18061_s30 + $0x514] ss:$216 sps:$4 sm:$0xff]   ;;  %v15331_v23 = vld [vmem:[%s18061_s30 + $0x510] ss:$216 sps:$4 sm:$0xff]   ;;  %v15333_v25 = vld [vmem:[%s18061_s30 + $0x6c4] ss:$216 sps:$4 sm:$0xff]  }
  0x1e   : > { %v15329_v22 = vld [vmem:[%s18061_s30 + $0x2014] ss:$216 sps:$4 sm:$0xff]   ;;  %v15332_v24 = vld [vmem:[%s18061_s30 + $0x2010] ss:$216 sps:$4 sm:$0xff]   ;;  %v15335_v26 = vld [vmem:[%s18061_s30 + $0x21c4] ss:$216 sps:$4 sm:$0xff]  }
  0x1f   : > { %v15337_v27 = vld [vmem:[%s18061_s30 + $0x6c0] ss:$216 sps:$4 sm:$0xff]   ;;  %v15339_v29 = vld [vmem:[%s18061_s30 + $0x874] ss:$216 sps:$4 sm:$0xff]   ;;  %v15343_v31 = vld [vmem:[%s18061_s30 + $0x870] ss:$216 sps:$4 sm:$0xff]  }
  0x20   : > { %v15338_v28 = vld [vmem:[%s18061_s30 + $0x21c0] ss:$216 sps:$4 sm:$0xff]   ;;  %v15341_v30 = vld [vmem:[%s18061_s30 + $0x2374] ss:$216 sps:$4 sm:$0xff]   ;;  %v15344_v32 = vld [vmem:[%s18061_s30 + $0x2370] ss:$216 sps:$4 sm:$0xff]  }
  0x21   : > { %v15345_v33 = vld [vmem:[%s18061_s30 + $0xa24] ss:$216 sps:$4 sm:$0xff]   ;;  %v15349_v35 = vld [vmem:[%s18061_s30 + $0xa20] ss:$216 sps:$4 sm:$0xff]   ;;  %v15351_v37 = vld [vmem:[%s18061_s30 + $0xbd4] ss:$216 sps:$4 sm:$0xff]  }
  0x22   : > { %v15347_v34 = vld [vmem:[%s18061_s30 + $0x2524] ss:$216 sps:$4 sm:$0xff]   ;;  %v15350_v36 = vld [vmem:[%s18061_s30 + $0x2520] ss:$216 sps:$4 sm:$0xff]   ;;  %v15353_v38 = vld [vmem:[%s18061_s30 + $0x26d4] ss:$216 sps:$4 sm:$0xff]  }
  0x23   : > { %10996 = vmatpush1.bf16.xpose.msra.mxu0 %v15319_v15  ;;  %v15355_v39 = vld [vmem:[%s18061_s30 + $0xbd0] ss:$216 sps:$4 sm:$0xff]   ;;  %v15357_v41 = vld [vmem:[%s18061_s30 + $0xd84] ss:$216 sps:$4 sm:$0xff]   ;;  %v15361_v43 = vld [vmem:[%s18061_s30 + $0xd80] ss:$216 sps:$4 sm:$0xff]  }
  0x24   : > { %12103 = vmatpush1.bf16.xpose.msra.mxu1 %v15320_v16  ;;  %10997 = vmatprep.subr.bf16.mxu0 %v15321_v17  ;;  %v15356_v40 = vld [vmem:[%s18061_s30 + $0x26d0] ss:$216 sps:$4 sm:$0xff]   ;;  %v15359_v42 = vld [vmem:[%s18061_s30 + $0x2884] ss:$216 sps:$4 sm:$0xff]   ;;  %v15362_v44 = vld [vmem:[%s18061_s30 + $0x2880] ss:$216 sps:$4 sm:$0xff]   ;;  %v18140_v17 = vrot.slane %v18053_v5, %v18056_v6 }
  0x25   : > { %12104 = vmatprep.subr.bf16.mxu1 %v15323_v18  ;;  %v15363_v45 = vld [vmem:[%s18061_s30 + $0xf34] ss:$216 sps:$4 sm:$0xff]   ;;  %v15367_v47 = vld [vmem:[%s18061_s30 + $0xf30] ss:$216 sps:$4 sm:$0xff]   ;;  %v15369_v49 = vld [vmem:[%s18061_s30 + $0x10e4] ss:$216 sps:$4 sm:$0xff]  }
  0x26   : > { %v15365_v46 = vld [vmem:[%s18061_s30 + $0x2a34] ss:$216 sps:$4 sm:$0xff]   ;;  %v15368_v48 = vld [vmem:[%s18061_s30 + $0x2a30] ss:$216 sps:$4 sm:$0xff]   ;;  %v15371_v50 = vld [vmem:[%s18061_s30 + $0x2be4] ss:$216 sps:$4 sm:$0xff]  }
  0x27   : > { %v15373_v51 = vld [vmem:[%s18061_s30 + $0x10e0] ss:$216 sps:$4 sm:$0xff]   ;;  %v15375_v53 = vld [vmem:[%s18061_s30 + $0x1294] ss:$216 sps:$4 sm:$0xff]   ;;  %v15379_v55 = vld [vmem:[%s18061_s30 + $0x1290] ss:$216 sps:$4 sm:$0xff]  }
  0x28   : > { %v15374_v52 = vld [vmem:[%s18061_s30 + $0x2be0] ss:$216 sps:$4 sm:$0xff]   ;;  %v15377_v54 = vld [vmem:[%s18061_s30 + $0x2d94] ss:$216 sps:$4 sm:$0xff]   ;;  %v15380_v56 = vld [vmem:[%s18061_s30 + $0x2d90] ss:$216 sps:$4 sm:$0xff]  }
  0x29   : > { %v15381_v57 = vld [vmem:[%s18061_s30 + $0x1444] ss:$216 sps:$4 sm:$0xff]   ;;  %v15385_v59 = vld [vmem:[%s18061_s30 + $0x1440] ss:$216 sps:$4 sm:$0xff]   ;;  %v15387_v61 = vld [vmem:[%s18061_s30 + $0x15f4] ss:$216 sps:$4 sm:$0xff]  }
  0x2a   : > { %v15383_v58 = vld [vmem:[%s18061_s30 + $0x2f44] ss:$216 sps:$4 sm:$0xff]   ;;  %v15386_v60 = vld [vmem:[%s18061_s30 + $0x2f40] ss:$216 sps:$4 sm:$0xff]   ;;  %v15389_v62 = vld [vmem:[%s18061_s30 + $0x30f4] ss:$216 sps:$4 sm:$0xff]  }
  0x2b   : > { %10998 = vmatpush1.bf16.xpose.msra.mxu0 %v15325_v19  ;;  %v15391_v63 = vld [vmem:[%s18061_s30 + $0x15f0] ss:$216 sps:$4 sm:$0xff]   ;;  %v15393_v1 = vld [vmem:[%s18061_s30 + $0x17a4] ss:$216 sps:$4 sm:$0xff]   ;;  %v15397_v4 = vld [vmem:[%s18061_s30 + $0x17a0] ss:$216 sps:$4 sm:$0xff]  }
  0x2c   : > { %12105 = vmatpush1.bf16.xpose.msra.mxu1 %v15326_v20  ;;  %10999 = vmatprep.subr.bf16.mxu0 %v15327_v21  ;;  %v15392_v0 = vld [vmem:[%s18061_s30 + $0x30f0] ss:$216 sps:$4 sm:$0xff]   ;;  %v15395_v2 = vld [vmem:[%s18061_s30 + $0x32a4] ss:$216 sps:$4 sm:$0xff]   ;;  %v15398_v7 = vld [vmem:[%s18061_s30 + $0x32a0] ss:$216 sps:$4 sm:$0xff]   ;;  %v2005_v20 = vcombine.high %v18071_v13, %v18071_v13 }
  0x2d   : > { %12106 = vmatprep.subr.bf16.mxu1 %v15329_v22  ;;  %v15399_v8 = vld [vmem:[%s18061_s30 + $0x1954] ss:$216 sps:$4 sm:$0xff]   ;;  %v15403_v10 = vld [vmem:[%s18061_s30 + $0x1950] ss:$216 sps:$4 sm:$0xff]  }
  0x2e   : > { %v15401_v9 = vld [vmem:[%s18061_s30 + $0x3454] ss:$216 sps:$4 sm:$0xff]   ;;  %v15404_v11 = vld [vmem:[%s18061_s30 + $0x3450] ss:$216 sps:$4 sm:$0xff]  }
  0x2f   : > { %v15407_v12 = vld [vmem:[%s18061_s30 + $0xc] ss:$216 sps:$4 sm:$0xff]   ;;  %v15405_v15 = vld [vmem:[%s18061_s30 + $0x8] ss:$216 sps:$4 sm:$0xff]   ;;  %v15413_v18 = vld [vmem:[%s18061_s30 + $0x1bc] ss:$216 sps:$4 sm:$0xff]  }
  0x30   : > { %v15410_v14 = vld [vmem:[%s18061_s30 + $0x1b0c] ss:$216 sps:$4 sm:$0xff]   ;;  %v15408_v16 = vld [vmem:[%s18061_s30 + $0x1b08] ss:$216 sps:$4 sm:$0xff]   ;;  %v15416_v19 = vld [vmem:[%s18061_s30 + $0x1cbc] ss:$216 sps:$4 sm:$0xff]  }
  0x31   : > { %v15411_v21 = vld [vmem:[%s18061_s30 + $0x1b8] ss:$216 sps:$4 sm:$0xff]   ;;  %v15419_v22 = vld [vmem:[%s18061_s30 + $0x36c] ss:$216 sps:$4 sm:$0xff]  }
  0x32   : > { %v15414_v5 = vld [vmem:[%s18061_s30 + $0x1cb8] ss:$216 sps:$4 sm:$0xff]   ;;  %v15422_v13 = vld [vmem:[%s18061_s30 + $0x1e6c] ss:$216 sps:$4 sm:$0xff]  }
  0x33   : > { %11000 = vmatpush1.bf16.xpose.msra.mxu0 %v15331_v23  ;;  %v15417_v23 = vld [vmem:[%s18061_s30 + $0x368] ss:$216 sps:$4 sm:$0xff]  }
  0x34   : > { %12107 = vmatpush1.bf16.xpose.msra.mxu1 %v15332_v24  ;;  %11001 = vmatprep.subr.bf16.mxu0 %v15333_v25  ;;  %v15420_v24 = vld [vmem:[%s18061_s30 + $0x1e68] ss:$216 sps:$4 sm:$0xff]   ;;  %v15425_v25 = vld [vmem:[%s18061_s30 + $0x51c] ss:$216 sps:$4 sm:$0xff]  }
  0x35   : > { %12108 = vmatprep.subr.bf16.mxu1 %v15335_v26  ;;  %v15428_v26 = vld [vmem:[%s18061_s30 + $0x201c] ss:$216 sps:$4 sm:$0xff]  }
  0x3b   : > { %11002 = vmatpush1.bf16.xpose.msra.mxu0 %v15337_v27  ;;  %v15423_v27 = vld [vmem:[%s18061_s30 + $0x518] ss:$216 sps:$4 sm:$0xff]  }
  0x3c   : > { %12109 = vmatpush1.bf16.xpose.msra.mxu1 %v15338_v28  ;;  %11003 = vmatprep.subr.bf16.mxu0 %v15339_v29  ;;  %v15426_v28 = vld [vmem:[%s18061_s30 + $0x2018] ss:$216 sps:$4 sm:$0xff]   ;;  %v15431_v29 = vld [vmem:[%s18061_s30 + $0x6cc] ss:$216 sps:$4 sm:$0xff]  }
  0x3d   : > { %12110 = vmatprep.subr.bf16.mxu1 %v15341_v30  ;;  %v15434_v30 = vld [vmem:[%s18061_s30 + $0x21cc] ss:$216 sps:$4 sm:$0xff]  }
  0x43   : > { %11004 = vmatpush1.bf16.xpose.msra.mxu0 %v15343_v31  ;;  %v15429_v31 = vld [vmem:[%s18061_s30 + $0x6c8] ss:$216 sps:$4 sm:$0xff]  }
  0x44   : > { %12111 = vmatpush1.bf16.xpose.msra.mxu1 %v15344_v32  ;;  %11005 = vmatprep.subr.bf16.mxu0 %v15345_v33  ;;  %v15432_v32 = vld [vmem:[%s18061_s30 + $0x21c8] ss:$216 sps:$4 sm:$0xff]   ;;  %v15437_v33 = vld [vmem:[%s18061_s30 + $0x87c] ss:$216 sps:$4 sm:$0xff]  }
  0x45   : > { %12112 = vmatprep.subr.bf16.mxu1 %v15347_v34  ;;  %v15440_v34 = vld [vmem:[%s18061_s30 + $0x237c] ss:$216 sps:$4 sm:$0xff]  }
  0x4b   : > { %11006 = vmatpush1.bf16.xpose.msra.mxu0 %v15349_v35  ;;  %v15435_v35 = vld [vmem:[%s18061_s30 + $0x878] ss:$216 sps:$4 sm:$0xff]  }
  0x4c   : > { %12113 = vmatpush1.bf16.xpose.msra.mxu1 %v15350_v36  ;;  %11007 = vmatprep.subr.bf16.mxu0 %v15351_v37  ;;  %v15438_v36 = vld [vmem:[%s18061_s30 + $0x2378] ss:$216 sps:$4 sm:$0xff]   ;;  %v15443_v37 = vld [vmem:[%s18061_s30 + $0xa2c] ss:$216 sps:$4 sm:$0xff]  }
  0x4d   : > { %12114 = vmatprep.subr.bf16.mxu1 %v15353_v38  ;;  %v15446_v38 = vld [vmem:[%s18061_s30 + $0x252c] ss:$216 sps:$4 sm:$0xff]  }
  0x53   : > { %11008 = vmatpush1.bf16.xpose.msra.mxu0 %v15355_v39  ;;  %v15441_v39 = vld [vmem:[%s18061_s30 + $0xa28] ss:$216 sps:$4 sm:$0xff]  }
  0x54   : > { %12115 = vmatpush1.bf16.xpose.msra.mxu1 %v15356_v40  ;;  %11009 = vmatprep.subr.bf16.mxu0 %v15357_v41  ;;  %v15444_v40 = vld [vmem:[%s18061_s30 + $0x2528] ss:$216 sps:$4 sm:$0xff]   ;;  %v15449_v41 = vld [vmem:[%s18061_s30 + $0xbdc] ss:$216 sps:$4 sm:$0xff]  }
  0x55   : > { %12116 = vmatprep.subr.bf16.mxu1 %v15359_v42  ;;  %v15452_v42 = vld [vmem:[%s18061_s30 + $0x26dc] ss:$216 sps:$4 sm:$0xff]  }
  0x5b   : > { %11010 = vmatpush1.bf16.xpose.msra.mxu0 %v15361_v43  ;;  %v15447_v43 = vld [vmem:[%s18061_s30 + $0xbd8] ss:$216 sps:$4 sm:$0xff]  }
  0x5c   : > { %12117 = vmatpush1.bf16.xpose.msra.mxu1 %v15362_v44  ;;  %11011 = vmatprep.subr.bf16.mxu0 %v15363_v45  ;;  %v15450_v44 = vld [vmem:[%s18061_s30 + $0x26d8] ss:$216 sps:$4 sm:$0xff]   ;;  %v15455_v45 = vld [vmem:[%s18061_s30 + $0xd8c] ss:$216 sps:$4 sm:$0xff]  }
  0x5d   : > { %12118 = vmatprep.subr.bf16.mxu1 %v15365_v46  ;;  %v15458_v46 = vld [vmem:[%s18061_s30 + $0x288c] ss:$216 sps:$4 sm:$0xff]  }
  0x63   : > { %11012 = vmatpush1.bf16.xpose.msra.mxu0 %v15367_v47  ;;  %v15453_v47 = vld [vmem:[%s18061_s30 + $0xd88] ss:$216 sps:$4 sm:$0xff]  }
  0x64   : > { %12119 = vmatpush1.bf16.xpose.msra.mxu1 %v15368_v48  ;;  %11013 = vmatprep.subr.bf16.mxu0 %v15369_v49  ;;  %v15456_v48 = vld [vmem:[%s18061_s30 + $0x2888] ss:$216 sps:$4 sm:$0xff]   ;;  %v15461_v49 = vld [vmem:[%s18061_s30 + $0xf3c] ss:$216 sps:$4 sm:$0xff]  }
  0x65   : > { %12120 = vmatprep.subr.bf16.mxu1 %v15371_v50  ;;  %v15464_v50 = vld [vmem:[%s18061_s30 + $0x2a3c] ss:$216 sps:$4 sm:$0xff]  }
  0x6b   : > { %11014 = vmatpush1.bf16.xpose.msra.mxu0 %v15373_v51  ;;  %v15459_v51 = vld [vmem:[%s18061_s30 + $0xf38] ss:$216 sps:$4 sm:$0xff]  }
  0x6c   : > { %12121 = vmatpush1.bf16.xpose.msra.mxu1 %v15374_v52  ;;  %11015 = vmatprep.subr.bf16.mxu0 %v15375_v53  ;;  %v15462_v52 = vld [vmem:[%s18061_s30 + $0x2a38] ss:$216 sps:$4 sm:$0xff]   ;;  %v15467_v53 = vld [vmem:[%s18061_s30 + $0x10ec] ss:$216 sps:$4 sm:$0xff]  }
  0x6d   : > { %12122 = vmatprep.subr.bf16.mxu1 %v15377_v54  ;;  %v15470_v54 = vld [vmem:[%s18061_s30 + $0x2bec] ss:$216 sps:$4 sm:$0xff]  }
  0x73   : > { %11016 = vmatpush1.bf16.xpose.msra.mxu0 %v15379_v55  ;;  %v15465_v55 = vld [vmem:[%s18061_s30 + $0x10e8] ss:$216 sps:$4 sm:$0xff]  }
  0x74   : > { %12123 = vmatpush1.bf16.xpose.msra.mxu1 %v15380_v56  ;;  %11017 = vmatprep.subr.bf16.mxu0 %v15381_v57  ;;  %v15468_v56 = vld [vmem:[%s18061_s30 + $0x2be8] ss:$216 sps:$4 sm:$0xff]   ;;  %v15473_v57 = vld [vmem:[%s18061_s30 + $0x129c] ss:$216 sps:$4 sm:$0xff]  }
  0x75   : > { %12124 = vmatprep.subr.bf16.mxu1 %v15383_v58  ;;  %v15476_v58 = vld [vmem:[%s18061_s30 + $0x2d9c] ss:$216 sps:$4 sm:$0xff]  }
  0x7b   : > { %11018 = vmatpush1.bf16.xpose.msra.mxu0 %v15385_v59  ;;  %v15471_v59 = vld [vmem:[%s18061_s30 + $0x1298] ss:$216 sps:$4 sm:$0xff]  }
  0x7c   : > { %12125 = vmatpush1.bf16.xpose.msra.mxu1 %v15386_v60  ;;  %11019 = vmatprep.subr.bf16.mxu0 %v15387_v61  ;;  %v15474_v60 = vld [vmem:[%s18061_s30 + $0x2d98] ss:$216 sps:$4 sm:$0xff]   ;;  %v15479_v61 = vld [vmem:[%s18061_s30 + $0x144c] ss:$216 sps:$4 sm:$0xff]  }
  0x7d   : > { %12126 = vmatprep.subr.bf16.mxu1 %v15389_v62  ;;  %v15482_v62 = vld [vmem:[%s18061_s30 + $0x2f4c] ss:$216 sps:$4 sm:$0xff]  }
  0x83   : > { %11020 = vmatpush1.bf16.xpose.msra.mxu0 %v15391_v63  ;;  %v15477_v63 = vld [vmem:[%s18061_s30 + $0x1448] ss:$216 sps:$4 sm:$0xff]  }
  0x84   : > { %12127 = vmatpush1.bf16.xpose.msra.mxu1 %v15392_v0  ;;  %11021 = vmatprep.subr.bf16.mxu0 %v15393_v1  ;;  %v15480_v0 = vld [vmem:[%s18061_s30 + $0x2f48] ss:$216 sps:$4 sm:$0xff]   ;;  %v15485_v1 = vld [vmem:[%s18061_s30 + $0x15fc] ss:$216 sps:$4 sm:$0xff]  }
  0x85   : > { %12128 = vmatprep.subr.bf16.mxu1 %v15395_v2  ;;  %v15488_v2 = vld [vmem:[%s18061_s30 + $0x30fc] ss:$216 sps:$4 sm:$0xff]  }
  0x8b   : > { %11022 = vmatpush1.bf16.xpose.msra.mxu0 %v15397_v4  ;;  %v15483_v4 = vld [vmem:[%s18061_s30 + $0x15f8] ss:$216 sps:$4 sm:$0xff]  }
  0x8c   : > { %12129 = vmatpush1.bf16.xpose.msra.mxu1 %v15398_v7  ;;  %11023 = vmatprep.subr.bf16.mxu0 %v15399_v8  ;;  %v15486_v7 = vld [vmem:[%s18061_s30 + $0x30f8] ss:$216 sps:$4 sm:$0xff]   ;;  %v15491_v8 = vld [vmem:[%s18061_s30 + $0x17ac] ss:$216 sps:$4 sm:$0xff]  }
  0x8d   : > { %12130 = vmatprep.subr.bf16.mxu1 %v15401_v9  ;;  %v15494_v9 = vld [vmem:[%s18061_s30 + $0x32ac] ss:$216 sps:$4 sm:$0xff]  }
  0x93   : > { %11024 = vmatpush1.bf16.xpose.msra.mxu0 %v15403_v10  ;;  %v15489_v10 = vld [vmem:[%s18061_s30 + $0x17a8] ss:$216 sps:$4 sm:$0xff]  }
  0x94   : > { %12131 = vmatpush1.bf16.xpose.msra.mxu1 %v15404_v11  ;;  %11034 = vmatprep.subr.bf16.mxu0 %v15407_v12  ;;  %v15492_v11 = vld [vmem:[%s18061_s30 + $0x32a8] ss:$216 sps:$4 sm:$0xff]   ;;  %v15497_v12 = vld [vmem:[%s18061_s30 + $0x195c] ss:$216 sps:$4 sm:$0xff]  }
  0x95   : > { %12141 = vmatprep.subr.bf16.mxu1 %v15410_v14  ;;  %v15500_v14 = vld [vmem:[%s18061_s30 + $0x345c] ss:$216 sps:$4 sm:$0xff]  }
  0x9a   : > { %11026 = vmatmul.mubr.bf16.vlgmr.msra.gmra.mrb[0].mxu0 %v18140_v17 }
  0x9b   : > { %12133 = vmatmul.mubr.bf16.vlgmr.msra.gmra.mrb[0].mxu1 %v18140_v17  ;;  %11035 = vmatpush1.bf16.xpose.msra.mxu0 %v15405_v15  ;;  %v15495_v15 = vld [vmem:[%s18061_s30 + $0x1958] ss:$216 sps:$4 sm:$0xff]  }
  0x9c   : > { %12142 = vmatpush1.bf16.xpose.msra.mxu1 %v15408_v16  ;;  %11036 = vmatprep.subr.bf16.mxu0 %v15413_v18  ;;  %v15498_v16 = vld [vmem:[%s18061_s30 + $0x3458] ss:$216 sps:$4 sm:$0xff]   ;;  %v15503_v18 = vld [vmem:[%s18061_s30 + $0x14] ss:$216 sps:$4 sm:$0xff]  }
  0x9d   : > { %12143 = vmatprep.subr.bf16.mxu1 %v15416_v19  ;;  %11066 = vmatprep.mubr.bf16.mxu0 %v2005_v20  ;;  %v15506_v19 = vld [vmem:[%s18061_s30 + $0x1b14] ss:$216 sps:$4 sm:$0xff]  }
  0x9e   : > { %12173 = vmatprep.mubr.bf16.mxu1 %v2005_v20  ;;  %v17908_v20 = vld [vmem:[%s20164_s0] sm:$0xff] }
  0xa3   : > { %11037 = vmatpush1.bf16.xpose.msra.mxu0 %v15411_v21  ;;  %v1958_v21 = vcombine.high %v17908_v20, %v17908_v20  ;;  %v15585_v20 = vld [vmem:[%s18061_s30 + $0x17b0] ss:$216 sps:$4 sm:$0xff]  }
  0xa4   : > { %12144 = vmatpush1.bf16.xpose.msra.mxu1 %v15414_v5  ;;  %11038 = vmatprep.subr.bf16.mxu0 %v15419_v22  ;;  %v15501_v22 = vld [vmem:[%s18061_s30 + $0x10] ss:$216 sps:$4 sm:$0xff]  }
  0xa5   : > { %12145 = vmatprep.subr.bf16.mxu1 %v15422_v13  ;;  %v18212_v5 = vrot.slane %v1958_v21, %v18056_v6  ;;  %v15504_v13 = vld [vmem:[%s18061_s30 + $0x1b10] ss:$216 sps:$4 sm:$0xff]  }
  0xa6   : > { %v15588_v21 = vld [vmem:[%s18061_s30 + $0x32b0] ss:$216 sps:$4 sm:$0xff]  }
  0xab   : > { %11039 = vmatpush1.bf16.xpose.msra.mxu0 %v15417_v23  ;;  %v2003_v23 = vcombine.high %v18140_v17, %v18140_v17  ;;  %v15507_v17 = vld [vmem:[%s18061_s30 + $0x1c0] ss:$216 sps:$4 sm:$0xff]  }
  0xac   : > { %12146 = vmatpush1.bf16.xpose.msra.mxu1 %v15420_v24  ;;  %11040 = vmatprep.subr.bf16.mxu0 %v15425_v25  ;;  %v15509_v24 = vld [vmem:[%s18061_s30 + $0x1c4] ss:$216 sps:$4 sm:$0xff]  }
  0xad   : > { %12147 = vmatprep.subr.bf16.mxu1 %v15428_v26  ;;  %v15512_v25 = vld [vmem:[%s18061_s30 + $0x1cc4] ss:$216 sps:$4 sm:$0xff]   ;;  %v1974_v26 = vcombine.high %v18212_v5, %v18212_v5 }
  0xb3   : > { %11041 = vmatpush1.bf16.xpose.msra.mxu0 %v15423_v27  ;;  %v18223_v27 = vrot.slane %v1974_v26, %v18056_v6  ;;  %v15603_v26 = vld [vmem:[%s18061_s30 + $0x1b1c] ss:$216 sps:$4 sm:$0xff]  }
  0xb4   : > { %12148 = vmatpush1.bf16.xpose.msra.mxu1 %v15426_v28  ;;  %11042 = vmatprep.subr.bf16.mxu0 %v15431_v29  ;;  %v15510_v28 = vld [vmem:[%s18061_s30 + $0x1cc0] ss:$216 sps:$4 sm:$0xff]   ;;  %v15515_v29 = vld [vmem:[%s18061_s30 + $0x374] ss:$216 sps:$4 sm:$0xff]  }
  0xb5   : > { %12149 = vmatprep.subr.bf16.mxu1 %v15434_v30  ;;  %v15518_v30 = vld [vmem:[%s18061_s30 + $0x1e74] ss:$216 sps:$4 sm:$0xff]  }
  0xbb   : > { %11043 = vmatpush1.bf16.xpose.msra.mxu0 %v15429_v31  ;;  %v15513_v31 = vld [vmem:[%s18061_s30 + $0x370] ss:$216 sps:$4 sm:$0xff]  }
  0xbc   : > { %12150 = vmatpush1.bf16.xpose.msra.mxu1 %v15432_v32  ;;  %11044 = vmatprep.subr.bf16.mxu0 %v15437_v33  ;;  %v15516_v32 = vld [vmem:[%s18061_s30 + $0x1e70] ss:$216 sps:$4 sm:$0xff]   ;;  %v15521_v33 = vld [vmem:[%s18061_s30 + $0x524] ss:$216 sps:$4 sm:$0xff]  }
  0xbd   : > { %12151 = vmatprep.subr.bf16.mxu1 %v15440_v34  ;;  %v15524_v34 = vld [vmem:[%s18061_s30 + $0x2024] ss:$216 sps:$4 sm:$0xff]  }
  0xc3   : > { %11045 = vmatpush1.bf16.xpose.msra.mxu0 %v15435_v35  ;;  %v15519_v35 = vld [vmem:[%s18061_s30 + $0x520] ss:$216 sps:$4 sm:$0xff]  }
  0xc4   : > { %12152 = vmatpush1.bf16.xpose.msra.mxu1 %v15438_v36  ;;  %11046 = vmatprep.subr.bf16.mxu0 %v15443_v37  ;;  %v15522_v36 = vld [vmem:[%s18061_s30 + $0x2020] ss:$216 sps:$4 sm:$0xff]   ;;  %v15527_v37 = vld [vmem:[%s18061_s30 + $0x6d4] ss:$216 sps:$4 sm:$0xff]  }
  0xc5   : > { %12153 = vmatprep.subr.bf16.mxu1 %v15446_v38  ;;  %v15530_v38 = vld [vmem:[%s18061_s30 + $0x21d4] ss:$216 sps:$4 sm:$0xff]  }
  0xcb   : > { %11047 = vmatpush1.bf16.xpose.msra.mxu0 %v15441_v39  ;;  %v15525_v39 = vld [vmem:[%s18061_s30 + $0x6d0] ss:$216 sps:$4 sm:$0xff]  }
  0xcc   : > { %12154 = vmatpush1.bf16.xpose.msra.mxu1 %v15444_v40  ;;  %11048 = vmatprep.subr.bf16.mxu0 %v15449_v41  ;;  %v15528_v40 = vld [vmem:[%s18061_s30 + $0x21d0] ss:$216 sps:$4 sm:$0xff]   ;;  %v15533_v41 = vld [vmem:[%s18061_s30 + $0x884] ss:$216 sps:$4 sm:$0xff]  }
  0xcd   : > { %12155 = vmatprep.subr.bf16.mxu1 %v15452_v42  ;;  %v15536_v42 = vld [vmem:[%s18061_s30 + $0x2384] ss:$216 sps:$4 sm:$0xff]  }
  0xd3   : > { %11049 = vmatpush1.bf16.xpose.msra.mxu0 %v15447_v43  ;;  %v15531_v43 = vld [vmem:[%s18061_s30 + $0x880] ss:$216 sps:$4 sm:$0xff]  }
  0xd4   : > { %12156 = vmatpush1.bf16.xpose.msra.mxu1 %v15450_v44  ;;  %11050 = vmatprep.subr.bf16.mxu0 %v15455_v45  ;;  %v15534_v44 = vld [vmem:[%s18061_s30 + $0x2380] ss:$216 sps:$4 sm:$0xff]   ;;  %v15539_v45 = vld [vmem:[%s18061_s30 + $0xa34] ss:$216 sps:$4 sm:$0xff]  }
  0xd5   : > { %12157 = vmatprep.subr.bf16.mxu1 %v15458_v46  ;;  %v15542_v46 = vld [vmem:[%s18061_s30 + $0x2534] ss:$216 sps:$4 sm:$0xff]  }
  0xdb   : > { %11051 = vmatpush1.bf16.xpose.msra.mxu0 %v15453_v47  ;;  %v15537_v47 = vld [vmem:[%s18061_s30 + $0xa30] ss:$216 sps:$4 sm:$0xff]  }
  0xdc   : > { %12158 = vmatpush1.bf16.xpose.msra.mxu1 %v15456_v48  ;;  %11052 = vmatprep.subr.bf16.mxu0 %v15461_v49  ;;  %v15540_v48 = vld [vmem:[%s18061_s30 + $0x2530] ss:$216 sps:$4 sm:$0xff]   ;;  %v15545_v49 = vld [vmem:[%s18061_s30 + $0xbe4] ss:$216 sps:$4 sm:$0xff]  }
  0xdd   : > { %12159 = vmatprep.subr.bf16.mxu1 %v15464_v50  ;;  %v15548_v50 = vld [vmem:[%s18061_s30 + $0x26e4] ss:$216 sps:$4 sm:$0xff]  }
  0xe3   : > { %11053 = vmatpush1.bf16.xpose.msra.mxu0 %v15459_v51  ;;  %v15543_v51 = vld [vmem:[%s18061_s30 + $0xbe0] ss:$216 sps:$4 sm:$0xff]  }
  0xe4   : > { %12160 = vmatpush1.bf16.xpose.msra.mxu1 %v15462_v52  ;;  %11054 = vmatprep.subr.bf16.mxu0 %v15467_v53  ;;  %v15546_v52 = vld [vmem:[%s18061_s30 + $0x26e0] ss:$216 sps:$4 sm:$0xff]   ;;  %v15551_v53 = vld [vmem:[%s18061_s30 + $0xd94] ss:$216 sps:$4 sm:$0xff]  }
  0xe5   : > { %12161 = vmatprep.subr.bf16.mxu1 %v15470_v54  ;;  %v15554_v54 = vld [vmem:[%s18061_s30 + $0x2894] ss:$216 sps:$4 sm:$0xff]  }
  0xeb   : > { %11055 = vmatpush1.bf16.xpose.msra.mxu0 %v15465_v55  ;;  %v15549_v55 = vld [vmem:[%s18061_s30 + $0xd90] ss:$216 sps:$4 sm:$0xff]  }
  0xec   : > { %12162 = vmatpush1.bf16.xpose.msra.mxu1 %v15468_v56  ;;  %11056 = vmatprep.subr.bf16.mxu0 %v15473_v57  ;;  %v15552_v56 = vld [vmem:[%s18061_s30 + $0x2890] ss:$216 sps:$4 sm:$0xff]   ;;  %v15557_v57 = vld [vmem:[%s18061_s30 + $0xf44] ss:$216 sps:$4 sm:$0xff]  }
  0xed   : > { %12163 = vmatprep.subr.bf16.mxu1 %v15476_v58  ;;  %v15560_v58 = vld [vmem:[%s18061_s30 + $0x2a44] ss:$216 sps:$4 sm:$0xff]  }
  0xf3   : > { %11057 = vmatpush1.bf16.xpose.msra.mxu0 %v15471_v59  ;;  %v15555_v59 = vld [vmem:[%s18061_s30 + $0xf40] ss:$216 sps:$4 sm:$0xff]  }
  0xf4   : > { %12164 = vmatpush1.bf16.xpose.msra.mxu1 %v15474_v60  ;;  %11058 = vmatprep.subr.bf16.mxu0 %v15479_v61  ;;  %v15558_v60 = vld [vmem:[%s18061_s30 + $0x2a40] ss:$216 sps:$4 sm:$0xff]   ;;  %v15563_v61 = vld [vmem:[%s18061_s30 + $0x10f4] ss:$216 sps:$4 sm:$0xff]  }
  0xf5   : > { %12165 = vmatprep.subr.bf16.mxu1 %v15482_v62  ;;  %v15566_v62 = vld [vmem:[%s18061_s30 + $0x2bf4] ss:$216 sps:$4 sm:$0xff]  }
  0xfb   : > { %11059 = vmatpush1.bf16.xpose.msra.mxu0 %v15477_v63  ;;  %v15561_v63 = vld [vmem:[%s18061_s30 + $0x10f0] ss:$216 sps:$4 sm:$0xff]  }
  0xfc   : > { %12166 = vmatpush1.bf16.xpose.msra.mxu1 %v15480_v0  ;;  %11060 = vmatprep.subr.bf16.mxu0 %v15485_v1  ;;  %v15564_v0 = vld [vmem:[%s18061_s30 + $0x2bf0] ss:$216 sps:$4 sm:$0xff]   ;;  %v15569_v1 = vld [vmem:[%s18061_s30 + $0x12a4] ss:$216 sps:$4 sm:$0xff]  }
  0xfd   : > { %12167 = vmatprep.subr.bf16.mxu1 %v15488_v2  ;;  %v15572_v2 = vld [vmem:[%s18061_s30 + $0x2da4] ss:$216 sps:$4 sm:$0xff]  }
 0x103   : > { %11061 = vmatpush1.bf16.xpose.msra.mxu0 %v15483_v4  ;;  %v15567_v4 = vld [vmem:[%s18061_s30 + $0x12a0] ss:$216 sps:$4 sm:$0xff]  }
 0x104   : > { %12168 = vmatpush1.bf16.xpose.msra.mxu1 %v15486_v7  ;;  %11062 = vmatprep.subr.bf16.mxu0 %v15491_v8  ;;  %v15570_v7 = vld [vmem:[%s18061_s30 + $0x2da0] ss:$216 sps:$4 sm:$0xff]   ;;  %v15575_v8 = vld [vmem:[%s18061_s30 + $0x1454] ss:$216 sps:$4 sm:$0xff]  }
 0x105   : > { %12169 = vmatprep.subr.bf16.mxu1 %v15494_v9  ;;  %v15578_v9 = vld [vmem:[%s18061_s30 + $0x2f54] ss:$216 sps:$4 sm:$0xff]  }
 0x10b   : > { %11063 = vmatpush1.bf16.xpose.msra.mxu0 %v15489_v10  ;;  %v15573_v10 = vld [vmem:[%s18061_s30 + $0x1450] ss:$216 sps:$4 sm:$0xff]  }
 0x10c   : > { %12170 = vmatpush1.bf16.xpose.msra.mxu1 %v15492_v11  ;;  %11064 = vmatprep.subr.bf16.mxu0 %v15497_v12  ;;  %v15576_v11 = vld [vmem:[%s18061_s30 + $0x2f50] ss:$216 sps:$4 sm:$0xff]   ;;  %v15581_v12 = vld [vmem:[%s18061_s30 + $0x1604] ss:$216 sps:$4 sm:$0xff]  }
 0x10d   : > { %12171 = vmatprep.subr.bf16.mxu1 %v15500_v14  ;;  %v15584_v14 = vld [vmem:[%s18061_s30 + $0x3104] ss:$216 sps:$4 sm:$0xff]  }
 0x113   : > { %11065 = vmatpush1.bf16.xpose.msra.mxu0 %v15495_v15  ;;  %v15579_v15 = vld [vmem:[%s18061_s30 + $0x1600] ss:$216 sps:$4 sm:$0xff]  }
 0x114   : > { %12172 = vmatpush1.bf16.xpose.msra.mxu1 %v15498_v16  ;;  %11075 = vmatprep.subr.bf16.mxu0 %v15503_v18  ;;  %v15582_v16 = vld [vmem:[%s18061_s30 + $0x3100] ss:$216 sps:$4 sm:$0xff]   ;;  %v15587_v18 = vld [vmem:[%s18061_s30 + $0x17b4] ss:$216 sps:$4 sm:$0xff]  }
 0x115   : > { %12182 = vmatprep.subr.bf16.mxu1 %v15506_v19  ;;  %v15590_v19 = vld [vmem:[%s18061_s30 + $0x32b4] ss:$216 sps:$4 sm:$0xff]  }
 0x11a   : > { %11067 = vmatmul.mubr.bf16.vlgmr.msra.gmra.mrb[0].mxu0 %v2003_v23 }
 0x11b   : > { %12174 = vmatmul.mubr.bf16.vlgmr.msra.gmra.mrb[0].mxu1 %v2003_v23  ;;  %11076 = vmatpush1.bf16.xpose.msra.mxu0 %v15501_v22  ;;  %v15593_v22 = vld [vmem:[%s18061_s30 + $0x1964] ss:$216 sps:$4 sm:$0xff]   ;;  %v15591_v23 = vld [vmem:[%s18061_s30 + $0x1960] ss:$216 sps:$4 sm:$0xff]  }
 0x11c   : > { %12183 = vmatpush1.bf16.xpose.msra.mxu1 %v15504_v13  ;;  %11077 = vmatprep.subr.bf16.mxu0 %v15509_v24  ;;  %v15596_v13 = vld [vmem:[%s18061_s30 + $0x3464] ss:$216 sps:$4 sm:$0xff]   ;;  %v15594_v24 = vld [vmem:[%s18061_s30 + $0x3460] ss:$216 sps:$4 sm:$0xff]  }
 0x11d   : > { %12184 = vmatprep.subr.bf16.mxu1 %v15512_v25  ;;  %11107 = vmatprep.mubr.bf16.mxu0 %v18223_v27  ;;  %v15600_v25 = vld [vmem:[%s18061_s30 + $0x1c] ss:$216 sps:$4 sm:$0xff]  }
 0x11e   : > { %12214 = vmatprep.mubr.bf16.mxu1 %v18223_v27 }
 0x123   : > { %11078 = vmatpush1.bf16.xpose.msra.mxu0 %v15507_v17  ;;  %v15598_v17 = vld [vmem:[%s18061_s30 + $0x18] ss:$216 sps:$4 sm:$0xff]  }
 0x124   : > { %12185 = vmatpush1.bf16.xpose.msra.mxu1 %v15510_v28  ;;  %11079 = vmatprep.subr.bf16.mxu0 %v15515_v29  ;;  %v15601_v28 = vld [vmem:[%s18061_s30 + $0x1b18] ss:$216 sps:$4 sm:$0xff]   ;;  %v18291_v29 = vrot.slane %v18212_v5, %v18056_v6  ;;  %v15607_v5 = vld [vmem:[%s18061_s30 + $0x1cc8] ss:$216 sps:$4 sm:$0xff]  }
 0x125   : > { %12186 = vmatprep.subr.bf16.mxu1 %v15518_v30  ;;  %v15606_v30 = vld [vmem:[%s18061_s30 + $0x1cc] ss:$216 sps:$4 sm:$0xff]  }
 0x12b   : > { %11080 = vmatpush1.bf16.xpose.msra.mxu0 %v15513_v31  ;;  %v15609_v31 = vld [vmem:[%s18061_s30 + $0x1ccc] ss:$216 sps:$4 sm:$0xff]  }
 0x12c   : > { %12187 = vmatpush1.bf16.xpose.msra.mxu1 %v15516_v32  ;;  %11081 = vmatprep.subr.bf16.mxu0 %v15521_v33  ;;  %v2006_v32 = vcombine.high %v18223_v27, %v18223_v27  ;;  %v15604_v33 = vld [vmem:[%s18061_s30 + $0x1c8] ss:$216 sps:$4 sm:$0xff]   ;;  %v15615_v27 = vld [vmem:[%s18061_s30 + $0x1e7c] ss:$216 sps:$4 sm:$0xff]  }
 0x12d   : > { %12188 = vmatprep.subr.bf16.mxu1 %v15524_v34  ;;  %v15612_v34 = vld [vmem:[%s18061_s30 + $0x37c] ss:$216 sps:$4 sm:$0xff]  }
 0x133   : > { %11082 = vmatpush1.bf16.xpose.msra.mxu0 %v15519_v35  ;;  %v15610_v35 = vld [vmem:[%s18061_s30 + $0x378] ss:$216 sps:$4 sm:$0xff]  }
 0x134   : > { %12189 = vmatpush1.bf16.xpose.msra.mxu1 %v15522_v36  ;;  %11083 = vmatprep.subr.bf16.mxu0 %v15527_v37  ;;  %v15613_v36 = vld [vmem:[%s18061_s30 + $0x1e78] ss:$216 sps:$4 sm:$0xff]   ;;  %v15618_v37 = vld [vmem:[%s18061_s30 + $0x52c] ss:$216 sps:$4 sm:$0xff]  }
 0x135   : > { %12190 = vmatprep.subr.bf16.mxu1 %v15530_v38  ;;  %v15621_v38 = vld [vmem:[%s18061_s30 + $0x202c] ss:$216 sps:$4 sm:$0xff]  }
 0x13b   : > { %11084 = vmatpush1.bf16.xpose.msra.mxu0 %v15525_v39  ;;  %v15616_v39 = vld [vmem:[%s18061_s30 + $0x528] ss:$216 sps:$4 sm:$0xff]  }
 0x13c   : > { %12191 = vmatpush1.bf16.xpose.msra.mxu1 %v15528_v40  ;;  %11085 = vmatprep.subr.bf16.mxu0 %v15533_v41  ;;  %v15619_v40 = vld [vmem:[%s18061_s30 + $0x2028] ss:$216 sps:$4 sm:$0xff]   ;;  %v15624_v41 = vld [vmem:[%s18061_s30 + $0x6dc] ss:$216 sps:$4 sm:$0xff]  }
 0x13d   : > { %12192 = vmatprep.subr.bf16.mxu1 %v15536_v42  ;;  %v15627_v42 = vld [vmem:[%s18061_s30 + $0x21dc] ss:$216 sps:$4 sm:$0xff]  }
 0x143   : > { %11086 = vmatpush1.bf16.xpose.msra.mxu0 %v15531_v43  ;;  %v15622_v43 = vld [vmem:[%s18061_s30 + $0x6d8] ss:$216 sps:$4 sm:$0xff]  }
 0x144   : > { %12193 = vmatpush1.bf16.xpose.msra.mxu1 %v15534_v44  ;;  %11087 = vmatprep.subr.bf16.mxu0 %v15539_v45  ;;  %v15625_v44 = vld [vmem:[%s18061_s30 + $0x21d8] ss:$216 sps:$4 sm:$0xff]   ;;  %v15630_v45 = vld [vmem:[%s18061_s30 + $0x88c] ss:$216 sps:$4 sm:$0xff]  }
 0x145   : > { %12194 = vmatprep.subr.bf16.mxu1 %v15542_v46  ;;  %v15633_v46 = vld [vmem:[%s18061_s30 + $0x238c] ss:$216 sps:$4 sm:$0xff]  }
 0x14b   : > { %11088 = vmatpush1.bf16.xpose.msra.mxu0 %v15537_v47  ;;  %v15628_v47 = vld [vmem:[%s18061_s30 + $0x888] ss:$216 sps:$4 sm:$0xff]  }
 0x14c   : > { %12195 = vmatpush1.bf16.xpose.msra.mxu1 %v15540_v48  ;;  %11089 = vmatprep.subr.bf16.mxu0 %v15545_v49  ;;  %v15631_v48 = vld [vmem:[%s18061_s30 + $0x2388] ss:$216 sps:$4 sm:$0xff]   ;;  %v15636_v49 = vld [vmem:[%s18061_s30 + $0xa3c] ss:$216 sps:$4 sm:$0xff]  }
 0x14d   : > { %12196 = vmatprep.subr.bf16.mxu1 %v15548_v50  ;;  %v15639_v50 = vld [vmem:[%s18061_s30 + $0x253c] ss:$216 sps:$4 sm:$0xff]  }
 0x153   : > { %11090 = vmatpush1.bf16.xpose.msra.mxu0 %v15543_v51  ;;  %v15634_v51 = vld [vmem:[%s18061_s30 + $0xa38] ss:$216 sps:$4 sm:$0xff]  }
 0x154   : > { %12197 = vmatpush1.bf16.xpose.msra.mxu1 %v15546_v52  ;;  %11091 = vmatprep.subr.bf16.mxu0 %v15551_v53  ;;  %v15637_v52 = vld [vmem:[%s18061_s30 + $0x2538] ss:$216 sps:$4 sm:$0xff]   ;;  %v15642_v53 = vld [vmem:[%s18061_s30 + $0xbec] ss:$216 sps:$4 sm:$0xff]  }
 0x155   : > { %12198 = vmatprep.subr.bf16.mxu1 %v15554_v54  ;;  %v15645_v54 = vld [vmem:[%s18061_s30 + $0x26ec] ss:$216 sps:$4 sm:$0xff]  }
 0x15b   : > { %11092 = vmatpush1.bf16.xpose.msra.mxu0 %v15549_v55  ;;  %v15640_v55 = vld [vmem:[%s18061_s30 + $0xbe8] ss:$216 sps:$4 sm:$0xff]  }
 0x15c   : > { %12199 = vmatpush1.bf16.xpose.msra.mxu1 %v15552_v56  ;;  %11093 = vmatprep.subr.bf16.mxu0 %v15557_v57  ;;  %v15643_v56 = vld [vmem:[%s18061_s30 + $0x26e8] ss:$216 sps:$4 sm:$0xff]   ;;  %v15648_v57 = vld [vmem:[%s18061_s30 + $0xd9c] ss:$216 sps:$4 sm:$0xff]  }
 0x15d   : > { %12200 = vmatprep.subr.bf16.mxu1 %v15560_v58  ;;  %v15651_v58 = vld [vmem:[%s18061_s30 + $0x289c] ss:$216 sps:$4 sm:$0xff]  }
 0x163   : > { %11094 = vmatpush1.bf16.xpose.msra.mxu0 %v15555_v59  ;;  %v15646_v59 = vld [vmem:[%s18061_s30 + $0xd98] ss:$216 sps:$4 sm:$0xff]  }
 0x164   : > { %12201 = vmatpush1.bf16.xpose.msra.mxu1 %v15558_v60  ;;  %11095 = vmatprep.subr.bf16.mxu0 %v15563_v61  ;;  %v15649_v60 = vld [vmem:[%s18061_s30 + $0x2898] ss:$216 sps:$4 sm:$0xff]   ;;  %v15654_v61 = vld [vmem:[%s18061_s30 + $0xf4c] ss:$216 sps:$4 sm:$0xff]  }
 0x165   : > { %12202 = vmatprep.subr.bf16.mxu1 %v15566_v62  ;;  %v15657_v62 = vld [vmem:[%s18061_s30 + $0x2a4c] ss:$216 sps:$4 sm:$0xff]  }
 0x16b   : > { %11096 = vmatpush1.bf16.xpose.msra.mxu0 %v15561_v63  ;;  %v15652_v63 = vld [vmem:[%s18061_s30 + $0xf48] ss:$216 sps:$4 sm:$0xff]  }
 0x16c   : > { %12203 = vmatpush1.bf16.xpose.msra.mxu1 %v15564_v0  ;;  %11097 = vmatprep.subr.bf16.mxu0 %v15569_v1  ;;  %v15655_v0 = vld [vmem:[%s18061_s30 + $0x2a48] ss:$216 sps:$4 sm:$0xff]   ;;  %v15660_v1 = vld [vmem:[%s18061_s30 + $0x10fc] ss:$216 sps:$4 sm:$0xff]  }
 0x16d   : > { %12204 = vmatprep.subr.bf16.mxu1 %v15572_v2  ;;  %v15663_v2 = vld [vmem:[%s18061_s30 + $0x2bfc] ss:$216 sps:$4 sm:$0xff]  }
 0x173   : > { %11098 = vmatpush1.bf16.xpose.msra.mxu0 %v15567_v4  ;;  %v15658_v4 = vld [vmem:[%s18061_s30 + $0x10f8] ss:$216 sps:$4 sm:$0xff]  }
 0x174   : > { %12205 = vmatpush1.bf16.xpose.msra.mxu1 %v15570_v7  ;;  %11099 = vmatprep.subr.bf16.mxu0 %v15575_v8  ;;  %v15661_v7 = vld [vmem:[%s18061_s30 + $0x2bf8] ss:$216 sps:$4 sm:$0xff]   ;;  %v15666_v8 = vld [vmem:[%s18061_s30 + $0x12ac] ss:$216 sps:$4 sm:$0xff]  }
 0x175   : > { %12206 = vmatprep.subr.bf16.mxu1 %v15578_v9  ;;  %v15669_v9 = vld [vmem:[%s18061_s30 + $0x2dac] ss:$216 sps:$4 sm:$0xff]  }
 0x17b   : > { %11100 = vmatpush1.bf16.xpose.msra.mxu0 %v15573_v10  ;;  %v15664_v10 = vld [vmem:[%s18061_s30 + $0x12a8] ss:$216 sps:$4 sm:$0xff]  }
 0x17c   : > { %12207 = vmatpush1.bf16.xpose.msra.mxu1 %v15576_v11  ;;  %11101 = vmatprep.subr.bf16.mxu0 %v15581_v12  ;;  %v15667_v11 = vld [vmem:[%s18061_s30 + $0x2da8] ss:$216 sps:$4 sm:$0xff]   ;;  %v15672_v12 = vld [vmem:[%s18061_s30 + $0x145c] ss:$216 sps:$4 sm:$0xff]  }
 0x17d   : > { %12208 = vmatprep.subr.bf16.mxu1 %v15584_v14  ;;  %v15675_v14 = vld [vmem:[%s18061_s30 + $0x2f5c] ss:$216 sps:$4 sm:$0xff]  }
 0x183   : > { %11102 = vmatpush1.bf16.xpose.msra.mxu0 %v15579_v15  ;;  %v15670_v15 = vld [vmem:[%s18061_s30 + $0x1458] ss:$216 sps:$4 sm:$0xff]  }
 0x184   : > { %12209 = vmatpush1.bf16.xpose.msra.mxu1 %v15582_v16  ;;  %11103 = vmatprep.subr.bf16.mxu0 %v15587_v18  ;;  %v15673_v16 = vld [vmem:[%s18061_s30 + $0x2f58] ss:$216 sps:$4 sm:$0xff]   ;;  %v15678_v18 = vld [vmem:[%s18061_s30 + $0x160c] ss:$216 sps:$4 sm:$0xff]  }
 0x185   : > { %12210 = vmatprep.subr.bf16.mxu1 %v15590_v19  ;;  %v15681_v19 = vld [vmem:[%s18061_s30 + $0x310c] ss:$216 sps:$4 sm:$0xff]  }
 0x18b   : > { %11104 = vmatpush1.bf16.xpose.msra.mxu0 %v15585_v20  ;;  %v15676_v20 = vld [vmem:[%s18061_s30 + $0x1608] ss:$216 sps:$4 sm:$0xff]  }
 0x18c   : > { %12211 = vmatpush1.bf16.xpose.msra.mxu1 %v15588_v21  ;;  %11105 = vmatprep.subr.bf16.mxu0 %v15593_v22  ;;  %v15679_v21 = vld [vmem:[%s18061_s30 + $0x3108] ss:$216 sps:$4 sm:$0xff]   ;;  %v15684_v22 = vld [vmem:[%s18061_s30 + $0x17bc] ss:$216 sps:$4 sm:$0xff]  }
 0x18d   : > { %12212 = vmatprep.subr.bf16.mxu1 %v15596_v13  ;;  %v15687_v13 = vld [vmem:[%s18061_s30 + $0x32bc] ss:$216 sps:$4 sm:$0xff]  }
 0x193   : > { %11106 = vmatpush1.bf16.xpose.msra.mxu0 %v15591_v23  ;;  %v15682_v23 = vld [vmem:[%s18061_s30 + $0x17b8] ss:$216 sps:$4 sm:$0xff]  }
 0x194   : > { %12213 = vmatpush1.bf16.xpose.msra.mxu1 %v15594_v24  ;;  %11116 = vmatprep.subr.bf16.mxu0 %v15600_v25  ;;  %v15685_v24 = vld [vmem:[%s18061_s30 + $0x32b8] ss:$216 sps:$4 sm:$0xff]   ;;  %v15690_v25 = vld [vmem:[%s18061_s30 + $0x196c] ss:$216 sps:$4 sm:$0xff]  }
 0x195   : > { %12223 = vmatprep.subr.bf16.mxu1 %v15603_v26  ;;  %v15693_v26 = vld [vmem:[%s18061_s30 + $0x346c] ss:$216 sps:$4 sm:$0xff]  }
 0x19a   : > { %11108 = vmatmul.mubr.bf16.vlgmr.msra.gmra.mrb[0].mxu0 %v18291_v29 }
 0x19b   : > { %12215 = vmatmul.mubr.bf16.vlgmr.msra.gmra.mrb[0].mxu1 %v18291_v29  ;;  %11117 = vmatpush1.bf16.xpose.msra.mxu0 %v15598_v17  ;;  %v15688_v17 = vld [vmem:[%s18061_s30 + $0x1968] ss:$216 sps:$4 sm:$0xff]  }
 0x19c   : > { %12224 = vmatpush1.bf16.xpose.msra.mxu1 %v15601_v28  ;;  %11118 = vmatprep.subr.bf16.mxu0 %v15606_v30  ;;  %v15691_v28 = vld [vmem:[%s18061_s30 + $0x3468] ss:$216 sps:$4 sm:$0xff]   ;;  %v15696_v30 = vld [vmem:[%s18061_s30 + $0x24] ss:$216 sps:$4 sm:$0xff]  }
 0x19d   : > { %12225 = vmatprep.subr.bf16.mxu1 %v15609_v31  ;;  %11148 = vmatprep.mubr.bf16.mxu0 %v2006_v32  ;;  %v15699_v31 = vld [vmem:[%s18061_s30 + $0x1b24] ss:$216 sps:$4 sm:$0xff]  }
 0x19e   : > { %12255 = vmatprep.mubr.bf16.mxu1 %v2006_v32  ;;  %v18362_v32 = vld.sshfl [vmem:[%s20164_s0 + $0x8] sm:$0xff pattern:$0x75316420] }
 0x1a3   : > { %11119 = vmatpush1.bf16.xpose.msra.mxu0 %v15604_v33  ;;  %v15694_v33 = vld [vmem:[%s18061_s30 + $0x20] ss:$216 sps:$4 sm:$0xff]  }
 0x1a4   : > { %12226 = vmatpush1.bf16.xpose.msra.mxu1 %v15607_v5  ;;  %11120 = vmatprep.subr.bf16.mxu0 %v15612_v34  ;;  %v15697_v5 = vld [vmem:[%s18061_s30 + $0x1b20] ss:$216 sps:$4 sm:$0xff]   ;;  %v2004_v34 = vcombine.high %v18291_v29, %v18291_v29  ;;  %v15700_v29 = vld [vmem:[%s18061_s30 + $0x1d0] ss:$216 sps:$4 sm:$0xff]  }
 0x1a5   : > { %12227 = vmatprep.subr.bf16.mxu1 %v15615_v27  ;;  %v15702_v27 = vld [vmem:[%s18061_s30 + $0x1d4] ss:$216 sps:$4 sm:$0xff]  }
 0x1ab   : > { %11121 = vmatpush1.bf16.xpose.msra.mxu0 %v15610_v35  ;;  %v15705_v35 = vld [vmem:[%s18061_s30 + $0x1cd4] ss:$216 sps:$4 sm:$0xff]  }
 0x1ac   : > { %12228 = vmatpush1.bf16.xpose.msra.mxu1 %v15613_v36  ;;  %11122 = vmatprep.subr.bf16.mxu0 %v15618_v37  ;;  %v2022_v36 = vcombine.high %v18362_v32, %v18362_v32 }
 0x1ad   : > { %12229 = vmatprep.subr.bf16.mxu1 %v15621_v38  ;;  %v15703_v38 = vld [vmem:[%s18061_s30 + $0x1cd0] ss:$216 sps:$4 sm:$0xff]  }
 0x1ae   : > { %v18373_v37 = vrot.slane %v2022_v36, %v18056_v6  ;;  %v15795_v36 = vld [vmem:[%s18061_s30 + $0x1b2c] ss:$216 sps:$4 sm:$0xff]  }
 0x1b3   : > { %11123 = vmatpush1.bf16.xpose.msra.mxu0 %v15616_v39  ;;  %v15708_v39 = vld [vmem:[%s18061_s30 + $0x384] ss:$216 sps:$4 sm:$0xff]  }
 0x1b4   : > { %12230 = vmatpush1.bf16.xpose.msra.mxu1 %v15619_v40  ;;  %11124 = vmatprep.subr.bf16.mxu0 %v15624_v41  ;;  %v15711_v40 = vld [vmem:[%s18061_s30 + $0x1e84] ss:$216 sps:$4 sm:$0xff]   ;;  %v15706_v41 = vld [vmem:[%s18061_s30 + $0x380] ss:$216 sps:$4 sm:$0xff]  }
 0x1b5   : > { %12231 = vmatprep.subr.bf16.mxu1 %v15627_v42  ;;  %v15709_v42 = vld [vmem:[%s18061_s30 + $0x1e80] ss:$216 sps:$4 sm:$0xff]  }
 0x1bb   : > { %11125 = vmatpush1.bf16.xpose.msra.mxu0 %v15622_v43  ;;  %v15714_v43 = vld [vmem:[%s18061_s30 + $0x534] ss:$216 sps:$4 sm:$0xff]  }
 0x1bc   : > { %12232 = vmatpush1.bf16.xpose.msra.mxu1 %v15625_v44  ;;  %11126 = vmatprep.subr.bf16.mxu0 %v15630_v45  ;;  %v15717_v44 = vld [vmem:[%s18061_s30 + $0x2034] ss:$216 sps:$4 sm:$0xff]   ;;  %v15712_v45 = vld [vmem:[%s18061_s30 + $0x530] ss:$216 sps:$4 sm:$0xff]  }
 0x1bd   : > { %12233 = vmatprep.subr.bf16.mxu1 %v15633_v46  ;;  %v15715_v46 = vld [vmem:[%s18061_s30 + $0x2030] ss:$216 sps:$4 sm:$0xff]  }
 0x1c3   : > { %11127 = vmatpush1.bf16.xpose.msra.mxu0 %v15628_v47  ;;  %v15720_v47 = vld [vmem:[%s18061_s30 + $0x6e4] ss:$216 sps:$4 sm:$0xff]  }
 0x1c4   : > { %12234 = vmatpush1.bf16.xpose.msra.mxu1 %v15631_v48  ;;  %11128 = vmatprep.subr.bf16.mxu0 %v15636_v49  ;;  %v15723_v48 = vld [vmem:[%s18061_s30 + $0x21e4] ss:$216 sps:$4 sm:$0xff]   ;;  %v15718_v49 = vld [vmem:[%s18061_s30 + $0x6e0] ss:$216 sps:$4 sm:$0xff]  }
 0x1c5   : > { %12235 = vmatprep.subr.bf16.mxu1 %v15639_v50  ;;  %v15721_v50 = vld [vmem:[%s18061_s30 + $0x21e0] ss:$216 sps:$4 sm:$0xff]  }
 0x1cb   : > { %11129 = vmatpush1.bf16.xpose.msra.mxu0 %v15634_v51  ;;  %v15726_v51 = vld [vmem:[%s18061_s30 + $0x894] ss:$216 sps:$4 sm:$0xff]  }
 0x1cc   : > { %12236 = vmatpush1.bf16.xpose.msra.mxu1 %v15637_v52  ;;  %11130 = vmatprep.subr.bf16.mxu0 %v15642_v53  ;;  %v15729_v52 = vld [vmem:[%s18061_s30 + $0x2394] ss:$216 sps:$4 sm:$0xff]   ;;  %v15724_v53 = vld [vmem:[%s18061_s30 + $0x890] ss:$216 sps:$4 sm:$0xff]  }
 0x1cd   : > { %12237 = vmatprep.subr.bf16.mxu1 %v15645_v54  ;;  %v15727_v54 = vld [vmem:[%s18061_s30 + $0x2390] ss:$216 sps:$4 sm:$0xff]  }
 0x1d3   : > { %11131 = vmatpush1.bf16.xpose.msra.mxu0 %v15640_v55  ;;  %v15732_v55 = vld [vmem:[%s18061_s30 + $0xa44] ss:$216 sps:$4 sm:$0xff]  }
 0x1d4   : > { %12238 = vmatpush1.bf16.xpose.msra.mxu1 %v15643_v56  ;;  %11132 = vmatprep.subr.bf16.mxu0 %v15648_v57  ;;  %v15735_v56 = vld [vmem:[%s18061_s30 + $0x2544] ss:$216 sps:$4 sm:$0xff]   ;;  %v15730_v57 = vld [vmem:[%s18061_s30 + $0xa40] ss:$216 sps:$4 sm:$0xff]  }
 0x1d5   : > { %12239 = vmatprep.subr.bf16.mxu1 %v15651_v58  ;;  %v15733_v58 = vld [vmem:[%s18061_s30 + $0x2540] ss:$216 sps:$4 sm:$0xff]  }
 0x1db   : > { %11133 = vmatpush1.bf16.xpose.msra.mxu0 %v15646_v59  ;;  %v15738_v59 = vld [vmem:[%s18061_s30 + $0xbf4] ss:$216 sps:$4 sm:$0xff]  }
 0x1dc   : > { %12240 = vmatpush1.bf16.xpose.msra.mxu1 %v15649_v60  ;;  %11134 = vmatprep.subr.bf16.mxu0 %v15654_v61  ;;  %v15741_v60 = vld [vmem:[%s18061_s30 + $0x26f4] ss:$216 sps:$4 sm:$0xff]   ;;  %v15736_v61 = vld [vmem:[%s18061_s30 + $0xbf0] ss:$216 sps:$4 sm:$0xff]  }
 0x1dd   : > { %12241 = vmatprep.subr.bf16.mxu1 %v15657_v62  ;;  %v15739_v62 = vld [vmem:[%s18061_s30 + $0x26f0] ss:$216 sps:$4 sm:$0xff]  }
 0x1e3   : > { %11135 = vmatpush1.bf16.xpose.msra.mxu0 %v15652_v63  ;;  %v15744_v63 = vld [vmem:[%s18061_s30 + $0xda4] ss:$216 sps:$4 sm:$0xff]  }
 0x1e4   : > { %12242 = vmatpush1.bf16.xpose.msra.mxu1 %v15655_v0  ;;  %11136 = vmatprep.subr.bf16.mxu0 %v15660_v1  ;;  %v15747_v0 = vld [vmem:[%s18061_s30 + $0x28a4] ss:$216 sps:$4 sm:$0xff]   ;;  %v15742_v1 = vld [vmem:[%s18061_s30 + $0xda0] ss:$216 sps:$4 sm:$0xff]  }
 0x1e5   : > { %12243 = vmatprep.subr.bf16.mxu1 %v15663_v2  ;;  %v15745_v2 = vld [vmem:[%s18061_s30 + $0x28a0] ss:$216 sps:$4 sm:$0xff]  }
 0x1eb   : > { %11137 = vmatpush1.bf16.xpose.msra.mxu0 %v15658_v4  ;;  %v15750_v4 = vld [vmem:[%s18061_s30 + $0xf54] ss:$216 sps:$4 sm:$0xff]  }
 0x1ec   : > { %12244 = vmatpush1.bf16.xpose.msra.mxu1 %v15661_v7  ;;  %11138 = vmatprep.subr.bf16.mxu0 %v15666_v8  ;;  %v15753_v7 = vld [vmem:[%s18061_s30 + $0x2a54] ss:$216 sps:$4 sm:$0xff]   ;;  %v15748_v8 = vld [vmem:[%s18061_s30 + $0xf50] ss:$216 sps:$4 sm:$0xff]  }
 0x1ed   : > { %12245 = vmatprep.subr.bf16.mxu1 %v15669_v9  ;;  %v15751_v9 = vld [vmem:[%s18061_s30 + $0x2a50] ss:$216 sps:$4 sm:$0xff]  }
 0x1f3   : > { %11139 = vmatpush1.bf16.xpose.msra.mxu0 %v15664_v10  ;;  %v15756_v10 = vld [vmem:[%s18061_s30 + $0x1104] ss:$216 sps:$4 sm:$0xff]  }
 0x1f4   : > { %12246 = vmatpush1.bf16.xpose.msra.mxu1 %v15667_v11  ;;  %11140 = vmatprep.subr.bf16.mxu0 %v15672_v12  ;;  %v15759_v11 = vld [vmem:[%s18061_s30 + $0x2c04] ss:$216 sps:$4 sm:$0xff]   ;;  %v15754_v12 = vld [vmem:[%s18061_s30 + $0x1100] ss:$216 sps:$4 sm:$0xff]  }
 0x1f5   : > { %12247 = vmatprep.subr.bf16.mxu1 %v15675_v14  ;;  %v15757_v14 = vld [vmem:[%s18061_s30 + $0x2c00] ss:$216 sps:$4 sm:$0xff]  }
 0x1fb   : > { %11141 = vmatpush1.bf16.xpose.msra.mxu0 %v15670_v15  ;;  %v15762_v15 = vld [vmem:[%s18061_s30 + $0x12b4] ss:$216 sps:$4 sm:$0xff]  }
 0x1fc   : > { %12248 = vmatpush1.bf16.xpose.msra.mxu1 %v15673_v16  ;;  %11142 = vmatprep.subr.bf16.mxu0 %v15678_v18  ;;  %v15765_v16 = vld [vmem:[%s18061_s30 + $0x2db4] ss:$216 sps:$4 sm:$0xff]   ;;  %v15760_v18 = vld [vmem:[%s18061_s30 + $0x12b0] ss:$216 sps:$4 sm:$0xff]  }
 0x1fd   : > { %12249 = vmatprep.subr.bf16.mxu1 %v15681_v19  ;;  %v15763_v19 = vld [vmem:[%s18061_s30 + $0x2db0] ss:$216 sps:$4 sm:$0xff]  }
 0x203   : > { %11143 = vmatpush1.bf16.xpose.msra.mxu0 %v15676_v20  ;;  %v15768_v20 = vld [vmem:[%s18061_s30 + $0x1464] ss:$216 sps:$4 sm:$0xff]  }
 0x204   : > { %12250 = vmatpush1.bf16.xpose.msra.mxu1 %v15679_v21  ;;  %11144 = vmatprep.subr.bf16.mxu0 %v15684_v22  ;;  %v15771_v21 = vld [vmem:[%s18061_s30 + $0x2f64] ss:$216 sps:$4 sm:$0xff]   ;;  %v15766_v22 = vld [vmem:[%s18061_s30 + $0x1460] ss:$216 sps:$4 sm:$0xff]  }
 0x205   : > { %12251 = vmatprep.subr.bf16.mxu1 %v15687_v13  ;;  %v15769_v13 = vld [vmem:[%s18061_s30 + $0x2f60] ss:$216 sps:$4 sm:$0xff]  }
 0x20b   : > { %11145 = vmatpush1.bf16.xpose.msra.mxu0 %v15682_v23  ;;  %v15774_v23 = vld [vmem:[%s18061_s30 + $0x1614] ss:$216 sps:$4 sm:$0xff]  }
 0x20c   : > { %12252 = vmatpush1.bf16.xpose.msra.mxu1 %v15685_v24  ;;  %11146 = vmatprep.subr.bf16.mxu0 %v15690_v25  ;;  %v15777_v24 = vld [vmem:[%s18061_s30 + $0x3114] ss:$216 sps:$4 sm:$0xff]   ;;  %v15772_v25 = vld [vmem:[%s18061_s30 + $0x1610] ss:$216 sps:$4 sm:$0xff]  }
 0x20d   : > { %12253 = vmatprep.subr.bf16.mxu1 %v15693_v26  ;;  %v15775_v26 = vld [vmem:[%s18061_s30 + $0x3110] ss:$216 sps:$4 sm:$0xff]  }
 0x213   : > { %11147 = vmatpush1.bf16.xpose.msra.mxu0 %v15688_v17  ;;  %v15780_v17 = vld [vmem:[%s18061_s30 + $0x17c4] ss:$216 sps:$4 sm:$0xff]  }
 0x214   : > { %12254 = vmatpush1.bf16.xpose.msra.mxu1 %v15691_v28  ;;  %11157 = vmatprep.subr.bf16.mxu0 %v15696_v30  ;;  %v15783_v28 = vld [vmem:[%s18061_s30 + $0x32c4] ss:$216 sps:$4 sm:$0xff]   ;;  %v15778_v30 = vld [vmem:[%s18061_s30 + $0x17c0] ss:$216 sps:$4 sm:$0xff]  }
 0x215   : > { %12264 = vmatprep.subr.bf16.mxu1 %v15699_v31  ;;  %v15781_v31 = vld [vmem:[%s18061_s30 + $0x32c0] ss:$216 sps:$4 sm:$0xff]  }
 0x21a   : > { %11149 = vmatmul.mubr.bf16.vlgmr.msra.gmra.mrb[0].mxu0 %v2004_v34 }
 0x21b   : > { %12256 = vmatmul.mubr.bf16.vlgmr.msra.gmra.mrb[0].mxu1 %v2004_v34  ;;  %11158 = vmatpush1.bf16.xpose.msra.mxu0 %v15694_v33  ;;  %v15786_v33 = vld [vmem:[%s18061_s30 + $0x1974] ss:$216 sps:$4 sm:$0xff]   ;;  %v15784_v34 = vld [vmem:[%s18061_s30 + $0x1970] ss:$216 sps:$4 sm:$0xff]  }
 0x21c   : > { %12265 = vmatpush1.bf16.xpose.msra.mxu1 %v15697_v5  ;;  %11159 = vmatprep.subr.bf16.mxu0 %v15702_v27  ;;  %v15789_v5 = vld [vmem:[%s18061_s30 + $0x3474] ss:$216 sps:$4 sm:$0xff]   ;;  %v15787_v27 = vld [vmem:[%s18061_s30 + $0x3470] ss:$216 sps:$4 sm:$0xff]  }
 0x21d   : > { %12266 = vmatprep.subr.bf16.mxu1 %v15705_v35  ;;  %11189 = vmatprep.mubr.bf16.mxu0 %v18373_v37  ;;  %v15792_v35 = vld [vmem:[%s18061_s30 + $0x2c] ss:$216 sps:$4 sm:$0xff]  }
 0x21e   : > { %12296 = vmatprep.mubr.bf16.mxu1 %v18373_v37 }
 0x223   : > { %11160 = vmatpush1.bf16.xpose.msra.mxu0 %v15700_v29  ;;  %v15790_v29 = vld [vmem:[%s18061_s30 + $0x28] ss:$216 sps:$4 sm:$0xff]  }
 0x224   : > { %12267 = vmatpush1.bf16.xpose.msra.mxu1 %v15703_v38  ;;  %11161 = vmatprep.subr.bf16.mxu0 %v15708_v39  ;;  %v15793_v38 = vld [vmem:[%s18061_s30 + $0x1b28] ss:$216 sps:$4 sm:$0xff]   ;;  %v18441_v39 = vrot.slane %v18362_v32, %v18056_v6  ;;  %v15799_v32 = vld [vmem:[%s18061_s30 + $0x1cd8] ss:$216 sps:$4 sm:$0xff]  }
 0x225   : > { %12268 = vmatprep.subr.bf16.mxu1 %v15711_v40  ;;  %v15798_v40 = vld [vmem:[%s18061_s30 + $0x1dc] ss:$216 sps:$4 sm:$0xff]  }
 0x22b   : > { %11162 = vmatpush1.bf16.xpose.msra.mxu0 %v15706_v41  ;;  %v15801_v41 = vld [vmem:[%s18061_s30 + $0x1cdc] ss:$216 sps:$4 sm:$0xff]  }
 0x22c   : > { %12269 = vmatpush1.bf16.xpose.msra.mxu1 %v15709_v42  ;;  %11163 = vmatprep.subr.bf16.mxu0 %v15714_v43  ;;  %v2054_v42 = vcombine.high %v18373_v37, %v18373_v37  ;;  %v15796_v43 = vld [vmem:[%s18061_s30 + $0x1d8] ss:$216 sps:$4 sm:$0xff]   ;;  %v15807_v37 = vld [vmem:[%s18061_s30 + $0x1e8c] ss:$216 sps:$4 sm:$0xff]  }
 0x22d   : > { %12270 = vmatprep.subr.bf16.mxu1 %v15717_v44  ;;  %v15804_v44 = vld [vmem:[%s18061_s30 + $0x38c] ss:$216 sps:$4 sm:$0xff]  }
 0x233   : > { %11164 = vmatpush1.bf16.xpose.msra.mxu0 %v15712_v45  ;;  %v15802_v45 = vld [vmem:[%s18061_s30 + $0x388] ss:$216 sps:$4 sm:$0xff]  }
 0x234   : > { %12271 = vmatpush1.bf16.xpose.msra.mxu1 %v15715_v46  ;;  %11165 = vmatprep.subr.bf16.mxu0 %v15720_v47  ;;  %v15805_v46 = vld [vmem:[%s18061_s30 + $0x1e88] ss:$216 sps:$4 sm:$0xff]   ;;  %v15810_v47 = vld [vmem:[%s18061_s30 + $0x53c] ss:$216 sps:$4 sm:$0xff]  }
 0x235   : > { %12272 = vmatprep.subr.bf16.mxu1 %v15723_v48  ;;  %v15813_v48 = vld [vmem:[%s18061_s30 + $0x203c] ss:$216 sps:$4 sm:$0xff]  }
 0x23b   : > { %11166 = vmatpush1.bf16.xpose.msra.mxu0 %v15718_v49  ;;  %v15808_v49 = vld [vmem:[%s18061_s30 + $0x538] ss:$216 sps:$4 sm:$0xff]  }
 0x23c   : > { %12273 = vmatpush1.bf16.xpose.msra.mxu1 %v15721_v50  ;;  %11167 = vmatprep.subr.bf16.mxu0 %v15726_v51  ;;  %v15811_v50 = vld [vmem:[%s18061_s30 + $0x2038] ss:$216 sps:$4 sm:$0xff]   ;;  %v15816_v51 = vld [vmem:[%s18061_s30 + $0x6ec] ss:$216 sps:$4 sm:$0xff]  }
 0x23d   : > { %12274 = vmatprep.subr.bf16.mxu1 %v15729_v52  ;;  %v15819_v52 = vld [vmem:[%s18061_s30 + $0x21ec] ss:$216 sps:$4 sm:$0xff]  }
 0x243   : > { %11168 = vmatpush1.bf16.xpose.msra.mxu0 %v15724_v53  ;;  %v15814_v53 = vld [vmem:[%s18061_s30 + $0x6e8] ss:$216 sps:$4 sm:$0xff]  }
 0x244   : > { %12275 = vmatpush1.bf16.xpose.msra.mxu1 %v15727_v54  ;;  %11169 = vmatprep.subr.bf16.mxu0 %v15732_v55  ;;  %v15817_v54 = vld [vmem:[%s18061_s30 + $0x21e8] ss:$216 sps:$4 sm:$0xff]   ;;  %v15822_v55 = vld [vmem:[%s18061_s30 + $0x89c] ss:$216 sps:$4 sm:$0xff]  }
 0x245   : > { %12276 = vmatprep.subr.bf16.mxu1 %v15735_v56  ;;  %v15825_v56 = vld [vmem:[%s18061_s30 + $0x239c] ss:$216 sps:$4 sm:$0xff]  }
 0x24b   : > { %11170 = vmatpush1.bf16.xpose.msra.mxu0 %v15730_v57  ;;  %v15820_v57 = vld [vmem:[%s18061_s30 + $0x898] ss:$216 sps:$4 sm:$0xff]  }
 0x24c   : > { %12277 = vmatpush1.bf16.xpose.msra.mxu1 %v15733_v58  ;;  %11171 = vmatprep.subr.bf16.mxu0 %v15738_v59  ;;  %v15823_v58 = vld [vmem:[%s18061_s30 + $0x2398] ss:$216 sps:$4 sm:$0xff]   ;;  %v15828_v59 = vld [vmem:[%s18061_s30 + $0xa4c] ss:$216 sps:$4 sm:$0xff]  }
 0x24d   : > { %12278 = vmatprep.subr.bf16.mxu1 %v15741_v60  ;;  %v15831_v60 = vld [vmem:[%s18061_s30 + $0x254c] ss:$216 sps:$4 sm:$0xff]  }
 0x253   : > { %11172 = vmatpush1.bf16.xpose.msra.mxu0 %v15736_v61  ;;  %v15826_v61 = vld [vmem:[%s18061_s30 + $0xa48] ss:$216 sps:$4 sm:$0xff]  }
 0x254   : > { %12279 = vmatpush1.bf16.xpose.msra.mxu1 %v15739_v62  ;;  %11173 = vmatprep.subr.bf16.mxu0 %v15744_v63  ;;  %v15829_v62 = vld [vmem:[%s18061_s30 + $0x2548] ss:$216 sps:$4 sm:$0xff]   ;;  %v15834_v63 = vld [vmem:[%s18061_s30 + $0xbfc] ss:$216 sps:$4 sm:$0xff]  }
 0x255   : > { %12280 = vmatprep.subr.bf16.mxu1 %v15747_v0  ;;  %v15837_v0 = vld [vmem:[%s18061_s30 + $0x26fc] ss:$216 sps:$4 sm:$0xff]  }
 0x25b   : > { %11174 = vmatpush1.bf16.xpose.msra.mxu0 %v15742_v1  ;;  %v15832_v1 = vld [vmem:[%s18061_s30 + $0xbf8] ss:$216 sps:$4 sm:$0xff]  }
 0x25c   : > { %12281 = vmatpush1.bf16.xpose.msra.mxu1 %v15745_v2  ;;  %11175 = vmatprep.subr.bf16.mxu0 %v15750_v4  ;;  %v15835_v2 = vld [vmem:[%s18061_s30 + $0x26f8] ss:$216 sps:$4 sm:$0xff]   ;;  %v15840_v4 = vld [vmem:[%s18061_s30 + $0xdac] ss:$216 sps:$4 sm:$0xff]  }
 0x25d   : > { %12282 = vmatprep.subr.bf16.mxu1 %v15753_v7  ;;  %v15843_v7 = vld [vmem:[%s18061_s30 + $0x28ac] ss:$216 sps:$4 sm:$0xff]  }
 0x263   : > { %11176 = vmatpush1.bf16.xpose.msra.mxu0 %v15748_v8  ;;  %v15838_v8 = vld [vmem:[%s18061_s30 + $0xda8] ss:$216 sps:$4 sm:$0xff]  }
 0x264   : > { %12283 = vmatpush1.bf16.xpose.msra.mxu1 %v15751_v9  ;;  %11177 = vmatprep.subr.bf16.mxu0 %v15756_v10  ;;  %v15841_v9 = vld [vmem:[%s18061_s30 + $0x28a8] ss:$216 sps:$4 sm:$0xff]   ;;  %v15846_v10 = vld [vmem:[%s18061_s30 + $0xf5c] ss:$216 sps:$4 sm:$0xff]  }
 0x265   : > { %12284 = vmatprep.subr.bf16.mxu1 %v15759_v11  ;;  %v15849_v11 = vld [vmem:[%s18061_s30 + $0x2a5c] ss:$216 sps:$4 sm:$0xff]  }
 0x26b   : > { %11178 = vmatpush1.bf16.xpose.msra.mxu0 %v15754_v12  ;;  %v15844_v12 = vld [vmem:[%s18061_s30 + $0xf58] ss:$216 sps:$4 sm:$0xff]  }
 0x26c   : > { %12285 = vmatpush1.bf16.xpose.msra.mxu1 %v15757_v14  ;;  %11179 = vmatprep.subr.bf16.mxu0 %v15762_v15  ;;  %v15847_v14 = vld [vmem:[%s18061_s30 + $0x2a58] ss:$216 sps:$4 sm:$0xff]   ;;  %v15852_v15 = vld [vmem:[%s18061_s30 + $0x110c] ss:$216 sps:$4 sm:$0xff]  }
 0x26d   : > { %12286 = vmatprep.subr.bf16.mxu1 %v15765_v16  ;;  %v15855_v16 = vld [vmem:[%s18061_s30 + $0x2c0c] ss:$216 sps:$4 sm:$0xff]  }
 0x273   : > { %11180 = vmatpush1.bf16.xpose.msra.mxu0 %v15760_v18  ;;  %v15850_v18 = vld [vmem:[%s18061_s30 + $0x1108] ss:$216 sps:$4 sm:$0xff]  }
 0x274   : > { %12287 = vmatpush1.bf16.xpose.msra.mxu1 %v15763_v19  ;;  %11181 = vmatprep.subr.bf16.mxu0 %v15768_v20  ;;  %v15853_v19 = vld [vmem:[%s18061_s30 + $0x2c08] ss:$216 sps:$4 sm:$0xff]   ;;  %v15858_v20 = vld [vmem:[%s18061_s30 + $0x12bc] ss:$216 sps:$4 sm:$0xff]  }
 0x275   : > { %12288 = vmatprep.subr.bf16.mxu1 %v15771_v21  ;;  %v15861_v21 = vld [vmem:[%s18061_s30 + $0x2dbc] ss:$216 sps:$4 sm:$0xff]  }
 0x27b   : > { %11182 = vmatpush1.bf16.xpose.msra.mxu0 %v15766_v22  ;;  %v15856_v22 = vld [vmem:[%s18061_s30 + $0x12b8] ss:$216 sps:$4 sm:$0xff]  }
 0x27c   : > { %12289 = vmatpush1.bf16.xpose.msra.mxu1 %v15769_v13  ;;  %11183 = vmatprep.subr.bf16.mxu0 %v15774_v23  ;;  %v15859_v13 = vld [vmem:[%s18061_s30 + $0x2db8] ss:$216 sps:$4 sm:$0xff]   ;;  %v15864_v23 = vld [vmem:[%s18061_s30 + $0x146c] ss:$216 sps:$4 sm:$0xff]  }
 0x27d   : > { %12290 = vmatprep.subr.bf16.mxu1 %v15777_v24  ;;  %v15867_v24 = vld [vmem:[%s18061_s30 + $0x2f6c] ss:$216 sps:$4 sm:$0xff]  }
 0x283   : > { %11184 = vmatpush1.bf16.xpose.msra.mxu0 %v15772_v25  ;;  %v15862_v25 = vld [vmem:[%s18061_s30 + $0x1468] ss:$216 sps:$4 sm:$0xff]  }
 0x284   : > { %12291 = vmatpush1.bf16.xpose.msra.mxu1 %v15775_v26  ;;  %11185 = vmatprep.subr.bf16.mxu0 %v15780_v17  ;;  %v15865_v26 = vld [vmem:[%s18061_s30 + $0x2f68] ss:$216 sps:$4 sm:$0xff]   ;;  %v15870_v17 = vld [vmem:[%s18061_s30 + $0x161c] ss:$216 sps:$4 sm:$0xff]  }
 0x285   : > { %12292 = vmatprep.subr.bf16.mxu1 %v15783_v28  ;;  %v15873_v28 = vld [vmem:[%s18061_s30 + $0x311c] ss:$216 sps:$4 sm:$0xff]  }
 0x28b   : > { %11186 = vmatpush1.bf16.xpose.msra.mxu0 %v15778_v30  ;;  %v15868_v30 = vld [vmem:[%s18061_s30 + $0x1618] ss:$216 sps:$4 sm:$0xff]  }
 0x28c   : > { %12293 = vmatpush1.bf16.xpose.msra.mxu1 %v15781_v31  ;;  %11187 = vmatprep.subr.bf16.mxu0 %v15786_v33  ;;  %v15871_v31 = vld [vmem:[%s18061_s30 + $0x3118] ss:$216 sps:$4 sm:$0xff]   ;;  %v15876_v33 = vld [vmem:[%s18061_s30 + $0x17cc] ss:$216 sps:$4 sm:$0xff]  }
 0x28d   : > { %12294 = vmatprep.subr.bf16.mxu1 %v15789_v5  ;;  %v15879_v5 = vld [vmem:[%s18061_s30 + $0x32cc] ss:$216 sps:$4 sm:$0xff]  }
 0x293   : > { %11188 = vmatpush1.bf16.xpose.msra.mxu0 %v15784_v34  ;;  %v15874_v34 = vld [vmem:[%s18061_s30 + $0x17c8] ss:$216 sps:$4 sm:$0xff]  }
 0x294   : > { %12295 = vmatpush1.bf16.xpose.msra.mxu1 %v15787_v27  ;;  %11198 = vmatprep.subr.bf16.mxu0 %v15792_v35  ;;  %v15877_v27 = vld [vmem:[%s18061_s30 + $0x32c8] ss:$216 sps:$4 sm:$0xff]   ;;  %v15882_v35 = vld [vmem:[%s18061_s30 + $0x197c] ss:$216 sps:$4 sm:$0xff]  }
 0x295   : > { %12305 = vmatprep.subr.bf16.mxu1 %v15795_v36  ;;  %v15885_v36 = vld [vmem:[%s18061_s30 + $0x347c] ss:$216 sps:$4 sm:$0xff]  }
 0x29a   : > { %11190 = vmatmul.mubr.bf16.vlgmr.msra.gmra.mrb[0].mxu0 %v18441_v39 }
 0x29b   : > { %12297 = vmatmul.mubr.bf16.vlgmr.msra.gmra.mrb[0].mxu1 %v18441_v39  ;;  %11199 = vmatpush1.bf16.xpose.msra.mxu0 %v15790_v29  ;;  %v15880_v29 = vld [vmem:[%s18061_s30 + $0x1978] ss:$216 sps:$4 sm:$0xff]  }
 0x29c   : > { %12306 = vmatpush1.bf16.xpose.msra.mxu1 %v15793_v38  ;;  %11200 = vmatprep.subr.bf16.mxu0 %v15798_v40  ;;  %v15883_v38 = vld [vmem:[%s18061_s30 + $0x3478] ss:$216 sps:$4 sm:$0xff]   ;;  %v15888_v40 = vld [vmem:[%s18061_s30 + $0x34] ss:$216 sps:$4 sm:$0xff]  }
 0x29d   : > { %12307 = vmatprep.subr.bf16.mxu1 %v15801_v41  ;;  %11230 = vmatprep.mubr.bf16.mxu0 %v2054_v42  ;;  %v15891_v41 = vld [vmem:[%s18061_s30 + $0x1b34] ss:$216 sps:$4 sm:$0xff]  }
 0x29e   : > { %12337 = vmatprep.mubr.bf16.mxu1 %v2054_v42  ;;  %v17909_v42 = vld [vmem:[%s20164_s0 + $0x8] sm:$0xff] }
 0x2a3   : > { %11201 = vmatpush1.bf16.xpose.msra.mxu0 %v15796_v43  ;;  %v2007_v43 = vcombine.high %v17909_v42, %v17909_v42  ;;  %v15970_v42 = vld [vmem:[%s18061_s30 + $0x17d0] ss:$216 sps:$4 sm:$0xff]  }
 0x2a4   : > { %12308 = vmatpush1.bf16.xpose.msra.mxu1 %v15799_v32  ;;  %11202 = vmatprep.subr.bf16.mxu0 %v15804_v44  ;;  %v2052_v44 = vcombine.high %v18441_v39, %v18441_v39  ;;  %v15892_v39 = vld [vmem:[%s18061_s30 + $0x1e0] ss:$216 sps:$4 sm:$0xff]  }
 0x2a5   : > { %12309 = vmatprep.subr.bf16.mxu1 %v15807_v37  ;;  %v18513_v32 = vrot.slane %v2007_v43, %v18056_v6  ;;  %v15973_v43 = vld [vmem:[%s18061_s30 + $0x32d0] ss:$216 sps:$4 sm:$0xff]  }
 0x2a7   : > { %v2023_v37 = vcombine.high %v18513_v32, %v18513_v32 }
 0x2ab   : > { %11203 = vmatpush1.bf16.xpose.msra.mxu0 %v15802_v45  ;;  %v15886_v45 = vld [vmem:[%s18061_s30 + $0x30] ss:$216 sps:$4 sm:$0xff]  }
 0x2ac   : > { %12310 = vmatpush1.bf16.xpose.msra.mxu1 %v15805_v46  ;;  %11204 = vmatprep.subr.bf16.mxu0 %v15810_v47  ;;  %v15889_v46 = vld [vmem:[%s18061_s30 + $0x1b30] ss:$216 sps:$4 sm:$0xff]   ;;  %v15894_v47 = vld [vmem:[%s18061_s30 + $0x1e4] ss:$216 sps:$4 sm:$0xff]  }
 0x2ad   : > { %12311 = vmatprep.subr.bf16.mxu1 %v15813_v48  ;;  %v15897_v48 = vld [vmem:[%s18061_s30 + $0x1ce4] ss:$216 sps:$4 sm:$0xff]  }
 0x2b3   : > { %11205 = vmatpush1.bf16.xpose.msra.mxu0 %v15808_v49  ;;  %v18524_v49 = vrot.slane %v2023_v37, %v18056_v6  ;;  %v15981_v37 = vld [vmem:[%s18061_s30 + $0x3484] ss:$216 sps:$4 sm:$0xff]  }
 0x2b4   : > { %12312 = vmatpush1.bf16.xpose.msra.mxu1 %v15811_v50  ;;  %11206 = vmatprep.subr.bf16.mxu0 %v15816_v51  ;;  %v15895_v50 = vld [vmem:[%s18061_s30 + $0x1ce0] ss:$216 sps:$4 sm:$0xff]   ;;  %v15900_v51 = vld [vmem:[%s18061_s30 + $0x394] ss:$216 sps:$4 sm:$0xff]  }
 0x2b5   : > { %12313 = vmatprep.subr.bf16.mxu1 %v15819_v52  ;;  %v15903_v52 = vld [vmem:[%s18061_s30 + $0x1e94] ss:$216 sps:$4 sm:$0xff]  }
 0x2bb   : > { %11207 = vmatpush1.bf16.xpose.msra.mxu0 %v15814_v53  ;;  %v15898_v53 = vld [vmem:[%s18061_s30 + $0x390] ss:$216 sps:$4 sm:$0xff]  }
 0x2bc   : > { %12314 = vmatpush1.bf16.xpose.msra.mxu1 %v15817_v54  ;;  %11208 = vmatprep.subr.bf16.mxu0 %v15822_v55  ;;  %v15901_v54 = vld [vmem:[%s18061_s30 + $0x1e90] ss:$216 sps:$4 sm:$0xff]   ;;  %v15906_v55 = vld [vmem:[%s18061_s30 + $0x544] ss:$216 sps:$4 sm:$0xff]  }
 0x2bd   : > { %12315 = vmatprep.subr.bf16.mxu1 %v15825_v56  ;;  %v15909_v56 = vld [vmem:[%s18061_s30 + $0x2044] ss:$216 sps:$4 sm:$0xff]  }
 0x2c3   : > { %11209 = vmatpush1.bf16.xpose.msra.mxu0 %v15820_v57  ;;  %v15904_v57 = vld [vmem:[%s18061_s30 + $0x540] ss:$216 sps:$4 sm:$0xff]  }
 0x2c4   : > { %12316 = vmatpush1.bf16.xpose.msra.mxu1 %v15823_v58  ;;  %11210 = vmatprep.subr.bf16.mxu0 %v15828_v59  ;;  %v15907_v58 = vld [vmem:[%s18061_s30 + $0x2040] ss:$216 sps:$4 sm:$0xff]   ;;  %v15912_v59 = vld [vmem:[%s18061_s30 + $0x6f4] ss:$216 sps:$4 sm:$0xff]  }
 0x2c5   : > { %12317 = vmatprep.subr.bf16.mxu1 %v15831_v60  ;;  %v15915_v60 = vld [vmem:[%s18061_s30 + $0x21f4] ss:$216 sps:$4 sm:$0xff]  }
 0x2cb   : > { %11211 = vmatpush1.bf16.xpose.msra.mxu0 %v15826_v61  ;;  %v15910_v61 = vld [vmem:[%s18061_s30 + $0x6f0] ss:$216 sps:$4 sm:$0xff]  }
 0x2cc   : > { %12318 = vmatpush1.bf16.xpose.msra.mxu1 %v15829_v62  ;;  %11212 = vmatprep.subr.bf16.mxu0 %v15834_v63  ;;  %v15913_v62 = vld [vmem:[%s18061_s30 + $0x21f0] ss:$216 sps:$4 sm:$0xff]   ;;  %v15918_v63 = vld [vmem:[%s18061_s30 + $0x8a4] ss:$216 sps:$4 sm:$0xff]  }
 0x2cd   : > { %12319 = vmatprep.subr.bf16.mxu1 %v15837_v0  ;;  %v15921_v0 = vld [vmem:[%s18061_s30 + $0x23a4] ss:$216 sps:$4 sm:$0xff]  }
 0x2d3   : > { %11213 = vmatpush1.bf16.xpose.msra.mxu0 %v15832_v1  ;;  %v15916_v1 = vld [vmem:[%s18061_s30 + $0x8a0] ss:$216 sps:$4 sm:$0xff]  }
 0x2d4   : > { %12320 = vmatpush1.bf16.xpose.msra.mxu1 %v15835_v2  ;;  %11214 = vmatprep.subr.bf16.mxu0 %v15840_v4  ;;  %v15919_v2 = vld [vmem:[%s18061_s30 + $0x23a0] ss:$216 sps:$4 sm:$0xff]   ;;  %v15924_v4 = vld [vmem:[%s18061_s30 + $0xa54] ss:$216 sps:$4 sm:$0xff]  }
 0x2d5   : > { %12321 = vmatprep.subr.bf16.mxu1 %v15843_v7  ;;  %v15927_v7 = vld [vmem:[%s18061_s30 + $0x2554] ss:$216 sps:$4 sm:$0xff]  }
 0x2db   : > { %11215 = vmatpush1.bf16.xpose.msra.mxu0 %v15838_v8  ;;  %v15922_v8 = vld [vmem:[%s18061_s30 + $0xa50] ss:$216 sps:$4 sm:$0xff]  }
 0x2dc   : > { %12322 = vmatpush1.bf16.xpose.msra.mxu1 %v15841_v9  ;;  %11216 = vmatprep.subr.bf16.mxu0 %v15846_v10  ;;  %v15925_v9 = vld [vmem:[%s18061_s30 + $0x2550] ss:$216 sps:$4 sm:$0xff]   ;;  %v15930_v10 = vld [vmem:[%s18061_s30 + $0xc04] ss:$216 sps:$4 sm:$0xff]  }
 0x2dd   : > { %12323 = vmatprep.subr.bf16.mxu1 %v15849_v11  ;;  %v15933_v11 = vld [vmem:[%s18061_s30 + $0x2704] ss:$216 sps:$4 sm:$0xff]  }
 0x2e3   : > { %11217 = vmatpush1.bf16.xpose.msra.mxu0 %v15844_v12  ;;  %v15928_v12 = vld [vmem:[%s18061_s30 + $0xc00] ss:$216 sps:$4 sm:$0xff]  }
 0x2e4   : > { %12324 = vmatpush1.bf16.xpose.msra.mxu1 %v15847_v14  ;;  %11218 = vmatprep.subr.bf16.mxu0 %v15852_v15  ;;  %v15931_v14 = vld [vmem:[%s18061_s30 + $0x2700] ss:$216 sps:$4 sm:$0xff]   ;;  %v15936_v15 = vld [vmem:[%s18061_s30 + $0xdb4] ss:$216 sps:$4 sm:$0xff]  }
 0x2e5   : > { %12325 = vmatprep.subr.bf16.mxu1 %v15855_v16  ;;  %v15939_v16 = vld [vmem:[%s18061_s30 + $0x28b4] ss:$216 sps:$4 sm:$0xff]  }
 0x2eb   : > { %11219 = vmatpush1.bf16.xpose.msra.mxu0 %v15850_v18  ;;  %v15934_v18 = vld [vmem:[%s18061_s30 + $0xdb0] ss:$216 sps:$4 sm:$0xff]  }
 0x2ec   : > { %12326 = vmatpush1.bf16.xpose.msra.mxu1 %v15853_v19  ;;  %11220 = vmatprep.subr.bf16.mxu0 %v15858_v20  ;;  %v15937_v19 = vld [vmem:[%s18061_s30 + $0x28b0] ss:$216 sps:$4 sm:$0xff]   ;;  %v15942_v20 = vld [vmem:[%s18061_s30 + $0xf64] ss:$216 sps:$4 sm:$0xff]  }
 0x2ed   : > { %12327 = vmatprep.subr.bf16.mxu1 %v15861_v21  ;;  %v15945_v21 = vld [vmem:[%s18061_s30 + $0x2a64] ss:$216 sps:$4 sm:$0xff]  }
 0x2f3   : > { %11221 = vmatpush1.bf16.xpose.msra.mxu0 %v15856_v22  ;;  %v15940_v22 = vld [vmem:[%s18061_s30 + $0xf60] ss:$216 sps:$4 sm:$0xff]  }
 0x2f4   : > { %12328 = vmatpush1.bf16.xpose.msra.mxu1 %v15859_v13  ;;  %11222 = vmatprep.subr.bf16.mxu0 %v15864_v23  ;;  %v15943_v13 = vld [vmem:[%s18061_s30 + $0x2a60] ss:$216 sps:$4 sm:$0xff]   ;;  %v15948_v23 = vld [vmem:[%s18061_s30 + $0x1114] ss:$216 sps:$4 sm:$0xff]  }
 0x2f5   : > { %12329 = vmatprep.subr.bf16.mxu1 %v15867_v24  ;;  %v15951_v24 = vld [vmem:[%s18061_s30 + $0x2c14] ss:$216 sps:$4 sm:$0xff]  }
 0x2fb   : > { %11223 = vmatpush1.bf16.xpose.msra.mxu0 %v15862_v25  ;;  %v15946_v25 = vld [vmem:[%s18061_s30 + $0x1110] ss:$216 sps:$4 sm:$0xff]  }
 0x2fc   : > { %12330 = vmatpush1.bf16.xpose.msra.mxu1 %v15865_v26  ;;  %11224 = vmatprep.subr.bf16.mxu0 %v15870_v17  ;;  %v15949_v26 = vld [vmem:[%s18061_s30 + $0x2c10] ss:$216 sps:$4 sm:$0xff]   ;;  %v15954_v17 = vld [vmem:[%s18061_s30 + $0x12c4] ss:$216 sps:$4 sm:$0xff]  }
 0x2fd   : > { %12331 = vmatprep.subr.bf16.mxu1 %v15873_v28  ;;  %v15957_v28 = vld [vmem:[%s18061_s30 + $0x2dc4] ss:$216 sps:$4 sm:$0xff]  }
 0x303   : > { %11225 = vmatpush1.bf16.xpose.msra.mxu0 %v15868_v30  ;;  %v15952_v30 = vld [vmem:[%s18061_s30 + $0x12c0] ss:$216 sps:$4 sm:$0xff]  }
 0x304   : > { %12332 = vmatpush1.bf16.xpose.msra.mxu1 %v15871_v31  ;;  %11226 = vmatprep.subr.bf16.mxu0 %v15876_v33  ;;  %v15955_v31 = vld [vmem:[%s18061_s30 + $0x2dc0] ss:$216 sps:$4 sm:$0xff]   ;;  %v15960_v33 = vld [vmem:[%s18061_s30 + $0x1474] ss:$216 sps:$4 sm:$0xff]  }
 0x305   : > { %12333 = vmatprep.subr.bf16.mxu1 %v15879_v5  ;;  %v15963_v5 = vld [vmem:[%s18061_s30 + $0x2f74] ss:$216 sps:$4 sm:$0xff]  }
 0x30b   : > { %11227 = vmatpush1.bf16.xpose.msra.mxu0 %v15874_v34  ;;  %v15958_v34 = vld [vmem:[%s18061_s30 + $0x1470] ss:$216 sps:$4 sm:$0xff]  }
 0x30c   : > { %12334 = vmatpush1.bf16.xpose.msra.mxu1 %v15877_v27  ;;  %11228 = vmatprep.subr.bf16.mxu0 %v15882_v35  ;;  %v15961_v27 = vld [vmem:[%s18061_s30 + $0x2f70] ss:$216 sps:$4 sm:$0xff]   ;;  %v15966_v35 = vld [vmem:[%s18061_s30 + $0x1624] ss:$216 sps:$4 sm:$0xff]  }
 0x30d   : > { %12335 = vmatprep.subr.bf16.mxu1 %v15885_v36  ;;  %v15969_v36 = vld [vmem:[%s18061_s30 + $0x3124] ss:$216 sps:$4 sm:$0xff]  }
 0x313   : > { %11229 = vmatpush1.bf16.xpose.msra.mxu0 %v15880_v29  ;;  %v15964_v29 = vld [vmem:[%s18061_s30 + $0x1620] ss:$216 sps:$4 sm:$0xff]  }
 0x314   : > { %12336 = vmatpush1.bf16.xpose.msra.mxu1 %v15883_v38  ;;  %11239 = vmatprep.subr.bf16.mxu0 %v15888_v40  ;;  %v15967_v38 = vld [vmem:[%s18061_s30 + $0x3120] ss:$216 sps:$4 sm:$0xff]   ;;  %v15972_v40 = vld [vmem:[%s18061_s30 + $0x17d4] ss:$216 sps:$4 sm:$0xff]  }
 0x315   : > { %12346 = vmatprep.subr.bf16.mxu1 %v15891_v41  ;;  %v15975_v41 = vld [vmem:[%s18061_s30 + $0x32d4] ss:$216 sps:$4 sm:$0xff]  }
 0x31a   : > { %11231 = vmatmul.mubr.bf16.vlgmr.msra.gmra.mrb[0].mxu0 %v2052_v44 }
 0x31b   : > { %12338 = vmatmul.mubr.bf16.vlgmr.msra.gmra.mrb[0].mxu1 %v2052_v44  ;;  %11240 = vmatpush1.bf16.xpose.msra.mxu0 %v15886_v45  ;;  %v15978_v44 = vld [vmem:[%s18061_s30 + $0x1984] ss:$216 sps:$4 sm:$0xff]   ;;  %v15976_v45 = vld [vmem:[%s18061_s30 + $0x1980] ss:$216 sps:$4 sm:$0xff]  }
 0x31c   : > { %12347 = vmatpush1.bf16.xpose.msra.mxu1 %v15889_v46  ;;  %11241 = vmatprep.subr.bf16.mxu0 %v15894_v47  ;;  %v15979_v46 = vld [vmem:[%s18061_s30 + $0x3480] ss:$216 sps:$4 sm:$0xff]   ;;  %v15985_v47 = vld [vmem:[%s18061_s30 + $0x3c] ss:$216 sps:$4 sm:$0xff]  }
 0x31d   : > { %12348 = vmatprep.subr.bf16.mxu1 %v15897_v48  ;;  %11271 = vmatprep.mubr.bf16.mxu0 %v18524_v49  ;;  %v15988_v48 = vld [vmem:[%s18061_s30 + $0x1b3c] ss:$216 sps:$4 sm:$0xff]  }
 0x31e   : > { %12378 = vmatprep.mubr.bf16.mxu1 %v18524_v49 }
 0x323   : > { %11242 = vmatpush1.bf16.xpose.msra.mxu0 %v15892_v39  ;;  %v18590_v39 = vrot.slane %v18513_v32, %v18056_v6  ;;  %v15989_v32 = vld [vmem:[%s18061_s30 + $0x1e8] ss:$216 sps:$4 sm:$0xff]  }
 0x324   : > { %12349 = vmatpush1.bf16.xpose.msra.mxu1 %v15895_v50  ;;  %11243 = vmatprep.subr.bf16.mxu0 %v15900_v51  ;;  %v15983_v50 = vld [vmem:[%s18061_s30 + $0x38] ss:$216 sps:$4 sm:$0xff]  }
 0x325   : > { %12350 = vmatprep.subr.bf16.mxu1 %v15903_v52  ;;  %v15986_v51 = vld [vmem:[%s18061_s30 + $0x1b38] ss:$216 sps:$4 sm:$0xff]   ;;  %v15991_v52 = vld [vmem:[%s18061_s30 + $0x1ec] ss:$216 sps:$4 sm:$0xff]  }
 0x32b   : > { %11244 = vmatpush1.bf16.xpose.msra.mxu0 %v15898_v53  ;;  %v15994_v53 = vld [vmem:[%s18061_s30 + $0x1cec] ss:$216 sps:$4 sm:$0xff]  }
 0x32c   : > { %12351 = vmatpush1.bf16.xpose.msra.mxu1 %v15901_v54  ;;  %11245 = vmatprep.subr.bf16.mxu0 %v15906_v55  ;;  %v2055_v54 = vcombine.high %v18524_v49, %v18524_v49  ;;  %v15992_v55 = vld [vmem:[%s18061_s30 + $0x1ce8] ss:$216 sps:$4 sm:$0xff]   ;;  %v16000_v49 = vld [vmem:[%s18061_s30 + $0x1e9c] ss:$216 sps:$4 sm:$0xff]  }
 0x32d   : > { %12352 = vmatprep.subr.bf16.mxu1 %v15909_v56  ;;  %v15997_v56 = vld [vmem:[%s18061_s30 + $0x39c] ss:$216 sps:$4 sm:$0xff]  }
 0x333   : > { %11246 = vmatpush1.bf16.xpose.msra.mxu0 %v15904_v57  ;;  %v15995_v57 = vld [vmem:[%s18061_s30 + $0x398] ss:$216 sps:$4 sm:$0xff]  }
 0x334   : > { %12353 = vmatpush1.bf16.xpose.msra.mxu1 %v15907_v58  ;;  %11247 = vmatprep.subr.bf16.mxu0 %v15912_v59  ;;  %v15998_v58 = vld [vmem:[%s18061_s30 + $0x1e98] ss:$216 sps:$4 sm:$0xff]   ;;  %v16003_v59 = vld [vmem:[%s18061_s30 + $0x54c] ss:$216 sps:$4 sm:$0xff]  }
 0x335   : > { %12354 = vmatprep.subr.bf16.mxu1 %v15915_v60  ;;  %v16006_v60 = vld [vmem:[%s18061_s30 + $0x204c] ss:$216 sps:$4 sm:$0xff]  }
 0x33b   : > { %11248 = vmatpush1.bf16.xpose.msra.mxu0 %v15910_v61  ;;  %v16001_v61 = vld [vmem:[%s18061_s30 + $0x548] ss:$216 sps:$4 sm:$0xff]  }
 0x33c   : > { %12355 = vmatpush1.bf16.xpose.msra.mxu1 %v15913_v62  ;;  %11249 = vmatprep.subr.bf16.mxu0 %v15918_v63  ;;  %v16004_v62 = vld [vmem:[%s18061_s30 + $0x2048] ss:$216 sps:$4 sm:$0xff]   ;;  %v16009_v63 = vld [vmem:[%s18061_s30 + $0x6fc] ss:$216 sps:$4 sm:$0xff]  }
 0x33d   : > { %12356 = vmatprep.subr.bf16.mxu1 %v15921_v0  ;;  %v16012_v0 = vld [vmem:[%s18061_s30 + $0x21fc] ss:$216 sps:$4 sm:$0xff]  }
 0x343   : > { %11250 = vmatpush1.bf16.xpose.msra.mxu0 %v15916_v1  ;;  %v16007_v1 = vld [vmem:[%s18061_s30 + $0x6f8] ss:$216 sps:$4 sm:$0xff]  }
 0x344   : > { %12357 = vmatpush1.bf16.xpose.msra.mxu1 %v15919_v2  ;;  %11251 = vmatprep.subr.bf16.mxu0 %v15924_v4  ;;  %v16010_v2 = vld [vmem:[%s18061_s30 + $0x21f8] ss:$216 sps:$4 sm:$0xff]   ;;  %v16015_v4 = vld [vmem:[%s18061_s30 + $0x8ac] ss:$216 sps:$4 sm:$0xff]  }
 0x345   : > { %12358 = vmatprep.subr.bf16.mxu1 %v15927_v7  ;;  %v16018_v7 = vld [vmem:[%s18061_s30 + $0x23ac] ss:$216 sps:$4 sm:$0xff]  }
 0x34b   : > { %11252 = vmatpush1.bf16.xpose.msra.mxu0 %v15922_v8  ;;  %v16013_v8 = vld [vmem:[%s18061_s30 + $0x8a8] ss:$216 sps:$4 sm:$0xff]  }
 0x34c   : > { %12359 = vmatpush1.bf16.xpose.msra.mxu1 %v15925_v9  ;;  %11253 = vmatprep.subr.bf16.mxu0 %v15930_v10  ;;  %v16016_v9 = vld [vmem:[%s18061_s30 + $0x23a8] ss:$216 sps:$4 sm:$0xff]   ;;  %v16021_v10 = vld [vmem:[%s18061_s30 + $0xa5c] ss:$216 sps:$4 sm:$0xff]  }
 0x34d   : > { %12360 = vmatprep.subr.bf16.mxu1 %v15933_v11  ;;  %v16024_v11 = vld [vmem:[%s18061_s30 + $0x255c] ss:$216 sps:$4 sm:$0xff]  }
 0x353   : > { %11254 = vmatpush1.bf16.xpose.msra.mxu0 %v15928_v12  ;;  %v16019_v12 = vld [vmem:[%s18061_s30 + $0xa58] ss:$216 sps:$4 sm:$0xff]  }
 0x354   : > { %12361 = vmatpush1.bf16.xpose.msra.mxu1 %v15931_v14  ;;  %11255 = vmatprep.subr.bf16.mxu0 %v15936_v15  ;;  %v16022_v14 = vld [vmem:[%s18061_s30 + $0x2558] ss:$216 sps:$4 sm:$0xff]   ;;  %v16027_v15 = vld [vmem:[%s18061_s30 + $0xc0c] ss:$216 sps:$4 sm:$0xff]  }
 0x355   : > { %12362 = vmatprep.subr.bf16.mxu1 %v15939_v16  ;;  %v16030_v16 = vld [vmem:[%s18061_s30 + $0x270c] ss:$216 sps:$4 sm:$0xff]  }
 0x35b   : > { %11256 = vmatpush1.bf16.xpose.msra.mxu0 %v15934_v18  ;;  %v16025_v18 = vld [vmem:[%s18061_s30 + $0xc08] ss:$216 sps:$4 sm:$0xff]  }
 0x35c   : > { %12363 = vmatpush1.bf16.xpose.msra.mxu1 %v15937_v19  ;;  %11257 = vmatprep.subr.bf16.mxu0 %v15942_v20  ;;  %v16028_v19 = vld [vmem:[%s18061_s30 + $0x2708] ss:$216 sps:$4 sm:$0xff]   ;;  %v16033_v20 = vld [vmem:[%s18061_s30 + $0xdbc] ss:$216 sps:$4 sm:$0xff]  }
 0x35d   : > { %12364 = vmatprep.subr.bf16.mxu1 %v15945_v21  ;;  %v16036_v21 = vld [vmem:[%s18061_s30 + $0x28bc] ss:$216 sps:$4 sm:$0xff]  }
 0x363   : > { %11258 = vmatpush1.bf16.xpose.msra.mxu0 %v15940_v22  ;;  %v16031_v22 = vld [vmem:[%s18061_s30 + $0xdb8] ss:$216 sps:$4 sm:$0xff]  }
 0x364   : > { %12365 = vmatpush1.bf16.xpose.msra.mxu1 %v15943_v13  ;;  %11259 = vmatprep.subr.bf16.mxu0 %v15948_v23  ;;  %v16034_v13 = vld [vmem:[%s18061_s30 + $0x28b8] ss:$216 sps:$4 sm:$0xff]   ;;  %v16039_v23 = vld [vmem:[%s18061_s30 + $0xf6c] ss:$216 sps:$4 sm:$0xff]  }
 0x365   : > { %12366 = vmatprep.subr.bf16.mxu1 %v15951_v24  ;;  %v16042_v24 = vld [vmem:[%s18061_s30 + $0x2a6c] ss:$216 sps:$4 sm:$0xff]  }
 0x36b   : > { %11260 = vmatpush1.bf16.xpose.msra.mxu0 %v15946_v25  ;;  %v16037_v25 = vld [vmem:[%s18061_s30 + $0xf68] ss:$216 sps:$4 sm:$0xff]  }
 0x36c   : > { %12367 = vmatpush1.bf16.xpose.msra.mxu1 %v15949_v26  ;;  %11261 = vmatprep.subr.bf16.mxu0 %v15954_v17  ;;  %v16040_v26 = vld [vmem:[%s18061_s30 + $0x2a68] ss:$216 sps:$4 sm:$0xff]   ;;  %v16045_v17 = vld [vmem:[%s18061_s30 + $0x111c] ss:$216 sps:$4 sm:$0xff]  }
 0x36d   : > { %12368 = vmatprep.subr.bf16.mxu1 %v15957_v28  ;;  %v16048_v28 = vld [vmem:[%s18061_s30 + $0x2c1c] ss:$216 sps:$4 sm:$0xff]  }
 0x373   : > { %11262 = vmatpush1.bf16.xpose.msra.mxu0 %v15952_v30  ;;  %v16043_v30 = vld [vmem:[%s18061_s30 + $0x1118] ss:$216 sps:$4 sm:$0xff]  }
 0x374   : > { %12369 = vmatpush1.bf16.xpose.msra.mxu1 %v15955_v31  ;;  %11263 = vmatprep.subr.bf16.mxu0 %v15960_v33  ;;  %v16046_v31 = vld [vmem:[%s18061_s30 + $0x2c18] ss:$216 sps:$4 sm:$0xff]   ;;  %v16051_v33 = vld [vmem:[%s18061_s30 + $0x12cc] ss:$216 sps:$4 sm:$0xff]  }
 0x375   : > { %12370 = vmatprep.subr.bf16.mxu1 %v15963_v5  ;;  %v16054_v5 = vld [vmem:[%s18061_s30 + $0x2dcc] ss:$216 sps:$4 sm:$0xff]  }
 0x37b   : > { %11264 = vmatpush1.bf16.xpose.msra.mxu0 %v15958_v34  ;;  %v16049_v34 = vld [vmem:[%s18061_s30 + $0x12c8] ss:$216 sps:$4 sm:$0xff]  }
 0x37c   : > { %12371 = vmatpush1.bf16.xpose.msra.mxu1 %v15961_v27  ;;  %11265 = vmatprep.subr.bf16.mxu0 %v15966_v35  ;;  %v16052_v27 = vld [vmem:[%s18061_s30 + $0x2dc8] ss:$216 sps:$4 sm:$0xff]   ;;  %v16057_v35 = vld [vmem:[%s18061_s30 + $0x147c] ss:$216 sps:$4 sm:$0xff]  }
 0x37d   : > { %12372 = vmatprep.subr.bf16.mxu1 %v15969_v36  ;;  %v16060_v36 = vld [vmem:[%s18061_s30 + $0x2f7c] ss:$216 sps:$4 sm:$0xff]  }
 0x383   : > { %11266 = vmatpush1.bf16.xpose.msra.mxu0 %v15964_v29  ;;  %v16055_v29 = vld [vmem:[%s18061_s30 + $0x1478] ss:$216 sps:$4 sm:$0xff]  }
 0x384   : > { %12373 = vmatpush1.bf16.xpose.msra.mxu1 %v15967_v38  ;;  %11267 = vmatprep.subr.bf16.mxu0 %v15972_v40  ;;  %v16058_v38 = vld [vmem:[%s18061_s30 + $0x2f78] ss:$216 sps:$4 sm:$0xff]   ;;  %v16063_v40 = vld [vmem:[%s18061_s30 + $0x162c] ss:$216 sps:$4 sm:$0xff]  }
 0x385   : > { %12374 = vmatprep.subr.bf16.mxu1 %v15975_v41  ;;  %v16066_v41 = vld [vmem:[%s18061_s30 + $0x312c] ss:$216 sps:$4 sm:$0xff]  }
 0x38b   : > { %11268 = vmatpush1.bf16.xpose.msra.mxu0 %v15970_v42  ;;  %v16061_v42 = vld [vmem:[%s18061_s30 + $0x1628] ss:$216 sps:$4 sm:$0xff]  }
 0x38c   : > { %12375 = vmatpush1.bf16.xpose.msra.mxu1 %v15973_v43  ;;  %11269 = vmatprep.subr.bf16.mxu0 %v15978_v44  ;;  %v16064_v43 = vld [vmem:[%s18061_s30 + $0x3128] ss:$216 sps:$4 sm:$0xff]   ;;  %v16069_v44 = vld [vmem:[%s18061_s30 + $0x17dc] ss:$216 sps:$4 sm:$0xff]  }
 0x38d   : > { %12376 = vmatprep.subr.bf16.mxu1 %v15981_v37  ;;  %v16072_v37 = vld [vmem:[%s18061_s30 + $0x32dc] ss:$216 sps:$4 sm:$0xff]  }
 0x393   : > { %11270 = vmatpush1.bf16.xpose.msra.mxu0 %v15976_v45  ;;  %v16067_v45 = vld [vmem:[%s18061_s30 + $0x17d8] ss:$216 sps:$4 sm:$0xff]  }
 0x394   : > { %12377 = vmatpush1.bf16.xpose.msra.mxu1 %v15979_v46  ;;  %11280 = vmatprep.subr.bf16.mxu0 %v15985_v47  ;;  %v16070_v46 = vld [vmem:[%s18061_s30 + $0x32d8] ss:$216 sps:$4 sm:$0xff]   ;;  %v16075_v47 = vld [vmem:[%s18061_s30 + $0x198c] ss:$216 sps:$4 sm:$0xff]  }
 0x395   : > { %12387 = vmatprep.subr.bf16.mxu1 %v15988_v48  ;;  %v16078_v48 = vld [vmem:[%s18061_s30 + $0x348c] ss:$216 sps:$4 sm:$0xff]  }
 0x39a   : > { %11272 = vmatmul.mubr.bf16.vlgmr.msra.gmra.mrb[0].mxu0 %v18590_v39 }
 0x39b   : > { %12379 = vmatmul.mubr.bf16.vlgmr.msra.gmra.mrb[0].mxu1 %v18590_v39  ;;  %11281 = vmatpush1.bf16.xpose.msra.mxu0 %v15983_v50  ;;  %v16073_v50 = vld [vmem:[%s18061_s30 + $0x1988] ss:$216 sps:$4 sm:$0xff]  }
 0x39c   : > { %12388 = vmatpush1.bf16.xpose.msra.mxu1 %v15986_v51  ;;  %11282 = vmatprep.subr.bf16.mxu0 %v15991_v52  ;;  %v16076_v51 = vld [vmem:[%s18061_s30 + $0x3488] ss:$216 sps:$4 sm:$0xff]   ;;  %v16081_v52 = vld [vmem:[%s18061_s30 + $0x44] ss:$216 sps:$4 sm:$0xff]  }
 0x39d   : > { %12389 = vmatprep.subr.bf16.mxu1 %v15994_v53  ;;  %11312 = vmatprep.mubr.bf16.mxu0 %v2055_v54  ;;  %v16084_v53 = vld [vmem:[%s18061_s30 + $0x1b44] ss:$216 sps:$4 sm:$0xff]  }
 0x39e   : > { %12419 = vmatprep.mubr.bf16.mxu1 %v2055_v54  ;;  %v18663_v54 = vld [vmem:[%s20164_s0 + $0x10] sm:$0xff] }
 0x3a3   : > { %11283 = vmatpush1.bf16.xpose.msra.mxu0 %v15989_v32  ;;  %v18667_v32 = vrot.slane %v18663_v54, %v18056_v6 }
 0x3a4   : > { %12390 = vmatpush1.bf16.xpose.msra.mxu1 %v15992_v55  ;;  %11284 = vmatprep.subr.bf16.mxu0 %v15997_v56  ;;  %v2053_v55 = vcombine.high %v18590_v39, %v18590_v39  ;;  %v16085_v39 = vld [vmem:[%s18061_s30 + $0x1f0] ss:$216 sps:$4 sm:$0xff]  }
 0x3a5   : > { %12391 = vmatprep.subr.bf16.mxu1 %v16000_v49  ;;  %v2071_v56 = vcombine.high %v18667_v32, %v18667_v32  ;;  %v16079_v49 = vld [vmem:[%s18061_s30 + $0x40] ss:$216 sps:$4 sm:$0xff]  }
 0x3ab   : > { %11285 = vmatpush1.bf16.xpose.msra.mxu0 %v15995_v57  ;;  %v16082_v57 = vld [vmem:[%s18061_s30 + $0x1b40] ss:$216 sps:$4 sm:$0xff]  }
 0x3ac   : > { %12392 = vmatpush1.bf16.xpose.msra.mxu1 %v15998_v58  ;;  %11286 = vmatprep.subr.bf16.mxu0 %v16003_v59  ;;  %v16087_v58 = vld [vmem:[%s18061_s30 + $0x1f4] ss:$216 sps:$4 sm:$0xff]  }
 0x3ad   : > { %12393 = vmatprep.subr.bf16.mxu1 %v16006_v60  ;;  %v16090_v59 = vld [vmem:[%s18061_s30 + $0x1cf4] ss:$216 sps:$4 sm:$0xff]   ;;  %v18678_v60 = vrot.slane %v2071_v56, %v18056_v6 }
 0x3ae   : > { %v16171_v56 = vld [vmem:[%s18061_s30 + $0x1994] ss:$216 sps:$4 sm:$0xff]  }
 0x3b3   : > { %11287 = vmatpush1.bf16.xpose.msra.mxu0 %v16001_v61  ;;  %v16088_v61 = vld [vmem:[%s18061_s30 + $0x1cf0] ss:$216 sps:$4 sm:$0xff]  }
 0x3b4   : > { %12394 = vmatpush1.bf16.xpose.msra.mxu1 %v16004_v62  ;;  %11288 = vmatprep.subr.bf16.mxu0 %v16009_v63  ;;  %v16093_v62 = vld [vmem:[%s18061_s30 + $0x3a4] ss:$216 sps:$4 sm:$0xff]  }
 0x3b5   : > { %12395 = vmatprep.subr.bf16.mxu1 %v16012_v0  ;;  %v16096_v63 = vld [vmem:[%s18061_s30 + $0x1ea4] ss:$216 sps:$4 sm:$0xff]   ;;  %v16091_v0 = vld [vmem:[%s18061_s30 + $0x3a0] ss:$216 sps:$4 sm:$0xff]  }
 0x3bb   : > { %11289 = vmatpush1.bf16.xpose.msra.mxu0 %v16007_v1  ;;  %v16094_v1 = vld [vmem:[%s18061_s30 + $0x1ea0] ss:$216 sps:$4 sm:$0xff]  }
 0x3bc   : > { %12396 = vmatpush1.bf16.xpose.msra.mxu1 %v16010_v2  ;;  %11290 = vmatprep.subr.bf16.mxu0 %v16015_v4  ;;  %v16099_v2 = vld [vmem:[%s18061_s30 + $0x554] ss:$216 sps:$4 sm:$0xff]  }
 0x3bd   : > { %12397 = vmatprep.subr.bf16.mxu1 %v16018_v7  ;;  %v16102_v4 = vld [vmem:[%s18061_s30 + $0x2054] ss:$216 sps:$4 sm:$0xff]   ;;  %v16097_v7 = vld [vmem:[%s18061_s30 + $0x550] ss:$216 sps:$4 sm:$0xff]  }
 0x3c3   : > { %11291 = vmatpush1.bf16.xpose.msra.mxu0 %v16013_v8  ;;  %v16100_v8 = vld [vmem:[%s18061_s30 + $0x2050] ss:$216 sps:$4 sm:$0xff]  }
 0x3c4   : > { %12398 = vmatpush1.bf16.xpose.msra.mxu1 %v16016_v9  ;;  %11292 = vmatprep.subr.bf16.mxu0 %v16021_v10  ;;  %v16105_v9 = vld [vmem:[%s18061_s30 + $0x704] ss:$216 sps:$4 sm:$0xff]  }
 0x3c5   : > { %12399 = vmatprep.subr.bf16.mxu1 %v16024_v11  ;;  %v16108_v10 = vld [vmem:[%s18061_s30 + $0x2204] ss:$216 sps:$4 sm:$0xff]   ;;  %v16103_v11 = vld [vmem:[%s18061_s30 + $0x700] ss:$216 sps:$4 sm:$0xff]  }
 0x3cb   : > { %11293 = vmatpush1.bf16.xpose.msra.mxu0 %v16019_v12  ;;  %v16106_v12 = vld [vmem:[%s18061_s30 + $0x2200] ss:$216 sps:$4 sm:$0xff]  }
 0x3cc   : > { %12400 = vmatpush1.bf16.xpose.msra.mxu1 %v16022_v14  ;;  %11294 = vmatprep.subr.bf16.mxu0 %v16027_v15  ;;  %v16111_v14 = vld [vmem:[%s18061_s30 + $0x8b4] ss:$216 sps:$4 sm:$0xff]  }
 0x3cd   : > { %12401 = vmatprep.subr.bf16.mxu1 %v16030_v16  ;;  %v16114_v15 = vld [vmem:[%s18061_s30 + $0x23b4] ss:$216 sps:$4 sm:$0xff]   ;;  %v16109_v16 = vld [vmem:[%s18061_s30 + $0x8b0] ss:$216 sps:$4 sm:$0xff]  }
 0x3d3   : > { %11295 = vmatpush1.bf16.xpose.msra.mxu0 %v16025_v18  ;;  %v16112_v18 = vld [vmem:[%s18061_s30 + $0x23b0] ss:$216 sps:$4 sm:$0xff]  }
 0x3d4   : > { %12402 = vmatpush1.bf16.xpose.msra.mxu1 %v16028_v19  ;;  %11296 = vmatprep.subr.bf16.mxu0 %v16033_v20  ;;  %v16117_v19 = vld [vmem:[%s18061_s30 + $0xa64] ss:$216 sps:$4 sm:$0xff]  }
 0x3d5   : > { %12403 = vmatprep.subr.bf16.mxu1 %v16036_v21  ;;  %v16120_v20 = vld [vmem:[%s18061_s30 + $0x2564] ss:$216 sps:$4 sm:$0xff]   ;;  %v16115_v21 = vld [vmem:[%s18061_s30 + $0xa60] ss:$216 sps:$4 sm:$0xff]  }
 0x3db   : > { %11297 = vmatpush1.bf16.xpose.msra.mxu0 %v16031_v22  ;;  %v16118_v22 = vld [vmem:[%s18061_s30 + $0x2560] ss:$216 sps:$4 sm:$0xff]  }
 0x3dc   : > { %12404 = vmatpush1.bf16.xpose.msra.mxu1 %v16034_v13  ;;  %11298 = vmatprep.subr.bf16.mxu0 %v16039_v23  ;;  %v16123_v13 = vld [vmem:[%s18061_s30 + $0xc14] ss:$216 sps:$4 sm:$0xff]  }
 0x3dd   : > { %12405 = vmatprep.subr.bf16.mxu1 %v16042_v24  ;;  %v16126_v23 = vld [vmem:[%s18061_s30 + $0x2714] ss:$216 sps:$4 sm:$0xff]   ;;  %v16121_v24 = vld [vmem:[%s18061_s30 + $0xc10] ss:$216 sps:$4 sm:$0xff]  }
 0x3e3   : > { %11299 = vmatpush1.bf16.xpose.msra.mxu0 %v16037_v25  ;;  %v16124_v25 = vld [vmem:[%s18061_s30 + $0x2710] ss:$216 sps:$4 sm:$0xff]  }
 0x3e4   : > { %12406 = vmatpush1.bf16.xpose.msra.mxu1 %v16040_v26  ;;  %11300 = vmatprep.subr.bf16.mxu0 %v16045_v17  ;;  %v16129_v26 = vld [vmem:[%s18061_s30 + $0xdc4] ss:$216 sps:$4 sm:$0xff]  }
 0x3e5   : > { %12407 = vmatprep.subr.bf16.mxu1 %v16048_v28  ;;  %v16132_v17 = vld [vmem:[%s18061_s30 + $0x28c4] ss:$216 sps:$4 sm:$0xff]   ;;  %v16127_v28 = vld [vmem:[%s18061_s30 + $0xdc0] ss:$216 sps:$4 sm:$0xff]  }
 0x3eb   : > { %11301 = vmatpush1.bf16.xpose.msra.mxu0 %v16043_v30  ;;  %v16130_v30 = vld [vmem:[%s18061_s30 + $0x28c0] ss:$216 sps:$4 sm:$0xff]  }
 0x3ec   : > { %12408 = vmatpush1.bf16.xpose.msra.mxu1 %v16046_v31  ;;  %11302 = vmatprep.subr.bf16.mxu0 %v16051_v33  ;;  %v16135_v31 = vld [vmem:[%s18061_s30 + $0xf74] ss:$216 sps:$4 sm:$0xff]  }
 0x3ed   : > { %12409 = vmatprep.subr.bf16.mxu1 %v16054_v5  ;;  %v16138_v33 = vld [vmem:[%s18061_s30 + $0x2a74] ss:$216 sps:$4 sm:$0xff]   ;;  %v16133_v5 = vld [vmem:[%s18061_s30 + $0xf70] ss:$216 sps:$4 sm:$0xff]  }
 0x3f3   : > { %11303 = vmatpush1.bf16.xpose.msra.mxu0 %v16049_v34  ;;  %v16136_v34 = vld [vmem:[%s18061_s30 + $0x2a70] ss:$216 sps:$4 sm:$0xff]  }
 0x3f4   : > { %12410 = vmatpush1.bf16.xpose.msra.mxu1 %v16052_v27  ;;  %11304 = vmatprep.subr.bf16.mxu0 %v16057_v35  ;;  %v16141_v27 = vld [vmem:[%s18061_s30 + $0x1124] ss:$216 sps:$4 sm:$0xff]  }
 0x3f5   : > { %12411 = vmatprep.subr.bf16.mxu1 %v16060_v36  ;;  %v16144_v35 = vld [vmem:[%s18061_s30 + $0x2c24] ss:$216 sps:$4 sm:$0xff]   ;;  %v16139_v36 = vld [vmem:[%s18061_s30 + $0x1120] ss:$216 sps:$4 sm:$0xff]  }
 0x3fb   : > { %11305 = vmatpush1.bf16.xpose.msra.mxu0 %v16055_v29  ;;  %v16142_v29 = vld [vmem:[%s18061_s30 + $0x2c20] ss:$216 sps:$4 sm:$0xff]  }
 0x3fc   : > { %12412 = vmatpush1.bf16.xpose.msra.mxu1 %v16058_v38  ;;  %11306 = vmatprep.subr.bf16.mxu0 %v16063_v40  ;;  %v16147_v38 = vld [vmem:[%s18061_s30 + $0x12d4] ss:$216 sps:$4 sm:$0xff]  }
 0x3fd   : > { %12413 = vmatprep.subr.bf16.mxu1 %v16066_v41  ;;  %v16150_v40 = vld [vmem:[%s18061_s30 + $0x2dd4] ss:$216 sps:$4 sm:$0xff]   ;;  %v16145_v41 = vld [vmem:[%s18061_s30 + $0x12d0] ss:$216 sps:$4 sm:$0xff]  }
 0x403   : > { %11307 = vmatpush1.bf16.xpose.msra.mxu0 %v16061_v42  ;;  %v16148_v42 = vld [vmem:[%s18061_s30 + $0x2dd0] ss:$216 sps:$4 sm:$0xff]  }
 0x404   : > { %12414 = vmatpush1.bf16.xpose.msra.mxu1 %v16064_v43  ;;  %11308 = vmatprep.subr.bf16.mxu0 %v16069_v44  ;;  %v16153_v43 = vld [vmem:[%s18061_s30 + $0x1484] ss:$216 sps:$4 sm:$0xff]  }
 0x405   : > { %12415 = vmatprep.subr.bf16.mxu1 %v16072_v37  ;;  %v16156_v44 = vld [vmem:[%s18061_s30 + $0x2f84] ss:$216 sps:$4 sm:$0xff]   ;;  %v16151_v37 = vld [vmem:[%s18061_s30 + $0x1480] ss:$216 sps:$4 sm:$0xff]  }
 0x40b   : > { %11309 = vmatpush1.bf16.xpose.msra.mxu0 %v16067_v45  ;;  %v16154_v45 = vld [vmem:[%s18061_s30 + $0x2f80] ss:$216 sps:$4 sm:$0xff]  }
 0x40c   : > { %12416 = vmatpush1.bf16.xpose.msra.mxu1 %v16070_v46  ;;  %11310 = vmatprep.subr.bf16.mxu0 %v16075_v47  ;;  %v16159_v46 = vld [vmem:[%s18061_s30 + $0x1634] ss:$216 sps:$4 sm:$0xff]  }
 0x40d   : > { %12417 = vmatprep.subr.bf16.mxu1 %v16078_v48  ;;  %v16162_v47 = vld [vmem:[%s18061_s30 + $0x3134] ss:$216 sps:$4 sm:$0xff]   ;;  %v16157_v48 = vld [vmem:[%s18061_s30 + $0x1630] ss:$216 sps:$4 sm:$0xff]  }
 0x413   : > { %11311 = vmatpush1.bf16.xpose.msra.mxu0 %v16073_v50  ;;  %v16160_v50 = vld [vmem:[%s18061_s30 + $0x3130] ss:$216 sps:$4 sm:$0xff]  }
 0x414   : > { %12418 = vmatpush1.bf16.xpose.msra.mxu1 %v16076_v51  ;;  %11321 = vmatprep.subr.bf16.mxu0 %v16081_v52  ;;  %v16165_v51 = vld [vmem:[%s18061_s30 + $0x17e4] ss:$216 sps:$4 sm:$0xff]  }
 0x415   : > { %12428 = vmatprep.subr.bf16.mxu1 %v16084_v53  ;;  %v16168_v52 = vld [vmem:[%s18061_s30 + $0x32e4] ss:$216 sps:$4 sm:$0xff]   ;;  %v16163_v53 = vld [vmem:[%s18061_s30 + $0x17e0] ss:$216 sps:$4 sm:$0xff]  }
 0x41a   : > { %11313 = vmatmul.mubr.bf16.vlgmr.msra.gmra.mrb[0].mxu0 %v2053_v55 }
 0x41b   : > { %12420 = vmatmul.mubr.bf16.vlgmr.msra.gmra.mrb[0].mxu1 %v2053_v55  ;;  %11322 = vmatpush1.bf16.xpose.msra.mxu0 %v16079_v49  ;;  %v16166_v55 = vld [vmem:[%s18061_s30 + $0x32e0] ss:$216 sps:$4 sm:$0xff]   ;;  %v16174_v49 = vld [vmem:[%s18061_s30 + $0x3494] ss:$216 sps:$4 sm:$0xff]  }
 0x41c   : > { %12429 = vmatpush1.bf16.xpose.msra.mxu1 %v16082_v57  ;;  %11323 = vmatprep.subr.bf16.mxu0 %v16087_v58  ;;  %v16169_v57 = vld [vmem:[%s18061_s30 + $0x1990] ss:$216 sps:$4 sm:$0xff]  }
 0x41d   : > { %12430 = vmatprep.subr.bf16.mxu1 %v16090_v59  ;;  %11353 = vmatprep.mubr.bf16.mxu0 %v18678_v60  ;;  %v16172_v58 = vld [vmem:[%s18061_s30 + $0x3490] ss:$216 sps:$4 sm:$0xff]   ;;  %v16177_v59 = vld [vmem:[%s18061_s30 + $0x4c] ss:$216 sps:$4 sm:$0xff]  }
 0x41e   : > { %12460 = vmatprep.mubr.bf16.mxu1 %v18678_v60 }
 0x423   : > { %11324 = vmatpush1.bf16.xpose.msra.mxu0 %v16085_v39  ;;  %v16180_v39 = vld [vmem:[%s18061_s30 + $0x1b4c] ss:$216 sps:$4 sm:$0xff]  }
 0x424   : > { %12431 = vmatpush1.bf16.xpose.msra.mxu1 %v16088_v61  ;;  %11325 = vmatprep.subr.bf16.mxu0 %v16093_v62  ;;  %v18744_v61 = vrot.slane %v18667_v32, %v18056_v6  ;;  %v16175_v62 = vld [vmem:[%s18061_s30 + $0x48] ss:$216 sps:$4 sm:$0xff]   ;;  %v16181_v32 = vld [vmem:[%s18061_s30 + $0x1f8] ss:$216 sps:$4 sm:$0xff]  }
 0x425   : > { %12432 = vmatprep.subr.bf16.mxu1 %v16096_v63  ;;  %v16178_v63 = vld [vmem:[%s18061_s30 + $0x1b48] ss:$216 sps:$4 sm:$0xff]  }
 0x42b   : > { %11326 = vmatpush1.bf16.xpose.msra.mxu0 %v16091_v0  ;;  %v16183_v0 = vld [vmem:[%s18061_s30 + $0x1fc] ss:$216 sps:$4 sm:$0xff]  }
 0x42c   : > { %12433 = vmatpush1.bf16.xpose.msra.mxu1 %v16094_v1  ;;  %11327 = vmatprep.subr.bf16.mxu0 %v16099_v2  ;;  %v16186_v1 = vld [vmem:[%s18061_s30 + $0x1cfc] ss:$216 sps:$4 sm:$0xff]   ;;  %v2103_v2 = vcombine.high %v18678_v60, %v18678_v60  ;;  %v16192_v60 = vld [vmem:[%s18061_s30 + $0x1eac] ss:$216 sps:$4 sm:$0xff]  }
 0x42d   : > { %12434 = vmatprep.subr.bf16.mxu1 %v16102_v4  ;;  %v16184_v4 = vld [vmem:[%s18061_s30 + $0x1cf8] ss:$216 sps:$4 sm:$0xff]  }
 0x433   : > { %11328 = vmatpush1.bf16.xpose.msra.mxu0 %v16097_v7  ;;  %v16189_v7 = vld [vmem:[%s18061_s30 + $0x3ac] ss:$216 sps:$4 sm:$0xff]  }
 0x434   : > { %12435 = vmatpush1.bf16.xpose.msra.mxu1 %v16100_v8  ;;  %11329 = vmatprep.subr.bf16.mxu0 %v16105_v9  ;;  %v16187_v8 = vld [vmem:[%s18061_s30 + $0x3a8] ss:$216 sps:$4 sm:$0xff]  }
 0x435   : > { %12436 = vmatprep.subr.bf16.mxu1 %v16108_v10  ;;  %v16190_v9 = vld [vmem:[%s18061_s30 + $0x1ea8] ss:$216 sps:$4 sm:$0xff]   ;;  %v16195_v10 = vld [vmem:[%s18061_s30 + $0x55c] ss:$216 sps:$4 sm:$0xff]  }
 0x43b   : > { %11330 = vmatpush1.bf16.xpose.msra.mxu0 %v16103_v11  ;;  %v16198_v11 = vld [vmem:[%s18061_s30 + $0x205c] ss:$216 sps:$4 sm:$0xff]  }
 0x43c   : > { %12437 = vmatpush1.bf16.xpose.msra.mxu1 %v16106_v12  ;;  %11331 = vmatprep.subr.bf16.mxu0 %v16111_v14  ;;  %v16193_v12 = vld [vmem:[%s18061_s30 + $0x558] ss:$216 sps:$4 sm:$0xff]  }
 0x43d   : > { %12438 = vmatprep.subr.bf16.mxu1 %v16114_v15  ;;  %v16196_v14 = vld [vmem:[%s18061_s30 + $0x2058] ss:$216 sps:$4 sm:$0xff]   ;;  %v16201_v15 = vld [vmem:[%s18061_s30 + $0x70c] ss:$216 sps:$4 sm:$0xff]  }
 0x443   : > { %11332 = vmatpush1.bf16.xpose.msra.mxu0 %v16109_v16  ;;  %v16204_v16 = vld [vmem:[%s18061_s30 + $0x220c] ss:$216 sps:$4 sm:$0xff]  }
 0x444   : > { %12439 = vmatpush1.bf16.xpose.msra.mxu1 %v16112_v18  ;;  %11333 = vmatprep.subr.bf16.mxu0 %v16117_v19  ;;  %v16199_v18 = vld [vmem:[%s18061_s30 + $0x708] ss:$216 sps:$4 sm:$0xff]  }
 0x445   : > { %12440 = vmatprep.subr.bf16.mxu1 %v16120_v20  ;;  %v16202_v19 = vld [vmem:[%s18061_s30 + $0x2208] ss:$216 sps:$4 sm:$0xff]   ;;  %v16207_v20 = vld [vmem:[%s18061_s30 + $0x8bc] ss:$216 sps:$4 sm:$0xff]  }
 0x44b   : > { %11334 = vmatpush1.bf16.xpose.msra.mxu0 %v16115_v21  ;;  %v16210_v21 = vld [vmem:[%s18061_s30 + $0x23bc] ss:$216 sps:$4 sm:$0xff]  }
 0x44c   : > { %12441 = vmatpush1.bf16.xpose.msra.mxu1 %v16118_v22  ;;  %11335 = vmatprep.subr.bf16.mxu0 %v16123_v13  ;;  %v16205_v22 = vld [vmem:[%s18061_s30 + $0x8b8] ss:$216 sps:$4 sm:$0xff]  }
 0x44d   : > { %12442 = vmatprep.subr.bf16.mxu1 %v16126_v23  ;;  %v16208_v13 = vld [vmem:[%s18061_s30 + $0x23b8] ss:$216 sps:$4 sm:$0xff]   ;;  %v16213_v23 = vld [vmem:[%s18061_s30 + $0xa6c] ss:$216 sps:$4 sm:$0xff]  }
 0x453   : > { %11336 = vmatpush1.bf16.xpose.msra.mxu0 %v16121_v24  ;;  %v16216_v24 = vld [vmem:[%s18061_s30 + $0x256c] ss:$216 sps:$4 sm:$0xff]  }
 0x454   : > { %12443 = vmatpush1.bf16.xpose.msra.mxu1 %v16124_v25  ;;  %11337 = vmatprep.subr.bf16.mxu0 %v16129_v26  ;;  %v16211_v25 = vld [vmem:[%s18061_s30 + $0xa68] ss:$216 sps:$4 sm:$0xff]  }
 0x455   : > { %12444 = vmatprep.subr.bf16.mxu1 %v16132_v17  ;;  %v16214_v26 = vld [vmem:[%s18061_s30 + $0x2568] ss:$216 sps:$4 sm:$0xff]   ;;  %v16219_v17 = vld [vmem:[%s18061_s30 + $0xc1c] ss:$216 sps:$4 sm:$0xff]  }
 0x45b   : > { %11338 = vmatpush1.bf16.xpose.msra.mxu0 %v16127_v28  ;;  %v16222_v28 = vld [vmem:[%s18061_s30 + $0x271c] ss:$216 sps:$4 sm:$0xff]  }
 0x45c   : > { %12445 = vmatpush1.bf16.xpose.msra.mxu1 %v16130_v30  ;;  %11339 = vmatprep.subr.bf16.mxu0 %v16135_v31  ;;  %v16217_v30 = vld [vmem:[%s18061_s30 + $0xc18] ss:$216 sps:$4 sm:$0xff]  }
 0x45d   : > { %12446 = vmatprep.subr.bf16.mxu1 %v16138_v33  ;;  %v16220_v31 = vld [vmem:[%s18061_s30 + $0x2718] ss:$216 sps:$4 sm:$0xff]   ;;  %v16225_v33 = vld [vmem:[%s18061_s30 + $0xdcc] ss:$216 sps:$4 sm:$0xff]  }
 0x463   : > { %11340 = vmatpush1.bf16.xpose.msra.mxu0 %v16133_v5  ;;  %v16228_v5 = vld [vmem:[%s18061_s30 + $0x28cc] ss:$216 sps:$4 sm:$0xff]  }
 0x464   : > { %12447 = vmatpush1.bf16.xpose.msra.mxu1 %v16136_v34  ;;  %11341 = vmatprep.subr.bf16.mxu0 %v16141_v27  ;;  %v16223_v34 = vld [vmem:[%s18061_s30 + $0xdc8] ss:$216 sps:$4 sm:$0xff]  }
 0x465   : > { %12448 = vmatprep.subr.bf16.mxu1 %v16144_v35  ;;  %v16226_v27 = vld [vmem:[%s18061_s30 + $0x28c8] ss:$216 sps:$4 sm:$0xff]   ;;  %v16231_v35 = vld [vmem:[%s18061_s30 + $0xf7c] ss:$216 sps:$4 sm:$0xff]  }
 0x46b   : > { %11342 = vmatpush1.bf16.xpose.msra.mxu0 %v16139_v36  ;;  %v16234_v36 = vld [vmem:[%s18061_s30 + $0x2a7c] ss:$216 sps:$4 sm:$0xff]  }
 0x46c   : > { %12449 = vmatpush1.bf16.xpose.msra.mxu1 %v16142_v29  ;;  %11343 = vmatprep.subr.bf16.mxu0 %v16147_v38  ;;  %v16229_v29 = vld [vmem:[%s18061_s30 + $0xf78] ss:$216 sps:$4 sm:$0xff]  }
 0x46d   : > { %12450 = vmatprep.subr.bf16.mxu1 %v16150_v40  ;;  %v16232_v38 = vld [vmem:[%s18061_s30 + $0x2a78] ss:$216 sps:$4 sm:$0xff]   ;;  %v16237_v40 = vld [vmem:[%s18061_s30 + $0x112c] ss:$216 sps:$4 sm:$0xff]  }
 0x473   : > { %11344 = vmatpush1.bf16.xpose.msra.mxu0 %v16145_v41  ;;  %v16240_v41 = vld [vmem:[%s18061_s30 + $0x2c2c] ss:$216 sps:$4 sm:$0xff]  }
 0x474   : > { %12451 = vmatpush1.bf16.xpose.msra.mxu1 %v16148_v42  ;;  %11345 = vmatprep.subr.bf16.mxu0 %v16153_v43  ;;  %v16235_v42 = vld [vmem:[%s18061_s30 + $0x1128] ss:$216 sps:$4 sm:$0xff]  }
 0x475   : > { %12452 = vmatprep.subr.bf16.mxu1 %v16156_v44  ;;  %v16238_v43 = vld [vmem:[%s18061_s30 + $0x2c28] ss:$216 sps:$4 sm:$0xff]   ;;  %v16243_v44 = vld [vmem:[%s18061_s30 + $0x12dc] ss:$216 sps:$4 sm:$0xff]  }
 0x47b   : > { %11346 = vmatpush1.bf16.xpose.msra.mxu0 %v16151_v37  ;;  %v16246_v37 = vld [vmem:[%s18061_s30 + $0x2ddc] ss:$216 sps:$4 sm:$0xff]  }
 0x47c   : > { %12453 = vmatpush1.bf16.xpose.msra.mxu1 %v16154_v45  ;;  %11347 = vmatprep.subr.bf16.mxu0 %v16159_v46  ;;  %v16241_v45 = vld [vmem:[%s18061_s30 + $0x12d8] ss:$216 sps:$4 sm:$0xff]  }
 0x47d   : > { %12454 = vmatprep.subr.bf16.mxu1 %v16162_v47  ;;  %v16244_v46 = vld [vmem:[%s18061_s30 + $0x2dd8] ss:$216 sps:$4 sm:$0xff]   ;;  %v16249_v47 = vld [vmem:[%s18061_s30 + $0x148c] ss:$216 sps:$4 sm:$0xff]  }
 0x483   : > { %11348 = vmatpush1.bf16.xpose.msra.mxu0 %v16157_v48  ;;  %v16252_v48 = vld [vmem:[%s18061_s30 + $0x2f8c] ss:$216 sps:$4 sm:$0xff]  }
 0x484   : > { %12455 = vmatpush1.bf16.xpose.msra.mxu1 %v16160_v50  ;;  %11349 = vmatprep.subr.bf16.mxu0 %v16165_v51  ;;  %v16247_v50 = vld [vmem:[%s18061_s30 + $0x1488] ss:$216 sps:$4 sm:$0xff]  }
 0x485   : > { %12456 = vmatprep.subr.bf16.mxu1 %v16168_v52  ;;  %v16250_v51 = vld [vmem:[%s18061_s30 + $0x2f88] ss:$216 sps:$4 sm:$0xff]   ;;  %v16255_v52 = vld [vmem:[%s18061_s30 + $0x163c] ss:$216 sps:$4 sm:$0xff]  }
 0x48b   : > { %11350 = vmatpush1.bf16.xpose.msra.mxu0 %v16163_v53  ;;  %v16258_v53 = vld [vmem:[%s18061_s30 + $0x313c] ss:$216 sps:$4 sm:$0xff]  }
 0x48c   : > { %12457 = vmatpush1.bf16.xpose.msra.mxu1 %v16166_v55  ;;  %11351 = vmatprep.subr.bf16.mxu0 %v16171_v56  ;;  %v16253_v55 = vld [vmem:[%s18061_s30 + $0x1638] ss:$216 sps:$4 sm:$0xff]  }
 0x48d   : > { %12458 = vmatprep.subr.bf16.mxu1 %v16174_v49  ;;  %v16256_v56 = vld [vmem:[%s18061_s30 + $0x3138] ss:$216 sps:$4 sm:$0xff]   ;;  %v16261_v49 = vld [vmem:[%s18061_s30 + $0x17ec] ss:$216 sps:$4 sm:$0xff]  }
 0x493   : > { %11352 = vmatpush1.bf16.xpose.msra.mxu0 %v16169_v57  ;;  %v16264_v57 = vld [vmem:[%s18061_s30 + $0x32ec] ss:$216 sps:$4 sm:$0xff]  }
 0x494   : > { %12459 = vmatpush1.bf16.xpose.msra.mxu1 %v16172_v58  ;;  %11362 = vmatprep.subr.bf16.mxu0 %v16177_v59  ;;  %v16259_v58 = vld [vmem:[%s18061_s30 + $0x17e8] ss:$216 sps:$4 sm:$0xff]  }
 0x495   : > { %12469 = vmatprep.subr.bf16.mxu1 %v16180_v39  ;;  %v16262_v59 = vld [vmem:[%s18061_s30 + $0x32e8] ss:$216 sps:$4 sm:$0xff]   ;;  %v16267_v39 = vld [vmem:[%s18061_s30 + $0x199c] ss:$216 sps:$4 sm:$0xff]  }
 0x49a   : > { %11354 = vmatmul.mubr.bf16.vlgmr.msra.gmra.mrb[0].mxu0 %v18744_v61 }
 0x49b   : > { %12461 = vmatmul.mubr.bf16.vlgmr.msra.gmra.mrb[0].mxu1 %v18744_v61  ;;  %11363 = vmatpush1.bf16.xpose.msra.mxu0 %v16175_v62  ;;  %v16270_v62 = vld [vmem:[%s18061_s30 + $0x349c] ss:$216 sps:$4 sm:$0xff]  }
 0x49c   : > { %12470 = vmatpush1.bf16.xpose.msra.mxu1 %v16178_v63  ;;  %11364 = vmatprep.subr.bf16.mxu0 %v16183_v0  ;;  %v16265_v63 = vld [vmem:[%s18061_s30 + $0x1998] ss:$216 sps:$4 sm:$0xff]  }
 0x49d   : > { %12471 = vmatprep.subr.bf16.mxu1 %v16186_v1  ;;  %11394 = vmatprep.mubr.bf16.mxu0 %v2103_v2  ;;  %v16268_v0 = vld [vmem:[%s18061_s30 + $0x3498] ss:$216 sps:$4 sm:$0xff]   ;;  %v16273_v1 = vld [vmem:[%s18061_s30 + $0x54] ss:$216 sps:$4 sm:$0xff]  }
 0x49e   : > { %12501 = vmatprep.mubr.bf16.mxu1 %v2103_v2  ;;  %v16276_v2 = vld [vmem:[%s18061_s30 + $0x1b54] ss:$216 sps:$4 sm:$0xff]  }
 0x4a3   : > { %11365 = vmatpush1.bf16.xpose.msra.mxu0 %v16181_v32  ;;  %v2056_v32 = vcombine.high %v18663_v54, %v18663_v54  ;;  %v16279_v54 = vld [vmem:[%s18061_s30 + $0x204] ss:$216 sps:$4 sm:$0xff]  }
 0x4a4   : > { %12472 = vmatpush1.bf16.xpose.msra.mxu1 %v16184_v4  ;;  %11366 = vmatprep.subr.bf16.mxu0 %v16189_v7  ;;  %v2101_v7 = vcombine.high %v18744_v61, %v18744_v61  ;;  %v16277_v61 = vld [vmem:[%s18061_s30 + $0x200] ss:$216 sps:$4 sm:$0xff]  }
 0x4a5   : > { %12473 = vmatprep.subr.bf16.mxu1 %v16192_v60  ;;  %v18817_v4 = vrot.slane %v2056_v32, %v18056_v6  ;;  %v16358_v32 = vld [vmem:[%s18061_s30 + $0x32f0] ss:$216 sps:$4 sm:$0xff]  }
 0x4a7   : > { %v2072_v60 = vcombine.high %v18817_v4, %v18817_v4 }
 0x4ab   : > { %11367 = vmatpush1.bf16.xpose.msra.mxu0 %v16187_v8  ;;  %v16271_v8 = vld [vmem:[%s18061_s30 + $0x50] ss:$216 sps:$4 sm:$0xff]  }
 0x4ac   : > { %12474 = vmatpush1.bf16.xpose.msra.mxu1 %v16190_v9  ;;  %11368 = vmatprep.subr.bf16.mxu0 %v16195_v10  ;;  %v16274_v9 = vld [vmem:[%s18061_s30 + $0x1b50] ss:$216 sps:$4 sm:$0xff]   ;;  %v16282_v10 = vld [vmem:[%s18061_s30 + $0x1d04] ss:$216 sps:$4 sm:$0xff]  }
 0x4ad   : > { %12475 = vmatprep.subr.bf16.mxu1 %v16198_v11  ;;  %v18828_v11 = vrot.slane %v2072_v60, %v18056_v6  ;;  %v16366_v60 = vld [vmem:[%s18061_s30 + $0x34a4] ss:$216 sps:$4 sm:$0xff]  }
 0x4b3   : > { %11369 = vmatpush1.bf16.xpose.msra.mxu0 %v16193_v12  ;;  %v16280_v12 = vld [vmem:[%s18061_s30 + $0x1d00] ss:$216 sps:$4 sm:$0xff]  }
 0x4b4   : > { %12476 = vmatpush1.bf16.xpose.msra.mxu1 %v16196_v14  ;;  %11370 = vmatprep.subr.bf16.mxu0 %v16201_v15  ;;  %v16285_v14 = vld [vmem:[%s18061_s30 + $0x3b4] ss:$216 sps:$4 sm:$0xff]  }
 0x4b5   : > { %12477 = vmatprep.subr.bf16.mxu1 %v16204_v16  ;;  %v16288_v15 = vld [vmem:[%s18061_s30 + $0x1eb4] ss:$216 sps:$4 sm:$0xff]   ;;  %v16283_v16 = vld [vmem:[%s18061_s30 + $0x3b0] ss:$216 sps:$4 sm:$0xff]  }
 0x4bb   : > { %11371 = vmatpush1.bf16.xpose.msra.mxu0 %v16199_v18  ;;  %v16286_v18 = vld [vmem:[%s18061_s30 + $0x1eb0] ss:$216 sps:$4 sm:$0xff]  }
 0x4bc   : > { %12478 = vmatpush1.bf16.xpose.msra.mxu1 %v16202_v19  ;;  %11372 = vmatprep.subr.bf16.mxu0 %v16207_v20  ;;  %v16291_v19 = vld [vmem:[%s18061_s30 + $0x564] ss:$216 sps:$4 sm:$0xff]  }
 0x4bd   : > { %12479 = vmatprep.subr.bf16.mxu1 %v16210_v21  ;;  %v16294_v20 = vld [vmem:[%s18061_s30 + $0x2064] ss:$216 sps:$4 sm:$0xff]   ;;  %v16289_v21 = vld [vmem:[%s18061_s30 + $0x560] ss:$216 sps:$4 sm:$0xff]  }
 0x4c3   : > { %11373 = vmatpush1.bf16.xpose.msra.mxu0 %v16205_v22  ;;  %v16292_v22 = vld [vmem:[%s18061_s30 + $0x2060] ss:$216 sps:$4 sm:$0xff]  }
 0x4c4   : > { %12480 = vmatpush1.bf16.xpose.msra.mxu1 %v16208_v13  ;;  %11374 = vmatprep.subr.bf16.mxu0 %v16213_v23  ;;  %v16297_v13 = vld [vmem:[%s18061_s30 + $0x714] ss:$216 sps:$4 sm:$0xff]  }
 0x4c5   : > { %12481 = vmatprep.subr.bf16.mxu1 %v16216_v24  ;;  %v16300_v23 = vld [vmem:[%s18061_s30 + $0x2214] ss:$216 sps:$4 sm:$0xff]   ;;  %v16295_v24 = vld [vmem:[%s18061_s30 + $0x710] ss:$216 sps:$4 sm:$0xff]  }
 0x4cb   : > { %11375 = vmatpush1.bf16.xpose.msra.mxu0 %v16211_v25  ;;  %v16298_v25 = vld [vmem:[%s18061_s30 + $0x2210] ss:$216 sps:$4 sm:$0xff]  }
 0x4cc   : > { %12482 = vmatpush1.bf16.xpose.msra.mxu1 %v16214_v26  ;;  %11376 = vmatprep.subr.bf16.mxu0 %v16219_v17  ;;  %v16303_v26 = vld [vmem:[%s18061_s30 + $0x8c4] ss:$216 sps:$4 sm:$0xff]  }
 0x4cd   : > { %12483 = vmatprep.subr.bf16.mxu1 %v16222_v28  ;;  %v16306_v17 = vld [vmem:[%s18061_s30 + $0x23c4] ss:$216 sps:$4 sm:$0xff]   ;;  %v16301_v28 = vld [vmem:[%s18061_s30 + $0x8c0] ss:$216 sps:$4 sm:$0xff]  }
 0x4d3   : > { %11377 = vmatpush1.bf16.xpose.msra.mxu0 %v16217_v30  ;;  %v16304_v30 = vld [vmem:[%s18061_s30 + $0x23c0] ss:$216 sps:$4 sm:$0xff]  }
 0x4d4   : > { %12484 = vmatpush1.bf16.xpose.msra.mxu1 %v16220_v31  ;;  %11378 = vmatprep.subr.bf16.mxu0 %v16225_v33  ;;  %v16309_v31 = vld [vmem:[%s18061_s30 + $0xa74] ss:$216 sps:$4 sm:$0xff]  }
 0x4d5   : > { %12485 = vmatprep.subr.bf16.mxu1 %v16228_v5  ;;  %v16312_v33 = vld [vmem:[%s18061_s30 + $0x2574] ss:$216 sps:$4 sm:$0xff]   ;;  %v16307_v5 = vld [vmem:[%s18061_s30 + $0xa70] ss:$216 sps:$4 sm:$0xff]  }
 0x4db   : > { %11379 = vmatpush1.bf16.xpose.msra.mxu0 %v16223_v34  ;;  %v16310_v34 = vld [vmem:[%s18061_s30 + $0x2570] ss:$216 sps:$4 sm:$0xff]  }
 0x4dc   : > { %12486 = vmatpush1.bf16.xpose.msra.mxu1 %v16226_v27  ;;  %11380 = vmatprep.subr.bf16.mxu0 %v16231_v35  ;;  %v16315_v27 = vld [vmem:[%s18061_s30 + $0xc24] ss:$216 sps:$4 sm:$0xff]  }
 0x4dd   : > { %12487 = vmatprep.subr.bf16.mxu1 %v16234_v36  ;;  %v16318_v35 = vld [vmem:[%s18061_s30 + $0x2724] ss:$216 sps:$4 sm:$0xff]   ;;  %v16313_v36 = vld [vmem:[%s18061_s30 + $0xc20] ss:$216 sps:$4 sm:$0xff]  }
 0x4e3   : > { %11381 = vmatpush1.bf16.xpose.msra.mxu0 %v16229_v29  ;;  %v16316_v29 = vld [vmem:[%s18061_s30 + $0x2720] ss:$216 sps:$4 sm:$0xff]  }
 0x4e4   : > { %12488 = vmatpush1.bf16.xpose.msra.mxu1 %v16232_v38  ;;  %11382 = vmatprep.subr.bf16.mxu0 %v16237_v40  ;;  %v16321_v38 = vld [vmem:[%s18061_s30 + $0xdd4] ss:$216 sps:$4 sm:$0xff]  }
 0x4e5   : > { %12489 = vmatprep.subr.bf16.mxu1 %v16240_v41  ;;  %v16324_v40 = vld [vmem:[%s18061_s30 + $0x28d4] ss:$216 sps:$4 sm:$0xff]   ;;  %v16319_v41 = vld [vmem:[%s18061_s30 + $0xdd0] ss:$216 sps:$4 sm:$0xff]  }
 0x4eb   : > { %11383 = vmatpush1.bf16.xpose.msra.mxu0 %v16235_v42  ;;  %v16322_v42 = vld [vmem:[%s18061_s30 + $0x28d0] ss:$216 sps:$4 sm:$0xff]  }
 0x4ec   : > { %12490 = vmatpush1.bf16.xpose.msra.mxu1 %v16238_v43  ;;  %11384 = vmatprep.subr.bf16.mxu0 %v16243_v44  ;;  %v16327_v43 = vld [vmem:[%s18061_s30 + $0xf84] ss:$216 sps:$4 sm:$0xff]  }
 0x4ed   : > { %12491 = vmatprep.subr.bf16.mxu1 %v16246_v37  ;;  %v16330_v44 = vld [vmem:[%s18061_s30 + $0x2a84] ss:$216 sps:$4 sm:$0xff]   ;;  %v16325_v37 = vld [vmem:[%s18061_s30 + $0xf80] ss:$216 sps:$4 sm:$0xff]  }
 0x4f3   : > { %11385 = vmatpush1.bf16.xpose.msra.mxu0 %v16241_v45  ;;  %v16328_v45 = vld [vmem:[%s18061_s30 + $0x2a80] ss:$216 sps:$4 sm:$0xff]  }
 0x4f4   : > { %12492 = vmatpush1.bf16.xpose.msra.mxu1 %v16244_v46  ;;  %11386 = vmatprep.subr.bf16.mxu0 %v16249_v47  ;;  %v16333_v46 = vld [vmem:[%s18061_s30 + $0x1134] ss:$216 sps:$4 sm:$0xff]  }
 0x4f5   : > { %12493 = vmatprep.subr.bf16.mxu1 %v16252_v48  ;;  %v16336_v47 = vld [vmem:[%s18061_s30 + $0x2c34] ss:$216 sps:$4 sm:$0xff]   ;;  %v16331_v48 = vld [vmem:[%s18061_s30 + $0x1130] ss:$216 sps:$4 sm:$0xff]  }
 0x4fb   : > { %11387 = vmatpush1.bf16.xpose.msra.mxu0 %v16247_v50  ;;  %v16334_v50 = vld [vmem:[%s18061_s30 + $0x2c30] ss:$216 sps:$4 sm:$0xff]  }
 0x4fc   : > { %12494 = vmatpush1.bf16.xpose.msra.mxu1 %v16250_v51  ;;  %11388 = vmatprep.subr.bf16.mxu0 %v16255_v52  ;;  %v16339_v51 = vld [vmem:[%s18061_s30 + $0x12e4] ss:$216 sps:$4 sm:$0xff]  }
 0x4fd   : > { %12495 = vmatprep.subr.bf16.mxu1 %v16258_v53  ;;  %v16342_v52 = vld [vmem:[%s18061_s30 + $0x2de4] ss:$216 sps:$4 sm:$0xff]   ;;  %v16337_v53 = vld [vmem:[%s18061_s30 + $0x12e0] ss:$216 sps:$4 sm:$0xff]  }
 0x503   : > { %11389 = vmatpush1.bf16.xpose.msra.mxu0 %v16253_v55  ;;  %v16340_v55 = vld [vmem:[%s18061_s30 + $0x2de0] ss:$216 sps:$4 sm:$0xff]  }
 0x504   : > { %12496 = vmatpush1.bf16.xpose.msra.mxu1 %v16256_v56  ;;  %11390 = vmatprep.subr.bf16.mxu0 %v16261_v49  ;;  %v16345_v56 = vld [vmem:[%s18061_s30 + $0x1494] ss:$216 sps:$4 sm:$0xff]  }
 0x505   : > { %12497 = vmatprep.subr.bf16.mxu1 %v16264_v57  ;;  %v16348_v49 = vld [vmem:[%s18061_s30 + $0x2f94] ss:$216 sps:$4 sm:$0xff]   ;;  %v16343_v57 = vld [vmem:[%s18061_s30 + $0x1490] ss:$216 sps:$4 sm:$0xff]  }
 0x50b   : > { %11391 = vmatpush1.bf16.xpose.msra.mxu0 %v16259_v58  ;;  %v16346_v58 = vld [vmem:[%s18061_s30 + $0x2f90] ss:$216 sps:$4 sm:$0xff]  }
 0x50c   : > { %12498 = vmatpush1.bf16.xpose.msra.mxu1 %v16262_v59  ;;  %11392 = vmatprep.subr.bf16.mxu0 %v16267_v39  ;;  %v16351_v59 = vld [vmem:[%s18061_s30 + $0x1644] ss:$216 sps:$4 sm:$0xff]  }
 0x50d   : > { %12499 = vmatprep.subr.bf16.mxu1 %v16270_v62  ;;  %v16354_v39 = vld [vmem:[%s18061_s30 + $0x3144] ss:$216 sps:$4 sm:$0xff]   ;;  %v16349_v62 = vld [vmem:[%s18061_s30 + $0x1640] ss:$216 sps:$4 sm:$0xff]  }
 0x513   : > { %11393 = vmatpush1.bf16.xpose.msra.mxu0 %v16265_v63  ;;  %v16352_v63 = vld [vmem:[%s18061_s30 + $0x3140] ss:$216 sps:$4 sm:$0xff]  }
 0x514   : > { %12500 = vmatpush1.bf16.xpose.msra.mxu1 %v16268_v0  ;;  %11403 = vmatprep.subr.bf16.mxu0 %v16273_v1  ;;  %v16357_v0 = vld [vmem:[%s18061_s30 + $0x17f4] ss:$216 sps:$4 sm:$0xff]  }
 0x515   : > { %12510 = vmatprep.subr.bf16.mxu1 %v16276_v2  ;;  %v16360_v1 = vld [vmem:[%s18061_s30 + $0x32f4] ss:$216 sps:$4 sm:$0xff]   ;;  %v16355_v2 = vld [vmem:[%s18061_s30 + $0x17f0] ss:$216 sps:$4 sm:$0xff]  }
 0x51a   : > { %11395 = vmatmul.mubr.bf16.vlgmr.msra.gmra.mrb[0].mxu0 %v2101_v7 }
 0x51b   : > { %12502 = vmatmul.mubr.bf16.vlgmr.msra.gmra.mrb[0].mxu1 %v2101_v7  ;;  %11404 = vmatpush1.bf16.xpose.msra.mxu0 %v16271_v8  ;;  %v16363_v7 = vld [vmem:[%s18061_s30 + $0x19a4] ss:$216 sps:$4 sm:$0xff]   ;;  %v16361_v8 = vld [vmem:[%s18061_s30 + $0x19a0] ss:$216 sps:$4 sm:$0xff]  }
 0x51c   : > { %12511 = vmatpush1.bf16.xpose.msra.mxu1 %v16274_v9  ;;  %11405 = vmatprep.subr.bf16.mxu0 %v16279_v54  ;;  %v16364_v9 = vld [vmem:[%s18061_s30 + $0x34a0] ss:$216 sps:$4 sm:$0xff]   ;;  %v16370_v54 = vld [vmem:[%s18061_s30 + $0x5c] ss:$216 sps:$4 sm:$0xff]  }
 0x51d   : > { %12512 = vmatprep.subr.bf16.mxu1 %v16282_v10  ;;  %11435 = vmatprep.mubr.bf16.mxu0 %v18828_v11  ;;  %v16373_v10 = vld [vmem:[%s18061_s30 + $0x1b5c] ss:$216 sps:$4 sm:$0xff]  }
 0x51e   : > { %12542 = vmatprep.mubr.bf16.mxu1 %v18828_v11 }
 0x523   : > { %11406 = vmatpush1.bf16.xpose.msra.mxu0 %v16277_v61  ;;  %v18894_v61 = vrot.slane %v18817_v4, %v18056_v6  ;;  %v16374_v4 = vld [vmem:[%s18061_s30 + $0x208] ss:$216 sps:$4 sm:$0xff]  }
 0x524   : > { %12513 = vmatpush1.bf16.xpose.msra.mxu1 %v16280_v12  ;;  %11407 = vmatprep.subr.bf16.mxu0 %v16285_v14  ;;  %v16368_v12 = vld [vmem:[%s18061_s30 + $0x58] ss:$216 sps:$4 sm:$0xff]  }
 0x525   : > { %12514 = vmatprep.subr.bf16.mxu1 %v16288_v15  ;;  %v16371_v14 = vld [vmem:[%s18061_s30 + $0x1b58] ss:$216 sps:$4 sm:$0xff]   ;;  %v16376_v15 = vld [vmem:[%s18061_s30 + $0x20c] ss:$216 sps:$4 sm:$0xff]  }
 0x52b   : > { %11408 = vmatpush1.bf16.xpose.msra.mxu0 %v16283_v16  ;;  %v16379_v16 = vld [vmem:[%s18061_s30 + $0x1d0c] ss:$216 sps:$4 sm:$0xff]  }
 0x52c   : > { %12515 = vmatpush1.bf16.xpose.msra.mxu1 %v16286_v18  ;;  %11409 = vmatprep.subr.bf16.mxu0 %v16291_v19  ;;  %v2104_v18 = vcombine.high %v18828_v11, %v18828_v11  ;;  %v16377_v19 = vld [vmem:[%s18061_s30 + $0x1d08] ss:$216 sps:$4 sm:$0xff]   ;;  %v16385_v11 = vld [vmem:[%s18061_s30 + $0x1ebc] ss:$216 sps:$4 sm:$0xff]  }
 0x52d   : > { %12516 = vmatprep.subr.bf16.mxu1 %v16294_v20  ;;  %v16382_v20 = vld [vmem:[%s18061_s30 + $0x3bc] ss:$216 sps:$4 sm:$0xff]  }
 0x533   : > { %11410 = vmatpush1.bf16.xpose.msra.mxu0 %v16289_v21  ;;  %v16380_v21 = vld [vmem:[%s18061_s30 + $0x3b8] ss:$216 sps:$4 sm:$0xff]  }
 0x534   : > { %12517 = vmatpush1.bf16.xpose.msra.mxu1 %v16292_v22  ;;  %11411 = vmatprep.subr.bf16.mxu0 %v16297_v13  ;;  %v16383_v22 = vld [vmem:[%s18061_s30 + $0x1eb8] ss:$216 sps:$4 sm:$0xff]   ;;  %v16388_v13 = vld [vmem:[%s18061_s30 + $0x56c] ss:$216 sps:$4 sm:$0xff]  }
 0x535   : > { %12518 = vmatprep.subr.bf16.mxu1 %v16300_v23  ;;  %v16391_v23 = vld [vmem:[%s18061_s30 + $0x206c] ss:$216 sps:$4 sm:$0xff]  }
 0x53b   : > { %11412 = vmatpush1.bf16.xpose.msra.mxu0 %v16295_v24  ;;  %v16386_v24 = vld [vmem:[%s18061_s30 + $0x568] ss:$216 sps:$4 sm:$0xff]  }
 0x53c   : > { %12519 = vmatpush1.bf16.xpose.msra.mxu1 %v16298_v25  ;;  %11413 = vmatprep.subr.bf16.mxu0 %v16303_v26  ;;  %v16389_v25 = vld [vmem:[%s18061_s30 + $0x2068] ss:$216 sps:$4 sm:$0xff]   ;;  %v16394_v26 = vld [vmem:[%s18061_s30 + $0x71c] ss:$216 sps:$4 sm:$0xff]  }
 0x53d   : > { %12520 = vmatprep.subr.bf16.mxu1 %v16306_v17  ;;  %v16397_v17 = vld [vmem:[%s18061_s30 + $0x221c] ss:$216 sps:$4 sm:$0xff]  }
 0x543   : > { %11414 = vmatpush1.bf16.xpose.msra.mxu0 %v16301_v28  ;;  %v16392_v28 = vld [vmem:[%s18061_s30 + $0x718] ss:$216 sps:$4 sm:$0xff]  }
 0x544   : > { %12521 = vmatpush1.bf16.xpose.msra.mxu1 %v16304_v30  ;;  %11415 = vmatprep.subr.bf16.mxu0 %v16309_v31  ;;  %v16395_v30 = vld [vmem:[%s18061_s30 + $0x2218] ss:$216 sps:$4 sm:$0xff]   ;;  %v16400_v31 = vld [vmem:[%s18061_s30 + $0x8cc] ss:$216 sps:$4 sm:$0xff]  }
 0x545   : > { %12522 = vmatprep.subr.bf16.mxu1 %v16312_v33  ;;  %v16403_v33 = vld [vmem:[%s18061_s30 + $0x23cc] ss:$216 sps:$4 sm:$0xff]  }
 0x54b   : > { %11416 = vmatpush1.bf16.xpose.msra.mxu0 %v16307_v5  ;;  %v16398_v5 = vld [vmem:[%s18061_s30 + $0x8c8] ss:$216 sps:$4 sm:$0xff]  }
 0x54c   : > { %12523 = vmatpush1.bf16.xpose.msra.mxu1 %v16310_v34  ;;  %11417 = vmatprep.subr.bf16.mxu0 %v16315_v27  ;;  %v16401_v34 = vld [vmem:[%s18061_s30 + $0x23c8] ss:$216 sps:$4 sm:$0xff]   ;;  %v16406_v27 = vld [vmem:[%s18061_s30 + $0xa7c] ss:$216 sps:$4 sm:$0xff]  }
 0x54d   : > { %12524 = vmatprep.subr.bf16.mxu1 %v16318_v35  ;;  %v16409_v35 = vld [vmem:[%s18061_s30 + $0x257c] ss:$216 sps:$4 sm:$0xff]  }
 0x553   : > { %11418 = vmatpush1.bf16.xpose.msra.mxu0 %v16313_v36  ;;  %v16404_v36 = vld [vmem:[%s18061_s30 + $0xa78] ss:$216 sps:$4 sm:$0xff]  }
 0x554   : > { %12525 = vmatpush1.bf16.xpose.msra.mxu1 %v16316_v29  ;;  %11419 = vmatprep.subr.bf16.mxu0 %v16321_v38  ;;  %v16407_v29 = vld [vmem:[%s18061_s30 + $0x2578] ss:$216 sps:$4 sm:$0xff]   ;;  %v16412_v38 = vld [vmem:[%s18061_s30 + $0xc2c] ss:$216 sps:$4 sm:$0xff]  }
 0x555   : > { %12526 = vmatprep.subr.bf16.mxu1 %v16324_v40  ;;  %v16415_v40 = vld [vmem:[%s18061_s30 + $0x272c] ss:$216 sps:$4 sm:$0xff]  }
 0x55b   : > { %11420 = vmatpush1.bf16.xpose.msra.mxu0 %v16319_v41  ;;  %v16410_v41 = vld [vmem:[%s18061_s30 + $0xc28] ss:$216 sps:$4 sm:$0xff]  }
 0x55c   : > { %12527 = vmatpush1.bf16.xpose.msra.mxu1 %v16322_v42  ;;  %11421 = vmatprep.subr.bf16.mxu0 %v16327_v43  ;;  %v16413_v42 = vld [vmem:[%s18061_s30 + $0x2728] ss:$216 sps:$4 sm:$0xff]   ;;  %v16418_v43 = vld [vmem:[%s18061_s30 + $0xddc] ss:$216 sps:$4 sm:$0xff]  }
 0x55d   : > { %12528 = vmatprep.subr.bf16.mxu1 %v16330_v44  ;;  %v16421_v44 = vld [vmem:[%s18061_s30 + $0x28dc] ss:$216 sps:$4 sm:$0xff]  }
 0x563   : > { %11422 = vmatpush1.bf16.xpose.msra.mxu0 %v16325_v37  ;;  %v16416_v37 = vld [vmem:[%s18061_s30 + $0xdd8] ss:$216 sps:$4 sm:$0xff]  }
 0x564   : > { %12529 = vmatpush1.bf16.xpose.msra.mxu1 %v16328_v45  ;;  %11423 = vmatprep.subr.bf16.mxu0 %v16333_v46  ;;  %v16419_v45 = vld [vmem:[%s18061_s30 + $0x28d8] ss:$216 sps:$4 sm:$0xff]   ;;  %v16424_v46 = vld [vmem:[%s18061_s30 + $0xf8c] ss:$216 sps:$4 sm:$0xff]  }
 0x565   : > { %12530 = vmatprep.subr.bf16.mxu1 %v16336_v47  ;;  %v16427_v47 = vld [vmem:[%s18061_s30 + $0x2a8c] ss:$216 sps:$4 sm:$0xff]  }
 0x56b   : > { %11424 = vmatpush1.bf16.xpose.msra.mxu0 %v16331_v48  ;;  %v16422_v48 = vld [vmem:[%s18061_s30 + $0xf88] ss:$216 sps:$4 sm:$0xff]  }
 0x56c   : > { %12531 = vmatpush1.bf16.xpose.msra.mxu1 %v16334_v50  ;;  %11425 = vmatprep.subr.bf16.mxu0 %v16339_v51  ;;  %v16425_v50 = vld [vmem:[%s18061_s30 + $0x2a88] ss:$216 sps:$4 sm:$0xff]   ;;  %v16430_v51 = vld [vmem:[%s18061_s30 + $0x113c] ss:$216 sps:$4 sm:$0xff]  }
 0x56d   : > { %12532 = vmatprep.subr.bf16.mxu1 %v16342_v52  ;;  %v16433_v52 = vld [vmem:[%s18061_s30 + $0x2c3c] ss:$216 sps:$4 sm:$0xff]  }
 0x573   : > { %11426 = vmatpush1.bf16.xpose.msra.mxu0 %v16337_v53  ;;  %v16428_v53 = vld [vmem:[%s18061_s30 + $0x1138] ss:$216 sps:$4 sm:$0xff]  }
 0x574   : > { %12533 = vmatpush1.bf16.xpose.msra.mxu1 %v16340_v55  ;;  %11427 = vmatprep.subr.bf16.mxu0 %v16345_v56  ;;  %v16431_v55 = vld [vmem:[%s18061_s30 + $0x2c38] ss:$216 sps:$4 sm:$0xff]   ;;  %v16436_v56 = vld [vmem:[%s18061_s30 + $0x12ec] ss:$216 sps:$4 sm:$0xff]  }
 0x575   : > { %12534 = vmatprep.subr.bf16.mxu1 %v16348_v49  ;;  %v16439_v49 = vld [vmem:[%s18061_s30 + $0x2dec] ss:$216 sps:$4 sm:$0xff]  }
 0x57b   : > { %11428 = vmatpush1.bf16.xpose.msra.mxu0 %v16343_v57  ;;  %v16434_v57 = vld [vmem:[%s18061_s30 + $0x12e8] ss:$216 sps:$4 sm:$0xff]  }
 0x57c   : > { %12535 = vmatpush1.bf16.xpose.msra.mxu1 %v16346_v58  ;;  %11429 = vmatprep.subr.bf16.mxu0 %v16351_v59  ;;  %v16437_v58 = vld [vmem:[%s18061_s30 + $0x2de8] ss:$216 sps:$4 sm:$0xff]   ;;  %v16442_v59 = vld [vmem:[%s18061_s30 + $0x149c] ss:$216 sps:$4 sm:$0xff]  }
 0x57d   : > { %12536 = vmatprep.subr.bf16.mxu1 %v16354_v39  ;;  %v16445_v39 = vld [vmem:[%s18061_s30 + $0x2f9c] ss:$216 sps:$4 sm:$0xff]  }
 0x583   : > { %11430 = vmatpush1.bf16.xpose.msra.mxu0 %v16349_v62  ;;  %v16440_v62 = vld [vmem:[%s18061_s30 + $0x1498] ss:$216 sps:$4 sm:$0xff]  }
 0x584   : > { %12537 = vmatpush1.bf16.xpose.msra.mxu1 %v16352_v63  ;;  %11431 = vmatprep.subr.bf16.mxu0 %v16357_v0  ;;  %v16443_v63 = vld [vmem:[%s18061_s30 + $0x2f98] ss:$216 sps:$4 sm:$0xff]   ;;  %v16448_v0 = vld [vmem:[%s18061_s30 + $0x164c] ss:$216 sps:$4 sm:$0xff]  }
 0x585   : > { %12538 = vmatprep.subr.bf16.mxu1 %v16360_v1  ;;  %v16451_v1 = vld [vmem:[%s18061_s30 + $0x314c] ss:$216 sps:$4 sm:$0xff]  }
 0x58b   : > { %11432 = vmatpush1.bf16.xpose.msra.mxu0 %v16355_v2  ;;  %v16446_v2 = vld [vmem:[%s18061_s30 + $0x1648] ss:$216 sps:$4 sm:$0xff]  }
 0x58c   : > { %12539 = vmatpush1.bf16.xpose.msra.mxu1 %v16358_v32  ;;  %11433 = vmatprep.subr.bf16.mxu0 %v16363_v7  ;;  %v16449_v32 = vld [vmem:[%s18061_s30 + $0x3148] ss:$216 sps:$4 sm:$0xff]   ;;  %v16454_v7 = vld [vmem:[%s18061_s30 + $0x17fc] ss:$216 sps:$4 sm:$0xff]  }
 0x58d   : > { %12540 = vmatprep.subr.bf16.mxu1 %v16366_v60  ;;  %v16457_v60 = vld [vmem:[%s18061_s30 + $0x32fc] ss:$216 sps:$4 sm:$0xff]  }
 0x593   : > { %11434 = vmatpush1.bf16.xpose.msra.mxu0 %v16361_v8  ;;  %v16452_v8 = vld [vmem:[%s18061_s30 + $0x17f8] ss:$216 sps:$4 sm:$0xff]  }
 0x594   : > { %12541 = vmatpush1.bf16.xpose.msra.mxu1 %v16364_v9  ;;  %11444 = vmatprep.subr.bf16.mxu0 %v16370_v54  ;;  %v16455_v9 = vld [vmem:[%s18061_s30 + $0x32f8] ss:$216 sps:$4 sm:$0xff]   ;;  %v16460_v54 = vld [vmem:[%s18061_s30 + $0x19ac] ss:$216 sps:$4 sm:$0xff]  }
 0x595   : > { %12551 = vmatprep.subr.bf16.mxu1 %v16373_v10  ;;  %v16463_v10 = vld [vmem:[%s18061_s30 + $0x34ac] ss:$216 sps:$4 sm:$0xff]  }
 0x59a   : > { %11436 = vmatmul.mubr.bf16.vlgmr.msra.gmra.mrb[0].mxu0 %v18894_v61 }
 0x59b   : > { %12543 = vmatmul.mubr.bf16.vlgmr.msra.gmra.mrb[0].mxu1 %v18894_v61  ;;  %11445 = vmatpush1.bf16.xpose.msra.mxu0 %v16368_v12  ;;  %v16458_v12 = vld [vmem:[%s18061_s30 + $0x19a8] ss:$216 sps:$4 sm:$0xff]  }
 0x59c   : > { %12552 = vmatpush1.bf16.xpose.msra.mxu1 %v16371_v14  ;;  %11446 = vmatprep.subr.bf16.mxu0 %v16376_v15  ;;  %v16461_v14 = vld [vmem:[%s18061_s30 + $0x34a8] ss:$216 sps:$4 sm:$0xff]   ;;  %v16466_v15 = vld [vmem:[%s18061_s30 + $0x64] ss:$216 sps:$4 sm:$0xff]  }
 0x59d   : > { %12553 = vmatprep.subr.bf16.mxu1 %v16379_v16  ;;  %11476 = vmatprep.mubr.bf16.mxu0 %v2104_v18  ;;  %v16469_v16 = vld [vmem:[%s18061_s30 + $0x1b64] ss:$216 sps:$4 sm:$0xff]  }
 0x59e   : > { %12583 = vmatprep.mubr.bf16.mxu1 %v2104_v18  ;;  %v18967_v18 = vld [vmem:[%s20164_s0 + $0x18] sm:$0xff] }
 0x5a3   : > { %11447 = vmatpush1.bf16.xpose.msra.mxu0 %v16374_v4  ;;  %v18971_v4 = vrot.slane %v18967_v18, %v18056_v6 }
 0x5a4   : > { %12554 = vmatpush1.bf16.xpose.msra.mxu1 %v16377_v19  ;;  %11448 = vmatprep.subr.bf16.mxu0 %v16382_v20  ;;  %v2102_v19 = vcombine.high %v18894_v61, %v18894_v61  ;;  %v16470_v61 = vld [vmem:[%s18061_s30 + $0x210] ss:$216 sps:$4 sm:$0xff]  }
 0x5a5   : > { %12555 = vmatprep.subr.bf16.mxu1 %v16385_v11  ;;  %v2120_v20 = vcombine.high %v18971_v4, %v18971_v4  ;;  %v16464_v11 = vld [vmem:[%s18061_s30 + $0x60] ss:$216 sps:$4 sm:$0xff]  }
 0x5ab   : > { %11449 = vmatpush1.bf16.xpose.msra.mxu0 %v16380_v21  ;;  %v16467_v21 = vld [vmem:[%s18061_s30 + $0x1b60] ss:$216 sps:$4 sm:$0xff]  }
 0x5ac   : > { %12556 = vmatpush1.bf16.xpose.msra.mxu1 %v16383_v22  ;;  %11450 = vmatprep.subr.bf16.mxu0 %v16388_v13  ;;  %v16472_v22 = vld [vmem:[%s18061_s30 + $0x214] ss:$216 sps:$4 sm:$0xff]  }
 0x5ad   : > { %12557 = vmatprep.subr.bf16.mxu1 %v16391_v23  ;;  %v16475_v13 = vld [vmem:[%s18061_s30 + $0x1d14] ss:$216 sps:$4 sm:$0xff]   ;;  %v18982_v23 = vrot.slane %v2120_v20, %v18056_v6 }
 0x5ae   : > { %v16556_v20 = vld [vmem:[%s18061_s30 + $0x19b4] ss:$216 sps:$4 sm:$0xff]  }
 0x5b3   : > { %11451 = vmatpush1.bf16.xpose.msra.mxu0 %v16386_v24  ;;  %v16473_v24 = vld [vmem:[%s18061_s30 + $0x1d10] ss:$216 sps:$4 sm:$0xff]  }
 0x5b4   : > { %12558 = vmatpush1.bf16.xpose.msra.mxu1 %v16389_v25  ;;  %11452 = vmatprep.subr.bf16.mxu0 %v16394_v26  ;;  %v16478_v25 = vld [vmem:[%s18061_s30 + $0x3c4] ss:$216 sps:$4 sm:$0xff]  }
 0x5b5   : > { %12559 = vmatprep.subr.bf16.mxu1 %v16397_v17  ;;  %v16481_v26 = vld [vmem:[%s18061_s30 + $0x1ec4] ss:$216 sps:$4 sm:$0xff]   ;;  %v16476_v17 = vld [vmem:[%s18061_s30 + $0x3c0] ss:$216 sps:$4 sm:$0xff]  }
 0x5bb   : > { %11453 = vmatpush1.bf16.xpose.msra.mxu0 %v16392_v28  ;;  %v16479_v28 = vld [vmem:[%s18061_s30 + $0x1ec0] ss:$216 sps:$4 sm:$0xff]  }
 0x5bc   : > { %12560 = vmatpush1.bf16.xpose.msra.mxu1 %v16395_v30  ;;  %11454 = vmatprep.subr.bf16.mxu0 %v16400_v31  ;;  %v16484_v30 = vld [vmem:[%s18061_s30 + $0x574] ss:$216 sps:$4 sm:$0xff]  }
 0x5bd   : > { %12561 = vmatprep.subr.bf16.mxu1 %v16403_v33  ;;  %v16487_v31 = vld [vmem:[%s18061_s30 + $0x2074] ss:$216 sps:$4 sm:$0xff]   ;;  %v16482_v33 = vld [vmem:[%s18061_s30 + $0x570] ss:$216 sps:$4 sm:$0xff]  }
 0x5c3   : > { %11455 = vmatpush1.bf16.xpose.msra.mxu0 %v16398_v5  ;;  %v16485_v5 = vld [vmem:[%s18061_s30 + $0x2070] ss:$216 sps:$4 sm:$0xff]  }
 0x5c4   : > { %12562 = vmatpush1.bf16.xpose.msra.mxu1 %v16401_v34  ;;  %11456 = vmatprep.subr.bf16.mxu0 %v16406_v27  ;;  %v16490_v34 = vld [vmem:[%s18061_s30 + $0x724] ss:$216 sps:$4 sm:$0xff]  }
 0x5c5   : > { %12563 = vmatprep.subr.bf16.mxu1 %v16409_v35  ;;  %v16493_v27 = vld [vmem:[%s18061_s30 + $0x2224] ss:$216 sps:$4 sm:$0xff]   ;;  %v16488_v35 = vld [vmem:[%s18061_s30 + $0x720] ss:$216 sps:$4 sm:$0xff]  }
 0x5cb   : > { %11457 = vmatpush1.bf16.xpose.msra.mxu0 %v16404_v36  ;;  %v16491_v36 = vld [vmem:[%s18061_s30 + $0x2220] ss:$216 sps:$4 sm:$0xff]  }
 0x5cc   : > { %12564 = vmatpush1.bf16.xpose.msra.mxu1 %v16407_v29  ;;  %11458 = vmatprep.subr.bf16.mxu0 %v16412_v38  ;;  %v16496_v29 = vld [vmem:[%s18061_s30 + $0x8d4] ss:$216 sps:$4 sm:$0xff]  }
 0x5cd   : > { %12565 = vmatprep.subr.bf16.mxu1 %v16415_v40  ;;  %v16499_v38 = vld [vmem:[%s18061_s30 + $0x23d4] ss:$216 sps:$4 sm:$0xff]   ;;  %v16494_v40 = vld [vmem:[%s18061_s30 + $0x8d0] ss:$216 sps:$4 sm:$0xff]  }
 0x5d3   : > { %11459 = vmatpush1.bf16.xpose.msra.mxu0 %v16410_v41  ;;  %v16497_v41 = vld [vmem:[%s18061_s30 + $0x23d0] ss:$216 sps:$4 sm:$0xff]  }
 0x5d4   : > { %12566 = vmatpush1.bf16.xpose.msra.mxu1 %v16413_v42  ;;  %11460 = vmatprep.subr.bf16.mxu0 %v16418_v43  ;;  %v16502_v42 = vld [vmem:[%s18061_s30 + $0xa84] ss:$216 sps:$4 sm:$0xff]  }
 0x5d5   : > { %12567 = vmatprep.subr.bf16.mxu1 %v16421_v44  ;;  %v16505_v43 = vld [vmem:[%s18061_s30 + $0x2584] ss:$216 sps:$4 sm:$0xff]   ;;  %v16500_v44 = vld [vmem:[%s18061_s30 + $0xa80] ss:$216 sps:$4 sm:$0xff]  }
 0x5db   : > { %11461 = vmatpush1.bf16.xpose.msra.mxu0 %v16416_v37  ;;  %v16503_v37 = vld [vmem:[%s18061_s30 + $0x2580] ss:$216 sps:$4 sm:$0xff]  }
 0x5dc   : > { %12568 = vmatpush1.bf16.xpose.msra.mxu1 %v16419_v45  ;;  %11462 = vmatprep.subr.bf16.mxu0 %v16424_v46  ;;  %v16508_v45 = vld [vmem:[%s18061_s30 + $0xc34] ss:$216 sps:$4 sm:$0xff]  }
 0x5dd   : > { %12569 = vmatprep.subr.bf16.mxu1 %v16427_v47  ;;  %v16511_v46 = vld [vmem:[%s18061_s30 + $0x2734] ss:$216 sps:$4 sm:$0xff]   ;;  %v16506_v47 = vld [vmem:[%s18061_s30 + $0xc30] ss:$216 sps:$4 sm:$0xff]  }
 0x5e3   : > { %11463 = vmatpush1.bf16.xpose.msra.mxu0 %v16422_v48  ;;  %v16509_v48 = vld [vmem:[%s18061_s30 + $0x2730] ss:$216 sps:$4 sm:$0xff]  }
 0x5e4   : > { %12570 = vmatpush1.bf16.xpose.msra.mxu1 %v16425_v50  ;;  %11464 = vmatprep.subr.bf16.mxu0 %v16430_v51  ;;  %v16514_v50 = vld [vmem:[%s18061_s30 + $0xde4] ss:$216 sps:$4 sm:$0xff]  }
 0x5e5   : > { %12571 = vmatprep.subr.bf16.mxu1 %v16433_v52  ;;  %v16517_v51 = vld [vmem:[%s18061_s30 + $0x28e4] ss:$216 sps:$4 sm:$0xff]   ;;  %v16512_v52 = vld [vmem:[%s18061_s30 + $0xde0] ss:$216 sps:$4 sm:$0xff]  }
 0x5eb   : > { %11465 = vmatpush1.bf16.xpose.msra.mxu0 %v16428_v53  ;;  %v16515_v53 = vld [vmem:[%s18061_s30 + $0x28e0] ss:$216 sps:$4 sm:$0xff]  }
 0x5ec   : > { %12572 = vmatpush1.bf16.xpose.msra.mxu1 %v16431_v55  ;;  %11466 = vmatprep.subr.bf16.mxu0 %v16436_v56  ;;  %v16520_v55 = vld [vmem:[%s18061_s30 + $0xf94] ss:$216 sps:$4 sm:$0xff]  }
 0x5ed   : > { %12573 = vmatprep.subr.bf16.mxu1 %v16439_v49  ;;  %v16523_v56 = vld [vmem:[%s18061_s30 + $0x2a94] ss:$216 sps:$4 sm:$0xff]   ;;  %v16518_v49 = vld [vmem:[%s18061_s30 + $0xf90] ss:$216 sps:$4 sm:$0xff]  }
 0x5f3   : > { %11467 = vmatpush1.bf16.xpose.msra.mxu0 %v16434_v57  ;;  %v16521_v57 = vld [vmem:[%s18061_s30 + $0x2a90] ss:$216 sps:$4 sm:$0xff]  }
 0x5f4   : > { %12574 = vmatpush1.bf16.xpose.msra.mxu1 %v16437_v58  ;;  %11468 = vmatprep.subr.bf16.mxu0 %v16442_v59  ;;  %v16526_v58 = vld [vmem:[%s18061_s30 + $0x1144] ss:$216 sps:$4 sm:$0xff]  }
 0x5f5   : > { %12575 = vmatprep.subr.bf16.mxu1 %v16445_v39  ;;  %v16529_v59 = vld [vmem:[%s18061_s30 + $0x2c44] ss:$216 sps:$4 sm:$0xff]   ;;  %v16524_v39 = vld [vmem:[%s18061_s30 + $0x1140] ss:$216 sps:$4 sm:$0xff]  }
 0x5fb   : > { %11469 = vmatpush1.bf16.xpose.msra.mxu0 %v16440_v62  ;;  %v16527_v62 = vld [vmem:[%s18061_s30 + $0x2c40] ss:$216 sps:$4 sm:$0xff]  }
 0x5fc   : > { %12576 = vmatpush1.bf16.xpose.msra.mxu1 %v16443_v63  ;;  %11470 = vmatprep.subr.bf16.mxu0 %v16448_v0  ;;  %v16532_v63 = vld [vmem:[%s18061_s30 + $0x12f4] ss:$216 sps:$4 sm:$0xff]  }
 0x5fd   : > { %12577 = vmatprep.subr.bf16.mxu1 %v16451_v1  ;;  %v16535_v0 = vld [vmem:[%s18061_s30 + $0x2df4] ss:$216 sps:$4 sm:$0xff]   ;;  %v16530_v1 = vld [vmem:[%s18061_s30 + $0x12f0] ss:$216 sps:$4 sm:$0xff]  }
 0x603   : > { %11471 = vmatpush1.bf16.xpose.msra.mxu0 %v16446_v2  ;;  %v16533_v2 = vld [vmem:[%s18061_s30 + $0x2df0] ss:$216 sps:$4 sm:$0xff]  }
 0x604   : > { %12578 = vmatpush1.bf16.xpose.msra.mxu1 %v16449_v32  ;;  %11472 = vmatprep.subr.bf16.mxu0 %v16454_v7  ;;  %v16538_v32 = vld [vmem:[%s18061_s30 + $0x14a4] ss:$216 sps:$4 sm:$0xff]  }
 0x605   : > { %12579 = vmatprep.subr.bf16.mxu1 %v16457_v60  ;;  %v16541_v7 = vld [vmem:[%s18061_s30 + $0x2fa4] ss:$216 sps:$4 sm:$0xff]   ;;  %v16536_v60 = vld [vmem:[%s18061_s30 + $0x14a0] ss:$216 sps:$4 sm:$0xff]  }
 0x60b   : > { %11473 = vmatpush1.bf16.xpose.msra.mxu0 %v16452_v8  ;;  %v16539_v8 = vld [vmem:[%s18061_s30 + $0x2fa0] ss:$216 sps:$4 sm:$0xff]  }
 0x60c   : > { %12580 = vmatpush1.bf16.xpose.msra.mxu1 %v16455_v9  ;;  %11474 = vmatprep.subr.bf16.mxu0 %v16460_v54  ;;  %v16544_v9 = vld [vmem:[%s18061_s30 + $0x1654] ss:$216 sps:$4 sm:$0xff]  }
 0x60d   : > { %12581 = vmatprep.subr.bf16.mxu1 %v16463_v10  ;;  %v16547_v54 = vld [vmem:[%s18061_s30 + $0x3154] ss:$216 sps:$4 sm:$0xff]   ;;  %v16542_v10 = vld [vmem:[%s18061_s30 + $0x1650] ss:$216 sps:$4 sm:$0xff]  }
 0x613   : > { %11475 = vmatpush1.bf16.xpose.msra.mxu0 %v16458_v12  ;;  %v16545_v12 = vld [vmem:[%s18061_s30 + $0x3150] ss:$216 sps:$4 sm:$0xff]  }
 0x614   : > { %12582 = vmatpush1.bf16.xpose.msra.mxu1 %v16461_v14  ;;  %11485 = vmatprep.subr.bf16.mxu0 %v16466_v15  ;;  %v16550_v14 = vld [vmem:[%s18061_s30 + $0x1804] ss:$216 sps:$4 sm:$0xff]  }
 0x615   : > { %12592 = vmatprep.subr.bf16.mxu1 %v16469_v16  ;;  %v16553_v15 = vld [vmem:[%s18061_s30 + $0x3304] ss:$216 sps:$4 sm:$0xff]   ;;  %v16548_v16 = vld [vmem:[%s18061_s30 + $0x1800] ss:$216 sps:$4 sm:$0xff]  }
 0x61a   : > { %11477 = vmatmul.mubr.bf16.vlgmr.msra.gmra.mrb[0].mxu0 %v2102_v19 }
 0x61b   : > { %12584 = vmatmul.mubr.bf16.vlgmr.msra.gmra.mrb[0].mxu1 %v2102_v19  ;;  %11486 = vmatpush1.bf16.xpose.msra.mxu0 %v16464_v11  ;;  %v16551_v19 = vld [vmem:[%s18061_s30 + $0x3300] ss:$216 sps:$4 sm:$0xff]   ;;  %v16559_v11 = vld [vmem:[%s18061_s30 + $0x34b4] ss:$216 sps:$4 sm:$0xff]  }
 0x61c   : > { %12593 = vmatpush1.bf16.xpose.msra.mxu1 %v16467_v21  ;;  %11487 = vmatprep.subr.bf16.mxu0 %v16472_v22  ;;  %v16554_v21 = vld [vmem:[%s18061_s30 + $0x19b0] ss:$216 sps:$4 sm:$0xff]  }
 0x61d   : > { %12594 = vmatprep.subr.bf16.mxu1 %v16475_v13  ;;  %11517 = vmatprep.mubr.bf16.mxu0 %v18982_v23  ;;  %v16557_v22 = vld [vmem:[%s18061_s30 + $0x34b0] ss:$216 sps:$4 sm:$0xff]   ;;  %v16562_v13 = vld [vmem:[%s18061_s30 + $0x6c] ss:$216 sps:$4 sm:$0xff]  }
 0x61e   : > { %12624 = vmatprep.mubr.bf16.mxu1 %v18982_v23 }
 0x623   : > { %11488 = vmatpush1.bf16.xpose.msra.mxu0 %v16470_v61  ;;  %v16565_v61 = vld [vmem:[%s18061_s30 + $0x1b6c] ss:$216 sps:$4 sm:$0xff]  }
 0x624   : > { %12595 = vmatpush1.bf16.xpose.msra.mxu1 %v16473_v24  ;;  %11489 = vmatprep.subr.bf16.mxu0 %v16478_v25  ;;  %v19048_v24 = vrot.slane %v18971_v4, %v18056_v6  ;;  %v16560_v25 = vld [vmem:[%s18061_s30 + $0x68] ss:$216 sps:$4 sm:$0xff]   ;;  %v16566_v4 = vld [vmem:[%s18061_s30 + $0x218] ss:$216 sps:$4 sm:$0xff]  }
 0x625   : > { %12596 = vmatprep.subr.bf16.mxu1 %v16481_v26  ;;  %v16563_v26 = vld [vmem:[%s18061_s30 + $0x1b68] ss:$216 sps:$4 sm:$0xff]  }
 0x62b   : > { %11490 = vmatpush1.bf16.xpose.msra.mxu0 %v16476_v17  ;;  %v16568_v17 = vld [vmem:[%s18061_s30 + $0x21c] ss:$216 sps:$4 sm:$0xff]  }
 0x62c   : > { %12597 = vmatpush1.bf16.xpose.msra.mxu1 %v16479_v28  ;;  %11491 = vmatprep.subr.bf16.mxu0 %v16484_v30  ;;  %v16571_v28 = vld [vmem:[%s18061_s30 + $0x1d1c] ss:$216 sps:$4 sm:$0xff]   ;;  %v2152_v30 = vcombine.high %v18982_v23, %v18982_v23  ;;  %v16577_v23 = vld [vmem:[%s18061_s30 + $0x1ecc] ss:$216 sps:$4 sm:$0xff]  }
 0x62d   : > { %12598 = vmatprep.subr.bf16.mxu1 %v16487_v31  ;;  %v16569_v31 = vld [vmem:[%s18061_s30 + $0x1d18] ss:$216 sps:$4 sm:$0xff]  }
 0x633   : > { %11492 = vmatpush1.bf16.xpose.msra.mxu0 %v16482_v33  ;;  %v16574_v33 = vld [vmem:[%s18061_s30 + $0x3cc] ss:$216 sps:$4 sm:$0xff]  }
 0x634   : > { %12599 = vmatpush1.bf16.xpose.msra.mxu1 %v16485_v5  ;;  %11493 = vmatprep.subr.bf16.mxu0 %v16490_v34  ;;  %v16572_v5 = vld [vmem:[%s18061_s30 + $0x3c8] ss:$216 sps:$4 sm:$0xff]  }
 0x635   : > { %12600 = vmatprep.subr.bf16.mxu1 %v16493_v27  ;;  %v16575_v34 = vld [vmem:[%s18061_s30 + $0x1ec8] ss:$216 sps:$4 sm:$0xff]   ;;  %v16580_v27 = vld [vmem:[%s18061_s30 + $0x57c] ss:$216 sps:$4 sm:$0xff]  }
 0x63b   : > { %11494 = vmatpush1.bf16.xpose.msra.mxu0 %v16488_v35  ;;  %v16583_v35 = vld [vmem:[%s18061_s30 + $0x207c] ss:$216 sps:$4 sm:$0xff]  }
 0x63c   : > { %12601 = vmatpush1.bf16.xpose.msra.mxu1 %v16491_v36  ;;  %11495 = vmatprep.subr.bf16.mxu0 %v16496_v29  ;;  %v16578_v36 = vld [vmem:[%s18061_s30 + $0x578] ss:$216 sps:$4 sm:$0xff]  }
 0x63d   : > { %12602 = vmatprep.subr.bf16.mxu1 %v16499_v38  ;;  %v16581_v29 = vld [vmem:[%s18061_s30 + $0x2078] ss:$216 sps:$4 sm:$0xff]   ;;  %v16586_v38 = vld [vmem:[%s18061_s30 + $0x72c] ss:$216 sps:$4 sm:$0xff]  }
 0x643   : > { %11496 = vmatpush1.bf16.xpose.msra.mxu0 %v16494_v40  ;;  %v16589_v40 = vld [vmem:[%s18061_s30 + $0x222c] ss:$216 sps:$4 sm:$0xff]  }
 0x644   : > { %12603 = vmatpush1.bf16.xpose.msra.mxu1 %v16497_v41  ;;  %11497 = vmatprep.subr.bf16.mxu0 %v16502_v42  ;;  %v16584_v41 = vld [vmem:[%s18061_s30 + $0x728] ss:$216 sps:$4 sm:$0xff]  }
 0x645   : > { %12604 = vmatprep.subr.bf16.mxu1 %v16505_v43  ;;  %v16587_v42 = vld [vmem:[%s18061_s30 + $0x2228] ss:$216 sps:$4 sm:$0xff]   ;;  %v16592_v43 = vld [vmem:[%s18061_s30 + $0x8dc] ss:$216 sps:$4 sm:$0xff]  }
 0x64b   : > { %11498 = vmatpush1.bf16.xpose.msra.mxu0 %v16500_v44  ;;  %v16595_v44 = vld [vmem:[%s18061_s30 + $0x23dc] ss:$216 sps:$4 sm:$0xff]  }
 0x64c   : > { %12605 = vmatpush1.bf16.xpose.msra.mxu1 %v16503_v37  ;;  %11499 = vmatprep.subr.bf16.mxu0 %v16508_v45  ;;  %v16590_v37 = vld [vmem:[%s18061_s30 + $0x8d8] ss:$216 sps:$4 sm:$0xff]  }
 0x64d   : > { %12606 = vmatprep.subr.bf16.mxu1 %v16511_v46  ;;  %v16593_v45 = vld [vmem:[%s18061_s30 + $0x23d8] ss:$216 sps:$4 sm:$0xff]   ;;  %v16598_v46 = vld [vmem:[%s18061_s30 + $0xa8c] ss:$216 sps:$4 sm:$0xff]  }
 0x653   : > { %11500 = vmatpush1.bf16.xpose.msra.mxu0 %v16506_v47  ;;  %v16601_v47 = vld [vmem:[%s18061_s30 + $0x258c] ss:$216 sps:$4 sm:$0xff]  }
 0x654   : > { %12607 = vmatpush1.bf16.xpose.msra.mxu1 %v16509_v48  ;;  %11501 = vmatprep.subr.bf16.mxu0 %v16514_v50  ;;  %v16596_v48 = vld [vmem:[%s18061_s30 + $0xa88] ss:$216 sps:$4 sm:$0xff]  }
 0x655   : > { %12608 = vmatprep.subr.bf16.mxu1 %v16517_v51  ;;  %v16599_v50 = vld [vmem:[%s18061_s30 + $0x2588] ss:$216 sps:$4 sm:$0xff]   ;;  %v16604_v51 = vld [vmem:[%s18061_s30 + $0xc3c] ss:$216 sps:$4 sm:$0xff]  }
 0x65b   : > { %11502 = vmatpush1.bf16.xpose.msra.mxu0 %v16512_v52  ;;  %v16607_v52 = vld [vmem:[%s18061_s30 + $0x273c] ss:$216 sps:$4 sm:$0xff]  }
 0x65c   : > { %12609 = vmatpush1.bf16.xpose.msra.mxu1 %v16515_v53  ;;  %11503 = vmatprep.subr.bf16.mxu0 %v16520_v55  ;;  %v16602_v53 = vld [vmem:[%s18061_s30 + $0xc38] ss:$216 sps:$4 sm:$0xff]  }
 0x65d   : > { %12610 = vmatprep.subr.bf16.mxu1 %v16523_v56  ;;  %v16605_v55 = vld [vmem:[%s18061_s30 + $0x2738] ss:$216 sps:$4 sm:$0xff]   ;;  %v16610_v56 = vld [vmem:[%s18061_s30 + $0xdec] ss:$216 sps:$4 sm:$0xff]  }
 0x663   : > { %11504 = vmatpush1.bf16.xpose.msra.mxu0 %v16518_v49  ;;  %v16613_v49 = vld [vmem:[%s18061_s30 + $0x28ec] ss:$216 sps:$4 sm:$0xff]  }
 0x664   : > { %12611 = vmatpush1.bf16.xpose.msra.mxu1 %v16521_v57  ;;  %11505 = vmatprep.subr.bf16.mxu0 %v16526_v58  ;;  %v16608_v57 = vld [vmem:[%s18061_s30 + $0xde8] ss:$216 sps:$4 sm:$0xff]  }
 0x665   : > { %12612 = vmatprep.subr.bf16.mxu1 %v16529_v59  ;;  %v16611_v58 = vld [vmem:[%s18061_s30 + $0x28e8] ss:$216 sps:$4 sm:$0xff]   ;;  %v16616_v59 = vld [vmem:[%s18061_s30 + $0xf9c] ss:$216 sps:$4 sm:$0xff]  }
 0x66b   : > { %11506 = vmatpush1.bf16.xpose.msra.mxu0 %v16524_v39  ;;  %v16619_v39 = vld [vmem:[%s18061_s30 + $0x2a9c] ss:$216 sps:$4 sm:$0xff]  }
 0x66c   : > { %12613 = vmatpush1.bf16.xpose.msra.mxu1 %v16527_v62  ;;  %11507 = vmatprep.subr.bf16.mxu0 %v16532_v63  ;;  %v16614_v62 = vld [vmem:[%s18061_s30 + $0xf98] ss:$216 sps:$4 sm:$0xff]  }
 0x66d   : > { %12614 = vmatprep.subr.bf16.mxu1 %v16535_v0  ;;  %v16617_v63 = vld [vmem:[%s18061_s30 + $0x2a98] ss:$216 sps:$4 sm:$0xff]   ;;  %v16622_v0 = vld [vmem:[%s18061_s30 + $0x114c] ss:$216 sps:$4 sm:$0xff]  }
 0x673   : > { %11508 = vmatpush1.bf16.xpose.msra.mxu0 %v16530_v1  ;;  %v16625_v1 = vld [vmem:[%s18061_s30 + $0x2c4c] ss:$216 sps:$4 sm:$0xff]  }
 0x674   : > { %12615 = vmatpush1.bf16.xpose.msra.mxu1 %v16533_v2  ;;  %11509 = vmatprep.subr.bf16.mxu0 %v16538_v32  ;;  %v16620_v2 = vld [vmem:[%s18061_s30 + $0x1148] ss:$216 sps:$4 sm:$0xff]  }
 0x675   : > { %12616 = vmatprep.subr.bf16.mxu1 %v16541_v7  ;;  %v16623_v32 = vld [vmem:[%s18061_s30 + $0x2c48] ss:$216 sps:$4 sm:$0xff]   ;;  %v16628_v7 = vld [vmem:[%s18061_s30 + $0x12fc] ss:$216 sps:$4 sm:$0xff]  }
 0x67b   : > { %11510 = vmatpush1.bf16.xpose.msra.mxu0 %v16536_v60  ;;  %v16631_v60 = vld [vmem:[%s18061_s30 + $0x2dfc] ss:$216 sps:$4 sm:$0xff]  }
 0x67c   : > { %12617 = vmatpush1.bf16.xpose.msra.mxu1 %v16539_v8  ;;  %11511 = vmatprep.subr.bf16.mxu0 %v16544_v9  ;;  %v16626_v8 = vld [vmem:[%s18061_s30 + $0x12f8] ss:$216 sps:$4 sm:$0xff]  }
 0x67d   : > { %12618 = vmatprep.subr.bf16.mxu1 %v16547_v54  ;;  %v16629_v9 = vld [vmem:[%s18061_s30 + $0x2df8] ss:$216 sps:$4 sm:$0xff]   ;;  %v16634_v54 = vld [vmem:[%s18061_s30 + $0x14ac] ss:$216 sps:$4 sm:$0xff]  }
 0x683   : > { %11512 = vmatpush1.bf16.xpose.msra.mxu0 %v16542_v10  ;;  %v16637_v10 = vld [vmem:[%s18061_s30 + $0x2fac] ss:$216 sps:$4 sm:$0xff]  }
 0x684   : > { %12619 = vmatpush1.bf16.xpose.msra.mxu1 %v16545_v12  ;;  %11513 = vmatprep.subr.bf16.mxu0 %v16550_v14  ;;  %v16632_v12 = vld [vmem:[%s18061_s30 + $0x14a8] ss:$216 sps:$4 sm:$0xff]  }
 0x685   : > { %12620 = vmatprep.subr.bf16.mxu1 %v16553_v15  ;;  %v16635_v14 = vld [vmem:[%s18061_s30 + $0x2fa8] ss:$216 sps:$4 sm:$0xff]   ;;  %v16640_v15 = vld [vmem:[%s18061_s30 + $0x165c] ss:$216 sps:$4 sm:$0xff]  }
 0x68b   : > { %11514 = vmatpush1.bf16.xpose.msra.mxu0 %v16548_v16  ;;  %v16643_v16 = vld [vmem:[%s18061_s30 + $0x315c] ss:$216 sps:$4 sm:$0xff]  }
 0x68c   : > { %12621 = vmatpush1.bf16.xpose.msra.mxu1 %v16551_v19  ;;  %11515 = vmatprep.subr.bf16.mxu0 %v16556_v20  ;;  %v16638_v19 = vld [vmem:[%s18061_s30 + $0x1658] ss:$216 sps:$4 sm:$0xff]  }
 0x68d   : > { %12622 = vmatprep.subr.bf16.mxu1 %v16559_v11  ;;  %v16641_v20 = vld [vmem:[%s18061_s30 + $0x3158] ss:$216 sps:$4 sm:$0xff]   ;;  %v16646_v11 = vld [vmem:[%s18061_s30 + $0x180c] ss:$216 sps:$4 sm:$0xff]  }
 0x693   : > { %11516 = vmatpush1.bf16.xpose.msra.mxu0 %v16554_v21  ;;  %v16649_v21 = vld [vmem:[%s18061_s30 + $0x330c] ss:$216 sps:$4 sm:$0xff]  }
 0x694   : > { %12623 = vmatpush1.bf16.xpose.msra.mxu1 %v16557_v22  ;;  %11526 = vmatprep.subr.bf16.mxu0 %v16562_v13  ;;  %v16644_v22 = vld [vmem:[%s18061_s30 + $0x1808] ss:$216 sps:$4 sm:$0xff]  }
 0x695   : > { %12633 = vmatprep.subr.bf16.mxu1 %v16565_v61  ;;  %v16647_v13 = vld [vmem:[%s18061_s30 + $0x3308] ss:$216 sps:$4 sm:$0xff]   ;;  %v16652_v61 = vld [vmem:[%s18061_s30 + $0x19bc] ss:$216 sps:$4 sm:$0xff]  }
 0x69a   : > { %11518 = vmatmul.mubr.bf16.vlgmr.msra.gmra.mrb[0].mxu0 %v19048_v24 }
 0x69b   : > { %12625 = vmatmul.mubr.bf16.vlgmr.msra.gmra.mrb[0].mxu1 %v19048_v24  ;;  %11527 = vmatpush1.bf16.xpose.msra.mxu0 %v16560_v25  ;;  %v16655_v25 = vld [vmem:[%s18061_s30 + $0x34bc] ss:$216 sps:$4 sm:$0xff]  }
 0x69c   : > { %12634 = vmatpush1.bf16.xpose.msra.mxu1 %v16563_v26  ;;  %11528 = vmatprep.subr.bf16.mxu0 %v16568_v17  ;;  %v16650_v26 = vld [vmem:[%s18061_s30 + $0x19b8] ss:$216 sps:$4 sm:$0xff]  }
 0x69d   : > { %12635 = vmatprep.subr.bf16.mxu1 %v16571_v28  ;;  %11558 = vmatprep.mubr.bf16.mxu0 %v2152_v30  ;;  %v16653_v17 = vld [vmem:[%s18061_s30 + $0x34b8] ss:$216 sps:$4 sm:$0xff]   ;;  %v16658_v28 = vld [vmem:[%s18061_s30 + $0x74] ss:$216 sps:$4 sm:$0xff]  }
 0x69e   : > { %12665 = vmatprep.mubr.bf16.mxu1 %v2152_v30  ;;  %v16661_v30 = vld [vmem:[%s18061_s30 + $0x1b74] ss:$216 sps:$4 sm:$0xff]  }
 0x6a3   : > { %11529 = vmatpush1.bf16.xpose.msra.mxu0 %v16566_v4  ;;  %v2105_v4 = vcombine.high %v18967_v18, %v18967_v18  ;;  %v16664_v18 = vld [vmem:[%s18061_s30 + $0x224] ss:$216 sps:$4 sm:$0xff]  }
 0x6a4   : > { %12636 = vmatpush1.bf16.xpose.msra.mxu1 %v16569_v31  ;;  %11530 = vmatprep.subr.bf16.mxu0 %v16574_v33  ;;  %v2150_v33 = vcombine.high %v19048_v24, %v19048_v24  ;;  %v16662_v24 = vld [vmem:[%s18061_s30 + $0x220] ss:$216 sps:$4 sm:$0xff]  }
 0x6a5   : > { %12637 = vmatprep.subr.bf16.mxu1 %v16577_v23  ;;  %v19121_v31 = vrot.slane %v2105_v4, %v18056_v6  ;;  %v16743_v4 = vld [vmem:[%s18061_s30 + $0x3310] ss:$216 sps:$4 sm:$0xff]  }
 0x6a7   : > { %v2121_v23 = vcombine.high %v19121_v31, %v19121_v31 }
 0x6ab   : > { %11531 = vmatpush1.bf16.xpose.msra.mxu0 %v16572_v5  ;;  %v16656_v5 = vld [vmem:[%s18061_s30 + $0x70] ss:$216 sps:$4 sm:$0xff]  }
 0x6ac   : > { %12638 = vmatpush1.bf16.xpose.msra.mxu1 %v16575_v34  ;;  %11532 = vmatprep.subr.bf16.mxu0 %v16580_v27  ;;  %v16659_v34 = vld [vmem:[%s18061_s30 + $0x1b70] ss:$216 sps:$4 sm:$0xff]   ;;  %v16667_v27 = vld [vmem:[%s18061_s30 + $0x1d24] ss:$216 sps:$4 sm:$0xff]  }
 0x6ad   : > { %12639 = vmatprep.subr.bf16.mxu1 %v16583_v35  ;;  %v19132_v35 = vrot.slane %v2121_v23, %v18056_v6  ;;  %v16751_v23 = vld [vmem:[%s18061_s30 + $0x34c4] ss:$216 sps:$4 sm:$0xff]  }
 0x6b3   : > { %11533 = vmatpush1.bf16.xpose.msra.mxu0 %v16578_v36  ;;  %v16665_v36 = vld [vmem:[%s18061_s30 + $0x1d20] ss:$216 sps:$4 sm:$0xff]  }
 0x6b4   : > { %12640 = vmatpush1.bf16.xpose.msra.mxu1 %v16581_v29  ;;  %11534 = vmatprep.subr.bf16.mxu0 %v16586_v38  ;;  %v16670_v29 = vld [vmem:[%s18061_s30 + $0x3d4] ss:$216 sps:$4 sm:$0xff]  }
 0x6b5   : > { %12641 = vmatprep.subr.bf16.mxu1 %v16589_v40  ;;  %v16673_v38 = vld [vmem:[%s18061_s30 + $0x1ed4] ss:$216 sps:$4 sm:$0xff]   ;;  %v16668_v40 = vld [vmem:[%s18061_s30 + $0x3d0] ss:$216 sps:$4 sm:$0xff]  }
 0x6bb   : > { %11535 = vmatpush1.bf16.xpose.msra.mxu0 %v16584_v41  ;;  %v16671_v41 = vld [vmem:[%s18061_s30 + $0x1ed0] ss:$216 sps:$4 sm:$0xff]  }
 0x6bc   : > { %12642 = vmatpush1.bf16.xpose.msra.mxu1 %v16587_v42  ;;  %11536 = vmatprep.subr.bf16.mxu0 %v16592_v43  ;;  %v16676_v42 = vld [vmem:[%s18061_s30 + $0x584] ss:$216 sps:$4 sm:$0xff]  }
 0x6bd   : > { %12643 = vmatprep.subr.bf16.mxu1 %v16595_v44  ;;  %v16679_v43 = vld [vmem:[%s18061_s30 + $0x2084] ss:$216 sps:$4 sm:$0xff]   ;;  %v16674_v44 = vld [vmem:[%s18061_s30 + $0x580] ss:$216 sps:$4 sm:$0xff]  }
 0x6c3   : > { %11537 = vmatpush1.bf16.xpose.msra.mxu0 %v16590_v37  ;;  %v16677_v37 = vld [vmem:[%s18061_s30 + $0x2080] ss:$216 sps:$4 sm:$0xff]  }
 0x6c4   : > { %12644 = vmatpush1.bf16.xpose.msra.mxu1 %v16593_v45  ;;  %11538 = vmatprep.subr.bf16.mxu0 %v16598_v46  ;;  %v16682_v45 = vld [vmem:[%s18061_s30 + $0x734] ss:$216 sps:$4 sm:$0xff]  }
 0x6c5   : > { %12645 = vmatprep.subr.bf16.mxu1 %v16601_v47  ;;  %v16685_v46 = vld [vmem:[%s18061_s30 + $0x2234] ss:$216 sps:$4 sm:$0xff]   ;;  %v16680_v47 = vld [vmem:[%s18061_s30 + $0x730] ss:$216 sps:$4 sm:$0xff]  }
 0x6cb   : > { %11539 = vmatpush1.bf16.xpose.msra.mxu0 %v16596_v48  ;;  %v16683_v48 = vld [vmem:[%s18061_s30 + $0x2230] ss:$216 sps:$4 sm:$0xff]  }
 0x6cc   : > { %12646 = vmatpush1.bf16.xpose.msra.mxu1 %v16599_v50  ;;  %11540 = vmatprep.subr.bf16.mxu0 %v16604_v51  ;;  %v16688_v50 = vld [vmem:[%s18061_s30 + $0x8e4] ss:$216 sps:$4 sm:$0xff]  }
 0x6cd   : > { %12647 = vmatprep.subr.bf16.mxu1 %v16607_v52  ;;  %v16691_v51 = vld [vmem:[%s18061_s30 + $0x23e4] ss:$216 sps:$4 sm:$0xff]   ;;  %v16686_v52 = vld [vmem:[%s18061_s30 + $0x8e0] ss:$216 sps:$4 sm:$0xff]  }
 0x6d3   : > { %11541 = vmatpush1.bf16.xpose.msra.mxu0 %v16602_v53  ;;  %v16689_v53 = vld [vmem:[%s18061_s30 + $0x23e0] ss:$216 sps:$4 sm:$0xff]  }
 0x6d4   : > { %12648 = vmatpush1.bf16.xpose.msra.mxu1 %v16605_v55  ;;  %11542 = vmatprep.subr.bf16.mxu0 %v16610_v56  ;;  %v16694_v55 = vld [vmem:[%s18061_s30 + $0xa94] ss:$216 sps:$4 sm:$0xff]  }
 0x6d5   : > { %12649 = vmatprep.subr.bf16.mxu1 %v16613_v49  ;;  %v16697_v56 = vld [vmem:[%s18061_s30 + $0x2594] ss:$216 sps:$4 sm:$0xff]   ;;  %v16692_v49 = vld [vmem:[%s18061_s30 + $0xa90] ss:$216 sps:$4 sm:$0xff]  }
 0x6db   : > { %11543 = vmatpush1.bf16.xpose.msra.mxu0 %v16608_v57  ;;  %v16695_v57 = vld [vmem:[%s18061_s30 + $0x2590] ss:$216 sps:$4 sm:$0xff]  }
 0x6dc   : > { %12650 = vmatpush1.bf16.xpose.msra.mxu1 %v16611_v58  ;;  %11544 = vmatprep.subr.bf16.mxu0 %v16616_v59  ;;  %v16700_v58 = vld [vmem:[%s18061_s30 + $0xc44] ss:$216 sps:$4 sm:$0xff]  }
 0x6dd   : > { %12651 = vmatprep.subr.bf16.mxu1 %v16619_v39  ;;  %v16703_v59 = vld [vmem:[%s18061_s30 + $0x2744] ss:$216 sps:$4 sm:$0xff]   ;;  %v16698_v39 = vld [vmem:[%s18061_s30 + $0xc40] ss:$216 sps:$4 sm:$0xff]  }
 0x6e3   : > { %11545 = vmatpush1.bf16.xpose.msra.mxu0 %v16614_v62  ;;  %v16701_v62 = vld [vmem:[%s18061_s30 + $0x2740] ss:$216 sps:$4 sm:$0xff]  }
 0x6e4   : > { %12652 = vmatpush1.bf16.xpose.msra.mxu1 %v16617_v63  ;;  %11546 = vmatprep.subr.bf16.mxu0 %v16622_v0  ;;  %v16706_v63 = vld [vmem:[%s18061_s30 + $0xdf4] ss:$216 sps:$4 sm:$0xff]  }
 0x6e5   : > { %12653 = vmatprep.subr.bf16.mxu1 %v16625_v1  ;;  %v16709_v0 = vld [vmem:[%s18061_s30 + $0x28f4] ss:$216 sps:$4 sm:$0xff]   ;;  %v16704_v1 = vld [vmem:[%s18061_s30 + $0xdf0] ss:$216 sps:$4 sm:$0xff]  }
 0x6eb   : > { %11547 = vmatpush1.bf16.xpose.msra.mxu0 %v16620_v2  ;;  %v16707_v2 = vld [vmem:[%s18061_s30 + $0x28f0] ss:$216 sps:$4 sm:$0xff]  }
 0x6ec   : > { %12654 = vmatpush1.bf16.xpose.msra.mxu1 %v16623_v32  ;;  %11548 = vmatprep.subr.bf16.mxu0 %v16628_v7  ;;  %v16712_v32 = vld [vmem:[%s18061_s30 + $0xfa4] ss:$216 sps:$4 sm:$0xff]  }
 0x6ed   : > { %12655 = vmatprep.subr.bf16.mxu1 %v16631_v60  ;;  %v16715_v7 = vld [vmem:[%s18061_s30 + $0x2aa4] ss:$216 sps:$4 sm:$0xff]   ;;  %v16710_v60 = vld [vmem:[%s18061_s30 + $0xfa0] ss:$216 sps:$4 sm:$0xff]  }
 0x6f3   : > { %11549 = vmatpush1.bf16.xpose.msra.mxu0 %v16626_v8  ;;  %v16713_v8 = vld [vmem:[%s18061_s30 + $0x2aa0] ss:$216 sps:$4 sm:$0xff]  }
 0x6f4   : > { %12656 = vmatpush1.bf16.xpose.msra.mxu1 %v16629_v9  ;;  %11550 = vmatprep.subr.bf16.mxu0 %v16634_v54  ;;  %v16718_v9 = vld [vmem:[%s18061_s30 + $0x1154] ss:$216 sps:$4 sm:$0xff]  }
 0x6f5   : > { %12657 = vmatprep.subr.bf16.mxu1 %v16637_v10  ;;  %v16721_v54 = vld [vmem:[%s18061_s30 + $0x2c54] ss:$216 sps:$4 sm:$0xff]   ;;  %v16716_v10 = vld [vmem:[%s18061_s30 + $0x1150] ss:$216 sps:$4 sm:$0xff]  }
 0x6fb   : > { %11551 = vmatpush1.bf16.xpose.msra.mxu0 %v16632_v12  ;;  %v16719_v12 = vld [vmem:[%s18061_s30 + $0x2c50] ss:$216 sps:$4 sm:$0xff]  }
 0x6fc   : > { %12658 = vmatpush1.bf16.xpose.msra.mxu1 %v16635_v14  ;;  %11552 = vmatprep.subr.bf16.mxu0 %v16640_v15  ;;  %v16724_v14 = vld [vmem:[%s18061_s30 + $0x1304] ss:$216 sps:$4 sm:$0xff]  }
 0x6fd   : > { %12659 = vmatprep.subr.bf16.mxu1 %v16643_v16  ;;  %v16727_v15 = vld [vmem:[%s18061_s30 + $0x2e04] ss:$216 sps:$4 sm:$0xff]   ;;  %v16722_v16 = vld [vmem:[%s18061_s30 + $0x1300] ss:$216 sps:$4 sm:$0xff]  }
 0x703   : > { %11553 = vmatpush1.bf16.xpose.msra.mxu0 %v16638_v19  ;;  %v16725_v19 = vld [vmem:[%s18061_s30 + $0x2e00] ss:$216 sps:$4 sm:$0xff]  }
 0x704   : > { %12660 = vmatpush1.bf16.xpose.msra.mxu1 %v16641_v20  ;;  %11554 = vmatprep.subr.bf16.mxu0 %v16646_v11  ;;  %v16730_v20 = vld [vmem:[%s18061_s30 + $0x14b4] ss:$216 sps:$4 sm:$0xff]  }
 0x705   : > { %12661 = vmatprep.subr.bf16.mxu1 %v16649_v21  ;;  %v16733_v11 = vld [vmem:[%s18061_s30 + $0x2fb4] ss:$216 sps:$4 sm:$0xff]   ;;  %v16728_v21 = vld [vmem:[%s18061_s30 + $0x14b0] ss:$216 sps:$4 sm:$0xff]  }
 0x70b   : > { %11555 = vmatpush1.bf16.xpose.msra.mxu0 %v16644_v22  ;;  %v16731_v22 = vld [vmem:[%s18061_s30 + $0x2fb0] ss:$216 sps:$4 sm:$0xff]  }
 0x70c   : > { %12662 = vmatpush1.bf16.xpose.msra.mxu1 %v16647_v13  ;;  %11556 = vmatprep.subr.bf16.mxu0 %v16652_v61  ;;  %v16736_v13 = vld [vmem:[%s18061_s30 + $0x1664] ss:$216 sps:$4 sm:$0xff]  }
 0x70d   : > { %12663 = vmatprep.subr.bf16.mxu1 %v16655_v25  ;;  %v16739_v61 = vld [vmem:[%s18061_s30 + $0x3164] ss:$216 sps:$4 sm:$0xff]   ;;  %v16734_v25 = vld [vmem:[%s18061_s30 + $0x1660] ss:$216 sps:$4 sm:$0xff]  }
 0x713   : > { %11557 = vmatpush1.bf16.xpose.msra.mxu0 %v16650_v26  ;;  %v16737_v26 = vld [vmem:[%s18061_s30 + $0x3160] ss:$216 sps:$4 sm:$0xff]  }
 0x714   : > { %12664 = vmatpush1.bf16.xpose.msra.mxu1 %v16653_v17  ;;  %11567 = vmatprep.subr.bf16.mxu0 %v16658_v28  ;;  %v16742_v17 = vld [vmem:[%s18061_s30 + $0x1814] ss:$216 sps:$4 sm:$0xff]  }
 0x715   : > { %12674 = vmatprep.subr.bf16.mxu1 %v16661_v30  ;;  %v16745_v28 = vld [vmem:[%s18061_s30 + $0x3314] ss:$216 sps:$4 sm:$0xff]   ;;  %v16740_v30 = vld [vmem:[%s18061_s30 + $0x1810] ss:$216 sps:$4 sm:$0xff]  }
 0x71a   : > { %11559 = vmatmul.mubr.bf16.vlgmr.msra.gmra.mrb[0].mxu0 %v2150_v33 }
 0x71b   : > { %12666 = vmatmul.mubr.bf16.vlgmr.msra.gmra.mrb[0].mxu1 %v2150_v33  ;;  %11568 = vmatpush1.bf16.xpose.msra.mxu0 %v16656_v5  ;;  %v16748_v33 = vld [vmem:[%s18061_s30 + $0x19c4] ss:$216 sps:$4 sm:$0xff]   ;;  %v16746_v5 = vld [vmem:[%s18061_s30 + $0x19c0] ss:$216 sps:$4 sm:$0xff]  }
 0x71c   : > { %12675 = vmatpush1.bf16.xpose.msra.mxu1 %v16659_v34  ;;  %11569 = vmatprep.subr.bf16.mxu0 %v16664_v18  ;;  %v16749_v34 = vld [vmem:[%s18061_s30 + $0x34c0] ss:$216 sps:$4 sm:$0xff]   ;;  %v16755_v18 = vld [vmem:[%s18061_s30 + $0x7c] ss:$216 sps:$4 sm:$0xff]  }
 0x71d   : > { %12676 = vmatprep.subr.bf16.mxu1 %v16667_v27  ;;  %11599 = vmatprep.mubr.bf16.mxu0 %v19132_v35  ;;  %v16758_v27 = vld [vmem:[%s18061_s30 + $0x1b7c] ss:$216 sps:$4 sm:$0xff]  }
 0x71e   : > { %12706 = vmatprep.mubr.bf16.mxu1 %v19132_v35 }
 0x723   : > { %11570 = vmatpush1.bf16.xpose.msra.mxu0 %v16662_v24  ;;  %v19198_v24 = vrot.slane %v19121_v31, %v18056_v6  ;;  %v16759_v31 = vld [vmem:[%s18061_s30 + $0x228] ss:$216 sps:$4 sm:$0xff]  }
 0x724   : > { %12677 = vmatpush1.bf16.xpose.msra.mxu1 %v16665_v36  ;;  %11571 = vmatprep.subr.bf16.mxu0 %v16670_v29  ;;  %v16753_v36 = vld [vmem:[%s18061_s30 + $0x78] ss:$216 sps:$4 sm:$0xff]  }
 0x725   : > { %12678 = vmatprep.subr.bf16.mxu1 %v16673_v38  ;;  %v16756_v29 = vld [vmem:[%s18061_s30 + $0x1b78] ss:$216 sps:$4 sm:$0xff]   ;;  %v16761_v38 = vld [vmem:[%s18061_s30 + $0x22c] ss:$216 sps:$4 sm:$0xff]  }
 0x72b   : > { %11572 = vmatpush1.bf16.xpose.msra.mxu0 %v16668_v40  ;;  %v16764_v40 = vld [vmem:[%s18061_s30 + $0x1d2c] ss:$216 sps:$4 sm:$0xff]  }
 0x72c   : > { %12679 = vmatpush1.bf16.xpose.msra.mxu1 %v16671_v41  ;;  %11573 = vmatprep.subr.bf16.mxu0 %v16676_v42  ;;  %v2153_v41 = vcombine.high %v19132_v35, %v19132_v35  ;;  %v16762_v42 = vld [vmem:[%s18061_s30 + $0x1d28] ss:$216 sps:$4 sm:$0xff]   ;;  %v16770_v35 = vld [vmem:[%s18061_s30 + $0x1edc] ss:$216 sps:$4 sm:$0xff]  }
 0x72d   : > { %12680 = vmatprep.subr.bf16.mxu1 %v16679_v43  ;;  %v16767_v43 = vld [vmem:[%s18061_s30 + $0x3dc] ss:$216 sps:$4 sm:$0xff]  }
 0x733   : > { %11574 = vmatpush1.bf16.xpose.msra.mxu0 %v16674_v44  ;;  %v16765_v44 = vld [vmem:[%s18061_s30 + $0x3d8] ss:$216 sps:$4 sm:$0xff]  }
 0x734   : > { %12681 = vmatpush1.bf16.xpose.msra.mxu1 %v16677_v37  ;;  %11575 = vmatprep.subr.bf16.mxu0 %v16682_v45  ;;  %v16768_v37 = vld [vmem:[%s18061_s30 + $0x1ed8] ss:$216 sps:$4 sm:$0xff]   ;;  %v16773_v45 = vld [vmem:[%s18061_s30 + $0x58c] ss:$216 sps:$4 sm:$0xff]  }
 0x735   : > { %12682 = vmatprep.subr.bf16.mxu1 %v16685_v46  ;;  %v16776_v46 = vld [vmem:[%s18061_s30 + $0x208c] ss:$216 sps:$4 sm:$0xff]  }
 0x73b   : > { %11576 = vmatpush1.bf16.xpose.msra.mxu0 %v16680_v47  ;;  %v16771_v47 = vld [vmem:[%s18061_s30 + $0x588] ss:$216 sps:$4 sm:$0xff]  }
 0x73c   : > { %12683 = vmatpush1.bf16.xpose.msra.mxu1 %v16683_v48  ;;  %11577 = vmatprep.subr.bf16.mxu0 %v16688_v50  ;;  %v16774_v48 = vld [vmem:[%s18061_s30 + $0x2088] ss:$216 sps:$4 sm:$0xff]   ;;  %v16779_v50 = vld [vmem:[%s18061_s30 + $0x73c] ss:$216 sps:$4 sm:$0xff]  }
 0x73d   : > { %12684 = vmatprep.subr.bf16.mxu1 %v16691_v51  ;;  %v16782_v51 = vld [vmem:[%s18061_s30 + $0x223c] ss:$216 sps:$4 sm:$0xff]  }
 0x743   : > { %11578 = vmatpush1.bf16.xpose.msra.mxu0 %v16686_v52  ;;  %v16777_v52 = vld [vmem:[%s18061_s30 + $0x738] ss:$216 sps:$4 sm:$0xff]  }
 0x744   : > { %12685 = vmatpush1.bf16.xpose.msra.mxu1 %v16689_v53  ;;  %11579 = vmatprep.subr.bf16.mxu0 %v16694_v55  ;;  %v16780_v53 = vld [vmem:[%s18061_s30 + $0x2238] ss:$216 sps:$4 sm:$0xff]   ;;  %v16785_v55 = vld [vmem:[%s18061_s30 + $0x8ec] ss:$216 sps:$4 sm:$0xff]  }
 0x745   : > { %12686 = vmatprep.subr.bf16.mxu1 %v16697_v56  ;;  %v16788_v56 = vld [vmem:[%s18061_s30 + $0x23ec] ss:$216 sps:$4 sm:$0xff]  }
 0x74b   : > { %11580 = vmatpush1.bf16.xpose.msra.mxu0 %v16692_v49  ;;  %v16783_v49 = vld [vmem:[%s18061_s30 + $0x8e8] ss:$216 sps:$4 sm:$0xff]  }
 0x74c   : > { %12687 = vmatpush1.bf16.xpose.msra.mxu1 %v16695_v57  ;;  %11581 = vmatprep.subr.bf16.mxu0 %v16700_v58  ;;  %v16786_v57 = vld [vmem:[%s18061_s30 + $0x23e8] ss:$216 sps:$4 sm:$0xff]   ;;  %v16791_v58 = vld [vmem:[%s18061_s30 + $0xa9c] ss:$216 sps:$4 sm:$0xff]  }
 0x74d   : > { %12688 = vmatprep.subr.bf16.mxu1 %v16703_v59  ;;  %v16794_v59 = vld [vmem:[%s18061_s30 + $0x259c] ss:$216 sps:$4 sm:$0xff]  }
 0x753   : > { %11582 = vmatpush1.bf16.xpose.msra.mxu0 %v16698_v39  ;;  %v16789_v39 = vld [vmem:[%s18061_s30 + $0xa98] ss:$216 sps:$4 sm:$0xff]  }
 0x754   : > { %12689 = vmatpush1.bf16.xpose.msra.mxu1 %v16701_v62  ;;  %11583 = vmatprep.subr.bf16.mxu0 %v16706_v63  ;;  %v16792_v62 = vld [vmem:[%s18061_s30 + $0x2598] ss:$216 sps:$4 sm:$0xff]   ;;  %v16797_v63 = vld [vmem:[%s18061_s30 + $0xc4c] ss:$216 sps:$4 sm:$0xff]  }
 0x755   : > { %12690 = vmatprep.subr.bf16.mxu1 %v16709_v0  ;;  %v16800_v0 = vld [vmem:[%s18061_s30 + $0x274c] ss:$216 sps:$4 sm:$0xff]  }
 0x75b   : > { %11584 = vmatpush1.bf16.xpose.msra.mxu0 %v16704_v1  ;;  %v16795_v1 = vld [vmem:[%s18061_s30 + $0xc48] ss:$216 sps:$4 sm:$0xff]  }
 0x75c   : > { %12691 = vmatpush1.bf16.xpose.msra.mxu1 %v16707_v2  ;;  %11585 = vmatprep.subr.bf16.mxu0 %v16712_v32  ;;  %v16798_v2 = vld [vmem:[%s18061_s30 + $0x2748] ss:$216 sps:$4 sm:$0xff]   ;;  %v16803_v32 = vld [vmem:[%s18061_s30 + $0xdfc] ss:$216 sps:$4 sm:$0xff]  }
 0x75d   : > { %12692 = vmatprep.subr.bf16.mxu1 %v16715_v7  ;;  %v16806_v7 = vld [vmem:[%s18061_s30 + $0x28fc] ss:$216 sps:$4 sm:$0xff]  }
 0x763   : > { %11586 = vmatpush1.bf16.xpose.msra.mxu0 %v16710_v60  ;;  %v16801_v60 = vld [vmem:[%s18061_s30 + $0xdf8] ss:$216 sps:$4 sm:$0xff]  }
 0x764   : > { %12693 = vmatpush1.bf16.xpose.msra.mxu1 %v16713_v8  ;;  %11587 = vmatprep.subr.bf16.mxu0 %v16718_v9  ;;  %v16804_v8 = vld [vmem:[%s18061_s30 + $0x28f8] ss:$216 sps:$4 sm:$0xff]   ;;  %v16809_v9 = vld [vmem:[%s18061_s30 + $0xfac] ss:$216 sps:$4 sm:$0xff]  }
 0x765   : > { %12694 = vmatprep.subr.bf16.mxu1 %v16721_v54  ;;  %v16812_v54 = vld [vmem:[%s18061_s30 + $0x2aac] ss:$216 sps:$4 sm:$0xff]  }
 0x76b   : > { %11588 = vmatpush1.bf16.xpose.msra.mxu0 %v16716_v10  ;;  %v16807_v10 = vld [vmem:[%s18061_s30 + $0xfa8] ss:$216 sps:$4 sm:$0xff]  }
 0x76c   : > { %12695 = vmatpush1.bf16.xpose.msra.mxu1 %v16719_v12  ;;  %11589 = vmatprep.subr.bf16.mxu0 %v16724_v14  ;;  %v16810_v12 = vld [vmem:[%s18061_s30 + $0x2aa8] ss:$216 sps:$4 sm:$0xff]   ;;  %v16815_v14 = vld [vmem:[%s18061_s30 + $0x115c] ss:$216 sps:$4 sm:$0xff]  }
 0x76d   : > { %12696 = vmatprep.subr.bf16.mxu1 %v16727_v15  ;;  %v16818_v15 = vld [vmem:[%s18061_s30 + $0x2c5c] ss:$216 sps:$4 sm:$0xff]  }
 0x773   : > { %11590 = vmatpush1.bf16.xpose.msra.mxu0 %v16722_v16  ;;  %v16813_v16 = vld [vmem:[%s18061_s30 + $0x1158] ss:$216 sps:$4 sm:$0xff]  }
 0x774   : > { %12697 = vmatpush1.bf16.xpose.msra.mxu1 %v16725_v19  ;;  %11591 = vmatprep.subr.bf16.mxu0 %v16730_v20  ;;  %v16816_v19 = vld [vmem:[%s18061_s30 + $0x2c58] ss:$216 sps:$4 sm:$0xff]   ;;  %v16821_v20 = vld [vmem:[%s18061_s30 + $0x130c] ss:$216 sps:$4 sm:$0xff]  }
 0x775   : > { %12698 = vmatprep.subr.bf16.mxu1 %v16733_v11  ;;  %v16824_v11 = vld [vmem:[%s18061_s30 + $0x2e0c] ss:$216 sps:$4 sm:$0xff]  }
 0x77b   : > { %11592 = vmatpush1.bf16.xpose.msra.mxu0 %v16728_v21  ;;  %v16819_v21 = vld [vmem:[%s18061_s30 + $0x1308] ss:$216 sps:$4 sm:$0xff]  }
 0x77c   : > { %12699 = vmatpush1.bf16.xpose.msra.mxu1 %v16731_v22  ;;  %11593 = vmatprep.subr.bf16.mxu0 %v16736_v13  ;;  %v16822_v22 = vld [vmem:[%s18061_s30 + $0x2e08] ss:$216 sps:$4 sm:$0xff]   ;;  %v16827_v13 = vld [vmem:[%s18061_s30 + $0x14bc] ss:$216 sps:$4 sm:$0xff]  }
 0x77d   : > { %12700 = vmatprep.subr.bf16.mxu1 %v16739_v61  ;;  %v16830_v61 = vld [vmem:[%s18061_s30 + $0x2fbc] ss:$216 sps:$4 sm:$0xff]  }
 0x783   : > { %11594 = vmatpush1.bf16.xpose.msra.mxu0 %v16734_v25  ;;  %v16825_v25 = vld [vmem:[%s18061_s30 + $0x14b8] ss:$216 sps:$4 sm:$0xff]  }
 0x784   : > { %12701 = vmatpush1.bf16.xpose.msra.mxu1 %v16737_v26  ;;  %11595 = vmatprep.subr.bf16.mxu0 %v16742_v17  ;;  %v16828_v26 = vld [vmem:[%s18061_s30 + $0x2fb8] ss:$216 sps:$4 sm:$0xff]   ;;  %v16833_v17 = vld [vmem:[%s18061_s30 + $0x166c] ss:$216 sps:$4 sm:$0xff]  }
 0x785   : > { %12702 = vmatprep.subr.bf16.mxu1 %v16745_v28  ;;  %v16836_v28 = vld [vmem:[%s18061_s30 + $0x316c] ss:$216 sps:$4 sm:$0xff]  }
 0x78b   : > { %11596 = vmatpush1.bf16.xpose.msra.mxu0 %v16740_v30  ;;  %v16831_v30 = vld [vmem:[%s18061_s30 + $0x1668] ss:$216 sps:$4 sm:$0xff]  }
 0x78c   : > { %12703 = vmatpush1.bf16.xpose.msra.mxu1 %v16743_v4  ;;  %11597 = vmatprep.subr.bf16.mxu0 %v16748_v33  ;;  %v16834_v4 = vld [vmem:[%s18061_s30 + $0x3168] ss:$216 sps:$4 sm:$0xff]   ;;  %v16839_v33 = vld [vmem:[%s18061_s30 + $0x181c] ss:$216 sps:$4 sm:$0xff]  }
 0x78d   : > { %12704 = vmatprep.subr.bf16.mxu1 %v16751_v23  ;;  %v16842_v23 = vld [vmem:[%s18061_s30 + $0x331c] ss:$216 sps:$4 sm:$0xff]  }
 0x793   : > { %11598 = vmatpush1.bf16.xpose.msra.mxu0 %v16746_v5  ;;  %v16837_v5 = vld [vmem:[%s18061_s30 + $0x1818] ss:$216 sps:$4 sm:$0xff]  }
 0x794   : > { %12705 = vmatpush1.bf16.xpose.msra.mxu1 %v16749_v34  ;;  %11608 = vmatprep.subr.bf16.mxu0 %v16755_v18  ;;  %v16840_v34 = vld [vmem:[%s18061_s30 + $0x3318] ss:$216 sps:$4 sm:$0xff]   ;;  %v16845_v18 = vld [vmem:[%s18061_s30 + $0x19cc] ss:$216 sps:$4 sm:$0xff]  }
 0x795   : > { %12715 = vmatprep.subr.bf16.mxu1 %v16758_v27  ;;  %v16848_v27 = vld [vmem:[%s18061_s30 + $0x34cc] ss:$216 sps:$4 sm:$0xff]  }
 0x79a   : > { %11600 = vmatmul.mubr.bf16.vlgmr.msra.gmra.mrb[0].mxu0 %v19198_v24 }
 0x79b   : > { %12707 = vmatmul.mubr.bf16.vlgmr.msra.gmra.mrb[0].mxu1 %v19198_v24  ;;  %11609 = vmatpush1.bf16.xpose.msra.mxu0 %v16753_v36  ;;  %v16843_v36 = vld [vmem:[%s18061_s30 + $0x19c8] ss:$216 sps:$4 sm:$0xff]  }
 0x79c   : > { %12716 = vmatpush1.bf16.xpose.msra.mxu1 %v16756_v29  ;;  %11610 = vmatprep.subr.bf16.mxu0 %v16761_v38  ;;  %v16846_v29 = vld [vmem:[%s18061_s30 + $0x34c8] ss:$216 sps:$4 sm:$0xff]   ;;  %v16851_v38 = vld [vmem:[%s18061_s30 + $0x84] ss:$216 sps:$4 sm:$0xff]  }
 0x79d   : > { %12717 = vmatprep.subr.bf16.mxu1 %v16764_v40  ;;  %11640 = vmatprep.mubr.bf16.mxu0 %v2153_v41  ;;  %v16854_v40 = vld [vmem:[%s18061_s30 + $0x1b84] ss:$216 sps:$4 sm:$0xff]  }
 0x79e   : > { %12747 = vmatprep.mubr.bf16.mxu1 %v2153_v41  ;;  %v19271_v41 = vld [vmem:[%s20164_s0 + $0x20] sm:$0xff] }
 0x7a3   : > { %11611 = vmatpush1.bf16.xpose.msra.mxu0 %v16759_v31  ;;  %v19275_v31 = vrot.slane %v19271_v41, %v18056_v6 }
 0x7a4   : > { %12718 = vmatpush1.bf16.xpose.msra.mxu1 %v16762_v42  ;;  %11612 = vmatprep.subr.bf16.mxu0 %v16767_v43  ;;  %v2151_v42 = vcombine.high %v19198_v24, %v19198_v24  ;;  %v16855_v24 = vld [vmem:[%s18061_s30 + $0x230] ss:$216 sps:$4 sm:$0xff]  }
 0x7a5   : > { %12719 = vmatprep.subr.bf16.mxu1 %v16770_v35  ;;  %v2169_v43 = vcombine.high %v19275_v31, %v19275_v31  ;;  %v16849_v35 = vld [vmem:[%s18061_s30 + $0x80] ss:$216 sps:$4 sm:$0xff]  }
 0x7ab   : > { %11613 = vmatpush1.bf16.xpose.msra.mxu0 %v16765_v44  ;;  %v16852_v44 = vld [vmem:[%s18061_s30 + $0x1b80] ss:$216 sps:$4 sm:$0xff]  }
 0x7ac   : > { %12720 = vmatpush1.bf16.xpose.msra.mxu1 %v16768_v37  ;;  %11614 = vmatprep.subr.bf16.mxu0 %v16773_v45  ;;  %v16857_v37 = vld [vmem:[%s18061_s30 + $0x234] ss:$216 sps:$4 sm:$0xff]  }
 0x7ad   : > { %12721 = vmatprep.subr.bf16.mxu1 %v16776_v46  ;;  %v16860_v45 = vld [vmem:[%s18061_s30 + $0x1d34] ss:$216 sps:$4 sm:$0xff]   ;;  %v19286_v46 = vrot.slane %v2169_v43, %v18056_v6 }
 0x7ae   : > { %v16941_v43 = vld [vmem:[%s18061_s30 + $0x19d4] ss:$216 sps:$4 sm:$0xff]  }
 0x7b3   : > { %11615 = vmatpush1.bf16.xpose.msra.mxu0 %v16771_v47  ;;  %v16858_v47 = vld [vmem:[%s18061_s30 + $0x1d30] ss:$216 sps:$4 sm:$0xff]  }
 0x7b4   : > { %12722 = vmatpush1.bf16.xpose.msra.mxu1 %v16774_v48  ;;  %11616 = vmatprep.subr.bf16.mxu0 %v16779_v50  ;;  %v16863_v48 = vld [vmem:[%s18061_s30 + $0x3e4] ss:$216 sps:$4 sm:$0xff]  }
 0x7b5   : > { %12723 = vmatprep.subr.bf16.mxu1 %v16782_v51  ;;  %v16866_v50 = vld [vmem:[%s18061_s30 + $0x1ee4] ss:$216 sps:$4 sm:$0xff]   ;;  %v16861_v51 = vld [vmem:[%s18061_s30 + $0x3e0] ss:$216 sps:$4 sm:$0xff]  }
 0x7bb   : > { %11617 = vmatpush1.bf16.xpose.msra.mxu0 %v16777_v52  ;;  %v16864_v52 = vld [vmem:[%s18061_s30 + $0x1ee0] ss:$216 sps:$4 sm:$0xff]  }
 0x7bc   : > { %12724 = vmatpush1.bf16.xpose.msra.mxu1 %v16780_v53  ;;  %11618 = vmatprep.subr.bf16.mxu0 %v16785_v55  ;;  %v16869_v53 = vld [vmem:[%s18061_s30 + $0x594] ss:$216 sps:$4 sm:$0xff]  }
 0x7bd   : > { %12725 = vmatprep.subr.bf16.mxu1 %v16788_v56  ;;  %v16872_v55 = vld [vmem:[%s18061_s30 + $0x2094] ss:$216 sps:$4 sm:$0xff]   ;;  %v16867_v56 = vld [vmem:[%s18061_s30 + $0x590] ss:$216 sps:$4 sm:$0xff]  }
 0x7c3   : > { %11619 = vmatpush1.bf16.xpose.msra.mxu0 %v16783_v49  ;;  %v16870_v49 = vld [vmem:[%s18061_s30 + $0x2090] ss:$216 sps:$4 sm:$0xff]  }
 0x7c4   : > { %12726 = vmatpush1.bf16.xpose.msra.mxu1 %v16786_v57  ;;  %11620 = vmatprep.subr.bf16.mxu0 %v16791_v58  ;;  %v16875_v57 = vld [vmem:[%s18061_s30 + $0x744] ss:$216 sps:$4 sm:$0xff]  }
 0x7c5   : > { %12727 = vmatprep.subr.bf16.mxu1 %v16794_v59  ;;  %v16878_v58 = vld [vmem:[%s18061_s30 + $0x2244] ss:$216 sps:$4 sm:$0xff]   ;;  %v16873_v59 = vld [vmem:[%s18061_s30 + $0x740] ss:$216 sps:$4 sm:$0xff]  }
 0x7cb   : > { %11621 = vmatpush1.bf16.xpose.msra.mxu0 %v16789_v39  ;;  %v16876_v39 = vld [vmem:[%s18061_s30 + $0x2240] ss:$216 sps:$4 sm:$0xff]  }
 0x7cc   : > { %12728 = vmatpush1.bf16.xpose.msra.mxu1 %v16792_v62  ;;  %11622 = vmatprep.subr.bf16.mxu0 %v16797_v63  ;;  %v16881_v62 = vld [vmem:[%s18061_s30 + $0x8f4] ss:$216 sps:$4 sm:$0xff]  }
 0x7cd   : > { %12729 = vmatprep.subr.bf16.mxu1 %v16800_v0  ;;  %v16884_v63 = vld [vmem:[%s18061_s30 + $0x23f4] ss:$216 sps:$4 sm:$0xff]   ;;  %v16879_v0 = vld [vmem:[%s18061_s30 + $0x8f0] ss:$216 sps:$4 sm:$0xff]  }
 0x7d3   : > { %11623 = vmatpush1.bf16.xpose.msra.mxu0 %v16795_v1  ;;  %v16882_v1 = vld [vmem:[%s18061_s30 + $0x23f0] ss:$216 sps:$4 sm:$0xff]  }
 0x7d4   : > { %12730 = vmatpush1.bf16.xpose.msra.mxu1 %v16798_v2  ;;  %11624 = vmatprep.subr.bf16.mxu0 %v16803_v32  ;;  %v16887_v2 = vld [vmem:[%s18061_s30 + $0xaa4] ss:$216 sps:$4 sm:$0xff]  }
 0x7d5   : > { %12731 = vmatprep.subr.bf16.mxu1 %v16806_v7  ;;  %v16890_v32 = vld [vmem:[%s18061_s30 + $0x25a4] ss:$216 sps:$4 sm:$0xff]   ;;  %v16885_v7 = vld [vmem:[%s18061_s30 + $0xaa0] ss:$216 sps:$4 sm:$0xff]  }
 0x7db   : > { %11625 = vmatpush1.bf16.xpose.msra.mxu0 %v16801_v60  ;;  %v16888_v60 = vld [vmem:[%s18061_s30 + $0x25a0] ss:$216 sps:$4 sm:$0xff]  }
 0x7dc   : > { %12732 = vmatpush1.bf16.xpose.msra.mxu1 %v16804_v8  ;;  %11626 = vmatprep.subr.bf16.mxu0 %v16809_v9  ;;  %v16893_v8 = vld [vmem:[%s18061_s30 + $0xc54] ss:$216 sps:$4 sm:$0xff]  }
 0x7dd   : > { %12733 = vmatprep.subr.bf16.mxu1 %v16812_v54  ;;  %v16896_v9 = vld [vmem:[%s18061_s30 + $0x2754] ss:$216 sps:$4 sm:$0xff]   ;;  %v16891_v54 = vld [vmem:[%s18061_s30 + $0xc50] ss:$216 sps:$4 sm:$0xff]  }
 0x7e3   : > { %11627 = vmatpush1.bf16.xpose.msra.mxu0 %v16807_v10  ;;  %v16894_v10 = vld [vmem:[%s18061_s30 + $0x2750] ss:$216 sps:$4 sm:$0xff]  }
 0x7e4   : > { %12734 = vmatpush1.bf16.xpose.msra.mxu1 %v16810_v12  ;;  %11628 = vmatprep.subr.bf16.mxu0 %v16815_v14  ;;  %v16899_v12 = vld [vmem:[%s18061_s30 + $0xe04] ss:$216 sps:$4 sm:$0xff]  }
 0x7e5   : > { %12735 = vmatprep.subr.bf16.mxu1 %v16818_v15  ;;  %v16902_v14 = vld [vmem:[%s18061_s30 + $0x2904] ss:$216 sps:$4 sm:$0xff]   ;;  %v16897_v15 = vld [vmem:[%s18061_s30 + $0xe00] ss:$216 sps:$4 sm:$0xff]  }
 0x7eb   : > { %11629 = vmatpush1.bf16.xpose.msra.mxu0 %v16813_v16  ;;  %v16900_v16 = vld [vmem:[%s18061_s30 + $0x2900] ss:$216 sps:$4 sm:$0xff]  }
 0x7ec   : > { %12736 = vmatpush1.bf16.xpose.msra.mxu1 %v16816_v19  ;;  %11630 = vmatprep.subr.bf16.mxu0 %v16821_v20  ;;  %v16905_v19 = vld [vmem:[%s18061_s30 + $0xfb4] ss:$216 sps:$4 sm:$0xff]  }
 0x7ed   : > { %12737 = vmatprep.subr.bf16.mxu1 %v16824_v11  ;;  %v16908_v20 = vld [vmem:[%s18061_s30 + $0x2ab4] ss:$216 sps:$4 sm:$0xff]   ;;  %v16903_v11 = vld [vmem:[%s18061_s30 + $0xfb0] ss:$216 sps:$4 sm:$0xff]  }
 0x7f3   : > { %11631 = vmatpush1.bf16.xpose.msra.mxu0 %v16819_v21  ;;  %v16906_v21 = vld [vmem:[%s18061_s30 + $0x2ab0] ss:$216 sps:$4 sm:$0xff]  }
 0x7f4   : > { %12738 = vmatpush1.bf16.xpose.msra.mxu1 %v16822_v22  ;;  %11632 = vmatprep.subr.bf16.mxu0 %v16827_v13  ;;  %v16911_v22 = vld [vmem:[%s18061_s30 + $0x1164] ss:$216 sps:$4 sm:$0xff]  }
 0x7f5   : > { %12739 = vmatprep.subr.bf16.mxu1 %v16830_v61  ;;  %v16914_v13 = vld [vmem:[%s18061_s30 + $0x2c64] ss:$216 sps:$4 sm:$0xff]   ;;  %v16909_v61 = vld [vmem:[%s18061_s30 + $0x1160] ss:$216 sps:$4 sm:$0xff]  }
 0x7fb   : > { %11633 = vmatpush1.bf16.xpose.msra.mxu0 %v16825_v25  ;;  %v16912_v25 = vld [vmem:[%s18061_s30 + $0x2c60] ss:$216 sps:$4 sm:$0xff]  }
 0x7fc   : > { %12740 = vmatpush1.bf16.xpose.msra.mxu1 %v16828_v26  ;;  %11634 = vmatprep.subr.bf16.mxu0 %v16833_v17  ;;  %v16917_v26 = vld [vmem:[%s18061_s30 + $0x1314] ss:$216 sps:$4 sm:$0xff]  }
 0x7fd   : > { %12741 = vmatprep.subr.bf16.mxu1 %v16836_v28  ;;  %v16920_v17 = vld [vmem:[%s18061_s30 + $0x2e14] ss:$216 sps:$4 sm:$0xff]   ;;  %v16915_v28 = vld [vmem:[%s18061_s30 + $0x1310] ss:$216 sps:$4 sm:$0xff]  }
 0x803   : > { %11635 = vmatpush1.bf16.xpose.msra.mxu0 %v16831_v30  ;;  %v16918_v30 = vld [vmem:[%s18061_s30 + $0x2e10] ss:$216 sps:$4 sm:$0xff]  }
 0x804   : > { %12742 = vmatpush1.bf16.xpose.msra.mxu1 %v16834_v4  ;;  %11636 = vmatprep.subr.bf16.mxu0 %v16839_v33  ;;  %v16923_v4 = vld [vmem:[%s18061_s30 + $0x14c4] ss:$216 sps:$4 sm:$0xff]  }
 0x805   : > { %12743 = vmatprep.subr.bf16.mxu1 %v16842_v23  ;;  %v16926_v33 = vld [vmem:[%s18061_s30 + $0x2fc4] ss:$216 sps:$4 sm:$0xff]   ;;  %v16921_v23 = vld [vmem:[%s18061_s30 + $0x14c0] ss:$216 sps:$4 sm:$0xff]  }
 0x80b   : > { %11637 = vmatpush1.bf16.xpose.msra.mxu0 %v16837_v5  ;;  %v16924_v5 = vld [vmem:[%s18061_s30 + $0x2fc0] ss:$216 sps:$4 sm:$0xff]  }
 0x80c   : > { %12744 = vmatpush1.bf16.xpose.msra.mxu1 %v16840_v34  ;;  %11638 = vmatprep.subr.bf16.mxu0 %v16845_v18  ;;  %v16929_v34 = vld [vmem:[%s18061_s30 + $0x1674] ss:$216 sps:$4 sm:$0xff]  }
 0x80d   : > { %12745 = vmatprep.subr.bf16.mxu1 %v16848_v27  ;;  %v16932_v18 = vld [vmem:[%s18061_s30 + $0x3174] ss:$216 sps:$4 sm:$0xff]   ;;  %v16927_v27 = vld [vmem:[%s18061_s30 + $0x1670] ss:$216 sps:$4 sm:$0xff]  }
 0x813   : > { %11639 = vmatpush1.bf16.xpose.msra.mxu0 %v16843_v36  ;;  %v16930_v36 = vld [vmem:[%s18061_s30 + $0x3170] ss:$216 sps:$4 sm:$0xff]  }
 0x814   : > { %12746 = vmatpush1.bf16.xpose.msra.mxu1 %v16846_v29  ;;  %11649 = vmatprep.subr.bf16.mxu0 %v16851_v38  ;;  %v16935_v29 = vld [vmem:[%s18061_s30 + $0x1824] ss:$216 sps:$4 sm:$0xff]  }
 0x815   : > { %12756 = vmatprep.subr.bf16.mxu1 %v16854_v40  ;;  %v16938_v38 = vld [vmem:[%s18061_s30 + $0x3324] ss:$216 sps:$4 sm:$0xff]   ;;  %v16933_v40 = vld [vmem:[%s18061_s30 + $0x1820] ss:$216 sps:$4 sm:$0xff]  }
 0x81a   : > { %11641 = vmatmul.mubr.bf16.vlgmr.msra.gmra.mrb[0].mxu0 %v2151_v42 }
 0x81b   : > { %12748 = vmatmul.mubr.bf16.vlgmr.msra.gmra.mrb[0].mxu1 %v2151_v42  ;;  %11650 = vmatpush1.bf16.xpose.msra.mxu0 %v16849_v35  ;;  %v16936_v42 = vld [vmem:[%s18061_s30 + $0x3320] ss:$216 sps:$4 sm:$0xff]   ;;  %v16944_v35 = vld [vmem:[%s18061_s30 + $0x34d4] ss:$216 sps:$4 sm:$0xff]  }
 0x81c   : > { %12757 = vmatpush1.bf16.xpose.msra.mxu1 %v16852_v44  ;;  %11651 = vmatprep.subr.bf16.mxu0 %v16857_v37  ;;  %v16939_v44 = vld [vmem:[%s18061_s30 + $0x19d0] ss:$216 sps:$4 sm:$0xff]  }
 0x81d   : > { %12758 = vmatprep.subr.bf16.mxu1 %v16860_v45  ;;  %11681 = vmatprep.mubr.bf16.mxu0 %v19286_v46  ;;  %v16942_v37 = vld [vmem:[%s18061_s30 + $0x34d0] ss:$216 sps:$4 sm:$0xff]   ;;  %v16947_v45 = vld [vmem:[%s18061_s30 + $0x8c] ss:$216 sps:$4 sm:$0xff]  }
 0x81e   : > { %12788 = vmatprep.mubr.bf16.mxu1 %v19286_v46 }
 0x823   : > { %11652 = vmatpush1.bf16.xpose.msra.mxu0 %v16855_v24  ;;  %v16950_v24 = vld [vmem:[%s18061_s30 + $0x1b8c] ss:$216 sps:$4 sm:$0xff]  }
 0x824   : > { %12759 = vmatpush1.bf16.xpose.msra.mxu1 %v16858_v47  ;;  %11653 = vmatprep.subr.bf16.mxu0 %v16863_v48  ;;  %v19352_v47 = vrot.slane %v19275_v31, %v18056_v6  ;;  %v16945_v48 = vld [vmem:[%s18061_s30 + $0x88] ss:$216 sps:$4 sm:$0xff]   ;;  %v16951_v31 = vld [vmem:[%s18061_s30 + $0x238] ss:$216 sps:$4 sm:$0xff]  }
 0x825   : > { %12760 = vmatprep.subr.bf16.mxu1 %v16866_v50  ;;  %v16948_v50 = vld [vmem:[%s18061_s30 + $0x1b88] ss:$216 sps:$4 sm:$0xff]  }
 0x82b   : > { %11654 = vmatpush1.bf16.xpose.msra.mxu0 %v16861_v51  ;;  %v16953_v51 = vld [vmem:[%s18061_s30 + $0x23c] ss:$216 sps:$4 sm:$0xff]  }
 0x82c   : > { %12761 = vmatpush1.bf16.xpose.msra.mxu1 %v16864_v52  ;;  %11655 = vmatprep.subr.bf16.mxu0 %v16869_v53  ;;  %v16956_v52 = vld [vmem:[%s18061_s30 + $0x1d3c] ss:$216 sps:$4 sm:$0xff]   ;;  %v2201_v53 = vcombine.high %v19286_v46, %v19286_v46  ;;  %v16962_v46 = vld [vmem:[%s18061_s30 + $0x1eec] ss:$216 sps:$4 sm:$0xff]  }
 0x82d   : > { %12762 = vmatprep.subr.bf16.mxu1 %v16872_v55  ;;  %v16954_v55 = vld [vmem:[%s18061_s30 + $0x1d38] ss:$216 sps:$4 sm:$0xff]  }
 0x833   : > { %11656 = vmatpush1.bf16.xpose.msra.mxu0 %v16867_v56  ;;  %v16959_v56 = vld [vmem:[%s18061_s30 + $0x3ec] ss:$216 sps:$4 sm:$0xff]  }
 0x834   : > { %12763 = vmatpush1.bf16.xpose.msra.mxu1 %v16870_v49  ;;  %11657 = vmatprep.subr.bf16.mxu0 %v16875_v57  ;;  %v16957_v49 = vld [vmem:[%s18061_s30 + $0x3e8] ss:$216 sps:$4 sm:$0xff]  }
 0x835   : > { %12764 = vmatprep.subr.bf16.mxu1 %v16878_v58  ;;  %v16960_v57 = vld [vmem:[%s18061_s30 + $0x1ee8] ss:$216 sps:$4 sm:$0xff]   ;;  %v16965_v58 = vld [vmem:[%s18061_s30 + $0x59c] ss:$216 sps:$4 sm:$0xff]  }
 0x83b   : > { %11658 = vmatpush1.bf16.xpose.msra.mxu0 %v16873_v59  ;;  %v16968_v59 = vld [vmem:[%s18061_s30 + $0x209c] ss:$216 sps:$4 sm:$0xff]  }
 0x83c   : > { %12765 = vmatpush1.bf16.xpose.msra.mxu1 %v16876_v39  ;;  %11659 = vmatprep.subr.bf16.mxu0 %v16881_v62  ;;  %v16963_v39 = vld [vmem:[%s18061_s30 + $0x598] ss:$216 sps:$4 sm:$0xff]  }
 0x83d   : > { %12766 = vmatprep.subr.bf16.mxu1 %v16884_v63  ;;  %v16966_v62 = vld [vmem:[%s18061_s30 + $0x2098] ss:$216 sps:$4 sm:$0xff]   ;;  %v16971_v63 = vld [vmem:[%s18061_s30 + $0x74c] ss:$216 sps:$4 sm:$0xff]  }
 0x843   : > { %11660 = vmatpush1.bf16.xpose.msra.mxu0 %v16879_v0  ;;  %v16974_v0 = vld [vmem:[%s18061_s30 + $0x224c] ss:$216 sps:$4 sm:$0xff]  }
 0x844   : > { %12767 = vmatpush1.bf16.xpose.msra.mxu1 %v16882_v1  ;;  %11661 = vmatprep.subr.bf16.mxu0 %v16887_v2  ;;  %v16969_v1 = vld [vmem:[%s18061_s30 + $0x748] ss:$216 sps:$4 sm:$0xff]  }
 0x845   : > { %12768 = vmatprep.subr.bf16.mxu1 %v16890_v32  ;;  %v16972_v2 = vld [vmem:[%s18061_s30 + $0x2248] ss:$216 sps:$4 sm:$0xff]   ;;  %v16977_v32 = vld [vmem:[%s18061_s30 + $0x8fc] ss:$216 sps:$4 sm:$0xff]  }
 0x84b   : > { %11662 = vmatpush1.bf16.xpose.msra.mxu0 %v16885_v7  ;;  %v16980_v7 = vld [vmem:[%s18061_s30 + $0x23fc] ss:$216 sps:$4 sm:$0xff]  }
 0x84c   : > { %12769 = vmatpush1.bf16.xpose.msra.mxu1 %v16888_v60  ;;  %11663 = vmatprep.subr.bf16.mxu0 %v16893_v8  ;;  %v16975_v60 = vld [vmem:[%s18061_s30 + $0x8f8] ss:$216 sps:$4 sm:$0xff]  }
 0x84d   : > { %12770 = vmatprep.subr.bf16.mxu1 %v16896_v9  ;;  %v16978_v8 = vld [vmem:[%s18061_s30 + $0x23f8] ss:$216 sps:$4 sm:$0xff]   ;;  %v16983_v9 = vld [vmem:[%s18061_s30 + $0xaac] ss:$216 sps:$4 sm:$0xff]  }
 0x853   : > { %11664 = vmatpush1.bf16.xpose.msra.mxu0 %v16891_v54  ;;  %v16986_v54 = vld [vmem:[%s18061_s30 + $0x25ac] ss:$216 sps:$4 sm:$0xff]  }
 0x854   : > { %12771 = vmatpush1.bf16.xpose.msra.mxu1 %v16894_v10  ;;  %11665 = vmatprep.subr.bf16.mxu0 %v16899_v12  ;;  %v16981_v10 = vld [vmem:[%s18061_s30 + $0xaa8] ss:$216 sps:$4 sm:$0xff]  }
 0x855   : > { %12772 = vmatprep.subr.bf16.mxu1 %v16902_v14  ;;  %v16984_v12 = vld [vmem:[%s18061_s30 + $0x25a8] ss:$216 sps:$4 sm:$0xff]   ;;  %v16989_v14 = vld [vmem:[%s18061_s30 + $0xc5c] ss:$216 sps:$4 sm:$0xff]  }
 0x85b   : > { %11666 = vmatpush1.bf16.xpose.msra.mxu0 %v16897_v15  ;;  %v16992_v15 = vld [vmem:[%s18061_s30 + $0x275c] ss:$216 sps:$4 sm:$0xff]  }
 0x85c   : > { %12773 = vmatpush1.bf16.xpose.msra.mxu1 %v16900_v16  ;;  %11667 = vmatprep.subr.bf16.mxu0 %v16905_v19  ;;  %v16987_v16 = vld [vmem:[%s18061_s30 + $0xc58] ss:$216 sps:$4 sm:$0xff]  }
 0x85d   : > { %12774 = vmatprep.subr.bf16.mxu1 %v16908_v20  ;;  %v16990_v19 = vld [vmem:[%s18061_s30 + $0x2758] ss:$216 sps:$4 sm:$0xff]   ;;  %v16995_v20 = vld [vmem:[%s18061_s30 + $0xe0c] ss:$216 sps:$4 sm:$0xff]  }
 0x863   : > { %11668 = vmatpush1.bf16.xpose.msra.mxu0 %v16903_v11  ;;  %v16998_v11 = vld [vmem:[%s18061_s30 + $0x290c] ss:$216 sps:$4 sm:$0xff]  }
 0x864   : > { %12775 = vmatpush1.bf16.xpose.msra.mxu1 %v16906_v21  ;;  %11669 = vmatprep.subr.bf16.mxu0 %v16911_v22  ;;  %v16993_v21 = vld [vmem:[%s18061_s30 + $0xe08] ss:$216 sps:$4 sm:$0xff]  }
 0x865   : > { %12776 = vmatprep.subr.bf16.mxu1 %v16914_v13  ;;  %v16996_v22 = vld [vmem:[%s18061_s30 + $0x2908] ss:$216 sps:$4 sm:$0xff]   ;;  %v17001_v13 = vld [vmem:[%s18061_s30 + $0xfbc] ss:$216 sps:$4 sm:$0xff]  }
 0x86b   : > { %11670 = vmatpush1.bf16.xpose.msra.mxu0 %v16909_v61  ;;  %v17004_v61 = vld [vmem:[%s18061_s30 + $0x2abc] ss:$216 sps:$4 sm:$0xff]  }
 0x86c   : > { %12777 = vmatpush1.bf16.xpose.msra.mxu1 %v16912_v25  ;;  %11671 = vmatprep.subr.bf16.mxu0 %v16917_v26  ;;  %v16999_v25 = vld [vmem:[%s18061_s30 + $0xfb8] ss:$216 sps:$4 sm:$0xff]  }
 0x86d   : > { %12778 = vmatprep.subr.bf16.mxu1 %v16920_v17  ;;  %v17002_v26 = vld [vmem:[%s18061_s30 + $0x2ab8] ss:$216 sps:$4 sm:$0xff]   ;;  %v17007_v17 = vld [vmem:[%s18061_s30 + $0x116c] ss:$216 sps:$4 sm:$0xff]  }
 0x873   : > { %11672 = vmatpush1.bf16.xpose.msra.mxu0 %v16915_v28  ;;  %v17010_v28 = vld [vmem:[%s18061_s30 + $0x2c6c] ss:$216 sps:$4 sm:$0xff]  }
 0x874   : > { %12779 = vmatpush1.bf16.xpose.msra.mxu1 %v16918_v30  ;;  %11673 = vmatprep.subr.bf16.mxu0 %v16923_v4  ;;  %v17005_v30 = vld [vmem:[%s18061_s30 + $0x1168] ss:$216 sps:$4 sm:$0xff]  }
 0x875   : > { %12780 = vmatprep.subr.bf16.mxu1 %v16926_v33  ;;  %v17008_v4 = vld [vmem:[%s18061_s30 + $0x2c68] ss:$216 sps:$4 sm:$0xff]   ;;  %v17013_v33 = vld [vmem:[%s18061_s30 + $0x131c] ss:$216 sps:$4 sm:$0xff]  }
 0x87b   : > { %11674 = vmatpush1.bf16.xpose.msra.mxu0 %v16921_v23  ;;  %v17016_v23 = vld [vmem:[%s18061_s30 + $0x2e1c] ss:$216 sps:$4 sm:$0xff]  }
 0x87c   : > { %12781 = vmatpush1.bf16.xpose.msra.mxu1 %v16924_v5  ;;  %11675 = vmatprep.subr.bf16.mxu0 %v16929_v34  ;;  %v17011_v5 = vld [vmem:[%s18061_s30 + $0x1318] ss:$216 sps:$4 sm:$0xff]  }
 0x87d   : > { %12782 = vmatprep.subr.bf16.mxu1 %v16932_v18  ;;  %v17014_v34 = vld [vmem:[%s18061_s30 + $0x2e18] ss:$216 sps:$4 sm:$0xff]   ;;  %v17019_v18 = vld [vmem:[%s18061_s30 + $0x14cc] ss:$216 sps:$4 sm:$0xff]  }
 0x883   : > { %11676 = vmatpush1.bf16.xpose.msra.mxu0 %v16927_v27  ;;  %v17022_v27 = vld [vmem:[%s18061_s30 + $0x2fcc] ss:$216 sps:$4 sm:$0xff]  }
 0x884   : > { %12783 = vmatpush1.bf16.xpose.msra.mxu1 %v16930_v36  ;;  %11677 = vmatprep.subr.bf16.mxu0 %v16935_v29  ;;  %v17017_v36 = vld [vmem:[%s18061_s30 + $0x14c8] ss:$216 sps:$4 sm:$0xff]  }
 0x885   : > { %12784 = vmatprep.subr.bf16.mxu1 %v16938_v38  ;;  %v17020_v29 = vld [vmem:[%s18061_s30 + $0x2fc8] ss:$216 sps:$4 sm:$0xff]   ;;  %v17025_v38 = vld [vmem:[%s18061_s30 + $0x167c] ss:$216 sps:$4 sm:$0xff]  }
 0x88b   : > { %11678 = vmatpush1.bf16.xpose.msra.mxu0 %v16933_v40  ;;  %v17028_v40 = vld [vmem:[%s18061_s30 + $0x317c] ss:$216 sps:$4 sm:$0xff]  }
 0x88c   : > { %12785 = vmatpush1.bf16.xpose.msra.mxu1 %v16936_v42  ;;  %11679 = vmatprep.subr.bf16.mxu0 %v16941_v43  ;;  %v17023_v42 = vld [vmem:[%s18061_s30 + $0x1678] ss:$216 sps:$4 sm:$0xff]  }
 0x88d   : > { %12786 = vmatprep.subr.bf16.mxu1 %v16944_v35  ;;  %v17026_v43 = vld [vmem:[%s18061_s30 + $0x3178] ss:$216 sps:$4 sm:$0xff]   ;;  %v17031_v35 = vld [vmem:[%s18061_s30 + $0x182c] ss:$216 sps:$4 sm:$0xff]  }
 0x893   : > { %11680 = vmatpush1.bf16.xpose.msra.mxu0 %v16939_v44  ;;  %v17034_v44 = vld [vmem:[%s18061_s30 + $0x332c] ss:$216 sps:$4 sm:$0xff]  }
 0x894   : > { %12787 = vmatpush1.bf16.xpose.msra.mxu1 %v16942_v37  ;;  %11690 = vmatprep.subr.bf16.mxu0 %v16947_v45  ;;  %v17029_v37 = vld [vmem:[%s18061_s30 + $0x1828] ss:$216 sps:$4 sm:$0xff]  }
 0x895   : > { %12797 = vmatprep.subr.bf16.mxu1 %v16950_v24  ;;  %v17032_v45 = vld [vmem:[%s18061_s30 + $0x3328] ss:$216 sps:$4 sm:$0xff]   ;;  %v17037_v24 = vld [vmem:[%s18061_s30 + $0x19dc] ss:$216 sps:$4 sm:$0xff]  }
 0x89a   : > { %11682 = vmatmul.mubr.bf16.vlgmr.msra.gmra.mrb[0].mxu0 %v19352_v47 }
 0x89b   : > { %12789 = vmatmul.mubr.bf16.vlgmr.msra.gmra.mrb[0].mxu1 %v19352_v47  ;;  %11691 = vmatpush1.bf16.xpose.msra.mxu0 %v16945_v48  ;;  %v17040_v48 = vld [vmem:[%s18061_s30 + $0x34dc] ss:$216 sps:$4 sm:$0xff]  }
 0x89c   : > { %12798 = vmatpush1.bf16.xpose.msra.mxu1 %v16948_v50  ;;  %11692 = vmatprep.subr.bf16.mxu0 %v16953_v51  ;;  %v17035_v50 = vld [vmem:[%s18061_s30 + $0x19d8] ss:$216 sps:$4 sm:$0xff]  }
 0x89d   : > { %12799 = vmatprep.subr.bf16.mxu1 %v16956_v52  ;;  %11722 = vmatprep.mubr.bf16.mxu0 %v2201_v53  ;;  %v17038_v51 = vld [vmem:[%s18061_s30 + $0x34d8] ss:$216 sps:$4 sm:$0xff]   ;;  %v17043_v52 = vld [vmem:[%s18061_s30 + $0x94] ss:$216 sps:$4 sm:$0xff]  }
 0x89e   : > { %12829 = vmatprep.mubr.bf16.mxu1 %v2201_v53  ;;  %v17046_v53 = vld [vmem:[%s18061_s30 + $0x1b94] ss:$216 sps:$4 sm:$0xff]  }
 0x8a3   : > { %11693 = vmatpush1.bf16.xpose.msra.mxu0 %v16951_v31  ;;  %v2154_v31 = vcombine.high %v19271_v41, %v19271_v41  ;;  %v17049_v41 = vld [vmem:[%s18061_s30 + $0x244] ss:$216 sps:$4 sm:$0xff]  }
 0x8a4   : > { %12800 = vmatpush1.bf16.xpose.msra.mxu1 %v16954_v55  ;;  %11694 = vmatprep.subr.bf16.mxu0 %v16959_v56  ;;  %v2199_v56 = vcombine.high %v19352_v47, %v19352_v47  ;;  %v17047_v47 = vld [vmem:[%s18061_s30 + $0x240] ss:$216 sps:$4 sm:$0xff]  }
 0x8a5   : > { %12801 = vmatprep.subr.bf16.mxu1 %v16962_v46  ;;  %v19425_v55 = vrot.slane %v2154_v31, %v18056_v6  ;;  %v17128_v31 = vld [vmem:[%s18061_s30 + $0x3330] ss:$216 sps:$4 sm:$0xff]  }
 0x8a7   : > { %v2170_v46 = vcombine.high %v19425_v55, %v19425_v55 }
 0x8ab   : > { %11695 = vmatpush1.bf16.xpose.msra.mxu0 %v16957_v49  ;;  %v17041_v49 = vld [vmem:[%s18061_s30 + $0x90] ss:$216 sps:$4 sm:$0xff]  }
 0x8ac   : > { %12802 = vmatpush1.bf16.xpose.msra.mxu1 %v16960_v57  ;;  %11696 = vmatprep.subr.bf16.mxu0 %v16965_v58  ;;  %v17044_v57 = vld [vmem:[%s18061_s30 + $0x1b90] ss:$216 sps:$4 sm:$0xff]   ;;  %v17052_v58 = vld [vmem:[%s18061_s30 + $0x1d44] ss:$216 sps:$4 sm:$0xff]  }
 0x8ad   : > { %12803 = vmatprep.subr.bf16.mxu1 %v16968_v59  ;;  %v19436_v59 = vrot.slane %v2170_v46, %v18056_v6  ;;  %v17136_v46 = vld [vmem:[%s18061_s30 + $0x34e4] ss:$216 sps:$4 sm:$0xff]  }
 0x8b3   : > { %11697 = vmatpush1.bf16.xpose.msra.mxu0 %v16963_v39  ;;  %v17050_v39 = vld [vmem:[%s18061_s30 + $0x1d40] ss:$216 sps:$4 sm:$0xff]  }
 0x8b4   : > { %12804 = vmatpush1.bf16.xpose.msra.mxu1 %v16966_v62  ;;  %11698 = vmatprep.subr.bf16.mxu0 %v16971_v63  ;;  %v17055_v62 = vld [vmem:[%s18061_s30 + $0x3f4] ss:$216 sps:$4 sm:$0xff]  }
 0x8b5   : > { %12805 = vmatprep.subr.bf16.mxu1 %v16974_v0  ;;  %v17058_v63 = vld [vmem:[%s18061_s30 + $0x1ef4] ss:$216 sps:$4 sm:$0xff]   ;;  %v17053_v0 = vld [vmem:[%s18061_s30 + $0x3f0] ss:$216 sps:$4 sm:$0xff]  }
 0x8bb   : > { %11699 = vmatpush1.bf16.xpose.msra.mxu0 %v16969_v1  ;;  %v17056_v1 = vld [vmem:[%s18061_s30 + $0x1ef0] ss:$216 sps:$4 sm:$0xff]  }
 0x8bc   : > { %12806 = vmatpush1.bf16.xpose.msra.mxu1 %v16972_v2  ;;  %11700 = vmatprep.subr.bf16.mxu0 %v16977_v32  ;;  %v17061_v2 = vld [vmem:[%s18061_s30 + $0x5a4] ss:$216 sps:$4 sm:$0xff]  }
 0x8bd   : > { %12807 = vmatprep.subr.bf16.mxu1 %v16980_v7  ;;  %v17064_v32 = vld [vmem:[%s18061_s30 + $0x20a4] ss:$216 sps:$4 sm:$0xff]   ;;  %v17059_v7 = vld [vmem:[%s18061_s30 + $0x5a0] ss:$216 sps:$4 sm:$0xff]  }
 0x8c3   : > { %11701 = vmatpush1.bf16.xpose.msra.mxu0 %v16975_v60  ;;  %v17062_v60 = vld [vmem:[%s18061_s30 + $0x20a0] ss:$216 sps:$4 sm:$0xff]  }
 0x8c4   : > { %12808 = vmatpush1.bf16.xpose.msra.mxu1 %v16978_v8  ;;  %11702 = vmatprep.subr.bf16.mxu0 %v16983_v9  ;;  %v17067_v8 = vld [vmem:[%s18061_s30 + $0x754] ss:$216 sps:$4 sm:$0xff]  }
 0x8c5   : > { %12809 = vmatprep.subr.bf16.mxu1 %v16986_v54  ;;  %v17070_v9 = vld [vmem:[%s18061_s30 + $0x2254] ss:$216 sps:$4 sm:$0xff]   ;;  %v17065_v54 = vld [vmem:[%s18061_s30 + $0x750] ss:$216 sps:$4 sm:$0xff]  }
 0x8cb   : > { %11703 = vmatpush1.bf16.xpose.msra.mxu0 %v16981_v10  ;;  %v17068_v10 = vld [vmem:[%s18061_s30 + $0x2250] ss:$216 sps:$4 sm:$0xff]  }
 0x8cc   : > { %12810 = vmatpush1.bf16.xpose.msra.mxu1 %v16984_v12  ;;  %11704 = vmatprep.subr.bf16.mxu0 %v16989_v14  ;;  %v17073_v12 = vld [vmem:[%s18061_s30 + $0x904] ss:$216 sps:$4 sm:$0xff]  }
 0x8cd   : > { %12811 = vmatprep.subr.bf16.mxu1 %v16992_v15  ;;  %v17076_v14 = vld [vmem:[%s18061_s30 + $0x2404] ss:$216 sps:$4 sm:$0xff]   ;;  %v17071_v15 = vld [vmem:[%s18061_s30 + $0x900] ss:$216 sps:$4 sm:$0xff]  }
 0x8d3   : > { %11705 = vmatpush1.bf16.xpose.msra.mxu0 %v16987_v16  ;;  %v17074_v16 = vld [vmem:[%s18061_s30 + $0x2400] ss:$216 sps:$4 sm:$0xff]  }
 0x8d4   : > { %12812 = vmatpush1.bf16.xpose.msra.mxu1 %v16990_v19  ;;  %11706 = vmatprep.subr.bf16.mxu0 %v16995_v20  ;;  %v17079_v19 = vld [vmem:[%s18061_s30 + $0xab4] ss:$216 sps:$4 sm:$0xff]  }
 0x8d5   : > { %12813 = vmatprep.subr.bf16.mxu1 %v16998_v11  ;;  %v17082_v20 = vld [vmem:[%s18061_s30 + $0x25b4] ss:$216 sps:$4 sm:$0xff]   ;;  %v17077_v11 = vld [vmem:[%s18061_s30 + $0xab0] ss:$216 sps:$4 sm:$0xff]  }
 0x8db   : > { %11707 = vmatpush1.bf16.xpose.msra.mxu0 %v16993_v21  ;;  %v17080_v21 = vld [vmem:[%s18061_s30 + $0x25b0] ss:$216 sps:$4 sm:$0xff]  }
 0x8dc   : > { %12814 = vmatpush1.bf16.xpose.msra.mxu1 %v16996_v22  ;;  %11708 = vmatprep.subr.bf16.mxu0 %v17001_v13  ;;  %v17085_v22 = vld [vmem:[%s18061_s30 + $0xc64] ss:$216 sps:$4 sm:$0xff]  }
 0x8dd   : > { %12815 = vmatprep.subr.bf16.mxu1 %v17004_v61  ;;  %v17088_v13 = vld [vmem:[%s18061_s30 + $0x2764] ss:$216 sps:$4 sm:$0xff]   ;;  %v17083_v61 = vld [vmem:[%s18061_s30 + $0xc60] ss:$216 sps:$4 sm:$0xff]  }
 0x8e3   : > { %11709 = vmatpush1.bf16.xpose.msra.mxu0 %v16999_v25  ;;  %v17086_v25 = vld [vmem:[%s18061_s30 + $0x2760] ss:$216 sps:$4 sm:$0xff]  }
 0x8e4   : > { %12816 = vmatpush1.bf16.xpose.msra.mxu1 %v17002_v26  ;;  %11710 = vmatprep.subr.bf16.mxu0 %v17007_v17  ;;  %v17091_v26 = vld [vmem:[%s18061_s30 + $0xe14] ss:$216 sps:$4 sm:$0xff]  }
 0x8e5   : > { %12817 = vmatprep.subr.bf16.mxu1 %v17010_v28  ;;  %v17094_v17 = vld [vmem:[%s18061_s30 + $0x2914] ss:$216 sps:$4 sm:$0xff]   ;;  %v17089_v28 = vld [vmem:[%s18061_s30 + $0xe10] ss:$216 sps:$4 sm:$0xff]  }
 0x8eb   : > { %11711 = vmatpush1.bf16.xpose.msra.mxu0 %v17005_v30  ;;  %v17092_v30 = vld [vmem:[%s18061_s30 + $0x2910] ss:$216 sps:$4 sm:$0xff]  }
 0x8ec   : > { %12818 = vmatpush1.bf16.xpose.msra.mxu1 %v17008_v4  ;;  %11712 = vmatprep.subr.bf16.mxu0 %v17013_v33  ;;  %v17097_v4 = vld [vmem:[%s18061_s30 + $0xfc4] ss:$216 sps:$4 sm:$0xff]  }
 0x8ed   : > { %12819 = vmatprep.subr.bf16.mxu1 %v17016_v23  ;;  %v17100_v33 = vld [vmem:[%s18061_s30 + $0x2ac4] ss:$216 sps:$4 sm:$0xff]   ;;  %v17095_v23 = vld [vmem:[%s18061_s30 + $0xfc0] ss:$216 sps:$4 sm:$0xff]  }
 0x8f3   : > { %11713 = vmatpush1.bf16.xpose.msra.mxu0 %v17011_v5  ;;  %v17098_v5 = vld [vmem:[%s18061_s30 + $0x2ac0] ss:$216 sps:$4 sm:$0xff]  }
 0x8f4   : > { %12820 = vmatpush1.bf16.xpose.msra.mxu1 %v17014_v34  ;;  %11714 = vmatprep.subr.bf16.mxu0 %v17019_v18  ;;  %v17103_v34 = vld [vmem:[%s18061_s30 + $0x1174] ss:$216 sps:$4 sm:$0xff]  }
 0x8f5   : > { %12821 = vmatprep.subr.bf16.mxu1 %v17022_v27  ;;  %v17106_v18 = vld [vmem:[%s18061_s30 + $0x2c74] ss:$216 sps:$4 sm:$0xff]   ;;  %v17101_v27 = vld [vmem:[%s18061_s30 + $0x1170] ss:$216 sps:$4 sm:$0xff]  }
 0x8fb   : > { %11715 = vmatpush1.bf16.xpose.msra.mxu0 %v17017_v36  ;;  %v17104_v36 = vld [vmem:[%s18061_s30 + $0x2c70] ss:$216 sps:$4 sm:$0xff]  }
 0x8fc   : > { %12822 = vmatpush1.bf16.xpose.msra.mxu1 %v17020_v29  ;;  %11716 = vmatprep.subr.bf16.mxu0 %v17025_v38  ;;  %v17109_v29 = vld [vmem:[%s18061_s30 + $0x1324] ss:$216 sps:$4 sm:$0xff]  }
 0x8fd   : > { %12823 = vmatprep.subr.bf16.mxu1 %v17028_v40  ;;  %v17112_v38 = vld [vmem:[%s18061_s30 + $0x2e24] ss:$216 sps:$4 sm:$0xff]   ;;  %v17107_v40 = vld [vmem:[%s18061_s30 + $0x1320] ss:$216 sps:$4 sm:$0xff]  }
 0x903   : > { %11717 = vmatpush1.bf16.xpose.msra.mxu0 %v17023_v42  ;;  %v17110_v42 = vld [vmem:[%s18061_s30 + $0x2e20] ss:$216 sps:$4 sm:$0xff]  }
 0x904   : > { %12824 = vmatpush1.bf16.xpose.msra.mxu1 %v17026_v43  ;;  %11718 = vmatprep.subr.bf16.mxu0 %v17031_v35  ;;  %v17115_v43 = vld [vmem:[%s18061_s30 + $0x14d4] ss:$216 sps:$4 sm:$0xff]  }
 0x905   : > { %12825 = vmatprep.subr.bf16.mxu1 %v17034_v44  ;;  %v17118_v35 = vld [vmem:[%s18061_s30 + $0x2fd4] ss:$216 sps:$4 sm:$0xff]   ;;  %v17113_v44 = vld [vmem:[%s18061_s30 + $0x14d0] ss:$216 sps:$4 sm:$0xff]  }
 0x90b   : > { %11719 = vmatpush1.bf16.xpose.msra.mxu0 %v17029_v37  ;;  %v17116_v37 = vld [vmem:[%s18061_s30 + $0x2fd0] ss:$216 sps:$4 sm:$0xff]  }
 0x90c   : > { %12826 = vmatpush1.bf16.xpose.msra.mxu1 %v17032_v45  ;;  %11720 = vmatprep.subr.bf16.mxu0 %v17037_v24  ;;  %v17121_v45 = vld [vmem:[%s18061_s30 + $0x1684] ss:$216 sps:$4 sm:$0xff]  }
 0x90d   : > { %12827 = vmatprep.subr.bf16.mxu1 %v17040_v48  ;;  %v17124_v24 = vld [vmem:[%s18061_s30 + $0x3184] ss:$216 sps:$4 sm:$0xff]   ;;  %v17119_v48 = vld [vmem:[%s18061_s30 + $0x1680] ss:$216 sps:$4 sm:$0xff]  }
 0x913   : > { %11721 = vmatpush1.bf16.xpose.msra.mxu0 %v17035_v50  ;;  %v17122_v50 = vld [vmem:[%s18061_s30 + $0x3180] ss:$216 sps:$4 sm:$0xff]  }
 0x914   : > { %12828 = vmatpush1.bf16.xpose.msra.mxu1 %v17038_v51  ;;  %11731 = vmatprep.subr.bf16.mxu0 %v17043_v52  ;;  %v17127_v51 = vld [vmem:[%s18061_s30 + $0x1834] ss:$216 sps:$4 sm:$0xff]  }
 0x915   : > { %12838 = vmatprep.subr.bf16.mxu1 %v17046_v53  ;;  %v17130_v52 = vld [vmem:[%s18061_s30 + $0x3334] ss:$216 sps:$4 sm:$0xff]   ;;  %v17125_v53 = vld [vmem:[%s18061_s30 + $0x1830] ss:$216 sps:$4 sm:$0xff]  }
 0x91a   : > { %11723 = vmatmul.mubr.bf16.vlgmr.msra.gmra.mrb[0].mxu0 %v2199_v56 }
 0x91b   : > { %12830 = vmatmul.mubr.bf16.vlgmr.msra.gmra.mrb[0].mxu1 %v2199_v56  ;;  %11732 = vmatpush1.bf16.xpose.msra.mxu0 %v17041_v49  ;;  %v17133_v56 = vld [vmem:[%s18061_s30 + $0x19e4] ss:$216 sps:$4 sm:$0xff]   ;;  %v17131_v49 = vld [vmem:[%s18061_s30 + $0x19e0] ss:$216 sps:$4 sm:$0xff]  }
 0x91c   : > { %12839 = vmatpush1.bf16.xpose.msra.mxu1 %v17044_v57  ;;  %11733 = vmatprep.subr.bf16.mxu0 %v17049_v41  ;;  %v17134_v57 = vld [vmem:[%s18061_s30 + $0x34e0] ss:$216 sps:$4 sm:$0xff]   ;;  %v17140_v41 = vld [vmem:[%s18061_s30 + $0x9c] ss:$216 sps:$4 sm:$0xff]  }
 0x91d   : > { %12840 = vmatprep.subr.bf16.mxu1 %v17052_v58  ;;  %11763 = vmatprep.mubr.bf16.mxu0 %v19436_v59  ;;  %v17143_v58 = vld [vmem:[%s18061_s30 + $0x1b9c] ss:$216 sps:$4 sm:$0xff]  }
 0x91e   : > { %12870 = vmatprep.mubr.bf16.mxu1 %v19436_v59 }
 0x923   : > { %11734 = vmatpush1.bf16.xpose.msra.mxu0 %v17047_v47  ;;  %v19502_v47 = vrot.slane %v19425_v55, %v18056_v6  ;;  %v17144_v55 = vld [vmem:[%s18061_s30 + $0x248] ss:$216 sps:$4 sm:$0xff]  }
 0x924   : > { %12841 = vmatpush1.bf16.xpose.msra.mxu1 %v17050_v39  ;;  %11735 = vmatprep.subr.bf16.mxu0 %v17055_v62  ;;  %v17138_v39 = vld [vmem:[%s18061_s30 + $0x98] ss:$216 sps:$4 sm:$0xff]  }
 0x925   : > { %12842 = vmatprep.subr.bf16.mxu1 %v17058_v63  ;;  %v17141_v62 = vld [vmem:[%s18061_s30 + $0x1b98] ss:$216 sps:$4 sm:$0xff]   ;;  %v17146_v63 = vld [vmem:[%s18061_s30 + $0x24c] ss:$216 sps:$4 sm:$0xff]  }
 0x92b   : > { %11736 = vmatpush1.bf16.xpose.msra.mxu0 %v17053_v0  ;;  %v17149_v0 = vld [vmem:[%s18061_s30 + $0x1d4c] ss:$216 sps:$4 sm:$0xff]  }
 0x92c   : > { %12843 = vmatpush1.bf16.xpose.msra.mxu1 %v17056_v1  ;;  %11737 = vmatprep.subr.bf16.mxu0 %v17061_v2  ;;  %v2202_v1 = vcombine.high %v19436_v59, %v19436_v59  ;;  %v17147_v2 = vld [vmem:[%s18061_s30 + $0x1d48] ss:$216 sps:$4 sm:$0xff]   ;;  %v17155_v59 = vld [vmem:[%s18061_s30 + $0x1efc] ss:$216 sps:$4 sm:$0xff]  }
 0x92d   : > { %12844 = vmatprep.subr.bf16.mxu1 %v17064_v32  ;;  %v17152_v32 = vld [vmem:[%s18061_s30 + $0x3fc] ss:$216 sps:$4 sm:$0xff]  }
 0x933   : > { %11738 = vmatpush1.bf16.xpose.msra.mxu0 %v17059_v7  ;;  %v17150_v7 = vld [vmem:[%s18061_s30 + $0x3f8] ss:$216 sps:$4 sm:$0xff]  }
 0x934   : > { %12845 = vmatpush1.bf16.xpose.msra.mxu1 %v17062_v60  ;;  %11739 = vmatprep.subr.bf16.mxu0 %v17067_v8  ;;  %v17153_v60 = vld [vmem:[%s18061_s30 + $0x1ef8] ss:$216 sps:$4 sm:$0xff]   ;;  %v17158_v8 = vld [vmem:[%s18061_s30 + $0x5ac] ss:$216 sps:$4 sm:$0xff]  }
 0x935   : > { %12846 = vmatprep.subr.bf16.mxu1 %v17070_v9  ;;  %v17161_v9 = vld [vmem:[%s18061_s30 + $0x20ac] ss:$216 sps:$4 sm:$0xff]  }
 0x93b   : > { %11740 = vmatpush1.bf16.xpose.msra.mxu0 %v17065_v54  ;;  %v17156_v54 = vld [vmem:[%s18061_s30 + $0x5a8] ss:$216 sps:$4 sm:$0xff]  }
 0x93c   : > { %12847 = vmatpush1.bf16.xpose.msra.mxu1 %v17068_v10  ;;  %11741 = vmatprep.subr.bf16.mxu0 %v17073_v12  ;;  %v17159_v10 = vld [vmem:[%s18061_s30 + $0x20a8] ss:$216 sps:$4 sm:$0xff]   ;;  %v17164_v12 = vld [vmem:[%s18061_s30 + $0x75c] ss:$216 sps:$4 sm:$0xff]  }
 0x93d   : > { %12848 = vmatprep.subr.bf16.mxu1 %v17076_v14  ;;  %v17167_v14 = vld [vmem:[%s18061_s30 + $0x225c] ss:$216 sps:$4 sm:$0xff]  }
 0x943   : > { %11742 = vmatpush1.bf16.xpose.msra.mxu0 %v17071_v15  ;;  %v17162_v15 = vld [vmem:[%s18061_s30 + $0x758] ss:$216 sps:$4 sm:$0xff]  }
 0x944   : > { %12849 = vmatpush1.bf16.xpose.msra.mxu1 %v17074_v16  ;;  %11743 = vmatprep.subr.bf16.mxu0 %v17079_v19  ;;  %v17165_v16 = vld [vmem:[%s18061_s30 + $0x2258] ss:$216 sps:$4 sm:$0xff]   ;;  %v17170_v19 = vld [vmem:[%s18061_s30 + $0x90c] ss:$216 sps:$4 sm:$0xff]  }
 0x945   : > { %12850 = vmatprep.subr.bf16.mxu1 %v17082_v20  ;;  %v17173_v20 = vld [vmem:[%s18061_s30 + $0x240c] ss:$216 sps:$4 sm:$0xff]  }
 0x94b   : > { %11744 = vmatpush1.bf16.xpose.msra.mxu0 %v17077_v11  ;;  %v17168_v11 = vld [vmem:[%s18061_s30 + $0x908] ss:$216 sps:$4 sm:$0xff]  }
 0x94c   : > { %12851 = vmatpush1.bf16.xpose.msra.mxu1 %v17080_v21  ;;  %11745 = vmatprep.subr.bf16.mxu0 %v17085_v22  ;;  %v17171_v21 = vld [vmem:[%s18061_s30 + $0x2408] ss:$216 sps:$4 sm:$0xff]   ;;  %v17176_v22 = vld [vmem:[%s18061_s30 + $0xabc] ss:$216 sps:$4 sm:$0xff]  }
 0x94d   : > { %12852 = vmatprep.subr.bf16.mxu1 %v17088_v13  ;;  %v17179_v13 = vld [vmem:[%s18061_s30 + $0x25bc] ss:$216 sps:$4 sm:$0xff]  }
 0x953   : > { %11746 = vmatpush1.bf16.xpose.msra.mxu0 %v17083_v61  ;;  %v17174_v61 = vld [vmem:[%s18061_s30 + $0xab8] ss:$216 sps:$4 sm:$0xff]  }
 0x954   : > { %12853 = vmatpush1.bf16.xpose.msra.mxu1 %v17086_v25  ;;  %11747 = vmatprep.subr.bf16.mxu0 %v17091_v26  ;;  %v17177_v25 = vld [vmem:[%s18061_s30 + $0x25b8] ss:$216 sps:$4 sm:$0xff]   ;;  %v17182_v26 = vld [vmem:[%s18061_s30 + $0xc6c] ss:$216 sps:$4 sm:$0xff]  }
 0x955   : > { %12854 = vmatprep.subr.bf16.mxu1 %v17094_v17  ;;  %v17185_v17 = vld [vmem:[%s18061_s30 + $0x276c] ss:$216 sps:$4 sm:$0xff]  }
 0x95b   : > { %11748 = vmatpush1.bf16.xpose.msra.mxu0 %v17089_v28  ;;  %v17180_v28 = vld [vmem:[%s18061_s30 + $0xc68] ss:$216 sps:$4 sm:$0xff]  }
 0x95c   : > { %12855 = vmatpush1.bf16.xpose.msra.mxu1 %v17092_v30  ;;  %11749 = vmatprep.subr.bf16.mxu0 %v17097_v4  ;;  %v17183_v30 = vld [vmem:[%s18061_s30 + $0x2768] ss:$216 sps:$4 sm:$0xff]   ;;  %v17188_v4 = vld [vmem:[%s18061_s30 + $0xe1c] ss:$216 sps:$4 sm:$0xff]  }
 0x95d   : > { %12856 = vmatprep.subr.bf16.mxu1 %v17100_v33  ;;  %v17191_v33 = vld [vmem:[%s18061_s30 + $0x291c] ss:$216 sps:$4 sm:$0xff]  }
 0x963   : > { %11750 = vmatpush1.bf16.xpose.msra.mxu0 %v17095_v23  ;;  %v17186_v23 = vld [vmem:[%s18061_s30 + $0xe18] ss:$216 sps:$4 sm:$0xff]  }
 0x964   : > { %12857 = vmatpush1.bf16.xpose.msra.mxu1 %v17098_v5  ;;  %11751 = vmatprep.subr.bf16.mxu0 %v17103_v34  ;;  %v17189_v5 = vld [vmem:[%s18061_s30 + $0x2918] ss:$216 sps:$4 sm:$0xff]   ;;  %v17194_v34 = vld [vmem:[%s18061_s30 + $0xfcc] ss:$216 sps:$4 sm:$0xff]  }
 0x965   : > { %12858 = vmatprep.subr.bf16.mxu1 %v17106_v18  ;;  %v17197_v18 = vld [vmem:[%s18061_s30 + $0x2acc] ss:$216 sps:$4 sm:$0xff]  }
 0x96b   : > { %11752 = vmatpush1.bf16.xpose.msra.mxu0 %v17101_v27  ;;  %v17192_v27 = vld [vmem:[%s18061_s30 + $0xfc8] ss:$216 sps:$4 sm:$0xff]  }
 0x96c   : > { %12859 = vmatpush1.bf16.xpose.msra.mxu1 %v17104_v36  ;;  %11753 = vmatprep.subr.bf16.mxu0 %v17109_v29  ;;  %v17195_v36 = vld [vmem:[%s18061_s30 + $0x2ac8] ss:$216 sps:$4 sm:$0xff]   ;;  %v17200_v29 = vld [vmem:[%s18061_s30 + $0x117c] ss:$216 sps:$4 sm:$0xff]  }
 0x96d   : > { %12860 = vmatprep.subr.bf16.mxu1 %v17112_v38  ;;  %v17203_v38 = vld [vmem:[%s18061_s30 + $0x2c7c] ss:$216 sps:$4 sm:$0xff]  }
 0x973   : > { %11754 = vmatpush1.bf16.xpose.msra.mxu0 %v17107_v40  ;;  %v17198_v40 = vld [vmem:[%s18061_s30 + $0x1178] ss:$216 sps:$4 sm:$0xff]  }
 0x974   : > { %12861 = vmatpush1.bf16.xpose.msra.mxu1 %v17110_v42  ;;  %11755 = vmatprep.subr.bf16.mxu0 %v17115_v43  ;;  %v17201_v42 = vld [vmem:[%s18061_s30 + $0x2c78] ss:$216 sps:$4 sm:$0xff]   ;;  %v17206_v43 = vld [vmem:[%s18061_s30 + $0x132c] ss:$216 sps:$4 sm:$0xff]  }
 0x975   : > { %12862 = vmatprep.subr.bf16.mxu1 %v17118_v35  ;;  %v17209_v35 = vld [vmem:[%s18061_s30 + $0x2e2c] ss:$216 sps:$4 sm:$0xff]  }
 0x97b   : > { %11756 = vmatpush1.bf16.xpose.msra.mxu0 %v17113_v44  ;;  %v17204_v44 = vld [vmem:[%s18061_s30 + $0x1328] ss:$216 sps:$4 sm:$0xff]  }
 0x97c   : > { %12863 = vmatpush1.bf16.xpose.msra.mxu1 %v17116_v37  ;;  %11757 = vmatprep.subr.bf16.mxu0 %v17121_v45  ;;  %v17207_v37 = vld [vmem:[%s18061_s30 + $0x2e28] ss:$216 sps:$4 sm:$0xff]   ;;  %v17212_v45 = vld [vmem:[%s18061_s30 + $0x14dc] ss:$216 sps:$4 sm:$0xff]  }
 0x97d   : > { %12864 = vmatprep.subr.bf16.mxu1 %v17124_v24  ;;  %v17215_v24 = vld [vmem:[%s18061_s30 + $0x2fdc] ss:$216 sps:$4 sm:$0xff]  }
 0x983   : > { %11758 = vmatpush1.bf16.xpose.msra.mxu0 %v17119_v48  ;;  %v17210_v48 = vld [vmem:[%s18061_s30 + $0x14d8] ss:$216 sps:$4 sm:$0xff]  }
 0x984   : > { %12865 = vmatpush1.bf16.xpose.msra.mxu1 %v17122_v50  ;;  %11759 = vmatprep.subr.bf16.mxu0 %v17127_v51  ;;  %v17213_v50 = vld [vmem:[%s18061_s30 + $0x2fd8] ss:$216 sps:$4 sm:$0xff]   ;;  %v17218_v51 = vld [vmem:[%s18061_s30 + $0x168c] ss:$216 sps:$4 sm:$0xff]  }
 0x985   : > { %12866 = vmatprep.subr.bf16.mxu1 %v17130_v52  ;;  %v17221_v52 = vld [vmem:[%s18061_s30 + $0x318c] ss:$216 sps:$4 sm:$0xff]  }
 0x98b   : > { %11760 = vmatpush1.bf16.xpose.msra.mxu0 %v17125_v53  ;;  %v17216_v53 = vld [vmem:[%s18061_s30 + $0x1688] ss:$216 sps:$4 sm:$0xff]  }
 0x98c   : > { %12867 = vmatpush1.bf16.xpose.msra.mxu1 %v17128_v31  ;;  %11761 = vmatprep.subr.bf16.mxu0 %v17133_v56  ;;  %v17219_v31 = vld [vmem:[%s18061_s30 + $0x3188] ss:$216 sps:$4 sm:$0xff]   ;;  %v17224_v56 = vld [vmem:[%s18061_s30 + $0x183c] ss:$216 sps:$4 sm:$0xff]  }
 0x98d   : > { %12868 = vmatprep.subr.bf16.mxu1 %v17136_v46  ;;  %v17227_v46 = vld [vmem:[%s18061_s30 + $0x333c] ss:$216 sps:$4 sm:$0xff]  }
 0x993   : > { %11762 = vmatpush1.bf16.xpose.msra.mxu0 %v17131_v49  ;;  %v17222_v49 = vld [vmem:[%s18061_s30 + $0x1838] ss:$216 sps:$4 sm:$0xff]  }
 0x994   : > { %12869 = vmatpush1.bf16.xpose.msra.mxu1 %v17134_v57  ;;  %11772 = vmatprep.subr.bf16.mxu0 %v17140_v41  ;;  %v17225_v57 = vld [vmem:[%s18061_s30 + $0x3338] ss:$216 sps:$4 sm:$0xff]   ;;  %v17230_v41 = vld [vmem:[%s18061_s30 + $0x19ec] ss:$216 sps:$4 sm:$0xff]  }
 0x995   : > { %12879 = vmatprep.subr.bf16.mxu1 %v17143_v58  ;;  %v17233_v58 = vld [vmem:[%s18061_s30 + $0x34ec] ss:$216 sps:$4 sm:$0xff]  }
 0x99a   : > { %11764 = vmatmul.mubr.bf16.vlgmr.msra.gmra.mrb[0].mxu0 %v19502_v47 }
 0x99b   : > { %12871 = vmatmul.mubr.bf16.vlgmr.msra.gmra.mrb[0].mxu1 %v19502_v47  ;;  %11773 = vmatpush1.bf16.xpose.msra.mxu0 %v17138_v39  ;;  %v17228_v39 = vld [vmem:[%s18061_s30 + $0x19e8] ss:$216 sps:$4 sm:$0xff]  }
 0x99c   : > { %12880 = vmatpush1.bf16.xpose.msra.mxu1 %v17141_v62  ;;  %11774 = vmatprep.subr.bf16.mxu0 %v17146_v63  ;;  %v17231_v62 = vld [vmem:[%s18061_s30 + $0x34e8] ss:$216 sps:$4 sm:$0xff]   ;;  %v17236_v63 = vld [vmem:[%s18061_s30 + $0xa4] ss:$216 sps:$4 sm:$0xff]  }
 0x99d   : > { %12881 = vmatprep.subr.bf16.mxu1 %v17149_v0  ;;  %11804 = vmatprep.mubr.bf16.mxu0 %v2202_v1  ;;  %v17239_v0 = vld [vmem:[%s18061_s30 + $0x1ba4] ss:$216 sps:$4 sm:$0xff]  }
 0x99e   : > { %12911 = vmatprep.mubr.bf16.mxu1 %v2202_v1  ;;  %v19575_v1 = vld [vmem:[%s20164_s0 + $0x28] sm:$0xff] }
 0x9a3   : > { %11775 = vmatpush1.bf16.xpose.msra.mxu0 %v17144_v55  ;;  %v19579_v55 = vrot.slane %v19575_v1, %v18056_v6 }
 0x9a4   : > { %12882 = vmatpush1.bf16.xpose.msra.mxu1 %v17147_v2  ;;  %11776 = vmatprep.subr.bf16.mxu0 %v17152_v32  ;;  %v2200_v2 = vcombine.high %v19502_v47, %v19502_v47  ;;  %v17240_v47 = vld [vmem:[%s18061_s30 + $0x250] ss:$216 sps:$4 sm:$0xff]  }
 0x9a5   : > { %12883 = vmatprep.subr.bf16.mxu1 %v17155_v59  ;;  %v2218_v32 = vcombine.high %v19579_v55, %v19579_v55  ;;  %v17234_v59 = vld [vmem:[%s18061_s30 + $0xa0] ss:$216 sps:$4 sm:$0xff]  }
 0x9ab   : > { %11777 = vmatpush1.bf16.xpose.msra.mxu0 %v17150_v7  ;;  %v17237_v7 = vld [vmem:[%s18061_s30 + $0x1ba0] ss:$216 sps:$4 sm:$0xff]  }
 0x9ac   : > { %12884 = vmatpush1.bf16.xpose.msra.mxu1 %v17153_v60  ;;  %11778 = vmatprep.subr.bf16.mxu0 %v17158_v8  ;;  %v17242_v60 = vld [vmem:[%s18061_s30 + $0x254] ss:$216 sps:$4 sm:$0xff]  }
 0x9ad   : > { %12885 = vmatprep.subr.bf16.mxu1 %v17161_v9  ;;  %v17245_v8 = vld [vmem:[%s18061_s30 + $0x1d54] ss:$216 sps:$4 sm:$0xff]   ;;  %v19590_v9 = vrot.slane %v2218_v32, %v18056_v6 }
 0x9ae   : > { %v17326_v32 = vld [vmem:[%s18061_s30 + $0x19f4] ss:$216 sps:$4 sm:$0xff]  }
 0x9b3   : > { %11779 = vmatpush1.bf16.xpose.msra.mxu0 %v17156_v54  ;;  %v17243_v54 = vld [vmem:[%s18061_s30 + $0x1d50] ss:$216 sps:$4 sm:$0xff]  }
 0x9b4   : > { %12886 = vmatpush1.bf16.xpose.msra.mxu1 %v17159_v10  ;;  %11780 = vmatprep.subr.bf16.mxu0 %v17164_v12  ;;  %v17248_v10 = vld [vmem:[%s18061_s30 + $0x404] ss:$216 sps:$4 sm:$0xff]  }
 0x9b5   : > { %12887 = vmatprep.subr.bf16.mxu1 %v17167_v14  ;;  %v17251_v12 = vld [vmem:[%s18061_s30 + $0x1f04] ss:$216 sps:$4 sm:$0xff]   ;;  %v17246_v14 = vld [vmem:[%s18061_s30 + $0x400] ss:$216 sps:$4 sm:$0xff]  }
 0x9bb   : > { %11781 = vmatpush1.bf16.xpose.msra.mxu0 %v17162_v15  ;;  %v17249_v15 = vld [vmem:[%s18061_s30 + $0x1f00] ss:$216 sps:$4 sm:$0xff]  }
 0x9bc   : > { %12888 = vmatpush1.bf16.xpose.msra.mxu1 %v17165_v16  ;;  %11782 = vmatprep.subr.bf16.mxu0 %v17170_v19  ;;  %v17254_v16 = vld [vmem:[%s18061_s30 + $0x5b4] ss:$216 sps:$4 sm:$0xff]  }
 0x9bd   : > { %12889 = vmatprep.subr.bf16.mxu1 %v17173_v20  ;;  %v17257_v19 = vld [vmem:[%s18061_s30 + $0x20b4] ss:$216 sps:$4 sm:$0xff]   ;;  %v17252_v20 = vld [vmem:[%s18061_s30 + $0x5b0] ss:$216 sps:$4 sm:$0xff]  }
 0x9c3   : > { %11783 = vmatpush1.bf16.xpose.msra.mxu0 %v17168_v11  ;;  %v17255_v11 = vld [vmem:[%s18061_s30 + $0x20b0] ss:$216 sps:$4 sm:$0xff]  }
 0x9c4   : > { %12890 = vmatpush1.bf16.xpose.msra.mxu1 %v17171_v21  ;;  %11784 = vmatprep.subr.bf16.mxu0 %v17176_v22  ;;  %v17260_v21 = vld [vmem:[%s18061_s30 + $0x764] ss:$216 sps:$4 sm:$0xff]  }
 0x9c5   : > { %12891 = vmatprep.subr.bf16.mxu1 %v17179_v13  ;;  %v17263_v22 = vld [vmem:[%s18061_s30 + $0x2264] ss:$216 sps:$4 sm:$0xff]   ;;  %v17258_v13 = vld [vmem:[%s18061_s30 + $0x760] ss:$216 sps:$4 sm:$0xff]  }
 0x9cb   : > { %11785 = vmatpush1.bf16.xpose.msra.mxu0 %v17174_v61  ;;  %v17261_v61 = vld [vmem:[%s18061_s30 + $0x2260] ss:$216 sps:$4 sm:$0xff]  }
 0x9cc   : > { %12892 = vmatpush1.bf16.xpose.msra.mxu1 %v17177_v25  ;;  %11786 = vmatprep.subr.bf16.mxu0 %v17182_v26  ;;  %v17266_v25 = vld [vmem:[%s18061_s30 + $0x914] ss:$216 sps:$4 sm:$0xff]  }
 0x9cd   : > { %12893 = vmatprep.subr.bf16.mxu1 %v17185_v17  ;;  %v17269_v26 = vld [vmem:[%s18061_s30 + $0x2414] ss:$216 sps:$4 sm:$0xff]   ;;  %v17264_v17 = vld [vmem:[%s18061_s30 + $0x910] ss:$216 sps:$4 sm:$0xff]  }
 0x9d3   : > { %11787 = vmatpush1.bf16.xpose.msra.mxu0 %v17180_v28  ;;  %v17267_v28 = vld [vmem:[%s18061_s30 + $0x2410] ss:$216 sps:$4 sm:$0xff]  }
 0x9d4   : > { %12894 = vmatpush1.bf16.xpose.msra.mxu1 %v17183_v30  ;;  %11788 = vmatprep.subr.bf16.mxu0 %v17188_v4  ;;  %v17272_v30 = vld [vmem:[%s18061_s30 + $0xac4] ss:$216 sps:$4 sm:$0xff]  }
 0x9d5   : > { %12895 = vmatprep.subr.bf16.mxu1 %v17191_v33  ;;  %v17275_v4 = vld [vmem:[%s18061_s30 + $0x25c4] ss:$216 sps:$4 sm:$0xff]   ;;  %v17270_v33 = vld [vmem:[%s18061_s30 + $0xac0] ss:$216 sps:$4 sm:$0xff]  }
 0x9db   : > { %11789 = vmatpush1.bf16.xpose.msra.mxu0 %v17186_v23  ;;  %v17273_v23 = vld [vmem:[%s18061_s30 + $0x25c0] ss:$216 sps:$4 sm:$0xff]  }
 0x9dc   : > { %12896 = vmatpush1.bf16.xpose.msra.mxu1 %v17189_v5  ;;  %11790 = vmatprep.subr.bf16.mxu0 %v17194_v34  ;;  %v17278_v5 = vld [vmem:[%s18061_s30 + $0xc74] ss:$216 sps:$4 sm:$0xff]  }
 0x9dd   : > { %12897 = vmatprep.subr.bf16.mxu1 %v17197_v18  ;;  %v17281_v34 = vld [vmem:[%s18061_s30 + $0x2774] ss:$216 sps:$4 sm:$0xff]   ;;  %v17276_v18 = vld [vmem:[%s18061_s30 + $0xc70] ss:$216 sps:$4 sm:$0xff]  }
 0x9e3   : > { %11791 = vmatpush1.bf16.xpose.msra.mxu0 %v17192_v27  ;;  %v17279_v27 = vld [vmem:[%s18061_s30 + $0x2770] ss:$216 sps:$4 sm:$0xff]  }
 0x9e4   : > { %12898 = vmatpush1.bf16.xpose.msra.mxu1 %v17195_v36  ;;  %11792 = vmatprep.subr.bf16.mxu0 %v17200_v29  ;;  %v17284_v36 = vld [vmem:[%s18061_s30 + $0xe24] ss:$216 sps:$4 sm:$0xff]  }
 0x9e5   : > { %12899 = vmatprep.subr.bf16.mxu1 %v17203_v38  ;;  %v17287_v29 = vld [vmem:[%s18061_s30 + $0x2924] ss:$216 sps:$4 sm:$0xff]   ;;  %v17282_v38 = vld [vmem:[%s18061_s30 + $0xe20] ss:$216 sps:$4 sm:$0xff]  }
 0x9eb   : > { %11793 = vmatpush1.bf16.xpose.msra.mxu0 %v17198_v40  ;;  %v17285_v40 = vld [vmem:[%s18061_s30 + $0x2920] ss:$216 sps:$4 sm:$0xff]  }
 0x9ec   : > { %12900 = vmatpush1.bf16.xpose.msra.mxu1 %v17201_v42  ;;  %11794 = vmatprep.subr.bf16.mxu0 %v17206_v43  ;;  %v17290_v42 = vld [vmem:[%s18061_s30 + $0xfd4] ss:$216 sps:$4 sm:$0xff]  }
 0x9ed   : > { %12901 = vmatprep.subr.bf16.mxu1 %v17209_v35  ;;  %v17293_v43 = vld [vmem:[%s18061_s30 + $0x2ad4] ss:$216 sps:$4 sm:$0xff]   ;;  %v17288_v35 = vld [vmem:[%s18061_s30 + $0xfd0] ss:$216 sps:$4 sm:$0xff]  }
 0x9f3   : > { %11795 = vmatpush1.bf16.xpose.msra.mxu0 %v17204_v44  ;;  %v17291_v44 = vld [vmem:[%s18061_s30 + $0x2ad0] ss:$216 sps:$4 sm:$0xff]  }
 0x9f4   : > { %12902 = vmatpush1.bf16.xpose.msra.mxu1 %v17207_v37  ;;  %11796 = vmatprep.subr.bf16.mxu0 %v17212_v45  ;;  %v17296_v37 = vld [vmem:[%s18061_s30 + $0x1184] ss:$216 sps:$4 sm:$0xff]  }
 0x9f5   : > { %12903 = vmatprep.subr.bf16.mxu1 %v17215_v24  ;;  %v17299_v45 = vld [vmem:[%s18061_s30 + $0x2c84] ss:$216 sps:$4 sm:$0xff]   ;;  %v17294_v24 = vld [vmem:[%s18061_s30 + $0x1180] ss:$216 sps:$4 sm:$0xff]  }
 0x9fb   : > { %11797 = vmatpush1.bf16.xpose.msra.mxu0 %v17210_v48  ;;  %v17297_v48 = vld [vmem:[%s18061_s30 + $0x2c80] ss:$216 sps:$4 sm:$0xff]  }
 0x9fc   : > { %12904 = vmatpush1.bf16.xpose.msra.mxu1 %v17213_v50  ;;  %11798 = vmatprep.subr.bf16.mxu0 %v17218_v51  ;;  %v17302_v50 = vld [vmem:[%s18061_s30 + $0x1334] ss:$216 sps:$4 sm:$0xff]  }
 0x9fd   : > { %12905 = vmatprep.subr.bf16.mxu1 %v17221_v52  ;;  %v17305_v51 = vld [vmem:[%s18061_s30 + $0x2e34] ss:$216 sps:$4 sm:$0xff]   ;;  %v17300_v52 = vld [vmem:[%s18061_s30 + $0x1330] ss:$216 sps:$4 sm:$0xff]  }
 0xa03   : > { %11799 = vmatpush1.bf16.xpose.msra.mxu0 %v17216_v53  ;;  %v17303_v53 = vld [vmem:[%s18061_s30 + $0x2e30] ss:$216 sps:$4 sm:$0xff]  }
 0xa04   : > { %12906 = vmatpush1.bf16.xpose.msra.mxu1 %v17219_v31  ;;  %11800 = vmatprep.subr.bf16.mxu0 %v17224_v56  ;;  %v17308_v31 = vld [vmem:[%s18061_s30 + $0x14e4] ss:$216 sps:$4 sm:$0xff]  }
 0xa05   : > { %12907 = vmatprep.subr.bf16.mxu1 %v17227_v46  ;;  %v17311_v56 = vld [vmem:[%s18061_s30 + $0x2fe4] ss:$216 sps:$4 sm:$0xff]   ;;  %v17306_v46 = vld [vmem:[%s18061_s30 + $0x14e0] ss:$216 sps:$4 sm:$0xff]  }
 0xa0b   : > { %11801 = vmatpush1.bf16.xpose.msra.mxu0 %v17222_v49  ;;  %v17309_v49 = vld [vmem:[%s18061_s30 + $0x2fe0] ss:$216 sps:$4 sm:$0xff]  }
 0xa0c   : > { %12908 = vmatpush1.bf16.xpose.msra.mxu1 %v17225_v57  ;;  %11802 = vmatprep.subr.bf16.mxu0 %v17230_v41  ;;  %v17314_v57 = vld [vmem:[%s18061_s30 + $0x1694] ss:$216 sps:$4 sm:$0xff]  }
 0xa0d   : > { %12909 = vmatprep.subr.bf16.mxu1 %v17233_v58  ;;  %v17317_v41 = vld [vmem:[%s18061_s30 + $0x3194] ss:$216 sps:$4 sm:$0xff]   ;;  %v17312_v58 = vld [vmem:[%s18061_s30 + $0x1690] ss:$216 sps:$4 sm:$0xff]  }
 0xa13   : > { %11803 = vmatpush1.bf16.xpose.msra.mxu0 %v17228_v39  ;;  %v17315_v39 = vld [vmem:[%s18061_s30 + $0x3190] ss:$216 sps:$4 sm:$0xff]  }
 0xa14   : > { %12910 = vmatpush1.bf16.xpose.msra.mxu1 %v17231_v62  ;;  %11813 = vmatprep.subr.bf16.mxu0 %v17236_v63  ;;  %v17320_v62 = vld [vmem:[%s18061_s30 + $0x1844] ss:$216 sps:$4 sm:$0xff]  }
 0xa15   : > { %12920 = vmatprep.subr.bf16.mxu1 %v17239_v0  ;;  %v17323_v63 = vld [vmem:[%s18061_s30 + $0x3344] ss:$216 sps:$4 sm:$0xff]   ;;  %v17318_v0 = vld [vmem:[%s18061_s30 + $0x1840] ss:$216 sps:$4 sm:$0xff]  }
 0xa1a   : > { %11805 = vmatmul.mubr.bf16.vlgmr.msra.gmra.mrb[0].mxu0 %v2200_v2 }
 0xa1b   : > { %12912 = vmatmul.mubr.bf16.vlgmr.msra.gmra.mrb[0].mxu1 %v2200_v2  ;;  %11814 = vmatpush1.bf16.xpose.msra.mxu0 %v17234_v59  ;;  %v17321_v2 = vld [vmem:[%s18061_s30 + $0x3340] ss:$216 sps:$4 sm:$0xff]   ;;  %v17329_v59 = vld [vmem:[%s18061_s30 + $0x34f4] ss:$216 sps:$4 sm:$0xff]  }
 0xa1c   : > { %12921 = vmatpush1.bf16.xpose.msra.mxu1 %v17237_v7  ;;  %11815 = vmatprep.subr.bf16.mxu0 %v17242_v60  ;;  %v17324_v7 = vld [vmem:[%s18061_s30 + $0x19f0] ss:$216 sps:$4 sm:$0xff]  }
 0xa1d   : > { %12922 = vmatprep.subr.bf16.mxu1 %v17245_v8  ;;  %11845 = vmatprep.mubr.bf16.mxu0 %v19590_v9  ;;  %v17327_v60 = vld [vmem:[%s18061_s30 + $0x34f0] ss:$216 sps:$4 sm:$0xff]   ;;  %v17332_v8 = vld [vmem:[%s18061_s30 + $0xac] ss:$216 sps:$4 sm:$0xff]  }
 0xa1e   : > { %12952 = vmatprep.mubr.bf16.mxu1 %v19590_v9 }
 0xa23   : > { %11816 = vmatpush1.bf16.xpose.msra.mxu0 %v17240_v47  ;;  %v17335_v47 = vld [vmem:[%s18061_s30 + $0x1bac] ss:$216 sps:$4 sm:$0xff]  }
 0xa24   : > { %12923 = vmatpush1.bf16.xpose.msra.mxu1 %v17243_v54  ;;  %11817 = vmatprep.subr.bf16.mxu0 %v17248_v10  ;;  %v19656_v54 = vrot.slane %v19579_v55, %v18056_v6  ;;  %v17330_v10 = vld [vmem:[%s18061_s30 + $0xa8] ss:$216 sps:$4 sm:$0xff]   ;;  %v17336_v55 = vld [vmem:[%s18061_s30 + $0x258] ss:$216 sps:$4 sm:$0xff]  }
 0xa25   : > { %12924 = vmatprep.subr.bf16.mxu1 %v17251_v12  ;;  %v17333_v12 = vld [vmem:[%s18061_s30 + $0x1ba8] ss:$216 sps:$4 sm:$0xff]  }
 0xa2b   : > { %11818 = vmatpush1.bf16.xpose.msra.mxu0 %v17246_v14  ;;  %v17338_v14 = vld [vmem:[%s18061_s30 + $0x25c] ss:$216 sps:$4 sm:$0xff]  }
 0xa2c   : > { %12925 = vmatpush1.bf16.xpose.msra.mxu1 %v17249_v15  ;;  %11819 = vmatprep.subr.bf16.mxu0 %v17254_v16  ;;  %v17341_v15 = vld [vmem:[%s18061_s30 + $0x1d5c] ss:$216 sps:$4 sm:$0xff]   ;;  %v2250_v16 = vcombine.high %v19590_v9, %v19590_v9  ;;  %v17347_v9 = vld [vmem:[%s18061_s30 + $0x1f0c] ss:$216 sps:$4 sm:$0xff]  }
 0xa2d   : > { %12926 = vmatprep.subr.bf16.mxu1 %v17257_v19  ;;  %v17339_v19 = vld [vmem:[%s18061_s30 + $0x1d58] ss:$216 sps:$4 sm:$0xff]  }
 0xa33   : > { %11820 = vmatpush1.bf16.xpose.msra.mxu0 %v17252_v20  ;;  %v17344_v20 = vld [vmem:[%s18061_s30 + $0x40c] ss:$216 sps:$4 sm:$0xff]  }
 0xa34   : > { %12927 = vmatpush1.bf16.xpose.msra.mxu1 %v17255_v11  ;;  %11821 = vmatprep.subr.bf16.mxu0 %v17260_v21  ;;  %v17342_v11 = vld [vmem:[%s18061_s30 + $0x408] ss:$216 sps:$4 sm:$0xff]  }
 0xa35   : > { %12928 = vmatprep.subr.bf16.mxu1 %v17263_v22  ;;  %v17345_v21 = vld [vmem:[%s18061_s30 + $0x1f08] ss:$216 sps:$4 sm:$0xff]   ;;  %v17350_v22 = vld [vmem:[%s18061_s30 + $0x5bc] ss:$216 sps:$4 sm:$0xff]  }
 0xa3b   : > { %11822 = vmatpush1.bf16.xpose.msra.mxu0 %v17258_v13  ;;  %v17353_v13 = vld [vmem:[%s18061_s30 + $0x20bc] ss:$216 sps:$4 sm:$0xff]  }
 0xa3c   : > { %12929 = vmatpush1.bf16.xpose.msra.mxu1 %v17261_v61  ;;  %11823 = vmatprep.subr.bf16.mxu0 %v17266_v25  ;;  %v17348_v61 = vld [vmem:[%s18061_s30 + $0x5b8] ss:$216 sps:$4 sm:$0xff]  }
 0xa3d   : > { %12930 = vmatprep.subr.bf16.mxu1 %v17269_v26  ;;  %v17351_v25 = vld [vmem:[%s18061_s30 + $0x20b8] ss:$216 sps:$4 sm:$0xff]   ;;  %v17356_v26 = vld [vmem:[%s18061_s30 + $0x76c] ss:$216 sps:$4 sm:$0xff]  }
 0xa43   : > { %11824 = vmatpush1.bf16.xpose.msra.mxu0 %v17264_v17  ;;  %v17359_v17 = vld [vmem:[%s18061_s30 + $0x226c] ss:$216 sps:$4 sm:$0xff]  }
 0xa44   : > { %12931 = vmatpush1.bf16.xpose.msra.mxu1 %v17267_v28  ;;  %11825 = vmatprep.subr.bf16.mxu0 %v17272_v30  ;;  %v17354_v28 = vld [vmem:[%s18061_s30 + $0x768] ss:$216 sps:$4 sm:$0xff]  }
 0xa45   : > { %12932 = vmatprep.subr.bf16.mxu1 %v17275_v4  ;;  %v17357_v30 = vld [vmem:[%s18061_s30 + $0x2268] ss:$216 sps:$4 sm:$0xff]   ;;  %v17362_v4 = vld [vmem:[%s18061_s30 + $0x91c] ss:$216 sps:$4 sm:$0xff]  }
 0xa4b   : > { %11826 = vmatpush1.bf16.xpose.msra.mxu0 %v17270_v33  ;;  %v17365_v33 = vld [vmem:[%s18061_s30 + $0x241c] ss:$216 sps:$4 sm:$0xff]  }
 0xa4c   : > { %12933 = vmatpush1.bf16.xpose.msra.mxu1 %v17273_v23  ;;  %11827 = vmatprep.subr.bf16.mxu0 %v17278_v5  ;;  %v17360_v23 = vld [vmem:[%s18061_s30 + $0x918] ss:$216 sps:$4 sm:$0xff]  }
 0xa4d   : > { %12934 = vmatprep.subr.bf16.mxu1 %v17281_v34  ;;  %v17363_v5 = vld [vmem:[%s18061_s30 + $0x2418] ss:$216 sps:$4 sm:$0xff]   ;;  %v17368_v34 = vld [vmem:[%s18061_s30 + $0xacc] ss:$216 sps:$4 sm:$0xff]  }
 0xa53   : > { %11828 = vmatpush1.bf16.xpose.msra.mxu0 %v17276_v18  ;;  %v17371_v18 = vld [vmem:[%s18061_s30 + $0x25cc] ss:$216 sps:$4 sm:$0xff]  }
 0xa54   : > { %12935 = vmatpush1.bf16.xpose.msra.mxu1 %v17279_v27  ;;  %11829 = vmatprep.subr.bf16.mxu0 %v17284_v36  ;;  %v17366_v27 = vld [vmem:[%s18061_s30 + $0xac8] ss:$216 sps:$4 sm:$0xff]  }
 0xa55   : > { %12936 = vmatprep.subr.bf16.mxu1 %v17287_v29  ;;  %v17369_v36 = vld [vmem:[%s18061_s30 + $0x25c8] ss:$216 sps:$4 sm:$0xff]   ;;  %v17374_v29 = vld [vmem:[%s18061_s30 + $0xc7c] ss:$216 sps:$4 sm:$0xff]  }
 0xa5b   : > { %11830 = vmatpush1.bf16.xpose.msra.mxu0 %v17282_v38  ;;  %v17377_v38 = vld [vmem:[%s18061_s30 + $0x277c] ss:$216 sps:$4 sm:$0xff]  }
 0xa5c   : > { %12937 = vmatpush1.bf16.xpose.msra.mxu1 %v17285_v40  ;;  %11831 = vmatprep.subr.bf16.mxu0 %v17290_v42  ;;  %v17372_v40 = vld [vmem:[%s18061_s30 + $0xc78] ss:$216 sps:$4 sm:$0xff]  }
 0xa5d   : > { %12938 = vmatprep.subr.bf16.mxu1 %v17293_v43  ;;  %v17375_v42 = vld [vmem:[%s18061_s30 + $0x2778] ss:$216 sps:$4 sm:$0xff]   ;;  %v17380_v43 = vld [vmem:[%s18061_s30 + $0xe2c] ss:$216 sps:$4 sm:$0xff]  }
 0xa63   : > { %11832 = vmatpush1.bf16.xpose.msra.mxu0 %v17288_v35  ;;  %v17383_v35 = vld [vmem:[%s18061_s30 + $0x292c] ss:$216 sps:$4 sm:$0xff]  }
 0xa64   : > { %12939 = vmatpush1.bf16.xpose.msra.mxu1 %v17291_v44  ;;  %11833 = vmatprep.subr.bf16.mxu0 %v17296_v37  ;;  %v17378_v44 = vld [vmem:[%s18061_s30 + $0xe28] ss:$216 sps:$4 sm:$0xff]  }
 0xa65   : > { %12940 = vmatprep.subr.bf16.mxu1 %v17299_v45  ;;  %v17381_v37 = vld [vmem:[%s18061_s30 + $0x2928] ss:$216 sps:$4 sm:$0xff]   ;;  %v17386_v45 = vld [vmem:[%s18061_s30 + $0xfdc] ss:$216 sps:$4 sm:$0xff]  }
 0xa6b   : > { %11834 = vmatpush1.bf16.xpose.msra.mxu0 %v17294_v24  ;;  %v17389_v24 = vld [vmem:[%s18061_s30 + $0x2adc] ss:$216 sps:$4 sm:$0xff]  }
 0xa6c   : > { %12941 = vmatpush1.bf16.xpose.msra.mxu1 %v17297_v48  ;;  %11835 = vmatprep.subr.bf16.mxu0 %v17302_v50  ;;  %v17384_v48 = vld [vmem:[%s18061_s30 + $0xfd8] ss:$216 sps:$4 sm:$0xff]  }
 0xa6d   : > { %12942 = vmatprep.subr.bf16.mxu1 %v17305_v51  ;;  %v17387_v50 = vld [vmem:[%s18061_s30 + $0x2ad8] ss:$216 sps:$4 sm:$0xff]   ;;  %v17392_v51 = vld [vmem:[%s18061_s30 + $0x118c] ss:$216 sps:$4 sm:$0xff]  }
 0xa73   : > { %11836 = vmatpush1.bf16.xpose.msra.mxu0 %v17300_v52  ;;  %v17395_v52 = vld [vmem:[%s18061_s30 + $0x2c8c] ss:$216 sps:$4 sm:$0xff]  }
 0xa74   : > { %12943 = vmatpush1.bf16.xpose.msra.mxu1 %v17303_v53  ;;  %11837 = vmatprep.subr.bf16.mxu0 %v17308_v31  ;;  %v17390_v53 = vld [vmem:[%s18061_s30 + $0x1188] ss:$216 sps:$4 sm:$0xff]  }
 0xa75   : > { %12944 = vmatprep.subr.bf16.mxu1 %v17311_v56  ;;  %v17393_v31 = vld [vmem:[%s18061_s30 + $0x2c88] ss:$216 sps:$4 sm:$0xff]   ;;  %v17398_v56 = vld [vmem:[%s18061_s30 + $0x133c] ss:$216 sps:$4 sm:$0xff]  }
 0xa7b   : > { %11838 = vmatpush1.bf16.xpose.msra.mxu0 %v17306_v46  ;;  %v17401_v46 = vld [vmem:[%s18061_s30 + $0x2e3c] ss:$216 sps:$4 sm:$0xff]  }
 0xa7c   : > { %12945 = vmatpush1.bf16.xpose.msra.mxu1 %v17309_v49  ;;  %11839 = vmatprep.subr.bf16.mxu0 %v17314_v57  ;;  %v17396_v49 = vld [vmem:[%s18061_s30 + $0x1338] ss:$216 sps:$4 sm:$0xff]  }
 0xa7d   : > { %12946 = vmatprep.subr.bf16.mxu1 %v17317_v41  ;;  %v17399_v57 = vld [vmem:[%s18061_s30 + $0x2e38] ss:$216 sps:$4 sm:$0xff]   ;;  %v17404_v41 = vld [vmem:[%s18061_s30 + $0x14ec] ss:$216 sps:$4 sm:$0xff]  }
 0xa83   : > { %11840 = vmatpush1.bf16.xpose.msra.mxu0 %v17312_v58  ;;  %v17407_v58 = vld [vmem:[%s18061_s30 + $0x2fec] ss:$216 sps:$4 sm:$0xff]  }
 0xa84   : > { %12947 = vmatpush1.bf16.xpose.msra.mxu1 %v17315_v39  ;;  %11841 = vmatprep.subr.bf16.mxu0 %v17320_v62  ;;  %v17402_v39 = vld [vmem:[%s18061_s30 + $0x14e8] ss:$216 sps:$4 sm:$0xff]  }
 0xa85   : > { %12948 = vmatprep.subr.bf16.mxu1 %v17323_v63  ;;  %v17405_v62 = vld [vmem:[%s18061_s30 + $0x2fe8] ss:$216 sps:$4 sm:$0xff]   ;;  %v17410_v63 = vld [vmem:[%s18061_s30 + $0x169c] ss:$216 sps:$4 sm:$0xff]  }
 0xa8b   : > { %11842 = vmatpush1.bf16.xpose.msra.mxu0 %v17318_v0  ;;  %v17413_v0 = vld [vmem:[%s18061_s30 + $0x319c] ss:$216 sps:$4 sm:$0xff]  }
 0xa8c   : > { %12949 = vmatpush1.bf16.xpose.msra.mxu1 %v17321_v2  ;;  %11843 = vmatprep.subr.bf16.mxu0 %v17326_v32  ;;  %v17408_v2 = vld [vmem:[%s18061_s30 + $0x1698] ss:$216 sps:$4 sm:$0xff]  }
 0xa8d   : > { %12950 = vmatprep.subr.bf16.mxu1 %v17329_v59  ;;  %v17411_v32 = vld [vmem:[%s18061_s30 + $0x3198] ss:$216 sps:$4 sm:$0xff]   ;;  %v17416_v59 = vld [vmem:[%s18061_s30 + $0x184c] ss:$216 sps:$4 sm:$0xff]  }
 0xa93   : > { %11844 = vmatpush1.bf16.xpose.msra.mxu0 %v17324_v7  ;;  %v17419_v7 = vld [vmem:[%s18061_s30 + $0x334c] ss:$216 sps:$4 sm:$0xff]  }
 0xa94   : > { %12951 = vmatpush1.bf16.xpose.msra.mxu1 %v17327_v60  ;;  %11854 = vmatprep.subr.bf16.mxu0 %v17332_v8  ;;  %v17414_v60 = vld [vmem:[%s18061_s30 + $0x1848] ss:$216 sps:$4 sm:$0xff]  }
 0xa95   : > { %12961 = vmatprep.subr.bf16.mxu1 %v17335_v47  ;;  %v17417_v8 = vld [vmem:[%s18061_s30 + $0x3348] ss:$216 sps:$4 sm:$0xff]   ;;  %v17422_v47 = vld [vmem:[%s18061_s30 + $0x19fc] ss:$216 sps:$4 sm:$0xff]  }
 0xa9a   : > { %11846 = vmatmul.mubr.bf16.vlgmr.msra.gmra.mrb[0].mxu0 %v19656_v54 }
 0xa9b   : > { %12953 = vmatmul.mubr.bf16.vlgmr.msra.gmra.mrb[0].mxu1 %v19656_v54  ;;  %11855 = vmatpush1.bf16.xpose.msra.mxu0 %v17330_v10  ;;  %v17425_v10 = vld [vmem:[%s18061_s30 + $0x34fc] ss:$216 sps:$4 sm:$0xff]  }
 0xa9c   : > { %12962 = vmatpush1.bf16.xpose.msra.mxu1 %v17333_v12  ;;  %11856 = vmatprep.subr.bf16.mxu0 %v17338_v14  ;;  %v17420_v12 = vld [vmem:[%s18061_s30 + $0x19f8] ss:$216 sps:$4 sm:$0xff]  }
 0xa9d   : > { %12963 = vmatprep.subr.bf16.mxu1 %v17341_v15  ;;  %11886 = vmatprep.mubr.bf16.mxu0 %v2250_v16  ;;  %v17423_v14 = vld [vmem:[%s18061_s30 + $0x34f8] ss:$216 sps:$4 sm:$0xff]   ;;  %v17428_v15 = vld [vmem:[%s18061_s30 + $0xb4] ss:$216 sps:$4 sm:$0xff]  }
 0xa9e   : > { %12993 = vmatprep.mubr.bf16.mxu1 %v2250_v16  ;;  %v17431_v16 = vld [vmem:[%s18061_s30 + $0x1bb4] ss:$216 sps:$4 sm:$0xff]  }
 0xaa3   : > { %11857 = vmatpush1.bf16.xpose.msra.mxu0 %v17336_v55  ;;  %v2203_v55 = vcombine.high %v19575_v1, %v19575_v1  ;;  %v17434_v1 = vld [vmem:[%s18061_s30 + $0x264] ss:$216 sps:$4 sm:$0xff]  }
 0xaa4   : > { %12964 = vmatpush1.bf16.xpose.msra.mxu1 %v17339_v19  ;;  %11858 = vmatprep.subr.bf16.mxu0 %v17344_v20  ;;  %v2248_v20 = vcombine.high %v19656_v54, %v19656_v54  ;;  %v17432_v54 = vld [vmem:[%s18061_s30 + $0x260] ss:$216 sps:$4 sm:$0xff]  }
 0xaa5   : > { %12965 = vmatprep.subr.bf16.mxu1 %v17347_v9  ;;  %v19729_v19 = vrot.slane %v2203_v55, %v18056_v6  ;;  %v17513_v55 = vld [vmem:[%s18061_s30 + $0x3350] ss:$216 sps:$4 sm:$0xff]  }
 0xaa7   : > { %v2219_v9 = vcombine.high %v19729_v19, %v19729_v19 }
 0xaab   : > { %11859 = vmatpush1.bf16.xpose.msra.mxu0 %v17342_v11  ;;  %v17426_v11 = vld [vmem:[%s18061_s30 + $0xb0] ss:$216 sps:$4 sm:$0xff]  }
 0xaac   : > { %12966 = vmatpush1.bf16.xpose.msra.mxu1 %v17345_v21  ;;  %11860 = vmatprep.subr.bf16.mxu0 %v17350_v22  ;;  %v17429_v21 = vld [vmem:[%s18061_s30 + $0x1bb0] ss:$216 sps:$4 sm:$0xff]   ;;  %v17437_v22 = vld [vmem:[%s18061_s30 + $0x1d64] ss:$216 sps:$4 sm:$0xff]  }
 0xaad   : > { %12967 = vmatprep.subr.bf16.mxu1 %v17353_v13  ;;  %v19740_v13 = vrot.slane %v2219_v9, %v18056_v6  ;;  %v17521_v9 = vld [vmem:[%s18061_s30 + $0x3504] ss:$216 sps:$4 sm:$0xff]  }
 0xab3   : > { %11861 = vmatpush1.bf16.xpose.msra.mxu0 %v17348_v61  ;;  %v17435_v61 = vld [vmem:[%s18061_s30 + $0x1d60] ss:$216 sps:$4 sm:$0xff]  }
 0xab4   : > { %12968 = vmatpush1.bf16.xpose.msra.mxu1 %v17351_v25  ;;  %11862 = vmatprep.subr.bf16.mxu0 %v17356_v26  ;;  %v17440_v25 = vld [vmem:[%s18061_s30 + $0x414] ss:$216 sps:$4 sm:$0xff]  }
 0xab5   : > { %12969 = vmatprep.subr.bf16.mxu1 %v17359_v17  ;;  %v17443_v26 = vld [vmem:[%s18061_s30 + $0x1f14] ss:$216 sps:$4 sm:$0xff]   ;;  %v17438_v17 = vld [vmem:[%s18061_s30 + $0x410] ss:$216 sps:$4 sm:$0xff]  }
 0xabb   : > { %11863 = vmatpush1.bf16.xpose.msra.mxu0 %v17354_v28  ;;  %v17441_v28 = vld [vmem:[%s18061_s30 + $0x1f10] ss:$216 sps:$4 sm:$0xff]  }
 0xabc   : > { %12970 = vmatpush1.bf16.xpose.msra.mxu1 %v17357_v30  ;;  %11864 = vmatprep.subr.bf16.mxu0 %v17362_v4  ;;  %v17446_v30 = vld [vmem:[%s18061_s30 + $0x5c4] ss:$216 sps:$4 sm:$0xff]  }
 0xabd   : > { %12971 = vmatprep.subr.bf16.mxu1 %v17365_v33  ;;  %v17449_v4 = vld [vmem:[%s18061_s30 + $0x20c4] ss:$216 sps:$4 sm:$0xff]   ;;  %v17444_v33 = vld [vmem:[%s18061_s30 + $0x5c0] ss:$216 sps:$4 sm:$0xff]  }
 0xac3   : > { %11865 = vmatpush1.bf16.xpose.msra.mxu0 %v17360_v23  ;;  %v17447_v23 = vld [vmem:[%s18061_s30 + $0x20c0] ss:$216 sps:$4 sm:$0xff]  }
 0xac4   : > { %12972 = vmatpush1.bf16.xpose.msra.mxu1 %v17363_v5  ;;  %11866 = vmatprep.subr.bf16.mxu0 %v17368_v34  ;;  %v17452_v5 = vld [vmem:[%s18061_s30 + $0x774] ss:$216 sps:$4 sm:$0xff]  }
 0xac5   : > { %12973 = vmatprep.subr.bf16.mxu1 %v17371_v18  ;;  %v17455_v34 = vld [vmem:[%s18061_s30 + $0x2274] ss:$216 sps:$4 sm:$0xff]   ;;  %v17450_v18 = vld [vmem:[%s18061_s30 + $0x770] ss:$216 sps:$4 sm:$0xff]  }
 0xacb   : > { %11867 = vmatpush1.bf16.xpose.msra.mxu0 %v17366_v27  ;;  %v17453_v27 = vld [vmem:[%s18061_s30 + $0x2270] ss:$216 sps:$4 sm:$0xff]  }
 0xacc   : > { %12974 = vmatpush1.bf16.xpose.msra.mxu1 %v17369_v36  ;;  %11868 = vmatprep.subr.bf16.mxu0 %v17374_v29  ;;  %v17458_v36 = vld [vmem:[%s18061_s30 + $0x924] ss:$216 sps:$4 sm:$0xff]  }
 0xacd   : > { %12975 = vmatprep.subr.bf16.mxu1 %v17377_v38  ;;  %v17461_v29 = vld [vmem:[%s18061_s30 + $0x2424] ss:$216 sps:$4 sm:$0xff]   ;;  %v17456_v38 = vld [vmem:[%s18061_s30 + $0x920] ss:$216 sps:$4 sm:$0xff]  }
 0xad3   : > { %11869 = vmatpush1.bf16.xpose.msra.mxu0 %v17372_v40  ;;  %v17459_v40 = vld [vmem:[%s18061_s30 + $0x2420] ss:$216 sps:$4 sm:$0xff]  }
 0xad4   : > { %12976 = vmatpush1.bf16.xpose.msra.mxu1 %v17375_v42  ;;  %11870 = vmatprep.subr.bf16.mxu0 %v17380_v43  ;;  %v17464_v42 = vld [vmem:[%s18061_s30 + $0xad4] ss:$216 sps:$4 sm:$0xff]  }
 0xad5   : > { %12977 = vmatprep.subr.bf16.mxu1 %v17383_v35  ;;  %v17467_v43 = vld [vmem:[%s18061_s30 + $0x25d4] ss:$216 sps:$4 sm:$0xff]   ;;  %v17462_v35 = vld [vmem:[%s18061_s30 + $0xad0] ss:$216 sps:$4 sm:$0xff]  }
 0xadb   : > { %11871 = vmatpush1.bf16.xpose.msra.mxu0 %v17378_v44  ;;  %v17465_v44 = vld [vmem:[%s18061_s30 + $0x25d0] ss:$216 sps:$4 sm:$0xff]  }
 0xadc   : > { %12978 = vmatpush1.bf16.xpose.msra.mxu1 %v17381_v37  ;;  %11872 = vmatprep.subr.bf16.mxu0 %v17386_v45  ;;  %v17470_v37 = vld [vmem:[%s18061_s30 + $0xc84] ss:$216 sps:$4 sm:$0xff]  }
 0xadd   : > { %12979 = vmatprep.subr.bf16.mxu1 %v17389_v24  ;;  %v17473_v45 = vld [vmem:[%s18061_s30 + $0x2784] ss:$216 sps:$4 sm:$0xff]   ;;  %v17468_v24 = vld [vmem:[%s18061_s30 + $0xc80] ss:$216 sps:$4 sm:$0xff]  }
 0xae3   : > { %11873 = vmatpush1.bf16.xpose.msra.mxu0 %v17384_v48  ;;  %v17471_v48 = vld [vmem:[%s18061_s30 + $0x2780] ss:$216 sps:$4 sm:$0xff]  }
 0xae4   : > { %12980 = vmatpush1.bf16.xpose.msra.mxu1 %v17387_v50  ;;  %11874 = vmatprep.subr.bf16.mxu0 %v17392_v51  ;;  %v17476_v50 = vld [vmem:[%s18061_s30 + $0xe34] ss:$216 sps:$4 sm:$0xff]  }
 0xae5   : > { %12981 = vmatprep.subr.bf16.mxu1 %v17395_v52  ;;  %v17479_v51 = vld [vmem:[%s18061_s30 + $0x2934] ss:$216 sps:$4 sm:$0xff]   ;;  %v17474_v52 = vld [vmem:[%s18061_s30 + $0xe30] ss:$216 sps:$4 sm:$0xff]  }
 0xaeb   : > { %11875 = vmatpush1.bf16.xpose.msra.mxu0 %v17390_v53  ;;  %v17477_v53 = vld [vmem:[%s18061_s30 + $0x2930] ss:$216 sps:$4 sm:$0xff]  }
 0xaec   : > { %12982 = vmatpush1.bf16.xpose.msra.mxu1 %v17393_v31  ;;  %11876 = vmatprep.subr.bf16.mxu0 %v17398_v56  ;;  %v17482_v31 = vld [vmem:[%s18061_s30 + $0xfe4] ss:$216 sps:$4 sm:$0xff]  }
 0xaed   : > { %12983 = vmatprep.subr.bf16.mxu1 %v17401_v46  ;;  %v17485_v56 = vld [vmem:[%s18061_s30 + $0x2ae4] ss:$216 sps:$4 sm:$0xff]   ;;  %v17480_v46 = vld [vmem:[%s18061_s30 + $0xfe0] ss:$216 sps:$4 sm:$0xff]  }
 0xaf3   : > { %11877 = vmatpush1.bf16.xpose.msra.mxu0 %v17396_v49  ;;  %v17483_v49 = vld [vmem:[%s18061_s30 + $0x2ae0] ss:$216 sps:$4 sm:$0xff]  }
 0xaf4   : > { %12984 = vmatpush1.bf16.xpose.msra.mxu1 %v17399_v57  ;;  %11878 = vmatprep.subr.bf16.mxu0 %v17404_v41  ;;  %v17488_v57 = vld [vmem:[%s18061_s30 + $0x1194] ss:$216 sps:$4 sm:$0xff]  }
 0xaf5   : > { %12985 = vmatprep.subr.bf16.mxu1 %v17407_v58  ;;  %v17491_v41 = vld [vmem:[%s18061_s30 + $0x2c94] ss:$216 sps:$4 sm:$0xff]   ;;  %v17486_v58 = vld [vmem:[%s18061_s30 + $0x1190] ss:$216 sps:$4 sm:$0xff]  }
 0xafb   : > { %11879 = vmatpush1.bf16.xpose.msra.mxu0 %v17402_v39  ;;  %v17489_v39 = vld [vmem:[%s18061_s30 + $0x2c90] ss:$216 sps:$4 sm:$0xff]  }
 0xafc   : > { %12986 = vmatpush1.bf16.xpose.msra.mxu1 %v17405_v62  ;;  %11880 = vmatprep.subr.bf16.mxu0 %v17410_v63  ;;  %v17494_v62 = vld [vmem:[%s18061_s30 + $0x1344] ss:$216 sps:$4 sm:$0xff]  }
 0xafd   : > { %12987 = vmatprep.subr.bf16.mxu1 %v17413_v0  ;;  %v17497_v63 = vld [vmem:[%s18061_s30 + $0x2e44] ss:$216 sps:$4 sm:$0xff]   ;;  %v17492_v0 = vld [vmem:[%s18061_s30 + $0x1340] ss:$216 sps:$4 sm:$0xff]  }
 0xb03   : > { %11881 = vmatpush1.bf16.xpose.msra.mxu0 %v17408_v2  ;;  %v17495_v2 = vld [vmem:[%s18061_s30 + $0x2e40] ss:$216 sps:$4 sm:$0xff]  }
 0xb04   : > { %12988 = vmatpush1.bf16.xpose.msra.mxu1 %v17411_v32  ;;  %11882 = vmatprep.subr.bf16.mxu0 %v17416_v59  ;;  %v17500_v32 = vld [vmem:[%s18061_s30 + $0x14f4] ss:$216 sps:$4 sm:$0xff]  }
 0xb05   : > { %12989 = vmatprep.subr.bf16.mxu1 %v17419_v7  ;;  %v17503_v59 = vld [vmem:[%s18061_s30 + $0x2ff4] ss:$216 sps:$4 sm:$0xff]   ;;  %v17498_v7 = vld [vmem:[%s18061_s30 + $0x14f0] ss:$216 sps:$4 sm:$0xff]  }
 0xb0b   : > { %11883 = vmatpush1.bf16.xpose.msra.mxu0 %v17414_v60  ;;  %v17501_v60 = vld [vmem:[%s18061_s30 + $0x2ff0] ss:$216 sps:$4 sm:$0xff]  }
 0xb0c   : > { %12990 = vmatpush1.bf16.xpose.msra.mxu1 %v17417_v8  ;;  %11884 = vmatprep.subr.bf16.mxu0 %v17422_v47  ;;  %v17506_v8 = vld [vmem:[%s18061_s30 + $0x16a4] ss:$216 sps:$4 sm:$0xff]  }
 0xb0d   : > { %12991 = vmatprep.subr.bf16.mxu1 %v17425_v10  ;;  %v17509_v47 = vld [vmem:[%s18061_s30 + $0x31a4] ss:$216 sps:$4 sm:$0xff]   ;;  %v17504_v10 = vld [vmem:[%s18061_s30 + $0x16a0] ss:$216 sps:$4 sm:$0xff]  }
 0xb13   : > { %11885 = vmatpush1.bf16.xpose.msra.mxu0 %v17420_v12  ;;  %v17507_v12 = vld [vmem:[%s18061_s30 + $0x31a0] ss:$216 sps:$4 sm:$0xff]  }
 0xb14   : > { %12992 = vmatpush1.bf16.xpose.msra.mxu1 %v17423_v14  ;;  %11895 = vmatprep.subr.bf16.mxu0 %v17428_v15  ;;  %v17512_v14 = vld [vmem:[%s18061_s30 + $0x1854] ss:$216 sps:$4 sm:$0xff]  }
 0xb15   : > { %13002 = vmatprep.subr.bf16.mxu1 %v17431_v16  ;;  %v17515_v15 = vld [vmem:[%s18061_s30 + $0x3354] ss:$216 sps:$4 sm:$0xff]   ;;  %v17510_v16 = vld [vmem:[%s18061_s30 + $0x1850] ss:$216 sps:$4 sm:$0xff]  }
 0xb1a   : > { %11887 = vmatmul.mubr.bf16.vlgmr.msra.gmra.mrb[0].mxu0 %v2248_v20 }
 0xb1b   : > { %12994 = vmatmul.mubr.bf16.vlgmr.msra.gmra.mrb[0].mxu1 %v2248_v20  ;;  %11896 = vmatpush1.bf16.xpose.msra.mxu0 %v17426_v11  ;;  %v17518_v20 = vld [vmem:[%s18061_s30 + $0x1a04] ss:$216 sps:$4 sm:$0xff]   ;;  %v17516_v11 = vld [vmem:[%s18061_s30 + $0x1a00] ss:$216 sps:$4 sm:$0xff]  }
 0xb1c   : > { %13003 = vmatpush1.bf16.xpose.msra.mxu1 %v17429_v21  ;;  %11897 = vmatprep.subr.bf16.mxu0 %v17434_v1  ;;  %v17519_v21 = vld [vmem:[%s18061_s30 + $0x3500] ss:$216 sps:$4 sm:$0xff]   ;;  %v17525_v1 = vld [vmem:[%s18061_s30 + $0xbc] ss:$216 sps:$4 sm:$0xff]  }
 0xb1d   : > { %13004 = vmatprep.subr.bf16.mxu1 %v17437_v22  ;;  %11927 = vmatprep.mubr.bf16.mxu0 %v19740_v13  ;;  %v17528_v22 = vld [vmem:[%s18061_s30 + $0x1bbc] ss:$216 sps:$4 sm:$0xff]  }
 0xb1e   : > { %13034 = vmatprep.mubr.bf16.mxu1 %v19740_v13 }
 0xb23   : > { %11898 = vmatpush1.bf16.xpose.msra.mxu0 %v17432_v54  ;;  %v19806_v54 = vrot.slane %v19729_v19, %v18056_v6  ;;  %v17529_v19 = vld [vmem:[%s18061_s30 + $0x268] ss:$216 sps:$4 sm:$0xff]  }
 0xb24   : > { %13005 = vmatpush1.bf16.xpose.msra.mxu1 %v17435_v61  ;;  %11899 = vmatprep.subr.bf16.mxu0 %v17440_v25  ;;  %v17523_v61 = vld [vmem:[%s18061_s30 + $0xb8] ss:$216 sps:$4 sm:$0xff]  }
 0xb25   : > { %13006 = vmatprep.subr.bf16.mxu1 %v17443_v26  ;;  %v17526_v25 = vld [vmem:[%s18061_s30 + $0x1bb8] ss:$216 sps:$4 sm:$0xff]   ;;  %v17531_v26 = vld [vmem:[%s18061_s30 + $0x26c] ss:$216 sps:$4 sm:$0xff]  }
 0xb2b   : > { %11900 = vmatpush1.bf16.xpose.msra.mxu0 %v17438_v17  ;;  %v17534_v17 = vld [vmem:[%s18061_s30 + $0x1d6c] ss:$216 sps:$4 sm:$0xff]  }
 0xb2c   : > { %13007 = vmatpush1.bf16.xpose.msra.mxu1 %v17441_v28  ;;  %11901 = vmatprep.subr.bf16.mxu0 %v17446_v30  ;;  %v2251_v28 = vcombine.high %v19740_v13, %v19740_v13  ;;  %v17532_v30 = vld [vmem:[%s18061_s30 + $0x1d68] ss:$216 sps:$4 sm:$0xff]   ;;  %v17540_v13 = vld [vmem:[%s18061_s30 + $0x1f1c] ss:$216 sps:$4 sm:$0xff]  }
 0xb2d   : > { %13008 = vmatprep.subr.bf16.mxu1 %v17449_v4  ;;  %v17537_v4 = vld [vmem:[%s18061_s30 + $0x41c] ss:$216 sps:$4 sm:$0xff]  }
 0xb33   : > { %11902 = vmatpush1.bf16.xpose.msra.mxu0 %v17444_v33  ;;  %v17535_v33 = vld [vmem:[%s18061_s30 + $0x418] ss:$216 sps:$4 sm:$0xff]  }
 0xb34   : > { %13009 = vmatpush1.bf16.xpose.msra.mxu1 %v17447_v23  ;;  %11903 = vmatprep.subr.bf16.mxu0 %v17452_v5  ;;  %v17538_v23 = vld [vmem:[%s18061_s30 + $0x1f18] ss:$216 sps:$4 sm:$0xff]   ;;  %v17543_v5 = vld [vmem:[%s18061_s30 + $0x5cc] ss:$216 sps:$4 sm:$0xff]  }
 0xb35   : > { %13010 = vmatprep.subr.bf16.mxu1 %v17455_v34  ;;  %v17546_v34 = vld [vmem:[%s18061_s30 + $0x20cc] ss:$216 sps:$4 sm:$0xff]  }
 0xb3b   : > { %11904 = vmatpush1.bf16.xpose.msra.mxu0 %v17450_v18  ;;  %v17541_v18 = vld [vmem:[%s18061_s30 + $0x5c8] ss:$216 sps:$4 sm:$0xff]  }
 0xb3c   : > { %13011 = vmatpush1.bf16.xpose.msra.mxu1 %v17453_v27  ;;  %11905 = vmatprep.subr.bf16.mxu0 %v17458_v36  ;;  %v17544_v27 = vld [vmem:[%s18061_s30 + $0x20c8] ss:$216 sps:$4 sm:$0xff]   ;;  %v17549_v36 = vld [vmem:[%s18061_s30 + $0x77c] ss:$216 sps:$4 sm:$0xff]  }
 0xb3d   : > { %13012 = vmatprep.subr.bf16.mxu1 %v17461_v29  ;;  %v17552_v29 = vld [vmem:[%s18061_s30 + $0x227c] ss:$216 sps:$4 sm:$0xff]  }
 0xb43   : > { %11906 = vmatpush1.bf16.xpose.msra.mxu0 %v17456_v38  ;;  %v17547_v38 = vld [vmem:[%s18061_s30 + $0x778] ss:$216 sps:$4 sm:$0xff]  }
 0xb44   : > { %13013 = vmatpush1.bf16.xpose.msra.mxu1 %v17459_v40  ;;  %11907 = vmatprep.subr.bf16.mxu0 %v17464_v42  ;;  %v17550_v40 = vld [vmem:[%s18061_s30 + $0x2278] ss:$216 sps:$4 sm:$0xff]   ;;  %v17555_v42 = vld [vmem:[%s18061_s30 + $0x92c] ss:$216 sps:$4 sm:$0xff]  }
 0xb45   : > { %13014 = vmatprep.subr.bf16.mxu1 %v17467_v43  ;;  %v17558_v43 = vld [vmem:[%s18061_s30 + $0x242c] ss:$216 sps:$4 sm:$0xff]  }
 0xb4b   : > { %11908 = vmatpush1.bf16.xpose.msra.mxu0 %v17462_v35  ;;  %v17553_v35 = vld [vmem:[%s18061_s30 + $0x928] ss:$216 sps:$4 sm:$0xff]  }
 0xb4c   : > { %13015 = vmatpush1.bf16.xpose.msra.mxu1 %v17465_v44  ;;  %11909 = vmatprep.subr.bf16.mxu0 %v17470_v37  ;;  %v17556_v44 = vld [vmem:[%s18061_s30 + $0x2428] ss:$216 sps:$4 sm:$0xff]   ;;  %v17561_v37 = vld [vmem:[%s18061_s30 + $0xadc] ss:$216 sps:$4 sm:$0xff]  }
 0xb4d   : > { %13016 = vmatprep.subr.bf16.mxu1 %v17473_v45  ;;  %v17564_v45 = vld [vmem:[%s18061_s30 + $0x25dc] ss:$216 sps:$4 sm:$0xff]  }
 0xb53   : > { %11910 = vmatpush1.bf16.xpose.msra.mxu0 %v17468_v24  ;;  %v17559_v24 = vld [vmem:[%s18061_s30 + $0xad8] ss:$216 sps:$4 sm:$0xff]  }
 0xb54   : > { %13017 = vmatpush1.bf16.xpose.msra.mxu1 %v17471_v48  ;;  %11911 = vmatprep.subr.bf16.mxu0 %v17476_v50  ;;  %v17562_v48 = vld [vmem:[%s18061_s30 + $0x25d8] ss:$216 sps:$4 sm:$0xff]   ;;  %v17567_v50 = vld [vmem:[%s18061_s30 + $0xc8c] ss:$216 sps:$4 sm:$0xff]  }
 0xb55   : > { %13018 = vmatprep.subr.bf16.mxu1 %v17479_v51  ;;  %v17570_v51 = vld [vmem:[%s18061_s30 + $0x278c] ss:$216 sps:$4 sm:$0xff]  }
 0xb5b   : > { %11912 = vmatpush1.bf16.xpose.msra.mxu0 %v17474_v52  ;;  %v17565_v52 = vld [vmem:[%s18061_s30 + $0xc88] ss:$216 sps:$4 sm:$0xff]  }
 0xb5c   : > { %13019 = vmatpush1.bf16.xpose.msra.mxu1 %v17477_v53  ;;  %11913 = vmatprep.subr.bf16.mxu0 %v17482_v31  ;;  %v17568_v53 = vld [vmem:[%s18061_s30 + $0x2788] ss:$216 sps:$4 sm:$0xff]   ;;  %v17573_v31 = vld [vmem:[%s18061_s30 + $0xe3c] ss:$216 sps:$4 sm:$0xff]  }
 0xb5d   : > { %13020 = vmatprep.subr.bf16.mxu1 %v17485_v56  ;;  %v17576_v56 = vld [vmem:[%s18061_s30 + $0x293c] ss:$216 sps:$4 sm:$0xff]  }
 0xb63   : > { %11914 = vmatpush1.bf16.xpose.msra.mxu0 %v17480_v46  ;;  %v17571_v46 = vld [vmem:[%s18061_s30 + $0xe38] ss:$216 sps:$4 sm:$0xff]  }
 0xb64   : > { %13021 = vmatpush1.bf16.xpose.msra.mxu1 %v17483_v49  ;;  %11915 = vmatprep.subr.bf16.mxu0 %v17488_v57  ;;  %v17574_v49 = vld [vmem:[%s18061_s30 + $0x2938] ss:$216 sps:$4 sm:$0xff]   ;;  %v17579_v57 = vld [vmem:[%s18061_s30 + $0xfec] ss:$216 sps:$4 sm:$0xff]  }
 0xb65   : > { %13022 = vmatprep.subr.bf16.mxu1 %v17491_v41  ;;  %v17582_v41 = vld [vmem:[%s18061_s30 + $0x2aec] ss:$216 sps:$4 sm:$0xff]  }
 0xb6b   : > { %11916 = vmatpush1.bf16.xpose.msra.mxu0 %v17486_v58  ;;  %v17577_v58 = vld [vmem:[%s18061_s30 + $0xfe8] ss:$216 sps:$4 sm:$0xff]  }
 0xb6c   : > { %13023 = vmatpush1.bf16.xpose.msra.mxu1 %v17489_v39  ;;  %11917 = vmatprep.subr.bf16.mxu0 %v17494_v62  ;;  %v17580_v39 = vld [vmem:[%s18061_s30 + $0x2ae8] ss:$216 sps:$4 sm:$0xff]   ;;  %v17585_v62 = vld [vmem:[%s18061_s30 + $0x119c] ss:$216 sps:$4 sm:$0xff]  }
 0xb6d   : > { %13024 = vmatprep.subr.bf16.mxu1 %v17497_v63  ;;  %v17588_v63 = vld [vmem:[%s18061_s30 + $0x2c9c] ss:$216 sps:$4 sm:$0xff]  }
 0xb73   : > { %11918 = vmatpush1.bf16.xpose.msra.mxu0 %v17492_v0  ;;  %v17583_v0 = vld [vmem:[%s18061_s30 + $0x1198] ss:$216 sps:$4 sm:$0xff]  }
 0xb74   : > { %13025 = vmatpush1.bf16.xpose.msra.mxu1 %v17495_v2  ;;  %11919 = vmatprep.subr.bf16.mxu0 %v17500_v32  ;;  %v17586_v2 = vld [vmem:[%s18061_s30 + $0x2c98] ss:$216 sps:$4 sm:$0xff]   ;;  %v17591_v32 = vld [vmem:[%s18061_s30 + $0x134c] ss:$216 sps:$4 sm:$0xff]  }
 0xb75   : > { %13026 = vmatprep.subr.bf16.mxu1 %v17503_v59  ;;  %v17594_v59 = vld [vmem:[%s18061_s30 + $0x2e4c] ss:$216 sps:$4 sm:$0xff]  }
 0xb7b   : > { %11920 = vmatpush1.bf16.xpose.msra.mxu0 %v17498_v7  ;;  %v17589_v7 = vld [vmem:[%s18061_s30 + $0x1348] ss:$216 sps:$4 sm:$0xff]  }
 0xb7c   : > { %13027 = vmatpush1.bf16.xpose.msra.mxu1 %v17501_v60  ;;  %11921 = vmatprep.subr.bf16.mxu0 %v17506_v8  ;;  %v17592_v60 = vld [vmem:[%s18061_s30 + $0x2e48] ss:$216 sps:$4 sm:$0xff]   ;;  %v17597_v8 = vld [vmem:[%s18061_s30 + $0x14fc] ss:$216 sps:$4 sm:$0xff]  }
 0xb7d   : > { %13028 = vmatprep.subr.bf16.mxu1 %v17509_v47  ;;  %v17600_v47 = vld [vmem:[%s18061_s30 + $0x2ffc] ss:$216 sps:$4 sm:$0xff]  }
 0xb83   : > { %11922 = vmatpush1.bf16.xpose.msra.mxu0 %v17504_v10  ;;  %v17595_v10 = vld [vmem:[%s18061_s30 + $0x14f8] ss:$216 sps:$4 sm:$0xff]  }
 0xb84   : > { %13029 = vmatpush1.bf16.xpose.msra.mxu1 %v17507_v12  ;;  %11923 = vmatprep.subr.bf16.mxu0 %v17512_v14  ;;  %v17598_v12 = vld [vmem:[%s18061_s30 + $0x2ff8] ss:$216 sps:$4 sm:$0xff]   ;;  %v17603_v14 = vld [vmem:[%s18061_s30 + $0x16ac] ss:$216 sps:$4 sm:$0xff]  }
 0xb85   : > { %13030 = vmatprep.subr.bf16.mxu1 %v17515_v15  ;;  %v17606_v15 = vld [vmem:[%s18061_s30 + $0x31ac] ss:$216 sps:$4 sm:$0xff]  }
 0xb8b   : > { %11924 = vmatpush1.bf16.xpose.msra.mxu0 %v17510_v16  ;;  %v17601_v16 = vld [vmem:[%s18061_s30 + $0x16a8] ss:$216 sps:$4 sm:$0xff]  }
 0xb8c   : > { %13031 = vmatpush1.bf16.xpose.msra.mxu1 %v17513_v55  ;;  %11925 = vmatprep.subr.bf16.mxu0 %v17518_v20  ;;  %v17604_v55 = vld [vmem:[%s18061_s30 + $0x31a8] ss:$216 sps:$4 sm:$0xff]   ;;  %v17609_v20 = vld [vmem:[%s18061_s30 + $0x185c] ss:$216 sps:$4 sm:$0xff]  }
 0xb8d   : > { %13032 = vmatprep.subr.bf16.mxu1 %v17521_v9  ;;  %v17612_v9 = vld [vmem:[%s18061_s30 + $0x335c] ss:$216 sps:$4 sm:$0xff]  }
 0xb93   : > { %11926 = vmatpush1.bf16.xpose.msra.mxu0 %v17516_v11  ;;  %v17607_v11 = vld [vmem:[%s18061_s30 + $0x1858] ss:$216 sps:$4 sm:$0xff]  }
 0xb94   : > { %13033 = vmatpush1.bf16.xpose.msra.mxu1 %v17519_v21  ;;  %11936 = vmatprep.subr.bf16.mxu0 %v17525_v1  ;;  %v17610_v21 = vld [vmem:[%s18061_s30 + $0x3358] ss:$216 sps:$4 sm:$0xff]   ;;  %v17615_v1 = vld [vmem:[%s18061_s30 + $0x1a0c] ss:$216 sps:$4 sm:$0xff]  }
 0xb95   : > { %13043 = vmatprep.subr.bf16.mxu1 %v17528_v22  ;;  %v17618_v22 = vld [vmem:[%s18061_s30 + $0x350c] ss:$216 sps:$4 sm:$0xff]  }
 0xb9a   : > { %11928 = vmatmul.mubr.bf16.vlgmr.msra.gmra.mrb[0].mxu0 %v19806_v54 }
 0xb9b   : > { %13035 = vmatmul.mubr.bf16.vlgmr.msra.gmra.mrb[0].mxu1 %v19806_v54  ;;  %11937 = vmatpush1.bf16.xpose.msra.mxu0 %v17523_v61  ;;  %v17613_v61 = vld [vmem:[%s18061_s30 + $0x1a08] ss:$216 sps:$4 sm:$0xff]  }
 0xb9c   : > { %13044 = vmatpush1.bf16.xpose.msra.mxu1 %v17526_v25  ;;  %11938 = vmatprep.subr.bf16.mxu0 %v17531_v26  ;;  %v17616_v25 = vld [vmem:[%s18061_s30 + $0x3508] ss:$216 sps:$4 sm:$0xff]   ;;  %v17621_v26 = vld [vmem:[%s18061_s30 + $0xc4] ss:$216 sps:$4 sm:$0xff]  }
 0xb9d   : > { %13045 = vmatprep.subr.bf16.mxu1 %v17534_v17  ;;  %11968 = vmatprep.mubr.bf16.mxu0 %v2251_v28  ;;  %v17624_v17 = vld [vmem:[%s18061_s30 + $0x1bc4] ss:$216 sps:$4 sm:$0xff]  }
 0xb9e   : > { %13075 = vmatprep.mubr.bf16.mxu1 %v2251_v28  ;;  %v19879_v28 = vld [vmem:[%s20164_s0 + $0x30] sm:$0x3f] }
 0xba3   : > { %11939 = vmatpush1.bf16.xpose.msra.mxu0 %v17529_v19  ;;  %v19883_v19 = vrot.slane %v19879_v28, %v18056_v6 }
 0xba4   : > { %13046 = vmatpush1.bf16.xpose.msra.mxu1 %v17532_v30  ;;  %11940 = vmatprep.subr.bf16.mxu0 %v17537_v4  ;;  %v2249_v30 = vcombine.high %v19806_v54, %v19806_v54  ;;  %v17625_v54 = vld [vmem:[%s18061_s30 + $0x270] ss:$216 sps:$4 sm:$0xff]  }
 0xba5   : > { %13047 = vmatprep.subr.bf16.mxu1 %v17540_v13  ;;  %v2267_v4 = vcombine.high %v19883_v19, %v19883_v19  ;;  %v17619_v13 = vld [vmem:[%s18061_s30 + $0xc0] ss:$216 sps:$4 sm:$0xff]  }
 0xbab   : > { %11941 = vmatpush1.bf16.xpose.msra.mxu0 %v17535_v33  ;;  %v17622_v33 = vld [vmem:[%s18061_s30 + $0x1bc0] ss:$216 sps:$4 sm:$0xff]  }
 0xbac   : > { %13048 = vmatpush1.bf16.xpose.msra.mxu1 %v17538_v23  ;;  %11942 = vmatprep.subr.bf16.mxu0 %v17543_v5  ;;  %v17627_v23 = vld [vmem:[%s18061_s30 + $0x274] ss:$216 sps:$4 sm:$0xff]  }
 0xbad   : > { %13049 = vmatprep.subr.bf16.mxu1 %v17546_v34  ;;  %v17630_v5 = vld [vmem:[%s18061_s30 + $0x1d74] ss:$216 sps:$4 sm:$0xff]   ;;  %v19894_v34 = vrot.slane %v2267_v4, %v18056_v6 }
 0xbae   : > { %v17711_v4 = vld [vmem:[%s18061_s30 + $0x1a14] ss:$216 sps:$4 sm:$0xff]  }
 0xbb3   : > { %11943 = vmatpush1.bf16.xpose.msra.mxu0 %v17541_v18  ;;  %v17628_v18 = vld [vmem:[%s18061_s30 + $0x1d70] ss:$216 sps:$4 sm:$0xff]  }
 0xbb4   : > { %13050 = vmatpush1.bf16.xpose.msra.mxu1 %v17544_v27  ;;  %11944 = vmatprep.subr.bf16.mxu0 %v17549_v36  ;;  %v17633_v27 = vld [vmem:[%s18061_s30 + $0x424] ss:$216 sps:$4 sm:$0xff]  }
 0xbb5   : > { %13051 = vmatprep.subr.bf16.mxu1 %v17552_v29  ;;  %v17636_v36 = vld [vmem:[%s18061_s30 + $0x1f24] ss:$216 sps:$4 sm:$0xff]   ;;  %v17631_v29 = vld [vmem:[%s18061_s30 + $0x420] ss:$216 sps:$4 sm:$0xff]  }
 0xbbb   : > { %11945 = vmatpush1.bf16.xpose.msra.mxu0 %v17547_v38  ;;  %v17634_v38 = vld [vmem:[%s18061_s30 + $0x1f20] ss:$216 sps:$4 sm:$0xff]  }
 0xbbc   : > { %13052 = vmatpush1.bf16.xpose.msra.mxu1 %v17550_v40  ;;  %11946 = vmatprep.subr.bf16.mxu0 %v17555_v42  ;;  %v17639_v40 = vld [vmem:[%s18061_s30 + $0x5d4] ss:$216 sps:$4 sm:$0xff]  }
 0xbbd   : > { %13053 = vmatprep.subr.bf16.mxu1 %v17558_v43  ;;  %v17642_v42 = vld [vmem:[%s18061_s30 + $0x20d4] ss:$216 sps:$4 sm:$0xff]   ;;  %v17637_v43 = vld [vmem:[%s18061_s30 + $0x5d0] ss:$216 sps:$4 sm:$0xff]  }
 0xbc3   : > { %11947 = vmatpush1.bf16.xpose.msra.mxu0 %v17553_v35  ;;  %v17640_v35 = vld [vmem:[%s18061_s30 + $0x20d0] ss:$216 sps:$4 sm:$0xff]  }
 0xbc4   : > { %13054 = vmatpush1.bf16.xpose.msra.mxu1 %v17556_v44  ;;  %11948 = vmatprep.subr.bf16.mxu0 %v17561_v37  ;;  %v17645_v44 = vld [vmem:[%s18061_s30 + $0x784] ss:$216 sps:$4 sm:$0xff]  }
 0xbc5   : > { %13055 = vmatprep.subr.bf16.mxu1 %v17564_v45  ;;  %v17648_v37 = vld [vmem:[%s18061_s30 + $0x2284] ss:$216 sps:$4 sm:$0xff]   ;;  %v17643_v45 = vld [vmem:[%s18061_s30 + $0x780] ss:$216 sps:$4 sm:$0xff]  }
 0xbcb   : > { %11949 = vmatpush1.bf16.xpose.msra.mxu0 %v17559_v24  ;;  %v17646_v24 = vld [vmem:[%s18061_s30 + $0x2280] ss:$216 sps:$4 sm:$0xff]  }
 0xbcc   : > { %13056 = vmatpush1.bf16.xpose.msra.mxu1 %v17562_v48  ;;  %11950 = vmatprep.subr.bf16.mxu0 %v17567_v50  ;;  %v17651_v48 = vld [vmem:[%s18061_s30 + $0x934] ss:$216 sps:$4 sm:$0xff]  }
 0xbcd   : > { %13057 = vmatprep.subr.bf16.mxu1 %v17570_v51  ;;  %v17654_v50 = vld [vmem:[%s18061_s30 + $0x2434] ss:$216 sps:$4 sm:$0xff]   ;;  %v17649_v51 = vld [vmem:[%s18061_s30 + $0x930] ss:$216 sps:$4 sm:$0xff]  }
 0xbd3   : > { %11951 = vmatpush1.bf16.xpose.msra.mxu0 %v17565_v52  ;;  %v17652_v52 = vld [vmem:[%s18061_s30 + $0x2430] ss:$216 sps:$4 sm:$0xff]  }
 0xbd4   : > { %13058 = vmatpush1.bf16.xpose.msra.mxu1 %v17568_v53  ;;  %11952 = vmatprep.subr.bf16.mxu0 %v17573_v31  ;;  %v17657_v53 = vld [vmem:[%s18061_s30 + $0xae4] ss:$216 sps:$4 sm:$0xff]  }
 0xbd5   : > { %13059 = vmatprep.subr.bf16.mxu1 %v17576_v56  ;;  %v17660_v31 = vld [vmem:[%s18061_s30 + $0x25e4] ss:$216 sps:$4 sm:$0xff]   ;;  %v17655_v56 = vld [vmem:[%s18061_s30 + $0xae0] ss:$216 sps:$4 sm:$0xff]  }
 0xbdb   : > { %11953 = vmatpush1.bf16.xpose.msra.mxu0 %v17571_v46  ;;  %v17658_v46 = vld [vmem:[%s18061_s30 + $0x25e0] ss:$216 sps:$4 sm:$0xff]  }
 0xbdc   : > { %13060 = vmatpush1.bf16.xpose.msra.mxu1 %v17574_v49  ;;  %11954 = vmatprep.subr.bf16.mxu0 %v17579_v57  ;;  %v17663_v49 = vld [vmem:[%s18061_s30 + $0xc94] ss:$216 sps:$4 sm:$0xff]  }
 0xbdd   : > { %13061 = vmatprep.subr.bf16.mxu1 %v17582_v41  ;;  %v17666_v57 = vld [vmem:[%s18061_s30 + $0x2794] ss:$216 sps:$4 sm:$0xff]   ;;  %v17661_v41 = vld [vmem:[%s18061_s30 + $0xc90] ss:$216 sps:$4 sm:$0xff]  }
 0xbe3   : > { %11955 = vmatpush1.bf16.xpose.msra.mxu0 %v17577_v58  ;;  %v17664_v58 = vld [vmem:[%s18061_s30 + $0x2790] ss:$216 sps:$4 sm:$0xff]  }
 0xbe4   : > { %13062 = vmatpush1.bf16.xpose.msra.mxu1 %v17580_v39  ;;  %11956 = vmatprep.subr.bf16.mxu0 %v17585_v62  ;;  %v17669_v39 = vld [vmem:[%s18061_s30 + $0xe44] ss:$216 sps:$4 sm:$0xff]  }
 0xbe5   : > { %13063 = vmatprep.subr.bf16.mxu1 %v17588_v63  ;;  %v17672_v62 = vld [vmem:[%s18061_s30 + $0x2944] ss:$216 sps:$4 sm:$0xff]   ;;  %v17667_v63 = vld [vmem:[%s18061_s30 + $0xe40] ss:$216 sps:$4 sm:$0xff]  }
 0xbeb   : > { %11957 = vmatpush1.bf16.xpose.msra.mxu0 %v17583_v0  ;;  %v17670_v0 = vld [vmem:[%s18061_s30 + $0x2940] ss:$216 sps:$4 sm:$0xff]  }
 0xbec   : > { %13064 = vmatpush1.bf16.xpose.msra.mxu1 %v17586_v2  ;;  %11958 = vmatprep.subr.bf16.mxu0 %v17591_v32  ;;  %v17675_v2 = vld [vmem:[%s18061_s30 + $0xff4] ss:$216 sps:$4 sm:$0xff]  }
 0xbed   : > { %13065 = vmatprep.subr.bf16.mxu1 %v17594_v59  ;;  %v17678_v32 = vld [vmem:[%s18061_s30 + $0x2af4] ss:$216 sps:$4 sm:$0xff]   ;;  %v17673_v59 = vld [vmem:[%s18061_s30 + $0xff0] ss:$216 sps:$4 sm:$0xff]  }
 0xbf3   : > { %11959 = vmatpush1.bf16.xpose.msra.mxu0 %v17589_v7  ;;  %v17676_v7 = vld [vmem:[%s18061_s30 + $0x2af0] ss:$216 sps:$4 sm:$0xff]  }
 0xbf4   : > { %13066 = vmatpush1.bf16.xpose.msra.mxu1 %v17592_v60  ;;  %11960 = vmatprep.subr.bf16.mxu0 %v17597_v8  ;;  %v17681_v60 = vld [vmem:[%s18061_s30 + $0x11a4] ss:$216 sps:$4 sm:$0xff]  }
 0xbf5   : > { %13067 = vmatprep.subr.bf16.mxu1 %v17600_v47  ;;  %v17684_v8 = vld [vmem:[%s18061_s30 + $0x2ca4] ss:$216 sps:$4 sm:$0xff]   ;;  %v17679_v47 = vld [vmem:[%s18061_s30 + $0x11a0] ss:$216 sps:$4 sm:$0xff]  }
 0xbfb   : > { %11961 = vmatpush1.bf16.xpose.msra.mxu0 %v17595_v10  ;;  %v17682_v10 = vld [vmem:[%s18061_s30 + $0x2ca0] ss:$216 sps:$4 sm:$0xff]  }
 0xbfc   : > { %13068 = vmatpush1.bf16.xpose.msra.mxu1 %v17598_v12  ;;  %11962 = vmatprep.subr.bf16.mxu0 %v17603_v14  ;;  %v17687_v12 = vld [vmem:[%s18061_s30 + $0x1354] ss:$216 sps:$4 sm:$0xff]  }
 0xbfd   : > { %13069 = vmatprep.subr.bf16.mxu1 %v17606_v15  ;;  %v17690_v14 = vld [vmem:[%s18061_s30 + $0x2e54] ss:$216 sps:$4 sm:$0xff]   ;;  %v17685_v15 = vld [vmem:[%s18061_s30 + $0x1350] ss:$216 sps:$4 sm:$0xff]  }
 0xc03   : > { %11963 = vmatpush1.bf16.xpose.msra.mxu0 %v17601_v16  ;;  %v17688_v16 = vld [vmem:[%s18061_s30 + $0x2e50] ss:$216 sps:$4 sm:$0xff]  }
 0xc04   : > { %13070 = vmatpush1.bf16.xpose.msra.mxu1 %v17604_v55  ;;  %11964 = vmatprep.subr.bf16.mxu0 %v17609_v20  ;;  %v17693_v55 = vld [vmem:[%s18061_s30 + $0x1504] ss:$216 sps:$4 sm:$0xff]  }
 0xc05   : > { %13071 = vmatprep.subr.bf16.mxu1 %v17612_v9  ;;  %v17696_v20 = vld [vmem:[%s18061_s30 + $0x3004] ss:$216 sps:$4 sm:$0xff]   ;;  %v17691_v9 = vld [vmem:[%s18061_s30 + $0x1500] ss:$216 sps:$4 sm:$0xff]  }
 0xc0b   : > { %11965 = vmatpush1.bf16.xpose.msra.mxu0 %v17607_v11  ;;  %v17694_v11 = vld [vmem:[%s18061_s30 + $0x3000] ss:$216 sps:$4 sm:$0xff]  }
 0xc0c   : > { %13072 = vmatpush1.bf16.xpose.msra.mxu1 %v17610_v21  ;;  %11966 = vmatprep.subr.bf16.mxu0 %v17615_v1  ;;  %v17699_v21 = vld [vmem:[%s18061_s30 + $0x16b4] ss:$216 sps:$4 sm:$0xff]  }
 0xc0d   : > { %13073 = vmatprep.subr.bf16.mxu1 %v17618_v22  ;;  %v17702_v1 = vld [vmem:[%s18061_s30 + $0x31b4] ss:$216 sps:$4 sm:$0xff]   ;;  %v17697_v22 = vld [vmem:[%s18061_s30 + $0x16b0] ss:$216 sps:$4 sm:$0xff]  }
 0xc13   : > { %11967 = vmatpush1.bf16.xpose.msra.mxu0 %v17613_v61  ;;  %v17700_v61 = vld [vmem:[%s18061_s30 + $0x31b0] ss:$216 sps:$4 sm:$0xff]  }
 0xc14   : > { %13074 = vmatpush1.bf16.xpose.msra.mxu1 %v17616_v25  ;;  %11977 = vmatprep.subr.bf16.mxu0 %v17621_v26  ;;  %v17705_v25 = vld [vmem:[%s18061_s30 + $0x1864] ss:$216 sps:$4 sm:$0xff]  }
 0xc15   : > { %13084 = vmatprep.subr.bf16.mxu1 %v17624_v17  ;;  %v17708_v26 = vld [vmem:[%s18061_s30 + $0x3364] ss:$216 sps:$4 sm:$0xff]   ;;  %v17703_v17 = vld [vmem:[%s18061_s30 + $0x1860] ss:$216 sps:$4 sm:$0xff]  }
 0xc1a   : > { %11969 = vmatmul.mubr.bf16.vlgmr.msra.gmra.mrb[0].mxu0 %v2249_v30 }
 0xc1b   : > { %13076 = vmatmul.mubr.bf16.vlgmr.msra.gmra.mrb[0].mxu1 %v2249_v30  ;;  %11978 = vmatpush1.bf16.xpose.msra.mxu0 %v17619_v13  ;;  %v17706_v30 = vld [vmem:[%s18061_s30 + $0x3360] ss:$216 sps:$4 sm:$0xff]   ;;  %v17714_v13 = vld [vmem:[%s18061_s30 + $0x3514] ss:$216 sps:$4 sm:$0xff]  }
 0xc1c   : > { %13085 = vmatpush1.bf16.xpose.msra.mxu1 %v17622_v33  ;;  %11979 = vmatprep.subr.bf16.mxu0 %v17627_v23  ;;  %v17709_v33 = vld [vmem:[%s18061_s30 + $0x1a10] ss:$216 sps:$4 sm:$0xff]  }
 0xc1d   : > { %13086 = vmatprep.subr.bf16.mxu1 %v17630_v5  ;;  %12009 = vmatprep.mubr.bf16.mxu0 %v19894_v34  ;;  %v17712_v23 = vld [vmem:[%s18061_s30 + $0x3510] ss:$216 sps:$4 sm:$0xff]   ;;  %v17717_v5 = vld [vmem:[%s18061_s30 + $0xcc] ss:$216 sps:$4 sm:$0xff]  }
 0xc1e   : > { %13116 = vmatprep.mubr.bf16.mxu1 %v19894_v34 }
 0xc23   : > { %11980 = vmatpush1.bf16.xpose.msra.mxu0 %v17625_v54  ;;  %v17720_v54 = vld [vmem:[%s18061_s30 + $0x1bcc] ss:$216 sps:$4 sm:$0xff]  }
 0xc24   : > { %13087 = vmatpush1.bf16.xpose.msra.mxu1 %v17628_v18  ;;  %11981 = vmatprep.subr.bf16.mxu0 %v17633_v27  ;;  %v19960_v18 = vrot.slane %v19883_v19, %v18056_v6  ;;  %v17715_v27 = vld [vmem:[%s18061_s30 + $0xc8] ss:$216 sps:$4 sm:$0xff]   ;;  %v17721_v19 = vld [vmem:[%s18061_s30 + $0x278] ss:$216 sps:$4 sm:$0xff]  }
 0xc25   : > { %13088 = vmatprep.subr.bf16.mxu1 %v17636_v36  ;;  %v17718_v36 = vld [vmem:[%s18061_s30 + $0x1bc8] ss:$216 sps:$4 sm:$0xff]  }
 0xc2b   : > { %11982 = vmatpush1.bf16.xpose.msra.mxu0 %v17631_v29  ;;  %v17723_v29 = vld [vmem:[%s18061_s30 + $0x27c] ss:$216 sps:$4 sm:$0xff]  }
 0xc2c   : > { %13089 = vmatpush1.bf16.xpose.msra.mxu1 %v17634_v38  ;;  %11983 = vmatprep.subr.bf16.mxu0 %v17639_v40  ;;  %v17726_v38 = vld [vmem:[%s18061_s30 + $0x1d7c] ss:$216 sps:$4 sm:$0xff]   ;;  %v2298_v40 = vcombine.high %v19894_v34, %v19894_v34  ;;  %v17732_v34 = vld [vmem:[%s18061_s30 + $0x1f2c] ss:$216 sps:$4 sm:$0xff]  }
 0xc2d   : > { %13090 = vmatprep.subr.bf16.mxu1 %v17642_v42  ;;  %v17724_v42 = vld [vmem:[%s18061_s30 + $0x1d78] ss:$216 sps:$4 sm:$0xff]  }
 0xc33   : > { %11984 = vmatpush1.bf16.xpose.msra.mxu0 %v17637_v43  ;;  %v17729_v43 = vld [vmem:[%s18061_s30 + $0x42c] ss:$216 sps:$4 sm:$0xff]  }
 0xc34   : > { %13091 = vmatpush1.bf16.xpose.msra.mxu1 %v17640_v35  ;;  %11985 = vmatprep.subr.bf16.mxu0 %v17645_v44  ;;  %v17727_v35 = vld [vmem:[%s18061_s30 + $0x428] ss:$216 sps:$4 sm:$0xff]  }
 0xc35   : > { %13092 = vmatprep.subr.bf16.mxu1 %v17648_v37  ;;  %v17730_v44 = vld [vmem:[%s18061_s30 + $0x1f28] ss:$216 sps:$4 sm:$0xff]   ;;  %v17735_v37 = vld [vmem:[%s18061_s30 + $0x5dc] ss:$216 sps:$4 sm:$0xff]  }
 0xc3b   : > { %11986 = vmatpush1.bf16.xpose.msra.mxu0 %v17643_v45  ;;  %v17738_v45 = vld [vmem:[%s18061_s30 + $0x20dc] ss:$216 sps:$4 sm:$0xff]  }
 0xc3c   : > { %13093 = vmatpush1.bf16.xpose.msra.mxu1 %v17646_v24  ;;  %11987 = vmatprep.subr.bf16.mxu0 %v17651_v48  ;;  %v17733_v24 = vld [vmem:[%s18061_s30 + $0x5d8] ss:$216 sps:$4 sm:$0xff]  }
 0xc3d   : > { %13094 = vmatprep.subr.bf16.mxu1 %v17654_v50  ;;  %v17736_v48 = vld [vmem:[%s18061_s30 + $0x20d8] ss:$216 sps:$4 sm:$0xff]   ;;  %v17741_v50 = vld [vmem:[%s18061_s30 + $0x78c] ss:$216 sps:$4 sm:$0xff]  }
 0xc43   : > { %11988 = vmatpush1.bf16.xpose.msra.mxu0 %v17649_v51  ;;  %v17744_v51 = vld [vmem:[%s18061_s30 + $0x228c] ss:$216 sps:$4 sm:$0xff]  }
 0xc44   : > { %13095 = vmatpush1.bf16.xpose.msra.mxu1 %v17652_v52  ;;  %11989 = vmatprep.subr.bf16.mxu0 %v17657_v53  ;;  %v17739_v52 = vld [vmem:[%s18061_s30 + $0x788] ss:$216 sps:$4 sm:$0xff]  }
 0xc45   : > { %13096 = vmatprep.subr.bf16.mxu1 %v17660_v31  ;;  %v17742_v53 = vld [vmem:[%s18061_s30 + $0x2288] ss:$216 sps:$4 sm:$0xff]   ;;  %v17747_v31 = vld [vmem:[%s18061_s30 + $0x93c] ss:$216 sps:$4 sm:$0xff]  }
 0xc4b   : > { %11990 = vmatpush1.bf16.xpose.msra.mxu0 %v17655_v56  ;;  %v17750_v56 = vld [vmem:[%s18061_s30 + $0x243c] ss:$216 sps:$4 sm:$0xff]  }
 0xc4c   : > { %13097 = vmatpush1.bf16.xpose.msra.mxu1 %v17658_v46  ;;  %11991 = vmatprep.subr.bf16.mxu0 %v17663_v49  ;;  %v17745_v46 = vld [vmem:[%s18061_s30 + $0x938] ss:$216 sps:$4 sm:$0xff]  }
 0xc4d   : > { %13098 = vmatprep.subr.bf16.mxu1 %v17666_v57  ;;  %v17748_v49 = vld [vmem:[%s18061_s30 + $0x2438] ss:$216 sps:$4 sm:$0xff]   ;;  %v17753_v57 = vld [vmem:[%s18061_s30 + $0xaec] ss:$216 sps:$4 sm:$0xff]  }
 0xc53   : > { %11992 = vmatpush1.bf16.xpose.msra.mxu0 %v17661_v41  ;;  %v17756_v41 = vld [vmem:[%s18061_s30 + $0x25ec] ss:$216 sps:$4 sm:$0xff]  }
 0xc54   : > { %13099 = vmatpush1.bf16.xpose.msra.mxu1 %v17664_v58  ;;  %11993 = vmatprep.subr.bf16.mxu0 %v17669_v39  ;;  %v17751_v58 = vld [vmem:[%s18061_s30 + $0xae8] ss:$216 sps:$4 sm:$0xff]  }
 0xc55   : > { %13100 = vmatprep.subr.bf16.mxu1 %v17672_v62  ;;  %v17754_v39 = vld [vmem:[%s18061_s30 + $0x25e8] ss:$216 sps:$4 sm:$0xff]   ;;  %v17759_v62 = vld [vmem:[%s18061_s30 + $0xc9c] ss:$216 sps:$4 sm:$0xff]  }
 0xc5b   : > { %11994 = vmatpush1.bf16.xpose.msra.mxu0 %v17667_v63  ;;  %v17762_v63 = vld [vmem:[%s18061_s30 + $0x279c] ss:$216 sps:$4 sm:$0xff]  }
 0xc5c   : > { %13101 = vmatpush1.bf16.xpose.msra.mxu1 %v17670_v0  ;;  %11995 = vmatprep.subr.bf16.mxu0 %v17675_v2  ;;  %v17757_v0 = vld [vmem:[%s18061_s30 + $0xc98] ss:$216 sps:$4 sm:$0xff]  }
 0xc5d   : > { %13102 = vmatprep.subr.bf16.mxu1 %v17678_v32  ;;  %v17760_v2 = vld [vmem:[%s18061_s30 + $0x2798] ss:$216 sps:$4 sm:$0xff]   ;;  %v17765_v32 = vld [vmem:[%s18061_s30 + $0xe4c] ss:$216 sps:$4 sm:$0xff]  }
 0xc63   : > { %11996 = vmatpush1.bf16.xpose.msra.mxu0 %v17673_v59  ;;  %v17768_v59 = vld [vmem:[%s18061_s30 + $0x294c] ss:$216 sps:$4 sm:$0xff]  }
 0xc64   : > { %13103 = vmatpush1.bf16.xpose.msra.mxu1 %v17676_v7  ;;  %11997 = vmatprep.subr.bf16.mxu0 %v17681_v60  ;;  %v17763_v7 = vld [vmem:[%s18061_s30 + $0xe48] ss:$216 sps:$4 sm:$0xff]  }
 0xc65   : > { %13104 = vmatprep.subr.bf16.mxu1 %v17684_v8  ;;  %v17766_v60 = vld [vmem:[%s18061_s30 + $0x2948] ss:$216 sps:$4 sm:$0xff]   ;;  %v17771_v8 = vld [vmem:[%s18061_s30 + $0xffc] ss:$216 sps:$4 sm:$0xff]  }
 0xc6b   : > { %11998 = vmatpush1.bf16.xpose.msra.mxu0 %v17679_v47  ;;  %v17774_v47 = vld [vmem:[%s18061_s30 + $0x2afc] ss:$216 sps:$4 sm:$0xff]  }
 0xc6c   : > { %13105 = vmatpush1.bf16.xpose.msra.mxu1 %v17682_v10  ;;  %11999 = vmatprep.subr.bf16.mxu0 %v17687_v12  ;;  %v17769_v10 = vld [vmem:[%s18061_s30 + $0xff8] ss:$216 sps:$4 sm:$0xff]  }
 0xc6d   : > { %13106 = vmatprep.subr.bf16.mxu1 %v17690_v14  ;;  %v17772_v12 = vld [vmem:[%s18061_s30 + $0x2af8] ss:$216 sps:$4 sm:$0xff]   ;;  %v17777_v14 = vld [vmem:[%s18061_s30 + $0x11ac] ss:$216 sps:$4 sm:$0xff]  }
 0xc73   : > { %12000 = vmatpush1.bf16.xpose.msra.mxu0 %v17685_v15  ;;  %v17780_v15 = vld [vmem:[%s18061_s30 + $0x2cac] ss:$216 sps:$4 sm:$0xff]  }
 0xc74   : > { %13107 = vmatpush1.bf16.xpose.msra.mxu1 %v17688_v16  ;;  %12001 = vmatprep.subr.bf16.mxu0 %v17693_v55  ;;  %v17775_v16 = vld [vmem:[%s18061_s30 + $0x11a8] ss:$216 sps:$4 sm:$0xff]  }
 0xc75   : > { %13108 = vmatprep.subr.bf16.mxu1 %v17696_v20  ;;  %v17778_v55 = vld [vmem:[%s18061_s30 + $0x2ca8] ss:$216 sps:$4 sm:$0xff]   ;;  %v17783_v20 = vld [vmem:[%s18061_s30 + $0x135c] ss:$216 sps:$4 sm:$0xff]  }
 0xc7b   : > { %12002 = vmatpush1.bf16.xpose.msra.mxu0 %v17691_v9  ;;  %v17786_v9 = vld [vmem:[%s18061_s30 + $0x2e5c] ss:$216 sps:$4 sm:$0xff]  }
 0xc7c   : > { %13109 = vmatpush1.bf16.xpose.msra.mxu1 %v17694_v11  ;;  %12003 = vmatprep.subr.bf16.mxu0 %v17699_v21  ;;  %v17781_v11 = vld [vmem:[%s18061_s30 + $0x1358] ss:$216 sps:$4 sm:$0xff]  }
 0xc7d   : > { %13110 = vmatprep.subr.bf16.mxu1 %v17702_v1  ;;  %v17784_v21 = vld [vmem:[%s18061_s30 + $0x2e58] ss:$216 sps:$4 sm:$0xff]   ;;  %v17789_v1 = vld [vmem:[%s18061_s30 + $0x150c] ss:$216 sps:$4 sm:$0xff]  }
 0xc83   : > { %12004 = vmatpush1.bf16.xpose.msra.mxu0 %v17697_v22  ;;  %v17792_v22 = vld [vmem:[%s18061_s30 + $0x300c] ss:$216 sps:$4 sm:$0xff]  }
 0xc84   : > { %13111 = vmatpush1.bf16.xpose.msra.mxu1 %v17700_v61  ;;  %12005 = vmatprep.subr.bf16.mxu0 %v17705_v25  ;;  %v17787_v61 = vld [vmem:[%s18061_s30 + $0x1508] ss:$216 sps:$4 sm:$0xff]  }
 0xc85   : > { %13112 = vmatprep.subr.bf16.mxu1 %v17708_v26  ;;  %v17790_v25 = vld [vmem:[%s18061_s30 + $0x3008] ss:$216 sps:$4 sm:$0xff]   ;;  %v17795_v26 = vld [vmem:[%s18061_s30 + $0x16bc] ss:$216 sps:$4 sm:$0xff]  }
 0xc8b   : > { %12006 = vmatpush1.bf16.xpose.msra.mxu0 %v17703_v17  ;;  %v17798_v17 = vld [vmem:[%s18061_s30 + $0x31bc] ss:$216 sps:$4 sm:$0xff]  }
 0xc8c   : > { %13113 = vmatpush1.bf16.xpose.msra.mxu1 %v17706_v30  ;;  %12007 = vmatprep.subr.bf16.mxu0 %v17711_v4  ;;  %v17793_v30 = vld [vmem:[%s18061_s30 + $0x16b8] ss:$216 sps:$4 sm:$0xff]  }
 0xc8d   : > { %13114 = vmatprep.subr.bf16.mxu1 %v17714_v13  ;;  %v17796_v4 = vld [vmem:[%s18061_s30 + $0x31b8] ss:$216 sps:$4 sm:$0xff]   ;;  %v17801_v13 = vld [vmem:[%s18061_s30 + $0x186c] ss:$216 sps:$4 sm:$0xff]  }
 0xc93   : > { %12008 = vmatpush1.bf16.xpose.msra.mxu0 %v17709_v33  ;;  %v17804_v33 = vld [vmem:[%s18061_s30 + $0x336c] ss:$216 sps:$4 sm:$0xff]  }
 0xc94   : > { %13115 = vmatpush1.bf16.xpose.msra.mxu1 %v17712_v23  ;;  %12018 = vmatprep.subr.bf16.mxu0 %v17717_v5  ;;  %v17799_v23 = vld [vmem:[%s18061_s30 + $0x1868] ss:$216 sps:$4 sm:$0xff]  }
 0xc95   : > { %13125 = vmatprep.subr.bf16.mxu1 %v17720_v54  ;;  %v17802_v5 = vld [vmem:[%s18061_s30 + $0x3368] ss:$216 sps:$4 sm:$0xff]   ;;  %v17807_v54 = vld [vmem:[%s18061_s30 + $0x1a1c] ss:$216 sps:$4 sm:$0xff]  }
 0xc9a   : > { %12010 = vmatmul.mubr.bf16.vlgmr.msra.gmra.mrb[0].mxu0 %v19960_v18 }
 0xc9b   : > { %13117 = vmatmul.mubr.bf16.vlgmr.msra.gmra.mrb[0].mxu1 %v19960_v18  ;;  %12019 = vmatpush1.bf16.xpose.msra.mxu0 %v17715_v27  ;;  %v17810_v27 = vld [vmem:[%s18061_s30 + $0x351c] ss:$216 sps:$4 sm:$0xff]  }
 0xc9c   : > { %13126 = vmatpush1.bf16.xpose.msra.mxu1 %v17718_v36  ;;  %12020 = vmatprep.subr.bf16.mxu0 %v17723_v29  ;;  %v17805_v36 = vld [vmem:[%s18061_s30 + $0x1a18] ss:$216 sps:$4 sm:$0xff]  }
 0xc9d   : > { %13127 = vmatprep.subr.bf16.mxu1 %v17726_v38  ;;  %12050 = vmatprep.mubr.bf16.mxu0 %v2298_v40  ;;  %v17808_v29 = vld [vmem:[%s18061_s30 + $0x3518] ss:$216 sps:$4 sm:$0xff]   ;;  %v17813_v38 = vld [vmem:[%s18061_s30 + $0xd4] ss:$216 sps:$4 sm:$0xff]  }
 0xc9e   : > { %13157 = vmatprep.mubr.bf16.mxu1 %v2298_v40  ;;  %v17816_v40 = vld [vmem:[%s18061_s30 + $0x1bd4] ss:$216 sps:$4 sm:$0xff]  }
 0xca3   : > { %12021 = vmatpush1.bf16.xpose.msra.mxu0 %v17721_v19  ;;  %v2252_v19 = vcombine.high %v19879_v28, %v19879_v28  ;;  %v17819_v28 = vld [vmem:[%s18061_s30 + $0x284] ss:$216 sps:$4 sm:$0xff]  }
 0xca4   : > { %13128 = vmatpush1.bf16.xpose.msra.mxu1 %v17724_v42  ;;  %12022 = vmatprep.subr.bf16.mxu0 %v17729_v43 }
 0xca5   : > { %13129 = vmatprep.subr.bf16.mxu1 %v17732_v34  ;;  %v20033_v42 = vrot.slane %v2252_v19, %v18056_v6  ;;  %v2297_v34 = vcombine.high %v19960_v18, %v19960_v18  ;;  %v17817_v18 = vld [vmem:[%s18061_s30 + $0x280] ss:$216 sps:$4 sm:$0xff]   ;;  %v17898_v19 = vld [vmem:[%s18061_s30 + $0x3370] ss:$216 sps:$4 sm:$0xff]  }
 0xca7   : > { %v2268_v43 = vcombine.high %v20033_v42, %v20033_v42 }
 0xcab   : > { %12023 = vmatpush1.bf16.xpose.msra.mxu0 %v17727_v35  ;;  %v17811_v35 = vld [vmem:[%s18061_s30 + $0xd0] ss:$216 sps:$4 sm:$0xff]  }
 0xcac   : > { %13130 = vmatpush1.bf16.xpose.msra.mxu1 %v17730_v44  ;;  %12024 = vmatprep.subr.bf16.mxu0 %v17735_v37  ;;  %v17814_v44 = vld [vmem:[%s18061_s30 + $0x1bd0] ss:$216 sps:$4 sm:$0xff]   ;;  %v17822_v37 = vld [vmem:[%s18061_s30 + $0x1d84] ss:$216 sps:$4 sm:$0xff]  }
 0xcad   : > { %13131 = vmatprep.subr.bf16.mxu1 %v17738_v45  ;;  %v2296_v45 = vrot.slane %v2268_v43, %v18056_v6  ;;  %v17903_v43 = vld [vmem:[%s18061_s30 + $0x1a24] ss:$216 sps:$4 sm:$0xff]  }
 0xcb3   : > { %12025 = vmatpush1.bf16.xpose.msra.mxu0 %v17733_v24  ;;  %v17820_v24 = vld [vmem:[%s18061_s30 + $0x1d80] ss:$216 sps:$4 sm:$0xff]  }
 0xcb4   : > { %13132 = vmatpush1.bf16.xpose.msra.mxu1 %v17736_v48  ;;  %12026 = vmatprep.subr.bf16.mxu0 %v17741_v50  ;;  %v17825_v48 = vld [vmem:[%s18061_s30 + $0x434] ss:$216 sps:$4 sm:$0xff]  }
 0xcb5   : > { %13133 = vmatprep.subr.bf16.mxu1 %v17744_v51  ;;  %v17828_v50 = vld [vmem:[%s18061_s30 + $0x1f34] ss:$216 sps:$4 sm:$0xff]   ;;  %v17823_v51 = vld [vmem:[%s18061_s30 + $0x430] ss:$216 sps:$4 sm:$0xff]  }
 0xcbb   : > { %12027 = vmatpush1.bf16.xpose.msra.mxu0 %v17739_v52  ;;  %v17826_v52 = vld [vmem:[%s18061_s30 + $0x1f30] ss:$216 sps:$4 sm:$0xff]  }
 0xcbc   : > { %13134 = vmatpush1.bf16.xpose.msra.mxu1 %v17742_v53  ;;  %12028 = vmatprep.subr.bf16.mxu0 %v17747_v31  ;;  %v17831_v53 = vld [vmem:[%s18061_s30 + $0x5e4] ss:$216 sps:$4 sm:$0xff]  }
 0xcbd   : > { %13135 = vmatprep.subr.bf16.mxu1 %v17750_v56  ;;  %v17834_v31 = vld [vmem:[%s18061_s30 + $0x20e4] ss:$216 sps:$4 sm:$0xff]   ;;  %v17829_v56 = vld [vmem:[%s18061_s30 + $0x5e0] ss:$216 sps:$4 sm:$0xff]  }
 0xcc3   : > { %12029 = vmatpush1.bf16.xpose.msra.mxu0 %v17745_v46  ;;  %v17832_v46 = vld [vmem:[%s18061_s30 + $0x20e0] ss:$216 sps:$4 sm:$0xff]  }
 0xcc4   : > { %13136 = vmatpush1.bf16.xpose.msra.mxu1 %v17748_v49  ;;  %12030 = vmatprep.subr.bf16.mxu0 %v17753_v57  ;;  %v17837_v49 = vld [vmem:[%s18061_s30 + $0x794] ss:$216 sps:$4 sm:$0xff]  }
 0xcc5   : > { %13137 = vmatprep.subr.bf16.mxu1 %v17756_v41  ;;  %v17840_v57 = vld [vmem:[%s18061_s30 + $0x2294] ss:$216 sps:$4 sm:$0xff]   ;;  %v17835_v41 = vld [vmem:[%s18061_s30 + $0x790] ss:$216 sps:$4 sm:$0xff]  }
 0xccb   : > { %12031 = vmatpush1.bf16.xpose.msra.mxu0 %v17751_v58  ;;  %v17838_v58 = vld [vmem:[%s18061_s30 + $0x2290] ss:$216 sps:$4 sm:$0xff]  }
 0xccc   : > { %13138 = vmatpush1.bf16.xpose.msra.mxu1 %v17754_v39  ;;  %12032 = vmatprep.subr.bf16.mxu0 %v17759_v62  ;;  %v17843_v39 = vld [vmem:[%s18061_s30 + $0x944] ss:$216 sps:$4 sm:$0xff]  }
 0xccd   : > { %13139 = vmatprep.subr.bf16.mxu1 %v17762_v63  ;;  %v17846_v62 = vld [vmem:[%s18061_s30 + $0x2444] ss:$216 sps:$4 sm:$0xff]   ;;  %v17841_v63 = vld [vmem:[%s18061_s30 + $0x940] ss:$216 sps:$4 sm:$0xff]  }
 0xcd3   : > { %12033 = vmatpush1.bf16.xpose.msra.mxu0 %v17757_v0  ;;  %v17844_v0 = vld [vmem:[%s18061_s30 + $0x2440] ss:$216 sps:$4 sm:$0xff]  }
 0xcd4   : > { %13140 = vmatpush1.bf16.xpose.msra.mxu1 %v17760_v2  ;;  %12034 = vmatprep.subr.bf16.mxu0 %v17765_v32  ;;  %v17849_v2 = vld [vmem:[%s18061_s30 + $0xaf4] ss:$216 sps:$4 sm:$0xff]  }
 0xcd5   : > { %13141 = vmatprep.subr.bf16.mxu1 %v17768_v59  ;;  %v17852_v32 = vld [vmem:[%s18061_s30 + $0x25f4] ss:$216 sps:$4 sm:$0xff]   ;;  %v17847_v59 = vld [vmem:[%s18061_s30 + $0xaf0] ss:$216 sps:$4 sm:$0xff]  }
 0xcdb   : > { %12035 = vmatpush1.bf16.xpose.msra.mxu0 %v17763_v7  ;;  %v17850_v7 = vld [vmem:[%s18061_s30 + $0x25f0] ss:$216 sps:$4 sm:$0xff]  }
 0xcdc   : > { %13142 = vmatpush1.bf16.xpose.msra.mxu1 %v17766_v60  ;;  %12036 = vmatprep.subr.bf16.mxu0 %v17771_v8  ;;  %v17855_v60 = vld [vmem:[%s18061_s30 + $0xca4] ss:$216 sps:$4 sm:$0xff]  }
 0xcdd   : > { %13143 = vmatprep.subr.bf16.mxu1 %v17774_v47  ;;  %v17858_v8 = vld [vmem:[%s18061_s30 + $0x27a4] ss:$216 sps:$4 sm:$0xff]   ;;  %v17853_v47 = vld [vmem:[%s18061_s30 + $0xca0] ss:$216 sps:$4 sm:$0xff]  }
 0xce3   : > { %12037 = vmatpush1.bf16.xpose.msra.mxu0 %v17769_v10  ;;  %v17856_v10 = vld [vmem:[%s18061_s30 + $0x27a0] ss:$216 sps:$4 sm:$0xff]  }
 0xce4   : > { %13144 = vmatpush1.bf16.xpose.msra.mxu1 %v17772_v12  ;;  %12038 = vmatprep.subr.bf16.mxu0 %v17777_v14  ;;  %v17861_v12 = vld [vmem:[%s18061_s30 + $0xe54] ss:$216 sps:$4 sm:$0xff]  }
 0xce5   : > { %13145 = vmatprep.subr.bf16.mxu1 %v17780_v15  ;;  %v17864_v14 = vld [vmem:[%s18061_s30 + $0x2954] ss:$216 sps:$4 sm:$0xff]   ;;  %v17859_v15 = vld [vmem:[%s18061_s30 + $0xe50] ss:$216 sps:$4 sm:$0xff]  }
 0xceb   : > { %12039 = vmatpush1.bf16.xpose.msra.mxu0 %v17775_v16  ;;  %v17862_v16 = vld [vmem:[%s18061_s30 + $0x2950] ss:$216 sps:$4 sm:$0xff]  }
 0xcec   : > { %13146 = vmatpush1.bf16.xpose.msra.mxu1 %v17778_v55  ;;  %12040 = vmatprep.subr.bf16.mxu0 %v17783_v20  ;;  %v17867_v55 = vld [vmem:[%s18061_s30 + $0x1004] ss:$216 sps:$4 sm:$0xff]  }
 0xced   : > { %13147 = vmatprep.subr.bf16.mxu1 %v17786_v9  ;;  %v17870_v20 = vld [vmem:[%s18061_s30 + $0x2b04] ss:$216 sps:$4 sm:$0xff]   ;;  %v17865_v9 = vld [vmem:[%s18061_s30 + $0x1000] ss:$216 sps:$4 sm:$0xff]  }
 0xcf3   : > { %12041 = vmatpush1.bf16.xpose.msra.mxu0 %v17781_v11  ;;  %v17868_v11 = vld [vmem:[%s18061_s30 + $0x2b00] ss:$216 sps:$4 sm:$0xff]  }
 0xcf4   : > { %13148 = vmatpush1.bf16.xpose.msra.mxu1 %v17784_v21  ;;  %12042 = vmatprep.subr.bf16.mxu0 %v17789_v1  ;;  %v17873_v21 = vld [vmem:[%s18061_s30 + $0x11b4] ss:$216 sps:$4 sm:$0xff]  }
 0xcf5   : > { %13149 = vmatprep.subr.bf16.mxu1 %v17792_v22  ;;  %v17876_v1 = vld [vmem:[%s18061_s30 + $0x2cb4] ss:$216 sps:$4 sm:$0xff]   ;;  %v17871_v22 = vld [vmem:[%s18061_s30 + $0x11b0] ss:$216 sps:$4 sm:$0xff]  }
 0xcfb   : > { %12043 = vmatpush1.bf16.xpose.msra.mxu0 %v17787_v61  ;;  %v17874_v61 = vld [vmem:[%s18061_s30 + $0x2cb0] ss:$216 sps:$4 sm:$0xff]  }
 0xcfc   : > { %13150 = vmatpush1.bf16.xpose.msra.mxu1 %v17790_v25  ;;  %12044 = vmatprep.subr.bf16.mxu0 %v17795_v26  ;;  %v17879_v25 = vld [vmem:[%s18061_s30 + $0x1364] ss:$216 sps:$4 sm:$0xff]  }
 0xcfd   : > { %13151 = vmatprep.subr.bf16.mxu1 %v17798_v17  ;;  %v17882_v26 = vld [vmem:[%s18061_s30 + $0x2e64] ss:$216 sps:$4 sm:$0xff]   ;;  %v17877_v17 = vld [vmem:[%s18061_s30 + $0x1360] ss:$216 sps:$4 sm:$0xff]  }
 0xd03   : > { %12045 = vmatpush1.bf16.xpose.msra.mxu0 %v17793_v30  ;;  %v17880_v30 = vld [vmem:[%s18061_s30 + $0x2e60] ss:$216 sps:$4 sm:$0xff]  }
 0xd04   : > { %13152 = vmatpush1.bf16.xpose.msra.mxu1 %v17796_v4  ;;  %12046 = vmatprep.subr.bf16.mxu0 %v17801_v13  ;;  %v17885_v4 = vld [vmem:[%s18061_s30 + $0x1514] ss:$216 sps:$4 sm:$0xff]  }
 0xd05   : > { %13153 = vmatprep.subr.bf16.mxu1 %v17804_v33  ;;  %v17888_v13 = vld [vmem:[%s18061_s30 + $0x3014] ss:$216 sps:$4 sm:$0xff]   ;;  %v17883_v33 = vld [vmem:[%s18061_s30 + $0x1510] ss:$216 sps:$4 sm:$0xff]  }
 0xd0b   : > { %12047 = vmatpush1.bf16.xpose.msra.mxu0 %v17799_v23  ;;  %v17886_v23 = vld [vmem:[%s18061_s30 + $0x3010] ss:$216 sps:$4 sm:$0xff]  }
 0xd0c   : > { %13154 = vmatpush1.bf16.xpose.msra.mxu1 %v17802_v5  ;;  %12048 = vmatprep.subr.bf16.mxu0 %v17807_v54  ;;  %v17891_v5 = vld [vmem:[%s18061_s30 + $0x16c4] ss:$216 sps:$4 sm:$0xff]  }
 0xd0d   : > { %13155 = vmatprep.subr.bf16.mxu1 %v17810_v27  ;;  %v17894_v54 = vld [vmem:[%s18061_s30 + $0x31c4] ss:$216 sps:$4 sm:$0xff]   ;;  %v17889_v27 = vld [vmem:[%s18061_s30 + $0x16c0] ss:$216 sps:$4 sm:$0xff]  }
 0xd13   : > { %12049 = vmatpush1.bf16.xpose.msra.mxu0 %v17805_v36  ;;  %v17892_v36 = vld [vmem:[%s18061_s30 + $0x31c0] ss:$216 sps:$4 sm:$0xff]  }
 0xd14   : > { %13156 = vmatpush1.bf16.xpose.msra.mxu1 %v17808_v29  ;;  %12059 = vmatprep.subr.bf16.mxu0 %v17813_v38  ;;  %v17897_v29 = vld [vmem:[%s18061_s30 + $0x1874] ss:$216 sps:$4 sm:$0xff]  }
 0xd15   : > { %13166 = vmatprep.subr.bf16.mxu1 %v17816_v40  ;;  %v17900_v38 = vld [vmem:[%s18061_s30 + $0x3374] ss:$216 sps:$4 sm:$0xff]   ;;  %v17895_v40 = vld [vmem:[%s18061_s30 + $0x1870] ss:$216 sps:$4 sm:$0xff]  }
 0xd1a   : > { %12051 = vmatmul.mubr.bf16.vlgmr.msra.gmra.mrb[0].mxu0 %v2297_v34 }
 0xd1b   : > { %13158 = vmatmul.mubr.bf16.vlgmr.msra.gmra.mrb[0].mxu1 %v2297_v34  ;;  %12060 = vmatpush1.bf16.xpose.msra.mxu0 %v17811_v35  ;;  %v17906_v34 = vld [vmem:[%s18061_s30 + $0x3524] ss:$216 sps:$4 sm:$0xff]   ;;  %v17901_v35 = vld [vmem:[%s18061_s30 + $0x1a20] ss:$216 sps:$4 sm:$0xff]  }
 0xd1c   : > { %13167 = vmatpush1.bf16.xpose.msra.mxu1 %v17814_v44  ;;  %12061 = vmatprep.subr.bf16.mxu0 %v17819_v28  ;;  %v17904_v44 = vld [vmem:[%s18061_s30 + $0x3520] ss:$216 sps:$4 sm:$0xff]   ;;  %v2282_v28 = vrot.slane %v20033_v42, %v18056_v6  ;;  %v1945_v6 = vsub.s32 3, %v18048_v3  ;;  %s178_s30 = sand.u32 1, %s17966_s13  }
 0xd1d   : > { %13168 = vmatprep.subr.bf16.mxu1 %v17822_v37  ;;  %12091 = vmatprep.mubr.bf16.mxu0 %v2296_v45  ;;  %v1933_v37 = vsub.s32 0, %v18048_v3  ;;  %s13317_s7 = sshll.u32 %s178_s30, 3  ;;  %s13231_s20 = scalar_lea.sflag [#allocation3], %s178_s30 }
 0xd1e   : > { %13198 = vmatprep.mubr.bf16.mxu1 %v2296_v45  ;;  %v1941_v45 = vsub.s32 2, %v18048_v3  ;;  %s180_s9 = scalar_lea.vmem [#allocation2], %s13317_s7 }
 0xd1f   : > { %s13245_s10 = sshll.u32 %s180_s9, 4  ;;  %s20122_s10 = int_to_ptr.vmem [resolvable:$true] %s13245_s10 }
 0xd20   : > { %s17912_s24 = scalar_lea.vmem %s20122_s10, 128  ;;  %p17919_p1 = scmp.lt.s32.totalorder %s20122_s10, %s17917_s25 }
 0xd21   : > { %p17913_p12 = scmp.ne.s32.totalorder %s20122_s10, %s17912_s24  ;;  %p17920_p2 = scmp.lt.s32.totalorder %s17918_s26, %s17912_s24 }
 0xd23   : > { %12062 = vmatpush1.bf16.xpose.msra.mxu0 %v17817_v18  ;;  %v1929_v18 = vld [vmem:[%s191_s6] sm:$0xf]  ;;  %p17914_p13 = pnand %p17913_p12, %p18037_p5  ;;  %p17921_p3 = por %p17920_p2, %p17919_p1 }
 0xd24   : > { %13169 = vmatpush1.bf16.xpose.msra.mxu1 %v17820_v24  ;;  %12063 = vmatprep.subr.bf16.mxu0 %v17825_v48  ;;  %v1937_v24 = vsub.s32 1, %v18048_v3  ;;  %v17977_v48 = vmov 1983009808   ;;  %v1934_v42 = vrot.slane %v1929_v18, %v1933_v37 }
 0xd25   : > { %13170 = vmatprep.subr.bf16.mxu1 %v17828_v50  ;;  %v13214_v50 = vunpack.c.l.s4 %v17977_v48  ;;  %p17915_p0 = pneg %p17914_p13 }
 0xd27   : > { %p17922_p4 = pnand %p17921_p3, %p17915_p0 }
 0xd2b   : > { %12064 = vmatpush1.bf16.xpose.msra.mxu0 %v17823_v51  ;;  %v1942_v51 = vrot.slane %v1929_v18, %v1941_v45 }
 0xd2c   : > { %13171 = vmatpush1.bf16.xpose.msra.mxu1 %v17826_v52  ;;  %12065 = vmatprep.subr.bf16.mxu0 %v17831_v53  ;;  %v1938_v52 = vrot.slane %v1929_v18, %v1937_v24  ;;  %v13215_v53 = vunpack.c.0.s8 %v13214_v50 }
 0xd2d   : > { %13172 = vmatprep.subr.bf16.mxu1 %v17834_v31  ;;  %v1946_v31 = vrot.slane %v1929_v18, %v1945_v6 }
 0xd33   : > { %12066 = vmatpush1.bf16.xpose.msra.mxu0 %v17829_v56 }
 0xd34   : > { %13173 = vmatpush1.bf16.xpose.msra.mxu1 %v17832_v46  ;;  %12067 = vmatprep.subr.bf16.mxu0 %v17837_v49 }
 0xd35   : > { %13174 = vmatprep.subr.bf16.mxu1 %v17840_v57 }
 0xd3b   : > { %12068 = vmatpush1.bf16.xpose.msra.mxu0 %v17835_v41 }
 0xd3c   : > { %13175 = vmatpush1.bf16.xpose.msra.mxu1 %v17838_v58  ;;  %12069 = vmatprep.subr.bf16.mxu0 %v17843_v39 }
 0xd3d   : > { %13176 = vmatprep.subr.bf16.mxu1 %v17846_v62  ;;  %v13218_v62 = vsub.s32 %v13215_v53, %v18048_v3 }
 0xd43   : > { %12070 = vmatpush1.bf16.xpose.msra.mxu0 %v17841_v63 }
 0xd44   : > { %13177 = vmatpush1.bf16.xpose.msra.mxu1 %v17844_v0  ;;  %12071 = vmatprep.subr.bf16.mxu0 %v17849_v2 }
 0xd45   : > { %13178 = vmatprep.subr.bf16.mxu1 %v17852_v32 }
 0xd4b   : > { %12072 = vmatpush1.bf16.xpose.msra.mxu0 %v17847_v59 }
 0xd4c   : > { %13179 = vmatpush1.bf16.xpose.msra.mxu1 %v17850_v7  ;;  %12073 = vmatprep.subr.bf16.mxu0 %v17855_v60 }
 0xd4d   : > { %13180 = vmatprep.subr.bf16.mxu1 %v17858_v8 }
 0xd53   : > { %12074 = vmatpush1.bf16.xpose.msra.mxu0 %v17853_v47 }
 0xd54   : > { %13181 = vmatpush1.bf16.xpose.msra.mxu1 %v17856_v10  ;;  %12075 = vmatprep.subr.bf16.mxu0 %v17861_v12 }
 0xd55   : > { %13182 = vmatprep.subr.bf16.mxu1 %v17864_v14 }
 0xd5b   : > { %12076 = vmatpush1.bf16.xpose.msra.mxu0 %v17859_v15 }
 0xd5c   : > { %13183 = vmatpush1.bf16.xpose.msra.mxu1 %v17862_v16  ;;  %12077 = vmatprep.subr.bf16.mxu0 %v17867_v55 }
 0xd5d   : > { %13184 = vmatprep.subr.bf16.mxu1 %v17870_v20 }
 0xd63   : > { %12078 = vmatpush1.bf16.xpose.msra.mxu0 %v17865_v9 }
 0xd64   : > { %13185 = vmatpush1.bf16.xpose.msra.mxu1 %v17868_v11  ;;  %12079 = vmatprep.subr.bf16.mxu0 %v17873_v21 }
 0xd65   : > { %13186 = vmatprep.subr.bf16.mxu1 %v17876_v1 }
 0xd6b   : > { %12080 = vmatpush1.bf16.xpose.msra.mxu0 %v17871_v22 }
 0xd6c   : > { %13187 = vmatpush1.bf16.xpose.msra.mxu1 %v17874_v61  ;;  %12081 = vmatprep.subr.bf16.mxu0 %v17879_v25 }
 0xd6d   : > { %13188 = vmatprep.subr.bf16.mxu1 %v17882_v26 }
 0xd73   : > { %12082 = vmatpush1.bf16.xpose.msra.mxu0 %v17877_v17 }
 0xd74   : > { %13189 = vmatpush1.bf16.xpose.msra.mxu1 %v17880_v30  ;;  %12083 = vmatprep.subr.bf16.mxu0 %v17885_v4 }
 0xd75   : > { %13190 = vmatprep.subr.bf16.mxu1 %v17888_v13 }
 0xd7b   : > { %12084 = vmatpush1.bf16.xpose.msra.mxu0 %v17883_v33 }
 0xd7c   : > { %13191 = vmatpush1.bf16.xpose.msra.mxu1 %v17886_v23  ;;  %12085 = vmatprep.subr.bf16.mxu0 %v17891_v5 }
 0xd7d   : > { %13192 = vmatprep.subr.bf16.mxu1 %v17894_v54 }
 0xd83   : > { %12086 = vmatpush1.bf16.xpose.msra.mxu0 %v17889_v27 }
 0xd84   : > { %13193 = vmatpush1.bf16.xpose.msra.mxu1 %v17892_v36  ;;  %12087 = vmatprep.subr.bf16.mxu0 %v17897_v29 }
 0xd85   : > { %13194 = vmatprep.subr.bf16.mxu1 %v17900_v38 }
 0xd8b   : > { %12088 = vmatpush1.bf16.xpose.msra.mxu0 %v17895_v40 }
 0xd8c   : > { %13195 = vmatpush1.bf16.xpose.msra.mxu1 %v17898_v19  ;;  %12089 = vmatprep.subr.bf16.mxu0 %v17903_v43 }
 0xd8d   : > { %13196 = vmatprep.subr.bf16.mxu1 %v17906_v34 }
 0xd93   : > { %12090 = vmatpush1.bf16.xpose.msra.mxu0 %v17901_v35 }
 0xd94   : > { %13197 = vmatpush1.bf16.xpose.msra.mxu1 %v17904_v44 }
 0xd9a   : > { %12092 = vmatmul.mubr.bf16.vlgmr.msra.gmra.mrb[0].mxu0 %v2282_v28 }
 0xd9b   : > { %13199 = vmatmul.mubr.bf16.vlgmr.msra.gmra.mrb[0].mxu1 %v2282_v28 }
 0xe6d   : > { %v12093_v56 = vpop.f32.mrb[0].mxu0 }
 0xe6e   : > { %v13200_v46 = vpop.f32.mrb[0].mxu1  ;;  %v15055_v49 = vadd.f32 %v12093_v56, %v1934_v42  ;;  %v12095_v41 = vpop.f32.mrb[1].mxu0 }
 0xe6f   : > { %v15057_v57 = vadd.f32 %v13200_v46, %v1942_v51  ;;  %v13202_v58 = vpop.f32.mrb[1].mxu1  ;;  %v15056_v39 = vadd.f32 %v12095_v41, %v1938_v52  ;;  %v12097_v0 = vpop.f32.mrb[2].mxu0 }
 0xe70   : > { %v15058_v63 = vadd.f32 %v13202_v58, %v1946_v31  ;;  %v13204_v2 = vpop.f32.mrb[2].mxu1  ;;  %v12098_v32 = vpop.f32.mrb[3].mxu0 }
 0xe71   : > { %v13205_v59 = vpop.f32.mrb[3].mxu1  ;;  %v13211_v7 = vcombine.low %v15055_v49, %v15056_v39 }
 0xe72   : > { %v13212_v60 = vcombine.low %v15057_v57, %v15058_v63 }
 0xe73   : > { %v13219_v8 = vrot.slane %v13211_v7, %v13218_v62 }
 0xe74   : > { %v13226_v47 = vrot.slane %v13212_v60, %v13218_v62 }
 0xe76   : > { %v13227_v10 = vcombine.low %v13219_v8, %v13226_v47 }
 0xe78   : > { %13229 = vst [vmem:[%s180_s9] sm:$0xff] %v13227_v10 }
 0xe79   : > { %17925 = shalt.err (!%p17922_p4)
}
 0xe7a   : > { %s17926_s27 = scalar_lea.hbm %s20120_s19, 128  ;;  %s17930_s4 = scalar_lea.hbm %s20167_s3, 256 }
 0xe7b   : > { %p17927_p7 = scmp.ne.s32.totalorder %s20120_s19, %s17926_s27  ;;  %p17931_p10 = scmp.lt.u32.totalorder %s20120_s19, %s20167_s3 }
 0xe7c   : > { %p17932_p11 = scmp.lt.u32.totalorder %s17930_s4, %s17926_s27  ;;  %p17934_p13 = scmp.lt.u32.totalorder %s17926_s27, %s20120_s19 }
 0xe7d   : > { %p17928_p8 = pnand %p17927_p7, %p18037_p5 }
 0xe7e   : > { %p17933_p12 = por %p17932_p11, %p17931_p10 }
 0xe7f   : > { %p17929_p9 = pneg %p17928_p8 }
 0xe80   : > { %p17935_p0 = por %p17934_p13, %p17933_p12 }
 0xe82   : > { %p17936_p1 = pnand %p17935_p0, %p17929_p9 }
 0xe84   : > { %17939 = shalt.err (!%p17936_p1)
}
 0xe85   : > { %15268 = dma.vmem_to_hbm [thread:$0]  (%p18037_p5), %s20122_s10, 128, %s20120_s19, %s13231_s20  }
 0xe86 PF: > { %p15274_p2 = scmp.ge.s32.totalorder %s17974_s15, 2  ;;  %s13257_s30 = sand.u32 1, %s17962_s12  }
 0xe87   : > { %s13258_s7 = scalar_lea.sflag [#allocation3], %s13257_s30 }
 0xe88   : > { %p15271_p3 = pnand %p15274_p2, %p18041_p6 }
 0xe8a   : > { %17957 = dma.done.wait (!%p15271_p3), %s13258_s7, 128  }
 0xe8b   : > { %17959 = vsyncadd (!%p15271_p3), %s13258_s7, 4294967168  ;;  %p13_p4 = scmp.ge.s32.totalorder %s18024_s18, 4   ;;  %s20170_s12 = smov %s17966_s13 }
 0xe8c   : > { %s20171_s13 = smov %s17970_s14  ;;  %s20172_s14 = smov %s18035_s21 }
 0xe8d   : > { %s20173_s15 = smov %s18024_s18  ;;  %15 = sbr.rel (!%p13_p4) target bundleno = 3 (0x3), region = 70 }
 0xe94   :  { %13263 = vsyncpa [#allocation3], 1 }
 0xe95   :  { %13265 = vsyncpa [#allocation3 + $0x1], 1 }

</bundles_post_ra>
